<compile_context>
chip_gen: v5e
topology: v5e:2x2
jax: 0.10.0
libtpu: 0.0.40
codegen_flags: <defaults>
</compile_context>

<pallas_src>
import functools

import jax
import jax.numpy as jnp
from jax.experimental import pallas as pl
from jax.experimental.pallas import tpu as pltpu

EPS = 1e-5


def _pick_tm(m):
    for tm in (1024, 512, 256, 128, 64, 32, 16, 8):
        if m % tm == 0:
            return tm
    return m  # falls back to a single full-extent block


def up_conv_kernel(x_ref, w_ref, g_ref, beta_ref, o_ref,
                   sum_ref, sumsq_ref, scale_ref, shift_ref,
                   *, cp, total_rows):
    # x_ref    : (TM, Cin)       flattened input pixels, channels-last
    # w_ref    : (Cin, 4*Cp)     kernel-position-major, channel-minor (Cp = padded Cout)
    # g_ref    : (1, Cp)         BatchNorm gamma (padded)
    # beta_ref : (1, Cp)         BatchNorm beta  (padded)
    # o_ref    : (TM, 4*Cp)
    # scratch  : sum / sumsq / scale / shift, each (1, Cp) f32
    phase = pl.program_id(0)
    j = pl.program_id(1)

    @pl.when((phase == 0) & (j == 0))
    def _init():
        sum_ref[...] = jnp.zeros_like(sum_ref)
        sumsq_ref[...] = jnp.zeros_like(sumsq_ref)

    # Cheap matmul, recomputed in both phases (x tile is far smaller than the y tile,
    # so recompute beats re-reading y from HBM).
    y = jnp.dot(x_ref[...], w_ref[...], preferred_element_type=jnp.float32)  # (TM, 4*Cp)

    @pl.when(phase == 0)
    def _stats():
        tm = y.shape[0]
        ones = jnp.ones((1, tm), jnp.float32)
        # Column sums on the MXU (otherwise idle: K = Cin is tiny), not the XLU.
        s1 = jnp.dot(ones, y, preferred_element_type=jnp.float32)        # (1, 4*Cp)
        s2 = jnp.dot(ones, y * y, preferred_element_type=jnp.float32)    # (1, 4*Cp)
        # Fold the 4 kernel positions with lane-aligned slices (Cp % 128 == 0).
        s1f = s1[:, 0:cp] + s1[:, cp:2 * cp] + s1[:, 2 * cp:3 * cp] + s1[:, 3 * cp:4 * cp]
        s2f = s2[:, 0:cp] + s2[:, cp:2 * cp] + s2[:, 2 * cp:3 * cp] + s2[:, 3 * cp:4 * cp]
        sum_ref[...] += s1f
        sumsq_ref[...] += s2f

    @pl.when((phase == 1) & (j == 0))
    def _finalize_stats():
        count = jnp.float32(total_rows * 4)            # N * H_out * W_out per channel
        mean = sum_ref[...] / count
        var = sumsq_ref[...] / count - mean * mean     # biased variance
        var = jnp.maximum(var, 0.0)
        scale = g_ref[...] * jax.lax.rsqrt(var + EPS)  # gamma folded into scale
        scale_ref[...] = scale
        shift_ref[...] = beta_ref[...] - mean * scale  # single FMA per element later

    @pl.when(phase == 1)
    def _normalize():
        scale = scale_ref[...]
        shift = shift_ref[...]
        for k in range(4):                             # static, lane-aligned chunks
            sl = slice(k * cp, (k + 1) * cp)
            o_ref[:, sl] = jnp.maximum(y[:, sl] * scale + shift, 0.0).astype(o_ref.dtype)


def up_conv_forward(x_nchw, w, b, gamma, beta, *, compute_dtype=jnp.float32):
    """x_nchw: (N, Cin, H, W); w: (Cin, Cout, 2, 2); b/gamma/beta: (Cout,)."""
    n, cin, h, wd = x_nchw.shape
    cout = w.shape[1]
    m = n * h * wd
    cp = ((cout + 127) // 128) * 128                    # lane-dense padded Cout

    # The conv-transpose bias is exactly cancelled by the train-mode BN mean
    # subtraction (mean shifts by b, variance unchanged) -> never ship it to the kernel.
    del b

    # Flatten input to (M, Cin), channels-last.
    x2d = jnp.transpose(x_nchw, (0, 2, 3, 1)).reshape(m, cin).astype(compute_dtype)

    # Pack weights to (Cin, 4*Cp): kernel-position-major, channel-minor, zero-padded.
    w4 = jnp.transpose(w, (0, 2, 3, 1))                               # (Cin, kh, kw, Cout)
    w4p = jnp.zeros((cin, 2, 2, cp), w4.dtype).at[:, :, :, :cout].set(w4)
    w4p = w4p.reshape(cin, 4 * cp).astype(compute_dtype)

    g_p = jnp.zeros((1, cp), jnp.float32).at[0, :cout].set(gamma)
    beta_p = jnp.zeros((1, cp), jnp.float32).at[0, :cout].set(beta)

    tm = _pick_tm(m)
    n_tiles = m // tm

    kernel = functools.partial(up_conv_kernel, cp=cp, total_rows=m)

    y = pl.pallas_call(
        kernel,
        out_shape=jax.ShapeDtypeStruct((m, 4 * cp), jnp.float32),
        grid_spec=pltpu.PrefetchScalarGridSpec(
            num_scalar_prefetch=0,
            grid=(2, n_tiles),                                   # (phase, M-tile)
            in_specs=[
                pl.BlockSpec((tm, cin), lambda p, j: (j, 0)),    # x tile
                pl.BlockSpec((cin, 4 * cp), lambda p, j: (0, 0)),  # weights, resident
                pl.BlockSpec((1, cp), lambda p, j: (0, 0)),      # gamma
                pl.BlockSpec((1, cp), lambda p, j: (0, 0)),      # beta
            ],
            # phase 0 pins the out block index so nothing is flushed until phase 1
            # actually writes it -> the output is written to HBM exactly once.
            out_specs=pl.BlockSpec((tm, 4 * cp), lambda p, j: (p * j, 0)),
            scratch_shapes=[pltpu.VMEM((1, cp), jnp.float32)] * 4,
        ),
        compiler_params=pltpu.CompilerParams(
            dimension_semantics=("arbitrary", "arbitrary"),
        ),
    )(x2d, w4p, g_p, beta_p)

    # Scatter (M, kh, kw, Cp) back to NCHW (N, Cout, 2H, 2W).
    y = y.reshape(n, h, wd, 2, 2, cp)[..., :cout]
    y = jnp.transpose(y, (0, 5, 1, 3, 2, 4))
    return y.reshape(n, cout, 2 * h, 2 * wd)


def up_conv_reference(x, w, b, gamma, beta):
    """Pure-JAX reference mirroring the PyTorch module in training mode."""
    n, cin, h, wd = x.shape
    cout = w.shape[1]
    y = jnp.einsum('ncij,cokl->noikjl', x, w).reshape(n, cout, 2 * h, 2 * wd)
    y = y + b[None, :, None, None]
    mean = y.mean(axis=(0, 2, 3), keepdims=True)
    var = y.var(axis=(0, 2, 3), keepdims=True)            # biased
    y = (y - mean) * jax.lax.rsqrt(var + EPS)
    y = gamma[None, :, None, None] * y + beta[None, :, None, None]
    return jnp.maximum(y, 0.0)


if __name__ == "__main__":
    key = jax.random.PRNGKey(0)
    k_x, k_w, k_b = jax.random.split(key, 3)

    N, Cin, Cout, H, W = 4, 4, 8, 16, 16
    x = jax.random.normal(k_x, (N, Cin, H, W), dtype=jnp.float32)
    w = jax.random.normal(k_w, (Cin, Cout, 2, 2), dtype=jnp.float32) * 0.1
    b = jax.random.normal(k_b, (Cout,), dtype=jnp.float32) * 0.1
    gamma = jnp.ones((Cout,), dtype=jnp.float32)           # BatchNorm init
    beta = jnp.zeros((Cout,), dtype=jnp.float32)

    out = up_conv_forward(x, w, b, gamma, beta)
    out = jax.block_until_ready(out)

    ref = up_conv_reference(x, w, b, gamma, beta)
    assert out.shape == (N, Cout, 2 * H, 2 * W), out.shape
    assert jnp.allclose(out, ref, rtol=1e-4, atol=1e-4), float(jnp.abs(out - ref).max())

    print("KERNEL_OK")
</pallas_src>

<mosaic_0001>
module attributes {stable_mosaic.version = 11 : i64} {
  func.func @up_conv_kernel(%arg0: i32, %arg1: i32, %arg2: memref<1024x4xf32, #tpu.memory_space<vmem>>, %arg3: memref<4x512xf32, #tpu.memory_space<vmem>>, %arg4: memref<1x128xf32, #tpu.memory_space<vmem>>, %arg5: memref<1x128xf32, #tpu.memory_space<vmem>>, %arg6: memref<1024x512xf32, #tpu.memory_space<vmem>>, %arg7: memref<1x128xf32, #tpu.memory_space<vmem>>, %arg8: memref<1x128xf32, #tpu.memory_space<vmem>>, %arg9: memref<1x128xf32, #tpu.memory_space<vmem>>, %arg10: memref<1x128xf32, #tpu.memory_space<vmem>>) attributes {dimension_semantics = [#tpu.dimension_semantics<arbitrary>, #tpu.dimension_semantics<arbitrary>], iteration_bounds = array<i64: 2, 1>, scalar_prefetch = 0 : i64, scratch_operands = 4 : i64, tpu.core_type = #tpu.core_type<tc>, window_params = [{transform_indices = @transform_0, window_bounds = array<i64: 1024, 4>}, {pipeline_mode = #tpu.pipeline_mode<synchronous>, transform_indices = @transform_1, window_bounds = array<i64: 4, 512>}, {pipeline_mode = #tpu.pipeline_mode<synchronous>, transform_indices = @transform_2, window_bounds = array<i64: 1, 128>}, {pipeline_mode = #tpu.pipeline_mode<synchronous>, transform_indices = @transform_3, window_bounds = array<i64: 1, 128>}, {transform_indices = @transform_4, window_bounds = array<i64: 1024, 512>}]} {
    %c0_i32 = arith.constant 0 : i32
    %0 = arith.cmpi eq, %arg0, %c0_i32 : i32
    %c0_i32_0 = arith.constant 0 : i32
    %1 = arith.cmpi eq, %arg1, %c0_i32_0 : i32
    %2 = arith.andi %0, %1 : i1
    %3 = arith.extui %2 : i1 to i32
    %c0_i32_1 = arith.constant 0 : i32
    %4 = arith.cmpi ne, %3, %c0_i32_1 : i32
    scf.if %4 {
      %cst_11 = arith.constant 0.000000e+00 : f32
      %19 = vector.broadcast %cst_11 : f32 to vector<1x128xf32>
      %c0_12 = arith.constant 0 : index
      %c0_13 = arith.constant 0 : index
      %20 = vector.load %arg7[%c0_12, %c0_13] : memref<1x128xf32, #tpu.memory_space<vmem>>, vector<1x128xf32>
      tpu.vector_store %arg7[%c0_12, %c0_13], %19 {strides = array<i32>} : memref<1x128xf32, #tpu.memory_space<vmem>>, vector<1x128xf32>,
      %cst_14 = arith.constant 0.000000e+00 : f32
      %21 = vector.broadcast %cst_14 : f32 to vector<1x128xf32>
      %c0_15 = arith.constant 0 : index
      %c0_16 = arith.constant 0 : index
      %22 = vector.load %arg8[%c0_15, %c0_16] : memref<1x128xf32, #tpu.memory_space<vmem>>, vector<1x128xf32>
      tpu.vector_store %arg8[%c0_15, %c0_16], %21 {strides = array<i32>} : memref<1x128xf32, #tpu.memory_space<vmem>>, vector<1x128xf32>,
    } else {
    }
    %c0 = arith.constant 0 : index
    %c0_2 = arith.constant 0 : index
    %5 = vector.load %arg2[%c0, %c0_2] : memref<1024x4xf32, #tpu.memory_space<vmem>>, vector<1024x4xf32>
    %c0_3 = arith.constant 0 : index
    %c0_4 = arith.constant 0 : index
    %6 = vector.load %arg3[%c0_3, %c0_4] : memref<4x512xf32, #tpu.memory_space<vmem>>, vector<4x512xf32>
    %cst = arith.constant dense<0.000000e+00> : vector<1024x512xf32>
    %7 = tpu.matmul %5, %6, %cst {dimension_numbers = #tpu.dot_dimension_numbers<[1], [0], [0], [1], [0, 0, 1, 1], [], []>} : vector<1024x4xf32>, vector<4x512xf32>, vector<1024x512xf32> -> vector<1024x512xf32>
    %c0_i32_5 = arith.constant 0 : i32
    %8 = arith.cmpi eq, %arg0, %c0_i32_5 : i32
    %9 = arith.extui %8 : i1 to i32
    %c0_i32_6 = arith.constant 0 : i32
    %10 = arith.cmpi ne, %9, %c0_i32_6 : i32
    scf.if %10 {
      %cst_11 = arith.constant 1.000000e+00 : f32
      %19 = vector.broadcast %cst_11 : f32 to vector<1x1024xf32>
      %cst_12 = arith.constant dense<0.000000e+00> : vector<1x512xf32>
      %20 = tpu.matmul %19, %7, %cst_12 {dimension_numbers = #tpu.dot_dimension_numbers<[1], [0], [0], [1], [0, 0, 1, 1], [], []>} : vector<1x1024xf32>, vector<1024x512xf32>, vector<1x512xf32> -> vector<1x512xf32>
      %21 = arith.mulf %7, %7 : vector<1024x512xf32>
      %cst_13 = arith.constant dense<0.000000e+00> : vector<1x512xf32>
      %22 = tpu.matmul %19, %21, %cst_13 {dimension_numbers = #tpu.dot_dimension_numbers<[1], [0], [0], [1], [0, 0, 1, 1], [], []>} : vector<1x1024xf32>, vector<1024x512xf32>, vector<1x512xf32> -> vector<1x512xf32>
      %23 = vector.extract_strided_slice %20 {offsets = [0, 0], sizes = [1, 128], strides = [1, 1]} : vector<1x512xf32> to vector<1x128xf32>
      %24 = vector.extract_strided_slice %20 {offsets = [0, 128], sizes = [1, 128], strides = [1, 1]} : vector<1x512xf32> to vector<1x128xf32>
      %25 = arith.addf %23, %24 : vector<1x128xf32>
      %26 = vector.extract_strided_slice %20 {offsets = [0, 256], sizes = [1, 128], strides = [1, 1]} : vector<1x512xf32> to vector<1x128xf32>
      %27 = arith.addf %25, %26 : vector<1x128xf32>
      %28 = vector.extract_strided_slice %20 {offsets = [0, 384], sizes = [1, 128], strides = [1, 1]} : vector<1x512xf32> to vector<1x128xf32>
      %29 = arith.addf %27, %28 : vector<1x128xf32>
      %30 = vector.extract_strided_slice %22 {offsets = [0, 0], sizes = [1, 128], strides = [1, 1]} : vector<1x512xf32> to vector<1x128xf32>
      %31 = vector.extract_strided_slice %22 {offsets = [0, 128], sizes = [1, 128], strides = [1, 1]} : vector<1x512xf32> to vector<1x128xf32>
      %32 = arith.addf %30, %31 : vector<1x128xf32>
      %33 = vector.extract_strided_slice %22 {offsets = [0, 256], sizes = [1, 128], strides = [1, 1]} : vector<1x512xf32> to vector<1x128xf32>
      %34 = arith.addf %32, %33 : vector<1x128xf32>
      %35 = vector.extract_strided_slice %22 {offsets = [0, 384], sizes = [1, 128], strides = [1, 1]} : vector<1x512xf32> to vector<1x128xf32>
      %36 = arith.addf %34, %35 : vector<1x128xf32>
      %c0_14 = arith.constant 0 : index
      %c0_15 = arith.constant 0 : index
      %37 = vector.load %arg7[%c0_14, %c0_15] : memref<1x128xf32, #tpu.memory_space<vmem>>, vector<1x128xf32>
      %38 = arith.addf %37, %29 : vector<1x128xf32>
      %c0_16 = arith.constant 0 : index
      %c0_17 = arith.constant 0 : index
      %39 = vector.load %arg7[%c0_16, %c0_17] : memref<1x128xf32, #tpu.memory_space<vmem>>, vector<1x128xf32>
      tpu.vector_store %arg7[%c0_16, %c0_17], %38 {strides = array<i32>} : memref<1x128xf32, #tpu.memory_space<vmem>>, vector<1x128xf32>,
      %c0_18 = arith.constant 0 : index
      %c0_19 = arith.constant 0 : index
      %40 = vector.load %arg8[%c0_18, %c0_19] : memref<1x128xf32, #tpu.memory_space<vmem>>, vector<1x128xf32>
      %41 = arith.addf %40, %36 : vector<1x128xf32>
      %c0_20 = arith.constant 0 : index
      %c0_21 = arith.constant 0 : index
      %42 = vector.load %arg8[%c0_20, %c0_21] : memref<1x128xf32, #tpu.memory_space<vmem>>, vector<1x128xf32>
      tpu.vector_store %arg8[%c0_20, %c0_21], %41 {strides = array<i32>} : memref<1x128xf32, #tpu.memory_space<vmem>>, vector<1x128xf32>,
    } else {
    }
    %c1_i32 = arith.constant 1 : i32
    %11 = arith.cmpi eq, %arg0, %c1_i32 : i32
    %c0_i32_7 = arith.constant 0 : i32
    %12 = arith.cmpi eq, %arg1, %c0_i32_7 : i32
    %13 = arith.andi %11, %12 : i1
    %14 = arith.extui %13 : i1 to i32
    %c0_i32_8 = arith.constant 0 : i32
    %15 = arith.cmpi ne, %14, %c0_i32_8 : i32
    scf.if %15 {
      %c0_11 = arith.constant 0 : index
      %c0_12 = arith.constant 0 : index
      %19 = vector.load %arg7[%c0_11, %c0_12] : memref<1x128xf32, #tpu.memory_space<vmem>>, vector<1x128xf32>
      %cst_13 = arith.constant 4.096000e+03 : f32
      %20 = vector.broadcast %cst_13 : f32 to vector<1x128xf32>
      %21 = arith.divf %19, %20 : vector<1x128xf32>
      %c0_14 = arith.constant 0 : index
      %c0_15 = arith.constant 0 : index
      %22 = vector.load %arg8[%c0_14, %c0_15] : memref<1x128xf32, #tpu.memory_space<vmem>>, vector<1x128xf32>
      %cst_16 = arith.constant 4.096000e+03 : f32
      %23 = vector.broadcast %cst_16 : f32 to vector<1x128xf32>
      %24 = arith.divf %22, %23 : vector<1x128xf32>
      %25 = arith.mulf %21, %21 : vector<1x128xf32>
      %26 = arith.subf %24, %25 : vector<1x128xf32>
      %cst_17 = arith.constant 0.000000e+00 : f32
      %27 = vector.broadcast %cst_17 : f32 to vector<1x128xf32>
      %28 = arith.maximumf %26, %27 : vector<1x128xf32>
      %c0_18 = arith.constant 0 : index
      %c0_19 = arith.constant 0 : index
      %29 = vector.load %arg4[%c0_18, %c0_19] : memref<1x128xf32, #tpu.memory_space<vmem>>, vector<1x128xf32>
      %cst_20 = arith.constant 9.99999974E-6 : f32
      %30 = vector.broadcast %cst_20 : f32 to vector<1x128xf32>
      %31 = arith.addf %28, %30 : vector<1x128xf32>
      %32 = math.rsqrt %31 : vector<1x128xf32>
      %33 = arith.mulf %29, %32 : vector<1x128xf32>
      %c0_21 = arith.constant 0 : index
      %c0_22 = arith.constant 0 : index
      %34 = vector.load %arg9[%c0_21, %c0_22] : memref<1x128xf32, #tpu.memory_space<vmem>>, vector<1x128xf32>
      tpu.vector_store %arg9[%c0_21, %c0_22], %33 {strides = array<i32>} : memref<1x128xf32, #tpu.memory_space<vmem>>, vector<1x128xf32>,
      %c0_23 = arith.constant 0 : index
      %c0_24 = arith.constant 0 : index
      %35 = vector.load %arg5[%c0_23, %c0_24] : memref<1x128xf32, #tpu.memory_space<vmem>>, vector<1x128xf32>
      %36 = arith.mulf %21, %33 : vector<1x128xf32>
      %37 = arith.subf %35, %36 : vector<1x128xf32>
      %c0_25 = arith.constant 0 : index
      %c0_26 = arith.constant 0 : index
      %38 = vector.load %arg10[%c0_25, %c0_26] : memref<1x128xf32, #tpu.memory_space<vmem>>, vector<1x128xf32>
      tpu.vector_store %arg10[%c0_25, %c0_26], %37 {strides = array<i32>} : memref<1x128xf32, #tpu.memory_space<vmem>>, vector<1x128xf32>,
    } else {
    }
    %c1_i32_9 = arith.constant 1 : i32
    %16 = arith.cmpi eq, %arg0, %c1_i32_9 : i32
    %17 = arith.extui %16 : i1 to i32
    %c0_i32_10 = arith.constant 0 : i32
    %18 = arith.cmpi ne, %17, %c0_i32_10 : i32
    scf.if %18 {
      %c0_11 = arith.constant 0 : index
      %c0_12 = arith.constant 0 : index
      %19 = vector.load %arg9[%c0_11, %c0_12] : memref<1x128xf32, #tpu.memory_space<vmem>>, vector<1x128xf32>
      %c0_13 = arith.constant 0 : index
      %c0_14 = arith.constant 0 : index
      %20 = vector.load %arg10[%c0_13, %c0_14] : memref<1x128xf32, #tpu.memory_space<vmem>>, vector<1x128xf32>
      %21 = vector.extract_strided_slice %7 {offsets = [0, 0], sizes = [1024, 128], strides = [1, 1]} : vector<1024x512xf32> to vector<1024x128xf32>
      %22 = vector.broadcast %19 : vector<1x128xf32> to vector<1024x128xf32>
      %23 = arith.mulf %21, %22 : vector<1024x128xf32>
      %24 = vector.broadcast %20 : vector<1x128xf32> to vector<1024x128xf32>
      %25 = arith.addf %23, %24 : vector<1024x128xf32>
      %cst_15 = arith.constant 0.000000e+00 : f32
      %26 = vector.broadcast %cst_15 : f32 to vector<1024x128xf32>
      %27 = arith.maximumf %25, %26 : vector<1024x128xf32>
      %c0_16 = arith.constant 0 : index
      %c0_17 = arith.constant 0 : index
      %28 = vector.load %arg6[%c0_16, %c0_17] : memref<1024x512xf32, #tpu.memory_space<vmem>>, vector<1024x128xf32>
      tpu.vector_store %arg6[%c0_16, %c0_17], %27 {strides = array<i32>} : memref<1024x512xf32, #tpu.memory_space<vmem>>, vector<1024x128xf32>,
      %29 = vector.extract_strided_slice %7 {offsets = [0, 128], sizes = [1024, 128], strides = [1, 1]} : vector<1024x512xf32> to vector<1024x128xf32>
      %30 = vector.broadcast %19 : vector<1x128xf32> to vector<1024x128xf32>
      %31 = arith.mulf %29, %30 : vector<1024x128xf32>
      %32 = vector.broadcast %20 : vector<1x128xf32> to vector<1024x128xf32>
      %33 = arith.addf %31, %32 : vector<1024x128xf32>
      %cst_18 = arith.constant 0.000000e+00 : f32
      %34 = vector.broadcast %cst_18 : f32 to vector<1024x128xf32>
      %35 = arith.maximumf %33, %34 : vector<1024x128xf32>
      %c0_19 = arith.constant 0 : index
      %c128 = arith.constant 128 : index
      %36 = vector.load %arg6[%c0_19, %c128] : memref<1024x512xf32, #tpu.memory_space<vmem>>, vector<1024x128xf32>
      tpu.vector_store %arg6[%c0_19, %c128], %35 {strides = array<i32>} : memref<1024x512xf32, #tpu.memory_space<vmem>>, vector<1024x128xf32>,
      %37 = vector.extract_strided_slice %7 {offsets = [0, 256], sizes = [1024, 128], strides = [1, 1]} : vector<1024x512xf32> to vector<1024x128xf32>
      %38 = vector.broadcast %19 : vector<1x128xf32> to vector<1024x128xf32>
      %39 = arith.mulf %37, %38 : vector<1024x128xf32>
      %40 = vector.broadcast %20 : vector<1x128xf32> to vector<1024x128xf32>
      %41 = arith.addf %39, %40 : vector<1024x128xf32>
      %cst_20 = arith.constant 0.000000e+00 : f32
      %42 = vector.broadcast %cst_20 : f32 to vector<1024x128xf32>
      %43 = arith.maximumf %41, %42 : vector<1024x128xf32>
      %c0_21 = arith.constant 0 : index
      %c256 = arith.constant 256 : index
      %44 = vector.load %arg6[%c0_21, %c256] : memref<1024x512xf32, #tpu.memory_space<vmem>>, vector<1024x128xf32>
      tpu.vector_store %arg6[%c0_21, %c256], %43 {strides = array<i32>} : memref<1024x512xf32, #tpu.memory_space<vmem>>, vector<1024x128xf32>,
      %45 = vector.extract_strided_slice %7 {offsets = [0, 384], sizes = [1024, 128], strides = [1, 1]} : vector<1024x512xf32> to vector<1024x128xf32>
      %46 = vector.broadcast %19 : vector<1x128xf32> to vector<1024x128xf32>
      %47 = arith.mulf %45, %46 : vector<1024x128xf32>
      %48 = vector.broadcast %20 : vector<1x128xf32> to vector<1024x128xf32>
      %49 = arith.addf %47, %48 : vector<1024x128xf32>
      %cst_22 = arith.constant 0.000000e+00 : f32
      %50 = vector.broadcast %cst_22 : f32 to vector<1024x128xf32>
      %51 = arith.maximumf %49, %50 : vector<1024x128xf32>
      %c0_23 = arith.constant 0 : index
      %c384 = arith.constant 384 : index
      %52 = vector.load %arg6[%c0_23, %c384] : memref<1024x512xf32, #tpu.memory_space<vmem>>, vector<1024x128xf32>
      tpu.vector_store %arg6[%c0_23, %c384], %51 {strides = array<i32>} : memref<1024x512xf32, #tpu.memory_space<vmem>>, vector<1024x128xf32>,
    } else {
    }
    return
  }
  func.func @transform_0(%arg0: i32, %arg1: i32) -> (i32, i32) {
    %c0_i32 = arith.constant 0 : i32
    %c0_i32_0 = arith.constant 0 : i32
    return %arg1, %c0_i32 : i32, i32
  }
  func.func @transform_1(%arg0: i32, %arg1: i32) -> (i32, i32) {
    %c0_i32 = arith.constant 0 : i32
    %c0_i32_0 = arith.constant 0 : i32
    %c0_i32_1 = arith.constant 0 : i32
    return %c0_i32, %c0_i32_0 : i32, i32
  }
  func.func @transform_2(%arg0: i32, %arg1: i32) -> (i32, i32) {
    %c0_i32 = arith.constant 0 : i32
    %c0_i32_0 = arith.constant 0 : i32
    %c0_i32_1 = arith.constant 0 : i32
    return %c0_i32, %c0_i32_0 : i32, i32
  }
  func.func @transform_3(%arg0: i32, %arg1: i32) -> (i32, i32) {
    %c0_i32 = arith.constant 0 : i32
    %c0_i32_0 = arith.constant 0 : i32
    %c0_i32_1 = arith.constant 0 : i32
    return %c0_i32, %c0_i32_0 : i32, i32
  }
  func.func @transform_4(%arg0: i32, %arg1: i32) -> (i32, i32) {
    %0 = arith.muli %arg0, %arg1 : i32
    %c0_i32 = arith.constant 0 : i32
    %c0_i32_0 = arith.constant 0 : i32
    return %0, %c0_i32 : i32, i32
  }
}

</mosaic_0001>

<bundles_post_ra>
// kernel: tpu_custom_call.1
= control target key start
LH: loop header
LB: loop body
LE: loop exit
PB: predicated region body
PF: predicated region fallthrough
CT: control target
= control target key end

     0   :  { %9 = vsyncpa [#allocation7], 0  ;;  %s12449_s0 = inlined_call_operand.vmem [shape: f32[1024,4], index: 0, kind: input, shape index: {}]   ;;  %s12450_s1 = inlined_call_operand.hbm [shape: f32[4,512], index: 1, kind: input, shape index: {}]   ;;  %s12451_s2 = inlined_call_operand.hbm [shape: f32[1,128], index: 2, kind: input, shape index: {}]   ;;  %s12452_s3 = inlined_call_operand.hbm [shape: f32[1,128], index: 3, kind: input, shape index: {}]   ;;  %s12453_s4 = inlined_call_operand.hbm [shape: f32[1024,512], index: 4, kind: output, shape index: {}]  }
   0x1   :  { %10 = vsyncpa [#allocation10], 0 }
   0x2   :  { %11 = vsyncpa [#allocation8], 0 }
   0x3   :  { %13 = vsyncpa [#allocation8 + $0x1], 0  ;;  %s7237_s15 = smov 0   ;;  %s7239_s16 = smov 0  }
   0x4   :  { %s7241_s17 = smov 0  }
   0x5 LB: > { %s186_s20 = sshll.u32 %s12451_s2, 4  ;;  %s6428_s21 = sadd.s32 4294967295, %s7201_s17   ;;  %s7201_s17 = sphi %s7241_s17, %s19_s17   ;;  %s7197_s16 = sphi %s7239_s16, %s14859_s16   ;;  %s7193_s15 = sphi %s7237_s15, %s14858_s15   ;;  %s187_s20 = int_to_ptr.hbm [resolvable:$true] %s186_s20 }
   0x6   : > { %s6429_s22 = sadd.s32 4294967294, %s7201_s17   ;;  %p6430_p0 = scmp.ge.s32.totalorder %s7201_s17, 1 }
   0x7   : > { %p153_p1 = scmp.lt.s32.totalorder %s7201_s17, 3  ;;  %p7261_p2 = scmp.eq.s32.totalorder %s6428_s21, 0 }
   0x8   : > { %s7203_s25 = smov [#allocation9]   ;;  %s31_s28 = sadd.s32 1, %s7197_s16 }
   0x9   : > { %p7265_p3 = pnand %p6430_p0, %p153_p1  ;;  %s188_s26 = sshll.u32 %s7203_s25, 4  ;;  %s189_s26 = int_to_ptr.vmem [resolvable:$true] %s188_s26 }
   0xa   : > { %s174_s5 = sshll.u32 %s12450_s1, 4  ;;  %p33_p6 = scmp.ge.s32.totalorder %s31_s28, 2  ;;  %s175_s5 = int_to_ptr.hbm [resolvable:$true] %s174_s5 }
   0xb   : > { %p6981_p4 = pneg %p7265_p3  ;;  %s7204_s6 = smov [#allocation6]  }
   0xc   : > { %s14861_s28 = smov (%p33_p6, %s31_s28), 0  ;;  %s176_s7 = sshll.u32 %s7204_s6, 4  ;;  %s177_s7 = int_to_ptr.vmem [resolvable:$true] %s176_s7 }
   0xd   : > { %p7273_p5 = pnand %p7261_p2, %p6981_p4  ;;  %s198_s10 = sshll.u32 %s12452_s3, 4  ;;  %s199_s10 = int_to_ptr.hbm [resolvable:$true] %s198_s10 }
   0xe   : > { %s7205_s11 = smov [#allocation11]   ;;  %213 = sbr.rel (%p7265_p3) target bundleno = 2693 (0xa85), region = 36 }
   0xf   : > { %6987 = dma.hbm_to_vmem [thread:$0]  (!%p7273_p5), %s187_s20, 16, %s189_s26, [#allocation10]  }
  0x10   : > { %6984 = dma.hbm_to_vmem [thread:$0]  (!%p7273_p5), %s175_s5, 256, %s177_s7, [#allocation7]  }
  0x11   : > { %s200_s12 = sshll.u32 %s7205_s11, 4  ;;  %s201_s12 = int_to_ptr.vmem [resolvable:$true] %s200_s12 }
  0x12   : > { %6990 = dma.hbm_to_vmem [thread:$0]  (!%p7273_p5), %s199_s10, 16, %s201_s12, [#allocation10]  }
  0x13   : > { %7180 = dma.done.wait (%p7261_p2), [#allocation7], 256  }
  0x14   : > { %7182 = vsyncadd (%p7261_p2), [#allocation7], 4294967040 }
  0x15   : > { %7184 = dma.done.wait (%p7261_p2), [#allocation10], 32  }
  0x16   : > { %7186 = vsyncadd (%p7261_p2), [#allocation10], 4294967264  ;;  %p258_p7 = scmp.eq.s32.totalorder %s7193_s15, 0 }
  0x17   : > { %v7206_v0 = vmov (%p258_p7), 0.0  }
  0x18   : > { %263 = sbr.rel (!%p258_p7) target bundleno = 29 (0x1d), region = 52  ;;  %264 = vst [vmem:[#allocation2] sm:$0x1] (%p258_p7), %v7206_v0 }
  0x19   : > { %265 = vst [vmem:[#allocation3] sm:$0x1] (%p258_p7), %v7206_v0 }
  0x1d PF: > { %v395_v1 = vld [vmem:[#allocation6 + $0x8] sm:$0xff]  ;;  %v394_v2 = vld [vmem:[#allocation6] sm:$0xff]  ;;  %vm790_vm0 = vcmask 1043456   ;;  %v266_v3 = vld [vmem:[%s12449_s0] sm:$0xff]  ;;  %vm405_vm1 = vcmask 31744   ;;  %p6956_p8 = scmp.ne.s32.totalorder %s7193_s15, 0 }
  0x1e   : > { %400 = vst [vmem:[#allocation1 + $0x10] ss:$2 sm:$0xff] %v395_v1  ;;  %v267_v8 = vld [vmem:[%s12449_s0 + $0x8] sm:$0xff]  ;;  %v268_v9 = vld [vmem:[%s12449_s0 + $0x10] sm:$0xff]  ;;  %v269_v10 = vld [vmem:[%s12449_s0 + $0x18] sm:$0xff] }
  0x1f   : > { %398 = vst [vmem:[#allocation1] ss:$2 sm:$0xff] %v394_v2  ;;  %v270_v11 = vld [vmem:[%s12449_s0 + $0x20] sm:$0xff]  ;;  %v271_v12 = vld [vmem:[%s12449_s0 + $0x28] sm:$0xff]  ;;  %v272_v13 = vld [vmem:[%s12449_s0 + $0x30] sm:$0xff] }
  0x20   : > { %v273_v14 = vld [vmem:[%s12449_s0 + $0x38] sm:$0xff]  ;;  %v274_v15 = vld [vmem:[%s12449_s0 + $0x40] sm:$0xff]  ;;  %v275_v16 = vld [vmem:[%s12449_s0 + $0x48] sm:$0xff] }
  0x21   : > { %v276_v17 = vld [vmem:[%s12449_s0 + $0x50] sm:$0xff]  ;;  %v277_v18 = vld [vmem:[%s12449_s0 + $0x58] sm:$0xff]  ;;  %v278_v19 = vld [vmem:[%s12449_s0 + $0x60] sm:$0xff] }
  0x22   : > { %v279_v20 = vld [vmem:[%s12449_s0 + $0x68] sm:$0xff]  ;;  %v280_v21 = vld [vmem:[%s12449_s0 + $0x70] sm:$0xff]  ;;  %v281_v22 = vld [vmem:[%s12449_s0 + $0x78] sm:$0xff] }
  0x23   : > { %v282_v23 = vld [vmem:[%s12449_s0 + $0x80] sm:$0xff]  ;;  %v283_v28 = vld [vmem:[%s12449_s0 + $0x88] sm:$0xff]  ;;  %v284_v33 = vld [vmem:[%s12449_s0 + $0x90] sm:$0xff] }
  0x24   : > { %v285_v38 = vld [vmem:[%s12449_s0 + $0x98] sm:$0xff]  ;;  %v286_v43 = vld [vmem:[%s12449_s0 + $0xa0] sm:$0xff]  ;;  %v287_v48 = vld [vmem:[%s12449_s0 + $0xa8] sm:$0xff] }
  0x25   : > { %v403_v4 = vld.sshfl [vmem:[#allocation1 + $0x10] sm:$0xff pattern:$0x75316420]  ;;  %v404_v5 = vld.sshfl [vmem:[#allocation1 + $0x18] sm:$0xff pattern:$0x75316420] }
  0x26   : > { %6698 = vmatpush.msk.msra.mxu2 %vm790_vm0, %v403_v4  ;;  %6827 = vmatpush.msk.msra.mxu3 %vm790_vm0, %v404_v5  ;;  %v401_v6 = vld.sshfl [vmem:[#allocation1] sm:$0xff pattern:$0x75316420]  ;;  %v402_v7 = vld.sshfl [vmem:[#allocation1 + $0x8] sm:$0xff pattern:$0x75316420] }
  0x27   : > { %6699 = vmatmul.msk.f32.vlgmr.msra.gmra.mxu2 %vm405_vm1, %v266_v3  ;;  %6828 = vmatmul.msk.f32.vlgmr.msra.gmra.mxu3 %vm405_vm1, %v266_v3  ;;  %v288_v53 = vld [vmem:[%s12449_s0 + $0xb0] sm:$0xff]  ;;  %v289_v58 = vld [vmem:[%s12449_s0 + $0xb8] sm:$0xff]  ;;  %v290_v63 = vld [vmem:[%s12449_s0 + $0xc0] sm:$0xff] }
  0x28   : > { %6440 = vmatpush.msk.msra.mxu0 %vm790_vm0, %v401_v6  ;;  %6569 = vmatpush.msk.msra.mxu1 %vm790_vm0, %v402_v7  ;;  %v291_v4 = vld [vmem:[%s12449_s0 + $0xc8] sm:$0xff] }
  0x29   : > { %6441 = vmatmul.msk.f32.vlgmr.msra.gmra.mxu0 %vm405_vm1, %v266_v3  ;;  %6570 = vmatmul.msk.f32.vlgmr.msra.gmra.mxu1 %vm405_vm1, %v266_v3 }
  0x2f   : > { %6700 = vmatmul.msk.f32.gmra.mxu2 %vm405_vm1, %v267_v8  ;;  %6829 = vmatmul.msk.f32.gmra.mxu3 %vm405_vm1, %v267_v8 }
  0x31   : > { %6442 = vmatmul.msk.f32.gmra.mxu0 %vm405_vm1, %v267_v8  ;;  %6571 = vmatmul.msk.f32.gmra.mxu1 %vm405_vm1, %v267_v8 }
  0x37   : > { %6701 = vmatmul.msk.f32.gmra.mxu2 %vm405_vm1, %v268_v9  ;;  %6830 = vmatmul.msk.f32.gmra.mxu3 %vm405_vm1, %v268_v9 }
  0x39   : > { %6443 = vmatmul.msk.f32.gmra.mxu0 %vm405_vm1, %v268_v9  ;;  %6572 = vmatmul.msk.f32.gmra.mxu1 %vm405_vm1, %v268_v9  ;;  %v292_v9 = vld [vmem:[%s12449_s0 + $0xd0] sm:$0xff] }
  0x3f   : > { %6702 = vmatmul.msk.f32.gmra.mxu2 %vm405_vm1, %v269_v10  ;;  %6831 = vmatmul.msk.f32.gmra.mxu3 %vm405_vm1, %v269_v10 }
  0x41   : > { %6444 = vmatmul.msk.f32.gmra.mxu0 %vm405_vm1, %v269_v10  ;;  %6573 = vmatmul.msk.f32.gmra.mxu1 %vm405_vm1, %v269_v10 }
  0x47   : > { %6703 = vmatmul.msk.f32.gmra.mxu2 %vm405_vm1, %v270_v11  ;;  %6832 = vmatmul.msk.f32.gmra.mxu3 %vm405_vm1, %v270_v11 }
  0x49   : > { %6445 = vmatmul.msk.f32.gmra.mxu0 %vm405_vm1, %v270_v11  ;;  %6574 = vmatmul.msk.f32.gmra.mxu1 %vm405_vm1, %v270_v11 }
  0x4f   : > { %6704 = vmatmul.msk.f32.gmra.mxu2 %vm405_vm1, %v271_v12  ;;  %6833 = vmatmul.msk.f32.gmra.mxu3 %vm405_vm1, %v271_v12 }
  0x51   : > { %6446 = vmatmul.msk.f32.gmra.mxu0 %vm405_vm1, %v271_v12  ;;  %6575 = vmatmul.msk.f32.gmra.mxu1 %vm405_vm1, %v271_v12 }
  0x57   : > { %6705 = vmatmul.msk.f32.gmra.mxu2 %vm405_vm1, %v272_v13  ;;  %6834 = vmatmul.msk.f32.gmra.mxu3 %vm405_vm1, %v272_v13 }
  0x59   : > { %6447 = vmatmul.msk.f32.gmra.mxu0 %vm405_vm1, %v272_v13  ;;  %6576 = vmatmul.msk.f32.gmra.mxu1 %vm405_vm1, %v272_v13 }
  0x5f   : > { %6706 = vmatmul.msk.f32.gmra.mxu2 %vm405_vm1, %v273_v14  ;;  %6835 = vmatmul.msk.f32.gmra.mxu3 %vm405_vm1, %v273_v14 }
  0x61   : > { %6448 = vmatmul.msk.f32.gmra.mxu0 %vm405_vm1, %v273_v14  ;;  %6577 = vmatmul.msk.f32.gmra.mxu1 %vm405_vm1, %v273_v14  ;;  %v293_v14 = vld [vmem:[%s12449_s0 + $0xd8] sm:$0xff] }
  0x67   : > { %6707 = vmatmul.msk.f32.gmra.mxu2 %vm405_vm1, %v274_v15  ;;  %6836 = vmatmul.msk.f32.gmra.mxu3 %vm405_vm1, %v274_v15 }
  0x69   : > { %6449 = vmatmul.msk.f32.gmra.mxu0 %vm405_vm1, %v274_v15  ;;  %6578 = vmatmul.msk.f32.gmra.mxu1 %vm405_vm1, %v274_v15 }
  0x6f   : > { %6708 = vmatmul.msk.f32.gmra.mxu2 %vm405_vm1, %v275_v16  ;;  %6837 = vmatmul.msk.f32.gmra.mxu3 %vm405_vm1, %v275_v16 }
  0x71   : > { %6450 = vmatmul.msk.f32.gmra.mxu0 %vm405_vm1, %v275_v16  ;;  %6579 = vmatmul.msk.f32.gmra.mxu1 %vm405_vm1, %v275_v16 }
  0x77   : > { %6709 = vmatmul.msk.f32.gmra.mxu2 %vm405_vm1, %v276_v17  ;;  %6838 = vmatmul.msk.f32.gmra.mxu3 %vm405_vm1, %v276_v17 }
  0x79   : > { %6451 = vmatmul.msk.f32.gmra.mxu0 %vm405_vm1, %v276_v17  ;;  %6580 = vmatmul.msk.f32.gmra.mxu1 %vm405_vm1, %v276_v17 }
  0x7f   : > { %6710 = vmatmul.msk.f32.gmra.mxu2 %vm405_vm1, %v277_v18  ;;  %6839 = vmatmul.msk.f32.gmra.mxu3 %vm405_vm1, %v277_v18 }
  0x81   : > { %6452 = vmatmul.msk.f32.gmra.mxu0 %vm405_vm1, %v277_v18  ;;  %6581 = vmatmul.msk.f32.gmra.mxu1 %vm405_vm1, %v277_v18 }
  0x87   : > { %6711 = vmatmul.msk.f32.gmra.mxu2 %vm405_vm1, %v278_v19  ;;  %6840 = vmatmul.msk.f32.gmra.mxu3 %vm405_vm1, %v278_v19 }
  0x89   : > { %6453 = vmatmul.msk.f32.gmra.mxu0 %vm405_vm1, %v278_v19  ;;  %6582 = vmatmul.msk.f32.gmra.mxu1 %vm405_vm1, %v278_v19  ;;  %v294_v19 = vld [vmem:[%s12449_s0 + $0xe0] sm:$0xff] }
  0x8f   : > { %6712 = vmatmul.msk.f32.gmra.mxu2 %vm405_vm1, %v279_v20  ;;  %6841 = vmatmul.msk.f32.gmra.mxu3 %vm405_vm1, %v279_v20 }
  0x91   : > { %6454 = vmatmul.msk.f32.gmra.mxu0 %vm405_vm1, %v279_v20  ;;  %6583 = vmatmul.msk.f32.gmra.mxu1 %vm405_vm1, %v279_v20 }
  0x97   : > { %6713 = vmatmul.msk.f32.gmra.mxu2 %vm405_vm1, %v280_v21  ;;  %6842 = vmatmul.msk.f32.gmra.mxu3 %vm405_vm1, %v280_v21 }
  0x99   : > { %6455 = vmatmul.msk.f32.gmra.mxu0 %vm405_vm1, %v280_v21  ;;  %6584 = vmatmul.msk.f32.gmra.mxu1 %vm405_vm1, %v280_v21 }
  0x9f   : > { %6714 = vmatmul.msk.f32.gmra.mxu2 %vm405_vm1, %v281_v22  ;;  %6843 = vmatmul.msk.f32.gmra.mxu3 %vm405_vm1, %v281_v22 }
  0xa1   : > { %6456 = vmatmul.msk.f32.gmra.mxu0 %vm405_vm1, %v281_v22  ;;  %6585 = vmatmul.msk.f32.gmra.mxu1 %vm405_vm1, %v281_v22 }
  0xa6   : > { %v7418_v24 = vpop.f32.mrf.mxu0  ;;  %v7420_v25 = vpop.f32.mrf.mxu1 }
  0xa7   : > { %12958 = vst [vmem:[#allocation16_spill] sm:$0xff] %v7418_v24  ;;  %6715 = vmatmul.msk.f32.gmra.mxu2 %vm405_vm1, %v282_v23  ;;  %6844 = vmatmul.msk.f32.gmra.mxu3 %vm405_vm1, %v282_v23 }
  0xa8   : > { %12959 = vst [vmem:[#allocation17_spill] sm:$0xff] %v7420_v25 }
  0xa9   : > { %6457 = vmatmul.msk.f32.gmra.mxu0 %vm405_vm1, %v282_v23  ;;  %6586 = vmatmul.msk.f32.gmra.mxu1 %vm405_vm1, %v282_v23 }
  0xaa   : > { %v7426_v26 = vpop.f32.mrf.mxu2  ;;  %v7428_v27 = vpop.f32.mrf.mxu3 }
  0xab   : > { %12960 = vst [vmem:[#allocation18_spill] sm:$0xff] %v7426_v26 }
  0xac   : > { %12961 = vst [vmem:[#allocation19_spill] sm:$0xff] %v7428_v27 }
  0xae   : > { %v7433_v29 = vpop.f32.mrf.mxu0  ;;  %v7435_v30 = vpop.f32.mrf.mxu1 }
  0xaf   : > { %12962 = vst [vmem:[#allocation20_spill] sm:$0xff] %v7433_v29  ;;  %6716 = vmatmul.msk.f32.gmra.mxu2 %vm405_vm1, %v283_v28  ;;  %6845 = vmatmul.msk.f32.gmra.mxu3 %vm405_vm1, %v283_v28 }
  0xb0   : > { %12963 = vst [vmem:[#allocation21_spill] sm:$0xff] %v7435_v30 }
  0xb1   : > { %6458 = vmatmul.msk.f32.gmra.mxu0 %vm405_vm1, %v283_v28  ;;  %6587 = vmatmul.msk.f32.gmra.mxu1 %vm405_vm1, %v283_v28  ;;  %v295_v28 = vld [vmem:[%s12449_s0 + $0xe8] sm:$0xff] }
  0xb2   : > { %v7441_v31 = vpop.f32.mrf.mxu2  ;;  %v7443_v32 = vpop.f32.mrf.mxu3 }
  0xb3   : > { %12964 = vst [vmem:[#allocation22_spill] sm:$0xff] %v7441_v31 }
  0xb4   : > { %12965 = vst [vmem:[#allocation23_spill] sm:$0xff] %v7443_v32  ;;  %v298_v32 = vld [vmem:[%s12449_s0 + $0x100] sm:$0xff] }
  0xb6   : > { %v7448_v34 = vpop.f32.mrf.mxu0  ;;  %v7450_v35 = vpop.f32.mrf.mxu1 }
  0xb7   : > { %12966 = vst [vmem:[#allocation24_spill] sm:$0xff] %v7448_v34  ;;  %6717 = vmatmul.msk.f32.gmra.mxu2 %vm405_vm1, %v284_v33  ;;  %6846 = vmatmul.msk.f32.gmra.mxu3 %vm405_vm1, %v284_v33 }
  0xb8   : > { %12967 = vst [vmem:[#allocation25_spill] sm:$0xff] %v7450_v35 }
  0xb9   : > { %6459 = vmatmul.msk.f32.gmra.mxu0 %vm405_vm1, %v284_v33  ;;  %6588 = vmatmul.msk.f32.gmra.mxu1 %vm405_vm1, %v284_v33 }
  0xba   : > { %v7456_v36 = vpop.f32.mrf.mxu2  ;;  %v7458_v37 = vpop.f32.mrf.mxu3 }
  0xbb   : > { %12968 = vst [vmem:[#allocation26_spill] sm:$0xff] %v7456_v36 }
  0xbc   : > { %12969 = vst [vmem:[#allocation27_spill] sm:$0xff] %v7458_v37 }
  0xbe   : > { %v7463_v39 = vpop.f32.mrf.mxu0  ;;  %v7465_v40 = vpop.f32.mrf.mxu1 }
  0xbf   : > { %12970 = vst [vmem:[#allocation28_spill] sm:$0xff] %v7463_v39  ;;  %6718 = vmatmul.msk.f32.gmra.mxu2 %vm405_vm1, %v285_v38  ;;  %6847 = vmatmul.msk.f32.gmra.mxu3 %vm405_vm1, %v285_v38 }
  0xc0   : > { %12971 = vst [vmem:[#allocation29_spill] sm:$0xff] %v7465_v40 }
  0xc1   : > { %6460 = vmatmul.msk.f32.gmra.mxu0 %vm405_vm1, %v285_v38  ;;  %6589 = vmatmul.msk.f32.gmra.mxu1 %vm405_vm1, %v285_v38 }
  0xc2   : > { %v7471_v41 = vpop.f32.mrf.mxu2  ;;  %v7473_v42 = vpop.f32.mrf.mxu3 }
  0xc3   : > { %12972 = vst [vmem:[#allocation30_spill] sm:$0xff] %v7471_v41 }
  0xc4   : > { %12973 = vst [vmem:[#allocation31_spill] sm:$0xff] %v7473_v42 }
  0xc6   : > { %v7478_v44 = vpop.f32.mrf.mxu0  ;;  %v7480_v45 = vpop.f32.mrf.mxu1 }
  0xc7   : > { %12974 = vst [vmem:[#allocation32_spill] sm:$0xff] %v7478_v44  ;;  %6719 = vmatmul.msk.f32.gmra.mxu2 %vm405_vm1, %v286_v43  ;;  %6848 = vmatmul.msk.f32.gmra.mxu3 %vm405_vm1, %v286_v43 }
  0xc8   : > { %12975 = vst [vmem:[#allocation33_spill] sm:$0xff] %v7480_v45 }
  0xc9   : > { %6461 = vmatmul.msk.f32.gmra.mxu0 %vm405_vm1, %v286_v43  ;;  %6590 = vmatmul.msk.f32.gmra.mxu1 %vm405_vm1, %v286_v43 }
  0xca   : > { %v7486_v46 = vpop.f32.mrf.mxu2  ;;  %v7488_v47 = vpop.f32.mrf.mxu3 }
  0xcb   : > { %12976 = vst [vmem:[#allocation34_spill] sm:$0xff] %v7486_v46 }
  0xcc   : > { %12977 = vst [vmem:[#allocation35_spill] sm:$0xff] %v7488_v47 }
  0xce   : > { %v7493_v49 = vpop.f32.mrf.mxu0  ;;  %v7495_v50 = vpop.f32.mrf.mxu1 }
  0xcf   : > { %12978 = vst [vmem:[#allocation36_spill] sm:$0xff] %v7495_v50  ;;  %6720 = vmatmul.msk.f32.gmra.mxu2 %vm405_vm1, %v287_v48  ;;  %6849 = vmatmul.msk.f32.gmra.mxu3 %vm405_vm1, %v287_v48 }
  0xd1   : > { %6462 = vmatmul.msk.f32.gmra.mxu0 %vm405_vm1, %v287_v48  ;;  %6591 = vmatmul.msk.f32.gmra.mxu1 %vm405_vm1, %v287_v48 }
  0xd2   : > { %v7501_v51 = vpop.f32.mrf.mxu2  ;;  %v7503_v52 = vpop.f32.mrf.mxu3 }
  0xd3   : > { %12979 = vst [vmem:[#allocation37_spill] sm:$0xff] %v7501_v51 }
  0xd4   : > { %12980 = vst [vmem:[#allocation38_spill] sm:$0xff] %v7503_v52  ;;  %v299_v52 = vld [vmem:[%s12449_s0 + $0x108] sm:$0xff] }
  0xd6   : > { %v7508_v54 = vpop.f32.mrf.mxu0  ;;  %v7510_v55 = vpop.f32.mrf.mxu1 }
  0xd7   : > { %12981 = vst [vmem:[#allocation39_spill] sm:$0xff] %v7510_v55  ;;  %6721 = vmatmul.msk.f32.gmra.mxu2 %vm405_vm1, %v288_v53  ;;  %6850 = vmatmul.msk.f32.gmra.mxu3 %vm405_vm1, %v288_v53 }
  0xd9   : > { %6463 = vmatmul.msk.f32.gmra.mxu0 %vm405_vm1, %v288_v53  ;;  %6592 = vmatmul.msk.f32.gmra.mxu1 %vm405_vm1, %v288_v53  ;;  %v296_v53 = vld [vmem:[%s12449_s0 + $0xf0] sm:$0xff] }
  0xda   : > { %v7516_v56 = vpop.f32.mrf.mxu2  ;;  %v7518_v57 = vpop.f32.mrf.mxu3 }
  0xdb   : > { %12982 = vst [vmem:[#allocation40_spill] sm:$0xff] %v7516_v56 }
  0xdc   : > { %12983 = vst [vmem:[#allocation41_spill] sm:$0xff] %v7518_v57 }
  0xde   : > { %v7523_v59 = vpop.f32.mrf.mxu0  ;;  %v7525_v60 = vpop.f32.mrf.mxu1 }
  0xdf   : > { %12984 = vst [vmem:[#allocation42_spill] sm:$0xff] %v7525_v60  ;;  %6722 = vmatmul.msk.f32.gmra.mxu2 %vm405_vm1, %v289_v58  ;;  %6851 = vmatmul.msk.f32.gmra.mxu3 %vm405_vm1, %v289_v58 }
  0xe1   : > { %6464 = vmatmul.msk.f32.gmra.mxu0 %vm405_vm1, %v289_v58  ;;  %6593 = vmatmul.msk.f32.gmra.mxu1 %vm405_vm1, %v289_v58 }
  0xe2   : > { %v7531_v61 = vpop.f32.mrf.mxu2  ;;  %v7533_v62 = vpop.f32.mrf.mxu3 }
  0xe3   : > { %12985 = vst [vmem:[#allocation43_spill] sm:$0xff] %v7531_v61 }
  0xe4   : > { %12986 = vst [vmem:[#allocation44_spill] sm:$0xff] %v7533_v62 }
  0xe6   : > { %v7538_v0 = vpop.f32.mrf.mxu0  ;;  %v7540_v1 = vpop.f32.mrf.mxu1 }
  0xe7   : > { %12987 = vst [vmem:[#allocation45_spill] sm:$0xff] %v7540_v1  ;;  %6723 = vmatmul.msk.f32.gmra.mxu2 %vm405_vm1, %v290_v63  ;;  %6852 = vmatmul.msk.f32.gmra.mxu3 %vm405_vm1, %v290_v63 }
  0xe9   : > { %6465 = vmatmul.msk.f32.gmra.mxu0 %vm405_vm1, %v290_v63  ;;  %6594 = vmatmul.msk.f32.gmra.mxu1 %vm405_vm1, %v290_v63 }
  0xea   : > { %v7546_v2 = vpop.f32.mrf.mxu2  ;;  %v7548_v3 = vpop.f32.mrf.mxu3 }
  0xeb   : > { %12988 = vst [vmem:[#allocation46_spill] sm:$0xff] %v7546_v2 }
  0xec   : > { %12989 = vst [vmem:[#allocation47_spill] sm:$0xff] %v7548_v3 }
  0xee   : > { %v7553_v5 = vpop.f32.mrf.mxu0  ;;  %v7555_v6 = vpop.f32.mrf.mxu1 }
  0xef   : > { %12990 = vst [vmem:[#allocation48_spill] sm:$0xff] %v7555_v6  ;;  %6724 = vmatmul.msk.f32.gmra.mxu2 %vm405_vm1, %v291_v4  ;;  %6853 = vmatmul.msk.f32.gmra.mxu3 %vm405_vm1, %v291_v4 }
  0xf1   : > { %6466 = vmatmul.msk.f32.gmra.mxu0 %vm405_vm1, %v291_v4  ;;  %6595 = vmatmul.msk.f32.gmra.mxu1 %vm405_vm1, %v291_v4 }
  0xf2   : > { %v7561_v7 = vpop.f32.mrf.mxu2  ;;  %v7563_v8 = vpop.f32.mrf.mxu3 }
  0xf3   : > { %12991 = vst [vmem:[#allocation49_spill] sm:$0xff] %v7561_v7 }
  0xf4   : > { %12992 = vst [vmem:[#allocation50_spill] sm:$0xff] %v7563_v8 }
  0xf6   : > { %v7568_v10 = vpop.f32.mrf.mxu0  ;;  %v7570_v11 = vpop.f32.mrf.mxu1 }
  0xf7   : > { %12993 = vst [vmem:[#allocation51_spill] sm:$0xff] %v7570_v11  ;;  %6725 = vmatmul.msk.f32.gmra.mxu2 %vm405_vm1, %v292_v9  ;;  %6854 = vmatmul.msk.f32.gmra.mxu3 %vm405_vm1, %v292_v9 }
  0xf9   : > { %6467 = vmatmul.msk.f32.gmra.mxu0 %vm405_vm1, %v292_v9  ;;  %6596 = vmatmul.msk.f32.gmra.mxu1 %vm405_vm1, %v292_v9 }
  0xfa   : > { %v7576_v12 = vpop.f32.mrf.mxu2  ;;  %v7578_v13 = vpop.f32.mrf.mxu3 }
  0xfb   : > { %12994 = vst [vmem:[#allocation52_spill] sm:$0xff] %v7576_v12 }
  0xfc   : > { %12995 = vst [vmem:[#allocation53_spill] sm:$0xff] %v7578_v13 }
  0xfe   : > { %v7583_v15 = vpop.f32.mrf.mxu0  ;;  %v7585_v16 = vpop.f32.mrf.mxu1 }
  0xff   : > { %12996 = vst [vmem:[#allocation54_spill] sm:$0xff] %v7585_v16  ;;  %6726 = vmatmul.msk.f32.gmra.mxu2 %vm405_vm1, %v293_v14  ;;  %6855 = vmatmul.msk.f32.gmra.mxu3 %vm405_vm1, %v293_v14 }
 0x101   : > { %6468 = vmatmul.msk.f32.gmra.mxu0 %vm405_vm1, %v293_v14  ;;  %6597 = vmatmul.msk.f32.gmra.mxu1 %vm405_vm1, %v293_v14  ;;  %v297_v14 = vld [vmem:[%s12449_s0 + $0xf8] sm:$0xff] }
 0x102   : > { %v7591_v17 = vpop.f32.mrf.mxu2  ;;  %v7593_v18 = vpop.f32.mrf.mxu3 }
 0x103   : > { %12997 = vst [vmem:[#allocation55_spill] sm:$0xff] %v7591_v17 }
 0x104   : > { %12998 = vst [vmem:[#allocation56_spill] sm:$0xff] %v7593_v18 }
 0x106   : > { %v7598_v20 = vpop.f32.mrf.mxu0  ;;  %v7600_v21 = vpop.f32.mrf.mxu1 }
 0x107   : > { %12999 = vst [vmem:[#allocation57_spill] sm:$0xff] %v7600_v21  ;;  %6727 = vmatmul.msk.f32.gmra.mxu2 %vm405_vm1, %v294_v19  ;;  %6856 = vmatmul.msk.f32.gmra.mxu3 %vm405_vm1, %v294_v19 }
 0x109   : > { %6469 = vmatmul.msk.f32.gmra.mxu0 %vm405_vm1, %v294_v19  ;;  %6598 = vmatmul.msk.f32.gmra.mxu1 %vm405_vm1, %v294_v19 }
 0x10a   : > { %v7606_v22 = vpop.f32.mrf.mxu2  ;;  %v7608_v23 = vpop.f32.mrf.mxu3 }
 0x10b   : > { %13000 = vst [vmem:[#allocation58_spill] sm:$0xff] %v7606_v22 }
 0x10c   : > { %13001 = vst [vmem:[#allocation59_spill] sm:$0xff] %v7608_v23 }
 0x10e   : > { %v7613_v33 = vpop.f32.mrf.mxu0  ;;  %v7615_v38 = vpop.f32.mrf.mxu1 }
 0x10f   : > { %13002 = vst [vmem:[#allocation60_spill] sm:$0xff] %v7615_v38  ;;  %6728 = vmatmul.msk.f32.gmra.mxu2 %vm405_vm1, %v295_v28  ;;  %6857 = vmatmul.msk.f32.gmra.mxu3 %vm405_vm1, %v295_v28 }
 0x111   : > { %6470 = vmatmul.msk.f32.gmra.mxu0 %vm405_vm1, %v295_v28  ;;  %6599 = vmatmul.msk.f32.gmra.mxu1 %vm405_vm1, %v295_v28 }
 0x112   : > { %v7621_v43 = vpop.f32.mrf.mxu2  ;;  %v7623_v48 = vpop.f32.mrf.mxu3 }
 0x113   : > { %13003 = vst [vmem:[#allocation61_spill] sm:$0xff] %v7621_v43 }
 0x114   : > { %13004 = vst [vmem:[#allocation62_spill] sm:$0xff] %v7623_v48 }
 0x116   : > { %v7628_v58 = vpop.f32.mrf.mxu0  ;;  %v7630_v63 = vpop.f32.mrf.mxu1 }
 0x117   : > { %13005 = vst [vmem:[#allocation63_spill] sm:$0xff] %v7628_v58  ;;  %6729 = vmatmul.msk.f32.gmra.mxu2 %vm405_vm1, %v296_v53  ;;  %6858 = vmatmul.msk.f32.gmra.mxu3 %vm405_vm1, %v296_v53 }
 0x118   : > { %13006 = vst [vmem:[#allocation64_spill] sm:$0xff] %v7630_v63 }
 0x119   : > { %6471 = vmatmul.msk.f32.gmra.mxu0 %vm405_vm1, %v296_v53  ;;  %6600 = vmatmul.msk.f32.gmra.mxu1 %vm405_vm1, %v296_v53 }
 0x11a   : > { %v7636_v4 = vpop.f32.mrf.mxu2  ;;  %v7638_v9 = vpop.f32.mrf.mxu3 }
 0x11b   : > { %13007 = vst [vmem:[#allocation65_spill] sm:$0xff] %v7636_v4 }
 0x11c   : > { %13008 = vst [vmem:[#allocation66_spill] sm:$0xff] %v7638_v9 }
 0x11e   : > { %v7643_v19 = vpop.f32.mrf.mxu0  ;;  %v7645_v28 = vpop.f32.mrf.mxu1 }
 0x11f   : > { %13009 = vst [vmem:[#allocation67_spill] sm:$0xff] %v7643_v19  ;;  %6730 = vmatmul.msk.f32.gmra.mxu2 %vm405_vm1, %v297_v14  ;;  %6859 = vmatmul.msk.f32.gmra.mxu3 %vm405_vm1, %v297_v14 }
 0x120   : > { %13010 = vst [vmem:[#allocation68_spill] sm:$0xff] %v7645_v28 }
 0x121   : > { %6472 = vmatmul.msk.f32.gmra.mxu0 %vm405_vm1, %v297_v14  ;;  %6601 = vmatmul.msk.f32.gmra.mxu1 %vm405_vm1, %v297_v14 }
 0x122   : > { %v7651_v53 = vpop.f32.mrf.mxu2  ;;  %v7653_v27 = vpop.f32.mrf.mxu3 }
 0x123   : > { %13011 = vst [vmem:[#allocation69_spill] sm:$0xff] %v7651_v53 }
 0x124   : > { %13012 = vst [vmem:[#allocation70_spill] sm:$0xff] %v7653_v27 }
 0x126   : > { %v7658_v37 = vpop.f32.mrf.mxu0  ;;  %v7660_v42 = vpop.f32.mrf.mxu1 }
 0x127   : > { %13013 = vst [vmem:[#allocation71_spill] sm:$0xff] %v7658_v37  ;;  %6731 = vmatmul.msk.f32.gmra.mxu2 %vm405_vm1, %v298_v32  ;;  %6860 = vmatmul.msk.f32.gmra.mxu3 %vm405_vm1, %v298_v32 }
 0x128   : > { %13014 = vst [vmem:[#allocation72_spill] sm:$0xff] %v7660_v42 }
 0x129   : > { %6473 = vmatmul.msk.f32.gmra.mxu0 %vm405_vm1, %v298_v32  ;;  %6602 = vmatmul.msk.f32.gmra.mxu1 %vm405_vm1, %v298_v32 }
 0x12a   : > { %v7666_v14 = vpop.f32.mrf.mxu2  ;;  %v7668_v47 = vpop.f32.mrf.mxu3 }
 0x12b   : > { %13015 = vst [vmem:[#allocation73_spill] sm:$0xff] %v7666_v14 }
 0x12c   : > { %13016 = vst [vmem:[#allocation74_spill] sm:$0xff] %v7668_v47  ;;  %v300_v47 = vld [vmem:[%s12449_s0 + $0x110] sm:$0xff] }
 0x12e   : > { %v7673_v57 = vpop.f32.mrf.mxu0  ;;  %v7675_v62 = vpop.f32.mrf.mxu1 }
 0x12f   : > { %13017 = vst [vmem:[#allocation75_spill] sm:$0xff] %v7673_v57  ;;  %6732 = vmatmul.msk.f32.gmra.mxu2 %vm405_vm1, %v299_v52  ;;  %6861 = vmatmul.msk.f32.gmra.mxu3 %vm405_vm1, %v299_v52 }
 0x130   : > { %13018 = vst [vmem:[#allocation76_spill] sm:$0xff] %v7675_v62 }
 0x131   : > { %6474 = vmatmul.msk.f32.gmra.mxu0 %vm405_vm1, %v299_v52  ;;  %6603 = vmatmul.msk.f32.gmra.mxu1 %vm405_vm1, %v299_v52 }
 0x132   : > { %v7681_v32 = vpop.f32.mrf.mxu2  ;;  %v7683_v3 = vpop.f32.mrf.mxu3 }
 0x133   : > { %13019 = vst [vmem:[#allocation77_spill] sm:$0xff] %v7681_v32 }
 0x134   : > { %13020 = vst [vmem:[#allocation78_spill] sm:$0xff] %v7683_v3  ;;  %v301_v3 = vld [vmem:[%s12449_s0 + $0x118] sm:$0xff] }
 0x136   : > { %v7688_v8 = vpop.f32.mrf.mxu0  ;;  %v7690_v13 = vpop.f32.mrf.mxu1 }
 0x137   : > { %13021 = vst [vmem:[#allocation79_spill] sm:$0xff] %v7688_v8  ;;  %6733 = vmatmul.msk.f32.gmra.mxu2 %vm405_vm1, %v300_v47  ;;  %6862 = vmatmul.msk.f32.gmra.mxu3 %vm405_vm1, %v300_v47 }
 0x138   : > { %13022 = vst [vmem:[#allocation80_spill] sm:$0xff] %v7690_v13 }
 0x139   : > { %6475 = vmatmul.msk.f32.gmra.mxu0 %vm405_vm1, %v300_v47  ;;  %6604 = vmatmul.msk.f32.gmra.mxu1 %vm405_vm1, %v300_v47 }
 0x13a   : > { %v7696_v52 = vpop.f32.mrf.mxu2  ;;  %v7698_v18 = vpop.f32.mrf.mxu3 }
 0x13b   : > { %13023 = vst [vmem:[#allocation81_spill] sm:$0xff] %v7696_v52 }
 0x13c   : > { %13024 = vst [vmem:[#allocation82_spill] sm:$0xff] %v7698_v18  ;;  %v302_v18 = vld [vmem:[%s12449_s0 + $0x120] sm:$0xff] }
 0x13e   : > { %v7703_v23 = vpop.f32.mrf.mxu0  ;;  %v7705_v48 = vpop.f32.mrf.mxu1 }
 0x13f   : > { %13025 = vst [vmem:[#allocation83_spill] sm:$0xff] %v7703_v23  ;;  %6734 = vmatmul.msk.f32.gmra.mxu2 %vm405_vm1, %v301_v3  ;;  %6863 = vmatmul.msk.f32.gmra.mxu3 %vm405_vm1, %v301_v3 }
 0x140   : > { %13026 = vst [vmem:[#allocation84_spill] sm:$0xff] %v7705_v48 }
 0x141   : > { %6476 = vmatmul.msk.f32.gmra.mxu0 %vm405_vm1, %v301_v3  ;;  %6605 = vmatmul.msk.f32.gmra.mxu1 %vm405_vm1, %v301_v3 }
 0x142   : > { %v7711_v47 = vpop.f32.mrf.mxu2  ;;  %v7713_v9 = vpop.f32.mrf.mxu3 }
 0x143   : > { %13027 = vst [vmem:[#allocation85_spill] sm:$0xff] %v7711_v47 }
 0x144   : > { %13028 = vst [vmem:[#allocation86_spill] sm:$0xff] %v7713_v9  ;;  %v303_v9 = vld [vmem:[%s12449_s0 + $0x128] sm:$0xff] }
 0x146   : > { %v7718_v27 = vpop.f32.mrf.mxu0  ;;  %v7720_v14 = vpop.f32.mrf.mxu1 }
 0x147   : > { %13029 = vst [vmem:[#allocation87_spill] sm:$0xff] %v7718_v27  ;;  %6735 = vmatmul.msk.f32.gmra.mxu2 %vm405_vm1, %v302_v18  ;;  %6864 = vmatmul.msk.f32.gmra.mxu3 %vm405_vm1, %v302_v18 }
 0x148   : > { %13030 = vst [vmem:[#allocation88_spill] sm:$0xff] %v7720_v14 }
 0x149   : > { %6477 = vmatmul.msk.f32.gmra.mxu0 %vm405_vm1, %v302_v18  ;;  %6606 = vmatmul.msk.f32.gmra.mxu1 %vm405_vm1, %v302_v18 }
 0x14a   : > { %v7726_v3 = vpop.f32.mrf.mxu2  ;;  %v7728_v32 = vpop.f32.mrf.mxu3 }
 0x14b   : > { %13031 = vst [vmem:[#allocation89_spill] sm:$0xff] %v7726_v3 }
 0x14c   : > { %13032 = vst [vmem:[#allocation90_spill] sm:$0xff] %v7728_v32  ;;  %v304_v32 = vld [vmem:[%s12449_s0 + $0x130] sm:$0xff] }
 0x14e   : > { %v7733_v26 = vpop.f32.mrf.mxu0  ;;  %v7735_v52 = vpop.f32.mrf.mxu1 }
 0x14f   : > { %13033 = vst [vmem:[#allocation91_spill] sm:$0xff] %v7733_v26  ;;  %6736 = vmatmul.msk.f32.gmra.mxu2 %vm405_vm1, %v303_v9  ;;  %6865 = vmatmul.msk.f32.gmra.mxu3 %vm405_vm1, %v303_v9 }
 0x150   : > { %13034 = vst [vmem:[#allocation92_spill] sm:$0xff] %v7735_v52 }
 0x151   : > { %6478 = vmatmul.msk.f32.gmra.mxu0 %vm405_vm1, %v303_v9  ;;  %6607 = vmatmul.msk.f32.gmra.mxu1 %vm405_vm1, %v303_v9 }
 0x152   : > { %v7741_v18 = vpop.f32.mrf.mxu2  ;;  %v7743_v31 = vpop.f32.mrf.mxu3 }
 0x153   : > { %13035 = vst [vmem:[#allocation93_spill] sm:$0xff] %v7741_v18 }
 0x154   : > { %13036 = vst [vmem:[#allocation94_spill] sm:$0xff] %v7743_v31  ;;  %v305_v31 = vld [vmem:[%s12449_s0 + $0x138] sm:$0xff] }
 0x156   : > { %v7748_v47 = vpop.f32.mrf.mxu0  ;;  %v7750_v36 = vpop.f32.mrf.mxu1 }
 0x157   : > { %13037 = vst [vmem:[#allocation95_spill] sm:$0xff] %v7750_v36  ;;  %6737 = vmatmul.msk.f32.gmra.mxu2 %vm405_vm1, %v304_v32  ;;  %6866 = vmatmul.msk.f32.gmra.mxu3 %vm405_vm1, %v304_v32 }
 0x159   : > { %6479 = vmatmul.msk.f32.gmra.mxu0 %vm405_vm1, %v304_v32  ;;  %6608 = vmatmul.msk.f32.gmra.mxu1 %vm405_vm1, %v304_v32 }
 0x15a   : > { %v7756_v9 = vpop.f32.mrf.mxu2  ;;  %v7758_v3 = vpop.f32.mrf.mxu3 }
 0x15b   : > { %13038 = vst [vmem:[#allocation96_spill] sm:$0xff] %v7756_v9 }
 0x15c   : > { %13039 = vst [vmem:[#allocation97_spill] sm:$0xff] %v7758_v3  ;;  %v306_v3 = vld [vmem:[%s12449_s0 + $0x140] sm:$0xff] }
 0x15e   : > { %v7763_v41 = vpop.f32.mrf.mxu0  ;;  %v7765_v18 = vpop.f32.mrf.mxu1 }
 0x15f   : > { %13040 = vst [vmem:[#allocation98_spill] sm:$0xff] %v7765_v18  ;;  %6738 = vmatmul.msk.f32.gmra.mxu2 %vm405_vm1, %v305_v31  ;;  %6867 = vmatmul.msk.f32.gmra.mxu3 %vm405_vm1, %v305_v31 }
 0x161   : > { %6480 = vmatmul.msk.f32.gmra.mxu0 %vm405_vm1, %v305_v31  ;;  %6609 = vmatmul.msk.f32.gmra.mxu1 %vm405_vm1, %v305_v31 }
 0x162   : > { %v7771_v32 = vpop.f32.mrf.mxu2  ;;  %v7773_v46 = vpop.f32.mrf.mxu3 }
 0x163   : > { %13041 = vst [vmem:[#allocation99_spill] sm:$0xff] %v7771_v32 }
 0x164   : > { %13042 = vst [vmem:[#allocation100_spill] sm:$0xff] %v7773_v46  ;;  %v307_v46 = vld [vmem:[%s12449_s0 + $0x148] sm:$0xff] }
 0x166   : > { %v7778_v9 = vpop.f32.mrf.mxu0  ;;  %v7780_v51 = vpop.f32.mrf.mxu1 }
 0x167   : > { %13043 = vst [vmem:[#allocation101_spill] sm:$0xff] %v7780_v51  ;;  %6739 = vmatmul.msk.f32.gmra.mxu2 %vm405_vm1, %v306_v3  ;;  %6868 = vmatmul.msk.f32.gmra.mxu3 %vm405_vm1, %v306_v3 }
 0x169   : > { %6481 = vmatmul.msk.f32.gmra.mxu0 %vm405_vm1, %v306_v3  ;;  %6610 = vmatmul.msk.f32.gmra.mxu1 %vm405_vm1, %v306_v3 }
 0x16a   : > { %v7786_v31 = vpop.f32.mrf.mxu2  ;;  %v7788_v32 = vpop.f32.mrf.mxu3 }
 0x16b   : > { %13044 = vst [vmem:[#allocation102_spill] sm:$0xff] %v7786_v31 }
 0x16c   : > { %13045 = vst [vmem:[#allocation103_spill] sm:$0xff] %v7788_v32  ;;  %v308_v32 = vld [vmem:[%s12449_s0 + $0x150] sm:$0xff] }
 0x16e   : > { %v7793_v56 = vpop.f32.mrf.mxu0  ;;  %v7795_v61 = vpop.f32.mrf.mxu1 }
 0x16f   : > { %13046 = vst [vmem:[#allocation104_spill] sm:$0xff] %v7795_v61  ;;  %6740 = vmatmul.msk.f32.gmra.mxu2 %vm405_vm1, %v307_v46  ;;  %6869 = vmatmul.msk.f32.gmra.mxu3 %vm405_vm1, %v307_v46 }
 0x171   : > { %6482 = vmatmul.msk.f32.gmra.mxu0 %vm405_vm1, %v307_v46  ;;  %6611 = vmatmul.msk.f32.gmra.mxu1 %vm405_vm1, %v307_v46 }
 0x172   : > { %v7801_v3 = vpop.f32.mrf.mxu2  ;;  %v7803_v31 = vpop.f32.mrf.mxu3 }
 0x173   : > { %13047 = vst [vmem:[#allocation105_spill] sm:$0xff] %v7801_v3 }
 0x174   : > { %13048 = vst [vmem:[#allocation106_spill] sm:$0xff] %v7803_v31  ;;  %v309_v31 = vld [vmem:[%s12449_s0 + $0x158] sm:$0xff] }
 0x176   : > { %v7808_v2 = vpop.f32.mrf.mxu0  ;;  %v7810_v7 = vpop.f32.mrf.mxu1 }
 0x177   : > { %13049 = vst [vmem:[#allocation107_spill] sm:$0xff] %v7808_v2  ;;  %6741 = vmatmul.msk.f32.gmra.mxu2 %vm405_vm1, %v308_v32  ;;  %6870 = vmatmul.msk.f32.gmra.mxu3 %vm405_vm1, %v308_v32 }
 0x178   : > { %13050 = vst [vmem:[#allocation108_spill] sm:$0xff] %v7810_v7 }
 0x179   : > { %6483 = vmatmul.msk.f32.gmra.mxu0 %vm405_vm1, %v308_v32  ;;  %6612 = vmatmul.msk.f32.gmra.mxu1 %vm405_vm1, %v308_v32 }
 0x17a   : > { %v7816_v46 = vpop.f32.mrf.mxu2  ;;  %v7818_v3 = vpop.f32.mrf.mxu3 }
 0x17b   : > { %13051 = vst [vmem:[#allocation109_spill] sm:$0xff] %v7816_v46 }
 0x17c   : > { %13052 = vst [vmem:[#allocation110_spill] sm:$0xff] %v7818_v3  ;;  %v310_v3 = vld [vmem:[%s12449_s0 + $0x160] sm:$0xff] }
 0x17e   : > { %v7823_v12 = vpop.f32.mrf.mxu0  ;;  %v7825_v17 = vpop.f32.mrf.mxu1 }
 0x17f   : > { %13053 = vst [vmem:[#allocation111_spill] sm:$0xff] %v7823_v12  ;;  %6742 = vmatmul.msk.f32.gmra.mxu2 %vm405_vm1, %v309_v31  ;;  %6871 = vmatmul.msk.f32.gmra.mxu3 %vm405_vm1, %v309_v31 }
 0x180   : > { %13054 = vst [vmem:[#allocation112_spill] sm:$0xff] %v7825_v17 }
 0x181   : > { %6484 = vmatmul.msk.f32.gmra.mxu0 %vm405_vm1, %v309_v31  ;;  %6613 = vmatmul.msk.f32.gmra.mxu1 %vm405_vm1, %v309_v31 }
 0x182   : > { %v7831_v32 = vpop.f32.mrf.mxu2  ;;  %v7833_v46 = vpop.f32.mrf.mxu3 }
 0x183   : > { %13055 = vst [vmem:[#allocation113_spill] sm:$0xff] %v7831_v32 }
 0x184   : > { %13056 = vst [vmem:[#allocation114_spill] sm:$0xff] %v7833_v46  ;;  %v311_v46 = vld [vmem:[%s12449_s0 + $0x168] sm:$0xff] }
 0x186   : > { %v7838_v22 = vpop.f32.mrf.mxu0  ;;  %v7840_v43 = vpop.f32.mrf.mxu1 }
 0x187   : > { %13057 = vst [vmem:[#allocation115_spill] sm:$0xff] %v7838_v22  ;;  %6743 = vmatmul.msk.f32.gmra.mxu2 %vm405_vm1, %v310_v3  ;;  %6872 = vmatmul.msk.f32.gmra.mxu3 %vm405_vm1, %v310_v3 }
 0x188   : > { %13058 = vst [vmem:[#allocation116_spill] sm:$0xff] %v7840_v43 }
 0x189   : > { %6485 = vmatmul.msk.f32.gmra.mxu0 %vm405_vm1, %v310_v3  ;;  %6614 = vmatmul.msk.f32.gmra.mxu1 %vm405_vm1, %v310_v3 }
 0x18a   : > { %v7846_v31 = vpop.f32.mrf.mxu2  ;;  %v7848_v32 = vpop.f32.mrf.mxu3 }
 0x18b   : > { %13059 = vst [vmem:[#allocation117_spill] sm:$0xff] %v7846_v31 }
 0x18c   : > { %13060 = vst [vmem:[#allocation118_spill] sm:$0xff] %v7848_v32  ;;  %v312_v32 = vld [vmem:[%s12449_s0 + $0x170] sm:$0xff] }
 0x18e   : > { %v7853_v4 = vpop.f32.mrf.mxu0  ;;  %v7855_v53 = vpop.f32.mrf.mxu1 }
 0x18f   : > { %13061 = vst [vmem:[#allocation119_spill] sm:$0xff] %v7853_v4  ;;  %6744 = vmatmul.msk.f32.gmra.mxu2 %vm405_vm1, %v311_v46  ;;  %6873 = vmatmul.msk.f32.gmra.mxu3 %vm405_vm1, %v311_v46 }
 0x190   : > { %13062 = vst [vmem:[#allocation120_spill] sm:$0xff] %v7855_v53 }
 0x191   : > { %6486 = vmatmul.msk.f32.gmra.mxu0 %vm405_vm1, %v311_v46  ;;  %6615 = vmatmul.msk.f32.gmra.mxu1 %vm405_vm1, %v311_v46 }
 0x192   : > { %v7861_v3 = vpop.f32.mrf.mxu2  ;;  %v7863_v31 = vpop.f32.mrf.mxu3 }
 0x193   : > { %13063 = vst [vmem:[#allocation121_spill] sm:$0xff] %v7861_v3 }
 0x194   : > { %13064 = vst [vmem:[#allocation122_spill] sm:$0xff] %v7863_v31  ;;  %v313_v31 = vld [vmem:[%s12449_s0 + $0x178] sm:$0xff] }
 0x196   : > { %v7868_v42 = vpop.f32.mrf.mxu0  ;;  %v7870_v62 = vpop.f32.mrf.mxu1 }
 0x197   : > { %13065 = vst [vmem:[#allocation123_spill] sm:$0xff] %v7868_v42  ;;  %6745 = vmatmul.msk.f32.gmra.mxu2 %vm405_vm1, %v312_v32  ;;  %6874 = vmatmul.msk.f32.gmra.mxu3 %vm405_vm1, %v312_v32 }
 0x198   : > { %13066 = vst [vmem:[#allocation124_spill] sm:$0xff] %v7870_v62 }
 0x199   : > { %6487 = vmatmul.msk.f32.gmra.mxu0 %vm405_vm1, %v312_v32  ;;  %6616 = vmatmul.msk.f32.gmra.mxu1 %vm405_vm1, %v312_v32 }
 0x19a   : > { %v7876_v46 = vpop.f32.mrf.mxu2  ;;  %v7878_v3 = vpop.f32.mrf.mxu3 }
 0x19b   : > { %13067 = vst [vmem:[#allocation125_spill] sm:$0xff] %v7876_v46 }
 0x19c   : > { %13068 = vst [vmem:[#allocation126_spill] sm:$0xff] %v7878_v3  ;;  %v314_v3 = vld [vmem:[%s12449_s0 + $0x180] sm:$0xff] }
 0x19e   : > { %v7883_v25 = vpop.f32.mrf.mxu0  ;;  %v7885_v13 = vpop.f32.mrf.mxu1 }
 0x19f   : > { %13069 = vst [vmem:[#allocation127_spill] sm:$0xff] %v7883_v25  ;;  %6746 = vmatmul.msk.f32.gmra.mxu2 %vm405_vm1, %v313_v31  ;;  %6875 = vmatmul.msk.f32.gmra.mxu3 %vm405_vm1, %v313_v31 }
 0x1a0   : > { %13070 = vst [vmem:[#allocation128_spill] sm:$0xff] %v7885_v13 }
 0x1a1   : > { %6488 = vmatmul.msk.f32.gmra.mxu0 %vm405_vm1, %v313_v31  ;;  %6617 = vmatmul.msk.f32.gmra.mxu1 %vm405_vm1, %v313_v31 }
 0x1a2   : > { %v7891_v32 = vpop.f32.mrf.mxu2  ;;  %v7893_v46 = vpop.f32.mrf.mxu3 }
 0x1a3   : > { %13071 = vst [vmem:[#allocation129_spill] sm:$0xff] %v7891_v32 }
 0x1a4   : > { %13072 = vst [vmem:[#allocation130_spill] sm:$0xff] %v7893_v46  ;;  %v315_v46 = vld [vmem:[%s12449_s0 + $0x188] sm:$0xff] }
 0x1a6   : > { %v7898_v30 = vpop.f32.mrf.mxu0  ;;  %v7900_v48 = vpop.f32.mrf.mxu1 }
 0x1a7   : > { %13073 = vst [vmem:[#allocation131_spill] sm:$0xff] %v7898_v30  ;;  %6747 = vmatmul.msk.f32.gmra.mxu2 %vm405_vm1, %v314_v3  ;;  %6876 = vmatmul.msk.f32.gmra.mxu3 %vm405_vm1, %v314_v3 }
 0x1a8   : > { %13074 = vst [vmem:[#allocation132_spill] sm:$0xff] %v7900_v48 }
 0x1a9   : > { %6489 = vmatmul.msk.f32.gmra.mxu0 %vm405_vm1, %v314_v3  ;;  %6618 = vmatmul.msk.f32.gmra.mxu1 %vm405_vm1, %v314_v3 }
 0x1aa   : > { %v7906_v31 = vpop.f32.mrf.mxu2  ;;  %v7908_v32 = vpop.f32.mrf.mxu3 }
 0x1ab   : > { %13075 = vst [vmem:[#allocation133_spill] sm:$0xff] %v7906_v31 }
 0x1ac   : > { %13076 = vst [vmem:[#allocation134_spill] sm:$0xff] %v7908_v32  ;;  %v316_v32 = vld [vmem:[%s12449_s0 + $0x190] sm:$0xff] }
 0x1ae   : > { %v7913_v35 = vpop.f32.mrf.mxu0  ;;  %v7915_v14 = vpop.f32.mrf.mxu1 }
 0x1af   : > { %13077 = vst [vmem:[#allocation135_spill] sm:$0xff] %v7913_v35  ;;  %6748 = vmatmul.msk.f32.gmra.mxu2 %vm405_vm1, %v315_v46  ;;  %6877 = vmatmul.msk.f32.gmra.mxu3 %vm405_vm1, %v315_v46 }
 0x1b0   : > { %13078 = vst [vmem:[#allocation136_spill] sm:$0xff] %v7915_v14 }
 0x1b1   : > { %6490 = vmatmul.msk.f32.gmra.mxu0 %vm405_vm1, %v315_v46  ;;  %6619 = vmatmul.msk.f32.gmra.mxu1 %vm405_vm1, %v315_v46 }
 0x1b2   : > { %v7921_v3 = vpop.f32.mrf.mxu2  ;;  %v7923_v31 = vpop.f32.mrf.mxu3 }
 0x1b3   : > { %13079 = vst [vmem:[#allocation137_spill] sm:$0xff] %v7921_v3 }
 0x1b4   : > { %13080 = vst [vmem:[#allocation138_spill] sm:$0xff] %v7923_v31  ;;  %v317_v31 = vld [vmem:[%s12449_s0 + $0x198] sm:$0xff] }
 0x1b6   : > { %v7928_v48 = vpop.f32.mrf.mxu0  ;;  %v7930_v40 = vpop.f32.mrf.mxu1 }
 0x1b7   : > { %13081 = vst [vmem:[#allocation139_spill] sm:$0xff] %v7928_v48  ;;  %6749 = vmatmul.msk.f32.gmra.mxu2 %vm405_vm1, %v316_v32  ;;  %6878 = vmatmul.msk.f32.gmra.mxu3 %vm405_vm1, %v316_v32 }
 0x1b8   : > { %13082 = vst [vmem:[#allocation140_spill] sm:$0xff] %v7930_v40 }
 0x1b9   : > { %6491 = vmatmul.msk.f32.gmra.mxu0 %vm405_vm1, %v316_v32  ;;  %6620 = vmatmul.msk.f32.gmra.mxu1 %vm405_vm1, %v316_v32 }
 0x1ba   : > { %v7936_v46 = vpop.f32.mrf.mxu2  ;;  %v7938_v3 = vpop.f32.mrf.mxu3 }
 0x1bb   : > { %13083 = vst [vmem:[#allocation141_spill] sm:$0xff] %v7936_v46 }
 0x1bc   : > { %13084 = vst [vmem:[#allocation142_spill] sm:$0xff] %v7938_v3  ;;  %v318_v3 = vld [vmem:[%s12449_s0 + $0x1a0] sm:$0xff] }
 0x1be   : > { %v7943_v14 = vpop.f32.mrf.mxu0  ;;  %v7945_v52 = vpop.f32.mrf.mxu1 }
 0x1bf   : > { %13085 = vst [vmem:[#allocation143_spill] sm:$0xff] %v7943_v14  ;;  %6750 = vmatmul.msk.f32.gmra.mxu2 %vm405_vm1, %v317_v31  ;;  %6879 = vmatmul.msk.f32.gmra.mxu3 %vm405_vm1, %v317_v31 }
 0x1c0   : > { %13086 = vst [vmem:[#allocation144_spill] sm:$0xff] %v7945_v52 }
 0x1c1   : > { %6492 = vmatmul.msk.f32.gmra.mxu0 %vm405_vm1, %v317_v31  ;;  %6621 = vmatmul.msk.f32.gmra.mxu1 %vm405_vm1, %v317_v31 }
 0x1c2   : > { %v7951_v32 = vpop.f32.mrf.mxu2  ;;  %v7953_v46 = vpop.f32.mrf.mxu3 }
 0x1c3   : > { %13087 = vst [vmem:[#allocation145_spill] sm:$0xff] %v7951_v32 }
 0x1c4   : > { %13088 = vst [vmem:[#allocation146_spill] sm:$0xff] %v7953_v46  ;;  %v319_v46 = vld [vmem:[%s12449_s0 + $0x1a8] sm:$0xff] }
 0x1c6   : > { %v7958_v40 = vpop.f32.mrf.mxu0  ;;  %v7960_v45 = vpop.f32.mrf.mxu1 }
 0x1c7   : > { %13089 = vst [vmem:[#allocation147_spill] sm:$0xff] %v7958_v40  ;;  %6751 = vmatmul.msk.f32.gmra.mxu2 %vm405_vm1, %v318_v3  ;;  %6880 = vmatmul.msk.f32.gmra.mxu3 %vm405_vm1, %v318_v3 }
 0x1c8   : > { %13090 = vst [vmem:[#allocation148_spill] sm:$0xff] %v7960_v45 }
 0x1c9   : > { %6493 = vmatmul.msk.f32.gmra.mxu0 %vm405_vm1, %v318_v3  ;;  %6622 = vmatmul.msk.f32.gmra.mxu1 %vm405_vm1, %v318_v3 }
 0x1ca   : > { %v7966_v31 = vpop.f32.mrf.mxu2  ;;  %v7968_v32 = vpop.f32.mrf.mxu3 }
 0x1cb   : > { %13091 = vst [vmem:[#allocation149_spill] sm:$0xff] %v7966_v31 }
 0x1cc   : > { %13092 = vst [vmem:[#allocation150_spill] sm:$0xff] %v7968_v32  ;;  %v320_v32 = vld [vmem:[%s12449_s0 + $0x1b0] sm:$0xff] }
 0x1ce   : > { %v7973_v52 = vpop.f32.mrf.mxu0  ;;  %v7975_v36 = vpop.f32.mrf.mxu1 }
 0x1cf   : > { %13093 = vst [vmem:[#allocation151_spill] sm:$0xff] %v7973_v52  ;;  %6752 = vmatmul.msk.f32.gmra.mxu2 %vm405_vm1, %v319_v46  ;;  %6881 = vmatmul.msk.f32.gmra.mxu3 %vm405_vm1, %v319_v46 }
 0x1d0   : > { %13094 = vst [vmem:[#allocation152_spill] sm:$0xff] %v7975_v36 }
 0x1d1   : > { %6494 = vmatmul.msk.f32.gmra.mxu0 %vm405_vm1, %v319_v46  ;;  %6623 = vmatmul.msk.f32.gmra.mxu1 %vm405_vm1, %v319_v46 }
 0x1d2   : > { %v7981_v3 = vpop.f32.mrf.mxu2  ;;  %v7983_v31 = vpop.f32.mrf.mxu3 }
 0x1d3   : > { %13095 = vst [vmem:[#allocation153_spill] sm:$0xff] %v7981_v3 }
 0x1d4   : > { %13096 = vst [vmem:[#allocation154_spill] sm:$0xff] %v7983_v31  ;;  %v321_v31 = vld [vmem:[%s12449_s0 + $0x1b8] sm:$0xff] }
 0x1d6   : > { %v7988_v45 = vpop.f32.mrf.mxu0  ;;  %v7990_v50 = vpop.f32.mrf.mxu1 }
 0x1d7   : > { %13097 = vst [vmem:[#allocation155_spill] sm:$0xff] %v7988_v45  ;;  %6753 = vmatmul.msk.f32.gmra.mxu2 %vm405_vm1, %v320_v32  ;;  %6882 = vmatmul.msk.f32.gmra.mxu3 %vm405_vm1, %v320_v32 }
 0x1d8   : > { %13098 = vst [vmem:[#allocation156_spill] sm:$0xff] %v7990_v50 }
 0x1d9   : > { %6495 = vmatmul.msk.f32.gmra.mxu0 %vm405_vm1, %v320_v32  ;;  %6624 = vmatmul.msk.f32.gmra.mxu1 %vm405_vm1, %v320_v32 }
 0x1da   : > { %v7996_v46 = vpop.f32.mrf.mxu2  ;;  %v7998_v3 = vpop.f32.mrf.mxu3 }
 0x1db   : > { %13099 = vst [vmem:[#allocation157_spill] sm:$0xff] %v7996_v46 }
 0x1dc   : > { %13100 = vst [vmem:[#allocation158_spill] sm:$0xff] %v7998_v3  ;;  %v322_v3 = vld [vmem:[%s12449_s0 + $0x1c0] sm:$0xff] }
 0x1de   : > { %v8003_v36 = vpop.f32.mrf.mxu0  ;;  %v8005_v18 = vpop.f32.mrf.mxu1 }
 0x1df   : > { %13101 = vst [vmem:[#allocation159_spill] sm:$0xff] %v8003_v36  ;;  %6754 = vmatmul.msk.f32.gmra.mxu2 %vm405_vm1, %v321_v31  ;;  %6883 = vmatmul.msk.f32.gmra.mxu3 %vm405_vm1, %v321_v31 }
 0x1e0   : > { %13102 = vst [vmem:[#allocation160_spill] sm:$0xff] %v8005_v18 }
 0x1e1   : > { %6496 = vmatmul.msk.f32.gmra.mxu0 %vm405_vm1, %v321_v31  ;;  %6625 = vmatmul.msk.f32.gmra.mxu1 %vm405_vm1, %v321_v31 }
 0x1e2   : > { %v8011_v32 = vpop.f32.mrf.mxu2  ;;  %v8013_v46 = vpop.f32.mrf.mxu3 }
 0x1e3   : > { %13103 = vst [vmem:[#allocation161_spill] sm:$0xff] %v8011_v32 }
 0x1e4   : > { %13104 = vst [vmem:[#allocation162_spill] sm:$0xff] %v8013_v46  ;;  %v323_v46 = vld [vmem:[%s12449_s0 + $0x1c8] sm:$0xff] }
 0x1e6   : > { %v8018_v50 = vpop.f32.mrf.mxu0  ;;  %v8020_v55 = vpop.f32.mrf.mxu1 }
 0x1e7   : > { %13105 = vst [vmem:[#allocation163_spill] sm:$0xff] %v8018_v50  ;;  %6755 = vmatmul.msk.f32.gmra.mxu2 %vm405_vm1, %v322_v3  ;;  %6884 = vmatmul.msk.f32.gmra.mxu3 %vm405_vm1, %v322_v3 }
 0x1e8   : > { %13106 = vst [vmem:[#allocation164_spill] sm:$0xff] %v8020_v55 }
 0x1e9   : > { %6497 = vmatmul.msk.f32.gmra.mxu0 %vm405_vm1, %v322_v3  ;;  %6626 = vmatmul.msk.f32.gmra.mxu1 %vm405_vm1, %v322_v3 }
 0x1ea   : > { %v8026_v31 = vpop.f32.mrf.mxu2  ;;  %v8028_v32 = vpop.f32.mrf.mxu3 }
 0x1eb   : > { %13107 = vst [vmem:[#allocation165_spill] sm:$0xff] %v8026_v31 }
 0x1ec   : > { %13108 = vst [vmem:[#allocation166_spill] sm:$0xff] %v8028_v32  ;;  %v324_v32 = vld [vmem:[%s12449_s0 + $0x1d0] sm:$0xff] }
 0x1ee   : > { %v8033_v18 = vpop.f32.mrf.mxu0  ;;  %v8035_v51 = vpop.f32.mrf.mxu1 }
 0x1ef   : > { %13109 = vst [vmem:[#allocation167_spill] sm:$0xff] %v8033_v18  ;;  %6756 = vmatmul.msk.f32.gmra.mxu2 %vm405_vm1, %v323_v46  ;;  %6885 = vmatmul.msk.f32.gmra.mxu3 %vm405_vm1, %v323_v46 }
 0x1f0   : > { %13110 = vst [vmem:[#allocation168_spill] sm:$0xff] %v8035_v51 }
 0x1f1   : > { %6498 = vmatmul.msk.f32.gmra.mxu0 %vm405_vm1, %v323_v46  ;;  %6627 = vmatmul.msk.f32.gmra.mxu1 %vm405_vm1, %v323_v46 }
 0x1f2   : > { %v8041_v3 = vpop.f32.mrf.mxu2  ;;  %v8043_v31 = vpop.f32.mrf.mxu3 }
 0x1f3   : > { %13111 = vst [vmem:[#allocation169_spill] sm:$0xff] %v8041_v3 }
 0x1f4   : > { %13112 = vst [vmem:[#allocation170_spill] sm:$0xff] %v8043_v31  ;;  %v325_v31 = vld [vmem:[%s12449_s0 + $0x1d8] sm:$0xff] }
 0x1f6   : > { %v8048_v60 = vpop.f32.mrf.mxu0  ;;  %v8050_v55 = vpop.f32.mrf.mxu1 }
 0x1f7   : > { %13113 = vst [vmem:[#allocation171_spill] sm:$0xff] %v8048_v60  ;;  %6757 = vmatmul.msk.f32.gmra.mxu2 %vm405_vm1, %v324_v32  ;;  %6886 = vmatmul.msk.f32.gmra.mxu3 %vm405_vm1, %v324_v32 }
 0x1f8   : > { %13114 = vst [vmem:[#allocation172_spill] sm:$0xff] %v8050_v55 }
 0x1f9   : > { %6499 = vmatmul.msk.f32.gmra.mxu0 %vm405_vm1, %v324_v32  ;;  %6628 = vmatmul.msk.f32.gmra.mxu1 %vm405_vm1, %v324_v32 }
 0x1fa   : > { %v8056_v46 = vpop.f32.mrf.mxu2  ;;  %v8058_v3 = vpop.f32.mrf.mxu3 }
 0x1fb   : > { %13115 = vst [vmem:[#allocation173_spill] sm:$0xff] %v8056_v46 }
 0x1fc   : > { %13116 = vst [vmem:[#allocation174_spill] sm:$0xff] %v8058_v3  ;;  %v326_v3 = vld [vmem:[%s12449_s0 + $0x1e0] sm:$0xff] }
 0x1fe   : > { %v8063_v61 = vpop.f32.mrf.mxu0  ;;  %v8065_v1 = vpop.f32.mrf.mxu1 }
 0x1ff   : > { %13117 = vst [vmem:[#allocation175_spill] sm:$0xff] %v8063_v61  ;;  %6758 = vmatmul.msk.f32.gmra.mxu2 %vm405_vm1, %v325_v31  ;;  %6887 = vmatmul.msk.f32.gmra.mxu3 %vm405_vm1, %v325_v31 }
 0x200   : > { %13118 = vst [vmem:[#allocation176_spill] sm:$0xff] %v8065_v1 }
 0x201   : > { %6500 = vmatmul.msk.f32.gmra.mxu0 %vm405_vm1, %v325_v31  ;;  %6629 = vmatmul.msk.f32.gmra.mxu1 %vm405_vm1, %v325_v31 }
 0x202   : > { %v8071_v32 = vpop.f32.mrf.mxu2  ;;  %v8073_v46 = vpop.f32.mrf.mxu3 }
 0x203   : > { %13119 = vst [vmem:[#allocation177_spill] sm:$0xff] %v8071_v32 }
 0x204   : > { %13120 = vst [vmem:[#allocation178_spill] sm:$0xff] %v8073_v46  ;;  %v327_v46 = vld [vmem:[%s12449_s0 + $0x1e8] sm:$0xff] }
 0x206   : > { %v8078_v51 = vpop.f32.mrf.mxu0  ;;  %v8080_v7 = vpop.f32.mrf.mxu1 }
 0x207   : > { %13121 = vst [vmem:[#allocation179_spill] sm:$0xff] %v8078_v51  ;;  %6759 = vmatmul.msk.f32.gmra.mxu2 %vm405_vm1, %v326_v3  ;;  %6888 = vmatmul.msk.f32.gmra.mxu3 %vm405_vm1, %v326_v3 }
 0x208   : > { %13122 = vst [vmem:[#allocation180_spill] sm:$0xff] %v8080_v7 }
 0x209   : > { %6501 = vmatmul.msk.f32.gmra.mxu0 %vm405_vm1, %v326_v3  ;;  %6630 = vmatmul.msk.f32.gmra.mxu1 %vm405_vm1, %v326_v3 }
 0x20a   : > { %v8086_v31 = vpop.f32.mrf.mxu2  ;;  %v8088_v32 = vpop.f32.mrf.mxu3 }
 0x20b   : > { %13123 = vst [vmem:[#allocation181_spill] sm:$0xff] %v8086_v31 }
 0x20c   : > { %13124 = vst [vmem:[#allocation182_spill] sm:$0xff] %v8088_v32  ;;  %v328_v32 = vld [vmem:[%s12449_s0 + $0x1f0] sm:$0xff] }
 0x20e   : > { %v8093_v6 = vpop.f32.mrf.mxu0  ;;  %v8095_v55 = vpop.f32.mrf.mxu1 }
 0x20f   : > { %13125 = vst [vmem:[#allocation183_spill] sm:$0xff] %v8093_v6  ;;  %6760 = vmatmul.msk.f32.gmra.mxu2 %vm405_vm1, %v327_v46  ;;  %6889 = vmatmul.msk.f32.gmra.mxu3 %vm405_vm1, %v327_v46 }
 0x210   : > { %13126 = vst [vmem:[#allocation184_spill] sm:$0xff] %v8095_v55 }
 0x211   : > { %6502 = vmatmul.msk.f32.gmra.mxu0 %vm405_vm1, %v327_v46  ;;  %6631 = vmatmul.msk.f32.gmra.mxu1 %vm405_vm1, %v327_v46 }
 0x212   : > { %v8101_v3 = vpop.f32.mrf.mxu2  ;;  %v8103_v31 = vpop.f32.mrf.mxu3 }
 0x213   : > { %13127 = vst [vmem:[#allocation185_spill] sm:$0xff] %v8101_v3 }
 0x214   : > { %13128 = vst [vmem:[#allocation186_spill] sm:$0xff] %v8103_v31  ;;  %v329_v31 = vld [vmem:[%s12449_s0 + $0x1f8] sm:$0xff] }
 0x216   : > { %v8108_v17 = vpop.f32.mrf.mxu0  ;;  %v8110_v11 = vpop.f32.mrf.mxu1 }
 0x217   : > { %13129 = vst [vmem:[#allocation187_spill] sm:$0xff] %v8108_v17  ;;  %6761 = vmatmul.msk.f32.gmra.mxu2 %vm405_vm1, %v328_v32  ;;  %6890 = vmatmul.msk.f32.gmra.mxu3 %vm405_vm1, %v328_v32 }
 0x218   : > { %13130 = vst [vmem:[#allocation188_spill] sm:$0xff] %v8110_v11 }
 0x219   : > { %6503 = vmatmul.msk.f32.gmra.mxu0 %vm405_vm1, %v328_v32  ;;  %6632 = vmatmul.msk.f32.gmra.mxu1 %vm405_vm1, %v328_v32 }
 0x21a   : > { %v8116_v46 = vpop.f32.mrf.mxu2  ;;  %v8118_v3 = vpop.f32.mrf.mxu3 }
 0x21b   : > { %13131 = vst [vmem:[#allocation189_spill] sm:$0xff] %v8116_v46 }
 0x21c   : > { %13132 = vst [vmem:[#allocation190_spill] sm:$0xff] %v8118_v3  ;;  %v330_v3 = vld [vmem:[%s12449_s0 + $0x200] sm:$0xff] }
 0x21e   : > { %v8123_v1 = vpop.f32.mrf.mxu0  ;;  %v8125_v43 = vpop.f32.mrf.mxu1 }
 0x21f   : > { %13133 = vst [vmem:[#allocation191_spill] sm:$0xff] %v8123_v1  ;;  %6762 = vmatmul.msk.f32.gmra.mxu2 %vm405_vm1, %v329_v31  ;;  %6891 = vmatmul.msk.f32.gmra.mxu3 %vm405_vm1, %v329_v31 }
 0x220   : > { %13134 = vst [vmem:[#allocation192_spill] sm:$0xff] %v8125_v43 }
 0x221   : > { %6504 = vmatmul.msk.f32.gmra.mxu0 %vm405_vm1, %v329_v31  ;;  %6633 = vmatmul.msk.f32.gmra.mxu1 %vm405_vm1, %v329_v31 }
 0x222   : > { %v8131_v32 = vpop.f32.mrf.mxu2  ;;  %v8133_v46 = vpop.f32.mrf.mxu3 }
 0x223   : > { %13135 = vst [vmem:[#allocation193_spill] sm:$0xff] %v8131_v32 }
 0x224   : > { %13136 = vst [vmem:[#allocation194_spill] sm:$0xff] %v8133_v46  ;;  %v331_v46 = vld [vmem:[%s12449_s0 + $0x208] sm:$0xff] }
 0x226   : > { %v8138_v16 = vpop.f32.mrf.mxu0  ;;  %v8140_v7 = vpop.f32.mrf.mxu1 }
 0x227   : > { %13137 = vst [vmem:[#allocation195_spill] sm:$0xff] %v8138_v16  ;;  %6763 = vmatmul.msk.f32.gmra.mxu2 %vm405_vm1, %v330_v3  ;;  %6892 = vmatmul.msk.f32.gmra.mxu3 %vm405_vm1, %v330_v3 }
 0x228   : > { %13138 = vst [vmem:[#allocation196_spill] sm:$0xff] %v8140_v7 }
 0x229   : > { %6505 = vmatmul.msk.f32.gmra.mxu0 %vm405_vm1, %v330_v3  ;;  %6634 = vmatmul.msk.f32.gmra.mxu1 %vm405_vm1, %v330_v3 }
 0x22a   : > { %v8146_v31 = vpop.f32.mrf.mxu2  ;;  %v8148_v32 = vpop.f32.mrf.mxu3 }
 0x22b   : > { %13139 = vst [vmem:[#allocation197_spill] sm:$0xff] %v8146_v31 }
 0x22c   : > { %13140 = vst [vmem:[#allocation198_spill] sm:$0xff] %v8148_v32  ;;  %v332_v32 = vld [vmem:[%s12449_s0 + $0x210] sm:$0xff] }
 0x22e   : > { %v8153_v53 = vpop.f32.mrf.mxu0  ;;  %v8155_v21 = vpop.f32.mrf.mxu1 }
 0x22f   : > { %13141 = vst [vmem:[#allocation199_spill] sm:$0xff] %v8153_v53  ;;  %6764 = vmatmul.msk.f32.gmra.mxu2 %vm405_vm1, %v331_v46  ;;  %6893 = vmatmul.msk.f32.gmra.mxu3 %vm405_vm1, %v331_v46 }
 0x230   : > { %13142 = vst [vmem:[#allocation200_spill] sm:$0xff] %v8155_v21 }
 0x231   : > { %6506 = vmatmul.msk.f32.gmra.mxu0 %vm405_vm1, %v331_v46  ;;  %6635 = vmatmul.msk.f32.gmra.mxu1 %vm405_vm1, %v331_v46 }
 0x232   : > { %v8161_v3 = vpop.f32.mrf.mxu2  ;;  %v8163_v31 = vpop.f32.mrf.mxu3 }
 0x233   : > { %13143 = vst [vmem:[#allocation201_spill] sm:$0xff] %v8161_v3 }
 0x234   : > { %13144 = vst [vmem:[#allocation202_spill] sm:$0xff] %v8163_v31  ;;  %v333_v31 = vld [vmem:[%s12449_s0 + $0x218] sm:$0xff] }
 0x236   : > { %v8168_v7 = vpop.f32.mrf.mxu0  ;;  %v8170_v55 = vpop.f32.mrf.mxu1 }
 0x237   : > { %13145 = vst [vmem:[#allocation203_spill] sm:$0xff] %v8168_v7  ;;  %6765 = vmatmul.msk.f32.gmra.mxu2 %vm405_vm1, %v332_v32  ;;  %6894 = vmatmul.msk.f32.gmra.mxu3 %vm405_vm1, %v332_v32 }
 0x238   : > { %13146 = vst [vmem:[#allocation204_spill] sm:$0xff] %v8170_v55 }
 0x239   : > { %6507 = vmatmul.msk.f32.gmra.mxu0 %vm405_vm1, %v332_v32  ;;  %6636 = vmatmul.msk.f32.gmra.mxu1 %vm405_vm1, %v332_v32 }
 0x23a   : > { %v8176_v46 = vpop.f32.mrf.mxu2  ;;  %v8178_v3 = vpop.f32.mrf.mxu3 }
 0x23b   : > { %13147 = vst [vmem:[#allocation205_spill] sm:$0xff] %v8176_v46 }
 0x23c   : > { %13148 = vst [vmem:[#allocation206_spill] sm:$0xff] %v8178_v3  ;;  %v334_v3 = vld [vmem:[%s12449_s0 + $0x220] sm:$0xff] }
 0x23e   : > { %v8183_v21 = vpop.f32.mrf.mxu0  ;;  %v8185_v62 = vpop.f32.mrf.mxu1 }
 0x23f   : > { %13149 = vst [vmem:[#allocation207_spill] sm:$0xff] %v8183_v21  ;;  %6766 = vmatmul.msk.f32.gmra.mxu2 %vm405_vm1, %v333_v31  ;;  %6895 = vmatmul.msk.f32.gmra.mxu3 %vm405_vm1, %v333_v31 }
 0x240   : > { %13150 = vst [vmem:[#allocation208_spill] sm:$0xff] %v8185_v62 }
 0x241   : > { %6508 = vmatmul.msk.f32.gmra.mxu0 %vm405_vm1, %v333_v31  ;;  %6637 = vmatmul.msk.f32.gmra.mxu1 %vm405_vm1, %v333_v31 }
 0x242   : > { %v8191_v32 = vpop.f32.mrf.mxu2  ;;  %v8193_v46 = vpop.f32.mrf.mxu3 }
 0x243   : > { %13151 = vst [vmem:[#allocation209_spill] sm:$0xff] %v8191_v32 }
 0x244   : > { %13152 = vst [vmem:[#allocation210_spill] sm:$0xff] %v8193_v46  ;;  %v335_v46 = vld [vmem:[%s12449_s0 + $0x228] sm:$0xff] }
 0x246   : > { %v8198_v55 = vpop.f32.mrf.mxu0  ;;  %v8200_v38 = vpop.f32.mrf.mxu1 }
 0x247   : > { %13153 = vst [vmem:[#allocation211_spill] sm:$0xff] %v8198_v55  ;;  %6767 = vmatmul.msk.f32.gmra.mxu2 %vm405_vm1, %v334_v3  ;;  %6896 = vmatmul.msk.f32.gmra.mxu3 %vm405_vm1, %v334_v3 }
 0x248   : > { %13154 = vst [vmem:[#allocation212_spill] sm:$0xff] %v8200_v38 }
 0x249   : > { %6509 = vmatmul.msk.f32.gmra.mxu0 %vm405_vm1, %v334_v3  ;;  %6638 = vmatmul.msk.f32.gmra.mxu1 %vm405_vm1, %v334_v3 }
 0x24a   : > { %v8206_v31 = vpop.f32.mrf.mxu2  ;;  %v8208_v32 = vpop.f32.mrf.mxu3 }
 0x24b   : > { %13155 = vst [vmem:[#allocation213_spill] sm:$0xff] %v8206_v31 }
 0x24c   : > { %13156 = vst [vmem:[#allocation214_spill] sm:$0xff] %v8208_v32  ;;  %v336_v32 = vld [vmem:[%s12449_s0 + $0x230] sm:$0xff] }
 0x24e   : > { %v8213_v62 = vpop.f32.mrf.mxu0  ;;  %v8215_v11 = vpop.f32.mrf.mxu1 }
 0x24f   : > { %13157 = vst [vmem:[#allocation215_spill] sm:$0xff] %v8213_v62  ;;  %6768 = vmatmul.msk.f32.gmra.mxu2 %vm405_vm1, %v335_v46  ;;  %6897 = vmatmul.msk.f32.gmra.mxu3 %vm405_vm1, %v335_v46 }
 0x250   : > { %13158 = vst [vmem:[#allocation216_spill] sm:$0xff] %v8215_v11 }
 0x251   : > { %6510 = vmatmul.msk.f32.gmra.mxu0 %vm405_vm1, %v335_v46  ;;  %6639 = vmatmul.msk.f32.gmra.mxu1 %vm405_vm1, %v335_v46 }
 0x252   : > { %v8221_v3 = vpop.f32.mrf.mxu2  ;;  %v8223_v31 = vpop.f32.mrf.mxu3 }
 0x253   : > { %13159 = vst [vmem:[#allocation217_spill] sm:$0xff] %v8221_v3 }
 0x254   : > { %13160 = vst [vmem:[#allocation218_spill] sm:$0xff] %v8223_v31  ;;  %v337_v31 = vld [vmem:[%s12449_s0 + $0x238] sm:$0xff] }
 0x256   : > { %v8228_v38 = vpop.f32.mrf.mxu0  ;;  %v8230_v13 = vpop.f32.mrf.mxu1 }
 0x257   : > { %13161 = vst [vmem:[#allocation219_spill] sm:$0xff] %v8228_v38  ;;  %6769 = vmatmul.msk.f32.gmra.mxu2 %vm405_vm1, %v336_v32  ;;  %6898 = vmatmul.msk.f32.gmra.mxu3 %vm405_vm1, %v336_v32 }
 0x258   : > { %13162 = vst [vmem:[#allocation220_spill] sm:$0xff] %v8230_v13 }
 0x259   : > { %6511 = vmatmul.msk.f32.gmra.mxu0 %vm405_vm1, %v336_v32  ;;  %6640 = vmatmul.msk.f32.gmra.mxu1 %vm405_vm1, %v336_v32 }
 0x25a   : > { %v8236_v46 = vpop.f32.mrf.mxu2  ;;  %v8238_v3 = vpop.f32.mrf.mxu3 }
 0x25b   : > { %13163 = vst [vmem:[#allocation221_spill] sm:$0xff] %v8236_v46 }
 0x25c   : > { %13164 = vst [vmem:[#allocation222_spill] sm:$0xff] %v8238_v3  ;;  %v338_v3 = vld [vmem:[%s12449_s0 + $0x240] sm:$0xff] }
 0x25e   : > { %v8243_v11 = vpop.f32.mrf.mxu0  ;;  %v8245_v63 = vpop.f32.mrf.mxu1 }
 0x25f   : > { %13165 = vst [vmem:[#allocation223_spill] sm:$0xff] %v8243_v11  ;;  %6770 = vmatmul.msk.f32.gmra.mxu2 %vm405_vm1, %v337_v31  ;;  %6899 = vmatmul.msk.f32.gmra.mxu3 %vm405_vm1, %v337_v31 }
 0x260   : > { %13166 = vst [vmem:[#allocation224_spill] sm:$0xff] %v8245_v63 }
 0x261   : > { %6512 = vmatmul.msk.f32.gmra.mxu0 %vm405_vm1, %v337_v31  ;;  %6641 = vmatmul.msk.f32.gmra.mxu1 %vm405_vm1, %v337_v31 }
 0x262   : > { %v8251_v32 = vpop.f32.mrf.mxu2  ;;  %v8253_v46 = vpop.f32.mrf.mxu3 }
 0x263   : > { %13167 = vst [vmem:[#allocation225_spill] sm:$0xff] %v8251_v32 }
 0x264   : > { %13168 = vst [vmem:[#allocation226_spill] sm:$0xff] %v8253_v46  ;;  %v339_v46 = vld [vmem:[%s12449_s0 + $0x248] sm:$0xff] }
 0x266   : > { %v8258_v13 = vpop.f32.mrf.mxu0  ;;  %v8260_v43 = vpop.f32.mrf.mxu1 }
 0x267   : > { %13169 = vst [vmem:[#allocation227_spill] sm:$0xff] %v8258_v13  ;;  %6771 = vmatmul.msk.f32.gmra.mxu2 %vm405_vm1, %v338_v3  ;;  %6900 = vmatmul.msk.f32.gmra.mxu3 %vm405_vm1, %v338_v3 }
 0x268   : > { %13170 = vst [vmem:[#allocation228_spill] sm:$0xff] %v8260_v43 }
 0x269   : > { %6513 = vmatmul.msk.f32.gmra.mxu0 %vm405_vm1, %v338_v3  ;;  %6642 = vmatmul.msk.f32.gmra.mxu1 %vm405_vm1, %v338_v3 }
 0x26a   : > { %v8266_v31 = vpop.f32.mrf.mxu2  ;;  %v8268_v32 = vpop.f32.mrf.mxu3 }
 0x26b   : > { %13171 = vst [vmem:[#allocation229_spill] sm:$0xff] %v8266_v31 }
 0x26c   : > { %13172 = vst [vmem:[#allocation230_spill] sm:$0xff] %v8268_v32  ;;  %v340_v32 = vld [vmem:[%s12449_s0 + $0x250] sm:$0xff] }
 0x26e   : > { %v8273_v63 = vpop.f32.mrf.mxu0  ;;  %v8275_v28 = vpop.f32.mrf.mxu1 }
 0x26f   : > { %13173 = vst [vmem:[#allocation231_spill] sm:$0xff] %v8273_v63  ;;  %6772 = vmatmul.msk.f32.gmra.mxu2 %vm405_vm1, %v339_v46  ;;  %6901 = vmatmul.msk.f32.gmra.mxu3 %vm405_vm1, %v339_v46 }
 0x270   : > { %13174 = vst [vmem:[#allocation232_spill] sm:$0xff] %v8275_v28 }
 0x271   : > { %6514 = vmatmul.msk.f32.gmra.mxu0 %vm405_vm1, %v339_v46  ;;  %6643 = vmatmul.msk.f32.gmra.mxu1 %vm405_vm1, %v339_v46 }
 0x272   : > { %v8281_v3 = vpop.f32.mrf.mxu2  ;;  %v8283_v31 = vpop.f32.mrf.mxu3 }
 0x273   : > { %13175 = vst [vmem:[#allocation233_spill] sm:$0xff] %v8281_v3 }
 0x274   : > { %13176 = vst [vmem:[#allocation234_spill] sm:$0xff] %v8283_v31  ;;  %v341_v31 = vld [vmem:[%s12449_s0 + $0x258] sm:$0xff] }
 0x276   : > { %v8288_v43 = vpop.f32.mrf.mxu0  ;;  %v8290_v16 = vpop.f32.mrf.mxu1 }
 0x277   : > { %13177 = vst [vmem:[#allocation235_spill] sm:$0xff] %v8288_v43  ;;  %6773 = vmatmul.msk.f32.gmra.mxu2 %vm405_vm1, %v340_v32  ;;  %6902 = vmatmul.msk.f32.gmra.mxu3 %vm405_vm1, %v340_v32 }
 0x278   : > { %13178 = vst [vmem:[#allocation236_spill] sm:$0xff] %v8290_v16 }
 0x279   : > { %6515 = vmatmul.msk.f32.gmra.mxu0 %vm405_vm1, %v340_v32  ;;  %6644 = vmatmul.msk.f32.gmra.mxu1 %vm405_vm1, %v340_v32 }
 0x27a   : > { %v8296_v46 = vpop.f32.mrf.mxu2  ;;  %v8298_v3 = vpop.f32.mrf.mxu3 }
 0x27b   : > { %13179 = vst [vmem:[#allocation237_spill] sm:$0xff] %v8296_v46 }
 0x27c   : > { %13180 = vst [vmem:[#allocation238_spill] sm:$0xff] %v8298_v3  ;;  %v342_v3 = vld [vmem:[%s12449_s0 + $0x260] sm:$0xff] }
 0x27e   : > { %v8303_v28 = vpop.f32.mrf.mxu0  ;;  %v8305_v37 = vpop.f32.mrf.mxu1 }
 0x27f   : > { %13181 = vst [vmem:[#allocation239_spill] sm:$0xff] %v8303_v28  ;;  %6774 = vmatmul.msk.f32.gmra.mxu2 %vm405_vm1, %v341_v31  ;;  %6903 = vmatmul.msk.f32.gmra.mxu3 %vm405_vm1, %v341_v31 }
 0x280   : > { %13182 = vst [vmem:[#allocation240_spill] sm:$0xff] %v8305_v37 }
 0x281   : > { %6516 = vmatmul.msk.f32.gmra.mxu0 %vm405_vm1, %v341_v31  ;;  %6645 = vmatmul.msk.f32.gmra.mxu1 %vm405_vm1, %v341_v31 }
 0x282   : > { %v8311_v32 = vpop.f32.mrf.mxu2  ;;  %v8313_v46 = vpop.f32.mrf.mxu3 }
 0x283   : > { %13183 = vst [vmem:[#allocation241_spill] sm:$0xff] %v8311_v32 }
 0x284   : > { %13184 = vst [vmem:[#allocation242_spill] sm:$0xff] %v8313_v46  ;;  %v343_v46 = vld [vmem:[%s12449_s0 + $0x268] sm:$0xff] }
 0x286   : > { %v8318_v16 = vpop.f32.mrf.mxu0  ;;  %v8320_v30 = vpop.f32.mrf.mxu1 }
 0x287   : > { %13185 = vst [vmem:[#allocation243_spill] sm:$0xff] %v8318_v16  ;;  %6775 = vmatmul.msk.f32.gmra.mxu2 %vm405_vm1, %v342_v3  ;;  %6904 = vmatmul.msk.f32.gmra.mxu3 %vm405_vm1, %v342_v3 }
 0x288   : > { %13186 = vst [vmem:[#allocation244_spill] sm:$0xff] %v8320_v30 }
 0x289   : > { %6517 = vmatmul.msk.f32.gmra.mxu0 %vm405_vm1, %v342_v3  ;;  %6646 = vmatmul.msk.f32.gmra.mxu1 %vm405_vm1, %v342_v3 }
 0x28a   : > { %v8326_v31 = vpop.f32.mrf.mxu2  ;;  %v8328_v32 = vpop.f32.mrf.mxu3 }
 0x28b   : > { %13187 = vst [vmem:[#allocation245_spill] sm:$0xff] %v8326_v31 }
 0x28c   : > { %13188 = vst [vmem:[#allocation246_spill] sm:$0xff] %v8328_v32  ;;  %v344_v32 = vld [vmem:[%s12449_s0 + $0x270] sm:$0xff] }
 0x28e   : > { %v8333_v37 = vpop.f32.mrf.mxu0  ;;  %v8335_v24 = vpop.f32.mrf.mxu1 }
 0x28f   : > { %13189 = vst [vmem:[#allocation247_spill] sm:$0xff] %v8333_v37  ;;  %6776 = vmatmul.msk.f32.gmra.mxu2 %vm405_vm1, %v343_v46  ;;  %6905 = vmatmul.msk.f32.gmra.mxu3 %vm405_vm1, %v343_v46 }
 0x290   : > { %13190 = vst [vmem:[#allocation248_spill] sm:$0xff] %v8335_v24 }
 0x291   : > { %6518 = vmatmul.msk.f32.gmra.mxu0 %vm405_vm1, %v343_v46  ;;  %6647 = vmatmul.msk.f32.gmra.mxu1 %vm405_vm1, %v343_v46 }
 0x292   : > { %v8341_v3 = vpop.f32.mrf.mxu2  ;;  %v8343_v31 = vpop.f32.mrf.mxu3 }
 0x293   : > { %13191 = vst [vmem:[#allocation249_spill] sm:$0xff] %v8341_v3 }
 0x294   : > { %13192 = vst [vmem:[#allocation250_spill] sm:$0xff] %v8343_v31  ;;  %v345_v31 = vld [vmem:[%s12449_s0 + $0x278] sm:$0xff] }
 0x296   : > { %v8348_v30 = vpop.f32.mrf.mxu0  ;;  %v8350_v53 = vpop.f32.mrf.mxu1 }
 0x297   : > { %13193 = vst [vmem:[#allocation251_spill] sm:$0xff] %v8348_v30  ;;  %6777 = vmatmul.msk.f32.gmra.mxu2 %vm405_vm1, %v344_v32  ;;  %6906 = vmatmul.msk.f32.gmra.mxu3 %vm405_vm1, %v344_v32 }
 0x298   : > { %13194 = vst [vmem:[#allocation252_spill] sm:$0xff] %v8350_v53 }
 0x299   : > { %6519 = vmatmul.msk.f32.gmra.mxu0 %vm405_vm1, %v344_v32  ;;  %6648 = vmatmul.msk.f32.gmra.mxu1 %vm405_vm1, %v344_v32 }
 0x29a   : > { %v8356_v46 = vpop.f32.mrf.mxu2  ;;  %v8358_v3 = vpop.f32.mrf.mxu3 }
 0x29b   : > { %13195 = vst [vmem:[#allocation253_spill] sm:$0xff] %v8356_v46 }
 0x29c   : > { %13196 = vst [vmem:[#allocation254_spill] sm:$0xff] %v8358_v3  ;;  %v346_v3 = vld [vmem:[%s12449_s0 + $0x280] sm:$0xff] }
 0x29e   : > { %v8363_v24 = vpop.f32.mrf.mxu0  ;;  %v8365_v57 = vpop.f32.mrf.mxu1 }
 0x29f   : > { %13197 = vst [vmem:[#allocation255_spill] sm:$0xff] %v8363_v24  ;;  %6778 = vmatmul.msk.f32.gmra.mxu2 %vm405_vm1, %v345_v31  ;;  %6907 = vmatmul.msk.f32.gmra.mxu3 %vm405_vm1, %v345_v31 }
 0x2a0   : > { %13198 = vst [vmem:[#allocation256_spill] sm:$0xff] %v8365_v57 }
 0x2a1   : > { %6520 = vmatmul.msk.f32.gmra.mxu0 %vm405_vm1, %v345_v31  ;;  %6649 = vmatmul.msk.f32.gmra.mxu1 %vm405_vm1, %v345_v31 }
 0x2a2   : > { %v8371_v32 = vpop.f32.mrf.mxu2  ;;  %v8373_v46 = vpop.f32.mrf.mxu3 }
 0x2a3   : > { %13199 = vst [vmem:[#allocation257_spill] sm:$0xff] %v8371_v32 }
 0x2a4   : > { %13200 = vst [vmem:[#allocation258_spill] sm:$0xff] %v8373_v46  ;;  %v347_v46 = vld [vmem:[%s12449_s0 + $0x288] sm:$0xff] }
 0x2a6   : > { %v8378_v53 = vpop.f32.mrf.mxu0  ;;  %v8380_v35 = vpop.f32.mrf.mxu1 }
 0x2a7   : > { %13201 = vst [vmem:[#allocation259_spill] sm:$0xff] %v8378_v53  ;;  %6779 = vmatmul.msk.f32.gmra.mxu2 %vm405_vm1, %v346_v3  ;;  %6908 = vmatmul.msk.f32.gmra.mxu3 %vm405_vm1, %v346_v3 }
 0x2a8   : > { %13202 = vst [vmem:[#allocation260_spill] sm:$0xff] %v8380_v35 }
 0x2a9   : > { %6521 = vmatmul.msk.f32.gmra.mxu0 %vm405_vm1, %v346_v3  ;;  %6650 = vmatmul.msk.f32.gmra.mxu1 %vm405_vm1, %v346_v3 }
 0x2aa   : > { %v8386_v31 = vpop.f32.mrf.mxu2  ;;  %v8388_v32 = vpop.f32.mrf.mxu3 }
 0x2ab   : > { %13203 = vst [vmem:[#allocation261_spill] sm:$0xff] %v8386_v31 }
 0x2ac   : > { %13204 = vst [vmem:[#allocation262_spill] sm:$0xff] %v8388_v32  ;;  %v348_v32 = vld [vmem:[%s12449_s0 + $0x290] sm:$0xff] }
 0x2ae   : > { %v8393_v57 = vpop.f32.mrf.mxu0  ;;  %v8395_v53 = vpop.f32.mrf.mxu1 }
 0x2af   : > { %13205 = vst [vmem:[#allocation263_spill] sm:$0xff] %v8393_v57  ;;  %6780 = vmatmul.msk.f32.gmra.mxu2 %vm405_vm1, %v347_v46  ;;  %6909 = vmatmul.msk.f32.gmra.mxu3 %vm405_vm1, %v347_v46 }
 0x2b0   : > { %13206 = vst [vmem:[#allocation264_spill] sm:$0xff] %v8395_v53 }
 0x2b1   : > { %6522 = vmatmul.msk.f32.gmra.mxu0 %vm405_vm1, %v347_v46  ;;  %6651 = vmatmul.msk.f32.gmra.mxu1 %vm405_vm1, %v347_v46 }
 0x2b2   : > { %v8401_v3 = vpop.f32.mrf.mxu2  ;;  %v8403_v31 = vpop.f32.mrf.mxu3 }
 0x2b3   : > { %13207 = vst [vmem:[#allocation265_spill] sm:$0xff] %v8401_v3 }
 0x2b4   : > { %13208 = vst [vmem:[#allocation266_spill] sm:$0xff] %v8403_v31  ;;  %v349_v31 = vld [vmem:[%s12449_s0 + $0x298] sm:$0xff] }
 0x2b6   : > { %v8408_v35 = vpop.f32.mrf.mxu0  ;;  %v8410_v57 = vpop.f32.mrf.mxu1 }
 0x2b7   : > { %13209 = vst [vmem:[#allocation267_spill] sm:$0xff] %v8408_v35  ;;  %6781 = vmatmul.msk.f32.gmra.mxu2 %vm405_vm1, %v348_v32  ;;  %6910 = vmatmul.msk.f32.gmra.mxu3 %vm405_vm1, %v348_v32 }
 0x2b8   : > { %13210 = vst [vmem:[#allocation268_spill] sm:$0xff] %v8410_v57 }
 0x2b9   : > { %6523 = vmatmul.msk.f32.gmra.mxu0 %vm405_vm1, %v348_v32  ;;  %6652 = vmatmul.msk.f32.gmra.mxu1 %vm405_vm1, %v348_v32 }
 0x2ba   : > { %v8416_v46 = vpop.f32.mrf.mxu2  ;;  %v8418_v3 = vpop.f32.mrf.mxu3 }
 0x2bb   : > { %13211 = vst [vmem:[#allocation269_spill] sm:$0xff] %v8416_v46 }
 0x2bc   : > { %13212 = vst [vmem:[#allocation270_spill] sm:$0xff] %v8418_v3  ;;  %v350_v3 = vld [vmem:[%s12449_s0 + $0x2a0] sm:$0xff] }
 0x2be   : > { %v8423_v53 = vpop.f32.mrf.mxu0  ;;  %v8425_v35 = vpop.f32.mrf.mxu1 }
 0x2bf   : > { %13213 = vst [vmem:[#allocation271_spill] sm:$0xff] %v8423_v53  ;;  %6782 = vmatmul.msk.f32.gmra.mxu2 %vm405_vm1, %v349_v31  ;;  %6911 = vmatmul.msk.f32.gmra.mxu3 %vm405_vm1, %v349_v31 }
 0x2c0   : > { %13214 = vst [vmem:[#allocation272_spill] sm:$0xff] %v8425_v35 }
 0x2c1   : > { %6524 = vmatmul.msk.f32.gmra.mxu0 %vm405_vm1, %v349_v31  ;;  %6653 = vmatmul.msk.f32.gmra.mxu1 %vm405_vm1, %v349_v31 }
 0x2c2   : > { %v8431_v32 = vpop.f32.mrf.mxu2  ;;  %v8433_v46 = vpop.f32.mrf.mxu3 }
 0x2c3   : > { %13215 = vst [vmem:[#allocation273_spill] sm:$0xff] %v8431_v32 }
 0x2c4   : > { %13216 = vst [vmem:[#allocation274_spill] sm:$0xff] %v8433_v46  ;;  %v351_v46 = vld [vmem:[%s12449_s0 + $0x2a8] sm:$0xff] }
 0x2c6   : > { %v8438_v57 = vpop.f32.mrf.mxu0  ;;  %v8440_v53 = vpop.f32.mrf.mxu1 }
 0x2c7   : > { %13217 = vst [vmem:[#allocation275_spill] sm:$0xff] %v8438_v57  ;;  %6783 = vmatmul.msk.f32.gmra.mxu2 %vm405_vm1, %v350_v3  ;;  %6912 = vmatmul.msk.f32.gmra.mxu3 %vm405_vm1, %v350_v3 }
 0x2c8   : > { %13218 = vst [vmem:[#allocation276_spill] sm:$0xff] %v8440_v53 }
 0x2c9   : > { %6525 = vmatmul.msk.f32.gmra.mxu0 %vm405_vm1, %v350_v3  ;;  %6654 = vmatmul.msk.f32.gmra.mxu1 %vm405_vm1, %v350_v3 }
 0x2ca   : > { %v8446_v31 = vpop.f32.mrf.mxu2  ;;  %v8448_v32 = vpop.f32.mrf.mxu3 }
 0x2cb   : > { %13219 = vst [vmem:[#allocation277_spill] sm:$0xff] %v8446_v31 }
 0x2cc   : > { %13220 = vst [vmem:[#allocation278_spill] sm:$0xff] %v8448_v32  ;;  %v352_v32 = vld [vmem:[%s12449_s0 + $0x2b0] sm:$0xff] }
 0x2ce   : > { %v8453_v35 = vpop.f32.mrf.mxu0  ;;  %v8455_v57 = vpop.f32.mrf.mxu1 }
 0x2cf   : > { %13221 = vst [vmem:[#allocation279_spill] sm:$0xff] %v8453_v35  ;;  %6784 = vmatmul.msk.f32.gmra.mxu2 %vm405_vm1, %v351_v46  ;;  %6913 = vmatmul.msk.f32.gmra.mxu3 %vm405_vm1, %v351_v46 }
 0x2d0   : > { %13222 = vst [vmem:[#allocation280_spill] sm:$0xff] %v8455_v57 }
 0x2d1   : > { %6526 = vmatmul.msk.f32.gmra.mxu0 %vm405_vm1, %v351_v46  ;;  %6655 = vmatmul.msk.f32.gmra.mxu1 %vm405_vm1, %v351_v46 }
 0x2d2   : > { %v8461_v3 = vpop.f32.mrf.mxu2  ;;  %v8463_v31 = vpop.f32.mrf.mxu3 }
 0x2d3   : > { %13223 = vst [vmem:[#allocation281_spill] sm:$0xff] %v8461_v3 }
 0x2d4   : > { %13224 = vst [vmem:[#allocation282_spill] sm:$0xff] %v8463_v31  ;;  %v353_v31 = vld [vmem:[%s12449_s0 + $0x2b8] sm:$0xff] }
 0x2d6   : > { %v8468_v53 = vpop.f32.mrf.mxu0  ;;  %v8470_v35 = vpop.f32.mrf.mxu1 }
 0x2d7   : > { %13225 = vst [vmem:[#allocation283_spill] sm:$0xff] %v8468_v53  ;;  %6785 = vmatmul.msk.f32.gmra.mxu2 %vm405_vm1, %v352_v32  ;;  %6914 = vmatmul.msk.f32.gmra.mxu3 %vm405_vm1, %v352_v32 }
 0x2d8   : > { %13226 = vst [vmem:[#allocation284_spill] sm:$0xff] %v8470_v35 }
 0x2d9   : > { %6527 = vmatmul.msk.f32.gmra.mxu0 %vm405_vm1, %v352_v32  ;;  %6656 = vmatmul.msk.f32.gmra.mxu1 %vm405_vm1, %v352_v32 }
 0x2da   : > { %v8476_v46 = vpop.f32.mrf.mxu2  ;;  %v8478_v3 = vpop.f32.mrf.mxu3 }
 0x2db   : > { %13227 = vst [vmem:[#allocation285_spill] sm:$0xff] %v8476_v46 }
 0x2dc   : > { %13228 = vst [vmem:[#allocation286_spill] sm:$0xff] %v8478_v3  ;;  %v354_v3 = vld [vmem:[%s12449_s0 + $0x2c0] sm:$0xff] }
 0x2de   : > { %v8483_v57 = vpop.f32.mrf.mxu0  ;;  %v8485_v53 = vpop.f32.mrf.mxu1 }
 0x2df   : > { %13229 = vst [vmem:[#allocation287_spill] sm:$0xff] %v8483_v57  ;;  %6786 = vmatmul.msk.f32.gmra.mxu2 %vm405_vm1, %v353_v31  ;;  %6915 = vmatmul.msk.f32.gmra.mxu3 %vm405_vm1, %v353_v31 }
 0x2e0   : > { %13230 = vst [vmem:[#allocation288_spill] sm:$0xff] %v8485_v53 }
 0x2e1   : > { %6528 = vmatmul.msk.f32.gmra.mxu0 %vm405_vm1, %v353_v31  ;;  %6657 = vmatmul.msk.f32.gmra.mxu1 %vm405_vm1, %v353_v31 }
 0x2e2   : > { %v8491_v32 = vpop.f32.mrf.mxu2  ;;  %v8493_v46 = vpop.f32.mrf.mxu3 }
 0x2e3   : > { %13231 = vst [vmem:[#allocation289_spill] sm:$0xff] %v8491_v32 }
 0x2e4   : > { %13232 = vst [vmem:[#allocation290_spill] sm:$0xff] %v8493_v46  ;;  %v355_v46 = vld [vmem:[%s12449_s0 + $0x2c8] sm:$0xff] }
 0x2e6   : > { %v8498_v35 = vpop.f32.mrf.mxu0  ;;  %v8500_v57 = vpop.f32.mrf.mxu1 }
 0x2e7   : > { %13233 = vst [vmem:[#allocation291_spill] sm:$0xff] %v8498_v35  ;;  %6787 = vmatmul.msk.f32.gmra.mxu2 %vm405_vm1, %v354_v3  ;;  %6916 = vmatmul.msk.f32.gmra.mxu3 %vm405_vm1, %v354_v3 }
 0x2e8   : > { %13234 = vst [vmem:[#allocation292_spill] sm:$0xff] %v8500_v57 }
 0x2e9   : > { %6529 = vmatmul.msk.f32.gmra.mxu0 %vm405_vm1, %v354_v3  ;;  %6658 = vmatmul.msk.f32.gmra.mxu1 %vm405_vm1, %v354_v3 }
 0x2ea   : > { %v8506_v31 = vpop.f32.mrf.mxu2  ;;  %v8508_v32 = vpop.f32.mrf.mxu3 }
 0x2eb   : > { %13235 = vst [vmem:[#allocation293_spill] sm:$0xff] %v8506_v31 }
 0x2ec   : > { %13236 = vst [vmem:[#allocation294_spill] sm:$0xff] %v8508_v32  ;;  %v356_v32 = vld [vmem:[%s12449_s0 + $0x2d0] sm:$0xff] }
 0x2ee   : > { %v8513_v53 = vpop.f32.mrf.mxu0  ;;  %v8515_v35 = vpop.f32.mrf.mxu1 }
 0x2ef   : > { %13237 = vst [vmem:[#allocation295_spill] sm:$0xff] %v8513_v53  ;;  %6788 = vmatmul.msk.f32.gmra.mxu2 %vm405_vm1, %v355_v46  ;;  %6917 = vmatmul.msk.f32.gmra.mxu3 %vm405_vm1, %v355_v46 }
 0x2f0   : > { %13238 = vst [vmem:[#allocation296_spill] sm:$0xff] %v8515_v35 }
 0x2f1   : > { %6530 = vmatmul.msk.f32.gmra.mxu0 %vm405_vm1, %v355_v46  ;;  %6659 = vmatmul.msk.f32.gmra.mxu1 %vm405_vm1, %v355_v46 }
 0x2f2   : > { %v8521_v3 = vpop.f32.mrf.mxu2  ;;  %v8523_v31 = vpop.f32.mrf.mxu3 }
 0x2f3   : > { %13239 = vst [vmem:[#allocation297_spill] sm:$0xff] %v8521_v3 }
 0x2f4   : > { %13240 = vst [vmem:[#allocation298_spill] sm:$0xff] %v8523_v31  ;;  %v357_v31 = vld [vmem:[%s12449_s0 + $0x2d8] sm:$0xff] }
 0x2f6   : > { %v8528_v57 = vpop.f32.mrf.mxu0  ;;  %v8530_v53 = vpop.f32.mrf.mxu1 }
 0x2f7   : > { %13241 = vst [vmem:[#allocation299_spill] sm:$0xff] %v8528_v57  ;;  %6789 = vmatmul.msk.f32.gmra.mxu2 %vm405_vm1, %v356_v32  ;;  %6918 = vmatmul.msk.f32.gmra.mxu3 %vm405_vm1, %v356_v32 }
 0x2f8   : > { %13242 = vst [vmem:[#allocation300_spill] sm:$0xff] %v8530_v53 }
 0x2f9   : > { %6531 = vmatmul.msk.f32.gmra.mxu0 %vm405_vm1, %v356_v32  ;;  %6660 = vmatmul.msk.f32.gmra.mxu1 %vm405_vm1, %v356_v32 }
 0x2fa   : > { %v8536_v46 = vpop.f32.mrf.mxu2  ;;  %v8538_v3 = vpop.f32.mrf.mxu3 }
 0x2fb   : > { %13243 = vst [vmem:[#allocation301_spill] sm:$0xff] %v8536_v46 }
 0x2fc   : > { %13244 = vst [vmem:[#allocation302_spill] sm:$0xff] %v8538_v3  ;;  %v358_v3 = vld [vmem:[%s12449_s0 + $0x2e0] sm:$0xff] }
 0x2fe   : > { %v8543_v35 = vpop.f32.mrf.mxu0  ;;  %v8545_v57 = vpop.f32.mrf.mxu1 }
 0x2ff   : > { %13245 = vst [vmem:[#allocation303_spill] sm:$0xff] %v8543_v35  ;;  %6790 = vmatmul.msk.f32.gmra.mxu2 %vm405_vm1, %v357_v31  ;;  %6919 = vmatmul.msk.f32.gmra.mxu3 %vm405_vm1, %v357_v31 }
 0x300   : > { %13246 = vst [vmem:[#allocation304_spill] sm:$0xff] %v8545_v57 }
 0x301   : > { %6532 = vmatmul.msk.f32.gmra.mxu0 %vm405_vm1, %v357_v31  ;;  %6661 = vmatmul.msk.f32.gmra.mxu1 %vm405_vm1, %v357_v31 }
 0x302   : > { %v8551_v32 = vpop.f32.mrf.mxu2  ;;  %v8553_v46 = vpop.f32.mrf.mxu3 }
 0x303   : > { %13247 = vst [vmem:[#allocation305_spill] sm:$0xff] %v8551_v32 }
 0x304   : > { %13248 = vst [vmem:[#allocation306_spill] sm:$0xff] %v8553_v46  ;;  %v359_v46 = vld [vmem:[%s12449_s0 + $0x2e8] sm:$0xff] }
 0x306   : > { %v8558_v53 = vpop.f32.mrf.mxu0  ;;  %v8560_v35 = vpop.f32.mrf.mxu1 }
 0x307   : > { %13249 = vst [vmem:[#allocation307_spill] sm:$0xff] %v8558_v53  ;;  %6791 = vmatmul.msk.f32.gmra.mxu2 %vm405_vm1, %v358_v3  ;;  %6920 = vmatmul.msk.f32.gmra.mxu3 %vm405_vm1, %v358_v3 }
 0x308   : > { %13250 = vst [vmem:[#allocation308_spill] sm:$0xff] %v8560_v35 }
 0x309   : > { %6533 = vmatmul.msk.f32.gmra.mxu0 %vm405_vm1, %v358_v3  ;;  %6662 = vmatmul.msk.f32.gmra.mxu1 %vm405_vm1, %v358_v3 }
 0x30a   : > { %v8566_v31 = vpop.f32.mrf.mxu2  ;;  %v8568_v32 = vpop.f32.mrf.mxu3 }
 0x30b   : > { %13251 = vst [vmem:[#allocation309_spill] sm:$0xff] %v8566_v31 }
 0x30c   : > { %13252 = vst [vmem:[#allocation310_spill] sm:$0xff] %v8568_v32  ;;  %v360_v32 = vld [vmem:[%s12449_s0 + $0x2f0] sm:$0xff] }
 0x30e   : > { %v8573_v57 = vpop.f32.mrf.mxu0  ;;  %v8575_v53 = vpop.f32.mrf.mxu1 }
 0x30f   : > { %13253 = vst [vmem:[#allocation311_spill] sm:$0xff] %v8573_v57  ;;  %6792 = vmatmul.msk.f32.gmra.mxu2 %vm405_vm1, %v359_v46  ;;  %6921 = vmatmul.msk.f32.gmra.mxu3 %vm405_vm1, %v359_v46 }
 0x310   : > { %13254 = vst [vmem:[#allocation312_spill] sm:$0xff] %v8575_v53 }
 0x311   : > { %6534 = vmatmul.msk.f32.gmra.mxu0 %vm405_vm1, %v359_v46  ;;  %6663 = vmatmul.msk.f32.gmra.mxu1 %vm405_vm1, %v359_v46 }
 0x312   : > { %v8581_v3 = vpop.f32.mrf.mxu2  ;;  %v8583_v31 = vpop.f32.mrf.mxu3 }
 0x313   : > { %13255 = vst [vmem:[#allocation313_spill] sm:$0xff] %v8581_v3 }
 0x314   : > { %13256 = vst [vmem:[#allocation314_spill] sm:$0xff] %v8583_v31  ;;  %v361_v31 = vld [vmem:[%s12449_s0 + $0x2f8] sm:$0xff] }
 0x316   : > { %v8588_v35 = vpop.f32.mrf.mxu0  ;;  %v8590_v57 = vpop.f32.mrf.mxu1 }
 0x317   : > { %13257 = vst [vmem:[#allocation315_spill] sm:$0xff] %v8588_v35  ;;  %6793 = vmatmul.msk.f32.gmra.mxu2 %vm405_vm1, %v360_v32  ;;  %6922 = vmatmul.msk.f32.gmra.mxu3 %vm405_vm1, %v360_v32 }
 0x318   : > { %13258 = vst [vmem:[#allocation316_spill] sm:$0xff] %v8590_v57 }
 0x319   : > { %6535 = vmatmul.msk.f32.gmra.mxu0 %vm405_vm1, %v360_v32  ;;  %6664 = vmatmul.msk.f32.gmra.mxu1 %vm405_vm1, %v360_v32 }
 0x31a   : > { %v8596_v46 = vpop.f32.mrf.mxu2  ;;  %v8598_v3 = vpop.f32.mrf.mxu3 }
 0x31b   : > { %13259 = vst [vmem:[#allocation317_spill] sm:$0xff] %v8596_v46 }
 0x31c   : > { %13260 = vst [vmem:[#allocation318_spill] sm:$0xff] %v8598_v3  ;;  %v362_v3 = vld [vmem:[%s12449_s0 + $0x300] sm:$0xff] }
 0x31e   : > { %v8603_v53 = vpop.f32.mrf.mxu0  ;;  %v8605_v35 = vpop.f32.mrf.mxu1 }
 0x31f   : > { %13261 = vst [vmem:[#allocation319_spill] sm:$0xff] %v8603_v53  ;;  %6794 = vmatmul.msk.f32.gmra.mxu2 %vm405_vm1, %v361_v31  ;;  %6923 = vmatmul.msk.f32.gmra.mxu3 %vm405_vm1, %v361_v31 }
 0x320   : > { %13262 = vst [vmem:[#allocation320_spill] sm:$0xff] %v8605_v35 }
 0x321   : > { %6536 = vmatmul.msk.f32.gmra.mxu0 %vm405_vm1, %v361_v31  ;;  %6665 = vmatmul.msk.f32.gmra.mxu1 %vm405_vm1, %v361_v31 }
 0x322   : > { %v8611_v32 = vpop.f32.mrf.mxu2  ;;  %v8613_v46 = vpop.f32.mrf.mxu3 }
 0x323   : > { %13263 = vst [vmem:[#allocation321_spill] sm:$0xff] %v8611_v32 }
 0x324   : > { %13264 = vst [vmem:[#allocation322_spill] sm:$0xff] %v8613_v46  ;;  %v363_v46 = vld [vmem:[%s12449_s0 + $0x308] sm:$0xff] }
 0x326   : > { %v8618_v57 = vpop.f32.mrf.mxu0  ;;  %v8620_v53 = vpop.f32.mrf.mxu1 }
 0x327   : > { %13265 = vst [vmem:[#allocation323_spill] sm:$0xff] %v8618_v57  ;;  %6795 = vmatmul.msk.f32.gmra.mxu2 %vm405_vm1, %v362_v3  ;;  %6924 = vmatmul.msk.f32.gmra.mxu3 %vm405_vm1, %v362_v3 }
 0x328   : > { %13266 = vst [vmem:[#allocation324_spill] sm:$0xff] %v8620_v53 }
 0x329   : > { %6537 = vmatmul.msk.f32.gmra.mxu0 %vm405_vm1, %v362_v3  ;;  %6666 = vmatmul.msk.f32.gmra.mxu1 %vm405_vm1, %v362_v3 }
 0x32a   : > { %v8626_v31 = vpop.f32.mrf.mxu2  ;;  %v8628_v32 = vpop.f32.mrf.mxu3 }
 0x32b   : > { %13267 = vst [vmem:[#allocation325_spill] sm:$0xff] %v8626_v31 }
 0x32c   : > { %13268 = vst [vmem:[#allocation326_spill] sm:$0xff] %v8628_v32  ;;  %v364_v32 = vld [vmem:[%s12449_s0 + $0x310] sm:$0xff] }
 0x32e   : > { %v8633_v35 = vpop.f32.mrf.mxu0  ;;  %v8635_v57 = vpop.f32.mrf.mxu1 }
 0x32f   : > { %13269 = vst [vmem:[#allocation327_spill] sm:$0xff] %v8633_v35  ;;  %6796 = vmatmul.msk.f32.gmra.mxu2 %vm405_vm1, %v363_v46  ;;  %6925 = vmatmul.msk.f32.gmra.mxu3 %vm405_vm1, %v363_v46 }
 0x330   : > { %13270 = vst [vmem:[#allocation328_spill] sm:$0xff] %v8635_v57 }
 0x331   : > { %6538 = vmatmul.msk.f32.gmra.mxu0 %vm405_vm1, %v363_v46  ;;  %6667 = vmatmul.msk.f32.gmra.mxu1 %vm405_vm1, %v363_v46 }
 0x332   : > { %v8641_v3 = vpop.f32.mrf.mxu2  ;;  %v8643_v31 = vpop.f32.mrf.mxu3 }
 0x333   : > { %13271 = vst [vmem:[#allocation329_spill] sm:$0xff] %v8641_v3 }
 0x334   : > { %13272 = vst [vmem:[#allocation330_spill] sm:$0xff] %v8643_v31  ;;  %v365_v31 = vld [vmem:[%s12449_s0 + $0x318] sm:$0xff] }
 0x336   : > { %v8648_v53 = vpop.f32.mrf.mxu0  ;;  %v8650_v35 = vpop.f32.mrf.mxu1 }
 0x337   : > { %13273 = vst [vmem:[#allocation331_spill] sm:$0xff] %v8648_v53  ;;  %6797 = vmatmul.msk.f32.gmra.mxu2 %vm405_vm1, %v364_v32  ;;  %6926 = vmatmul.msk.f32.gmra.mxu3 %vm405_vm1, %v364_v32 }
 0x338   : > { %13274 = vst [vmem:[#allocation332_spill] sm:$0xff] %v8650_v35 }
 0x339   : > { %6539 = vmatmul.msk.f32.gmra.mxu0 %vm405_vm1, %v364_v32  ;;  %6668 = vmatmul.msk.f32.gmra.mxu1 %vm405_vm1, %v364_v32 }
 0x33a   : > { %v8656_v46 = vpop.f32.mrf.mxu2  ;;  %v8658_v3 = vpop.f32.mrf.mxu3 }
 0x33b   : > { %13275 = vst [vmem:[#allocation333_spill] sm:$0xff] %v8656_v46 }
 0x33c   : > { %13276 = vst [vmem:[#allocation334_spill] sm:$0xff] %v8658_v3  ;;  %v366_v3 = vld [vmem:[%s12449_s0 + $0x320] sm:$0xff] }
 0x33e   : > { %v8663_v57 = vpop.f32.mrf.mxu0  ;;  %v8665_v53 = vpop.f32.mrf.mxu1 }
 0x33f   : > { %13277 = vst [vmem:[#allocation335_spill] sm:$0xff] %v8663_v57  ;;  %6798 = vmatmul.msk.f32.gmra.mxu2 %vm405_vm1, %v365_v31  ;;  %6927 = vmatmul.msk.f32.gmra.mxu3 %vm405_vm1, %v365_v31 }
 0x340   : > { %13278 = vst [vmem:[#allocation336_spill] sm:$0xff] %v8665_v53 }
 0x341   : > { %6540 = vmatmul.msk.f32.gmra.mxu0 %vm405_vm1, %v365_v31  ;;  %6669 = vmatmul.msk.f32.gmra.mxu1 %vm405_vm1, %v365_v31 }
 0x342   : > { %v8671_v32 = vpop.f32.mrf.mxu2  ;;  %v8673_v46 = vpop.f32.mrf.mxu3 }
 0x343   : > { %13279 = vst [vmem:[#allocation337_spill] sm:$0xff] %v8671_v32 }
 0x344   : > { %13280 = vst [vmem:[#allocation338_spill] sm:$0xff] %v8673_v46  ;;  %v367_v46 = vld [vmem:[%s12449_s0 + $0x328] sm:$0xff] }
 0x346   : > { %v8678_v35 = vpop.f32.mrf.mxu0  ;;  %v8680_v57 = vpop.f32.mrf.mxu1 }
 0x347   : > { %13281 = vst [vmem:[#allocation339_spill] sm:$0xff] %v8678_v35  ;;  %6799 = vmatmul.msk.f32.gmra.mxu2 %vm405_vm1, %v366_v3  ;;  %6928 = vmatmul.msk.f32.gmra.mxu3 %vm405_vm1, %v366_v3 }
 0x348   : > { %13282 = vst [vmem:[#allocation340_spill] sm:$0xff] %v8680_v57 }
 0x349   : > { %6541 = vmatmul.msk.f32.gmra.mxu0 %vm405_vm1, %v366_v3  ;;  %6670 = vmatmul.msk.f32.gmra.mxu1 %vm405_vm1, %v366_v3 }
 0x34a   : > { %v8686_v31 = vpop.f32.mrf.mxu2  ;;  %v8688_v32 = vpop.f32.mrf.mxu3 }
 0x34b   : > { %13283 = vst [vmem:[#allocation341_spill] sm:$0xff] %v8686_v31 }
 0x34c   : > { %13284 = vst [vmem:[#allocation342_spill] sm:$0xff] %v8688_v32  ;;  %v368_v32 = vld [vmem:[%s12449_s0 + $0x330] sm:$0xff] }
 0x34e   : > { %v8693_v53 = vpop.f32.mrf.mxu0  ;;  %v8695_v35 = vpop.f32.mrf.mxu1 }
 0x34f   : > { %13285 = vst [vmem:[#allocation343_spill] sm:$0xff] %v8693_v53  ;;  %6800 = vmatmul.msk.f32.gmra.mxu2 %vm405_vm1, %v367_v46  ;;  %6929 = vmatmul.msk.f32.gmra.mxu3 %vm405_vm1, %v367_v46 }
 0x350   : > { %13286 = vst [vmem:[#allocation344_spill] sm:$0xff] %v8695_v35 }
 0x351   : > { %6542 = vmatmul.msk.f32.gmra.mxu0 %vm405_vm1, %v367_v46  ;;  %6671 = vmatmul.msk.f32.gmra.mxu1 %vm405_vm1, %v367_v46 }
 0x352   : > { %v8701_v3 = vpop.f32.mrf.mxu2  ;;  %v8703_v31 = vpop.f32.mrf.mxu3 }
 0x353   : > { %13287 = vst [vmem:[#allocation345_spill] sm:$0xff] %v8701_v3 }
 0x354   : > { %13288 = vst [vmem:[#allocation346_spill] sm:$0xff] %v8703_v31  ;;  %v369_v31 = vld [vmem:[%s12449_s0 + $0x338] sm:$0xff] }
 0x356   : > { %v8708_v57 = vpop.f32.mrf.mxu0  ;;  %v8710_v53 = vpop.f32.mrf.mxu1 }
 0x357   : > { %13289 = vst [vmem:[#allocation347_spill] sm:$0xff] %v8708_v57  ;;  %6801 = vmatmul.msk.f32.gmra.mxu2 %vm405_vm1, %v368_v32  ;;  %6930 = vmatmul.msk.f32.gmra.mxu3 %vm405_vm1, %v368_v32 }
 0x358   : > { %13290 = vst [vmem:[#allocation348_spill] sm:$0xff] %v8710_v53 }
 0x359   : > { %6543 = vmatmul.msk.f32.gmra.mxu0 %vm405_vm1, %v368_v32  ;;  %6672 = vmatmul.msk.f32.gmra.mxu1 %vm405_vm1, %v368_v32 }
 0x35a   : > { %v8716_v46 = vpop.f32.mrf.mxu2  ;;  %v8718_v3 = vpop.f32.mrf.mxu3 }
 0x35b   : > { %13291 = vst [vmem:[#allocation349_spill] sm:$0xff] %v8716_v46 }
 0x35c   : > { %13292 = vst [vmem:[#allocation350_spill] sm:$0xff] %v8718_v3  ;;  %v370_v3 = vld [vmem:[%s12449_s0 + $0x340] sm:$0xff] }
 0x35e   : > { %v8723_v35 = vpop.f32.mrf.mxu0  ;;  %v8725_v57 = vpop.f32.mrf.mxu1 }
 0x35f   : > { %13293 = vst [vmem:[#allocation351_spill] sm:$0xff] %v8723_v35  ;;  %6802 = vmatmul.msk.f32.gmra.mxu2 %vm405_vm1, %v369_v31  ;;  %6931 = vmatmul.msk.f32.gmra.mxu3 %vm405_vm1, %v369_v31 }
 0x360   : > { %13294 = vst [vmem:[#allocation352_spill] sm:$0xff] %v8725_v57 }
 0x361   : > { %6544 = vmatmul.msk.f32.gmra.mxu0 %vm405_vm1, %v369_v31  ;;  %6673 = vmatmul.msk.f32.gmra.mxu1 %vm405_vm1, %v369_v31 }
 0x362   : > { %v8731_v32 = vpop.f32.mrf.mxu2  ;;  %v8733_v46 = vpop.f32.mrf.mxu3 }
 0x363   : > { %13295 = vst [vmem:[#allocation353_spill] sm:$0xff] %v8731_v32 }
 0x364   : > { %13296 = vst [vmem:[#allocation354_spill] sm:$0xff] %v8733_v46  ;;  %v371_v46 = vld [vmem:[%s12449_s0 + $0x348] sm:$0xff] }
 0x366   : > { %v8738_v53 = vpop.f32.mrf.mxu0  ;;  %v8740_v35 = vpop.f32.mrf.mxu1 }
 0x367   : > { %13297 = vst [vmem:[#allocation355_spill] sm:$0xff] %v8738_v53  ;;  %6803 = vmatmul.msk.f32.gmra.mxu2 %vm405_vm1, %v370_v3  ;;  %6932 = vmatmul.msk.f32.gmra.mxu3 %vm405_vm1, %v370_v3 }
 0x368   : > { %13298 = vst [vmem:[#allocation356_spill] sm:$0xff] %v8740_v35 }
 0x369   : > { %6545 = vmatmul.msk.f32.gmra.mxu0 %vm405_vm1, %v370_v3  ;;  %6674 = vmatmul.msk.f32.gmra.mxu1 %vm405_vm1, %v370_v3 }
 0x36a   : > { %v8746_v31 = vpop.f32.mrf.mxu2  ;;  %v8748_v32 = vpop.f32.mrf.mxu3 }
 0x36b   : > { %13299 = vst [vmem:[#allocation357_spill] sm:$0xff] %v8746_v31 }
 0x36c   : > { %13300 = vst [vmem:[#allocation358_spill] sm:$0xff] %v8748_v32  ;;  %v372_v32 = vld [vmem:[%s12449_s0 + $0x350] sm:$0xff] }
 0x36e   : > { %v8753_v57 = vpop.f32.mrf.mxu0  ;;  %v8755_v53 = vpop.f32.mrf.mxu1 }
 0x36f   : > { %13301 = vst [vmem:[#allocation359_spill] sm:$0xff] %v8753_v57  ;;  %6804 = vmatmul.msk.f32.gmra.mxu2 %vm405_vm1, %v371_v46  ;;  %6933 = vmatmul.msk.f32.gmra.mxu3 %vm405_vm1, %v371_v46 }
 0x370   : > { %13302 = vst [vmem:[#allocation360_spill] sm:$0xff] %v8755_v53 }
 0x371   : > { %6546 = vmatmul.msk.f32.gmra.mxu0 %vm405_vm1, %v371_v46  ;;  %6675 = vmatmul.msk.f32.gmra.mxu1 %vm405_vm1, %v371_v46 }
 0x372   : > { %v8761_v3 = vpop.f32.mrf.mxu2  ;;  %v8763_v31 = vpop.f32.mrf.mxu3 }
 0x373   : > { %13303 = vst [vmem:[#allocation361_spill] sm:$0xff] %v8761_v3 }
 0x374   : > { %13304 = vst [vmem:[#allocation362_spill] sm:$0xff] %v8763_v31  ;;  %v373_v31 = vld [vmem:[%s12449_s0 + $0x358] sm:$0xff] }
 0x376   : > { %v8768_v35 = vpop.f32.mrf.mxu0  ;;  %v8770_v57 = vpop.f32.mrf.mxu1 }
 0x377   : > { %13305 = vst [vmem:[#allocation363_spill] sm:$0xff] %v8768_v35  ;;  %6805 = vmatmul.msk.f32.gmra.mxu2 %vm405_vm1, %v372_v32  ;;  %6934 = vmatmul.msk.f32.gmra.mxu3 %vm405_vm1, %v372_v32 }
 0x378   : > { %13306 = vst [vmem:[#allocation364_spill] sm:$0xff] %v8770_v57 }
 0x379   : > { %6547 = vmatmul.msk.f32.gmra.mxu0 %vm405_vm1, %v372_v32  ;;  %6676 = vmatmul.msk.f32.gmra.mxu1 %vm405_vm1, %v372_v32 }
 0x37a   : > { %v8776_v46 = vpop.f32.mrf.mxu2  ;;  %v8778_v3 = vpop.f32.mrf.mxu3 }
 0x37b   : > { %13307 = vst [vmem:[#allocation365_spill] sm:$0xff] %v8776_v46 }
 0x37c   : > { %13308 = vst [vmem:[#allocation366_spill] sm:$0xff] %v8778_v3  ;;  %v374_v3 = vld [vmem:[%s12449_s0 + $0x360] sm:$0xff] }
 0x37e   : > { %v8783_v53 = vpop.f32.mrf.mxu0  ;;  %v8785_v35 = vpop.f32.mrf.mxu1 }
 0x37f   : > { %13309 = vst [vmem:[#allocation367_spill] sm:$0xff] %v8783_v53  ;;  %6806 = vmatmul.msk.f32.gmra.mxu2 %vm405_vm1, %v373_v31  ;;  %6935 = vmatmul.msk.f32.gmra.mxu3 %vm405_vm1, %v373_v31 }
 0x380   : > { %13310 = vst [vmem:[#allocation368_spill] sm:$0xff] %v8785_v35 }
 0x381   : > { %6548 = vmatmul.msk.f32.gmra.mxu0 %vm405_vm1, %v373_v31  ;;  %6677 = vmatmul.msk.f32.gmra.mxu1 %vm405_vm1, %v373_v31 }
 0x382   : > { %v8791_v32 = vpop.f32.mrf.mxu2  ;;  %v8793_v46 = vpop.f32.mrf.mxu3 }
 0x383   : > { %13311 = vst [vmem:[#allocation369_spill] sm:$0xff] %v8791_v32 }
 0x384   : > { %13312 = vst [vmem:[#allocation370_spill] sm:$0xff] %v8793_v46  ;;  %v375_v46 = vld [vmem:[%s12449_s0 + $0x368] sm:$0xff] }
 0x386   : > { %v8798_v57 = vpop.f32.mrf.mxu0  ;;  %v8800_v53 = vpop.f32.mrf.mxu1 }
 0x387   : > { %13313 = vst [vmem:[#allocation371_spill] sm:$0xff] %v8798_v57  ;;  %6807 = vmatmul.msk.f32.gmra.mxu2 %vm405_vm1, %v374_v3  ;;  %6936 = vmatmul.msk.f32.gmra.mxu3 %vm405_vm1, %v374_v3 }
 0x388   : > { %13314 = vst [vmem:[#allocation372_spill] sm:$0xff] %v8800_v53 }
 0x389   : > { %6549 = vmatmul.msk.f32.gmra.mxu0 %vm405_vm1, %v374_v3  ;;  %6678 = vmatmul.msk.f32.gmra.mxu1 %vm405_vm1, %v374_v3 }
 0x38a   : > { %v8806_v31 = vpop.f32.mrf.mxu2  ;;  %v8808_v32 = vpop.f32.mrf.mxu3 }
 0x38b   : > { %13315 = vst [vmem:[#allocation373_spill] sm:$0xff] %v8806_v31 }
 0x38c   : > { %13316 = vst [vmem:[#allocation374_spill] sm:$0xff] %v8808_v32  ;;  %v376_v32 = vld [vmem:[%s12449_s0 + $0x370] sm:$0xff] }
 0x38e   : > { %v8813_v35 = vpop.f32.mrf.mxu0  ;;  %v8815_v57 = vpop.f32.mrf.mxu1 }
 0x38f   : > { %13317 = vst [vmem:[#allocation375_spill] sm:$0xff] %v8813_v35  ;;  %6808 = vmatmul.msk.f32.gmra.mxu2 %vm405_vm1, %v375_v46  ;;  %6937 = vmatmul.msk.f32.gmra.mxu3 %vm405_vm1, %v375_v46 }
 0x390   : > { %13318 = vst [vmem:[#allocation376_spill] sm:$0xff] %v8815_v57 }
 0x391   : > { %6550 = vmatmul.msk.f32.gmra.mxu0 %vm405_vm1, %v375_v46  ;;  %6679 = vmatmul.msk.f32.gmra.mxu1 %vm405_vm1, %v375_v46 }
 0x392   : > { %v8821_v3 = vpop.f32.mrf.mxu2  ;;  %v8823_v31 = vpop.f32.mrf.mxu3 }
 0x393   : > { %13319 = vst [vmem:[#allocation377_spill] sm:$0xff] %v8821_v3 }
 0x394   : > { %13320 = vst [vmem:[#allocation378_spill] sm:$0xff] %v8823_v31  ;;  %v377_v31 = vld [vmem:[%s12449_s0 + $0x378] sm:$0xff] }
 0x396   : > { %v8828_v53 = vpop.f32.mrf.mxu0  ;;  %v8830_v35 = vpop.f32.mrf.mxu1 }
 0x397   : > { %13321 = vst [vmem:[#allocation379_spill] sm:$0xff] %v8828_v53  ;;  %6809 = vmatmul.msk.f32.gmra.mxu2 %vm405_vm1, %v376_v32  ;;  %6938 = vmatmul.msk.f32.gmra.mxu3 %vm405_vm1, %v376_v32 }
 0x398   : > { %13322 = vst [vmem:[#allocation380_spill] sm:$0xff] %v8830_v35 }
 0x399   : > { %6551 = vmatmul.msk.f32.gmra.mxu0 %vm405_vm1, %v376_v32  ;;  %6680 = vmatmul.msk.f32.gmra.mxu1 %vm405_vm1, %v376_v32 }
 0x39a   : > { %v8836_v46 = vpop.f32.mrf.mxu2  ;;  %v8838_v3 = vpop.f32.mrf.mxu3 }
 0x39b   : > { %13323 = vst [vmem:[#allocation381_spill] sm:$0xff] %v8836_v46 }
 0x39c   : > { %13324 = vst [vmem:[#allocation382_spill] sm:$0xff] %v8838_v3  ;;  %v378_v3 = vld [vmem:[%s12449_s0 + $0x380] sm:$0xff] }
 0x39e   : > { %v8843_v57 = vpop.f32.mrf.mxu0  ;;  %v8845_v53 = vpop.f32.mrf.mxu1 }
 0x39f   : > { %13325 = vst [vmem:[#allocation383_spill] sm:$0xff] %v8843_v57  ;;  %6810 = vmatmul.msk.f32.gmra.mxu2 %vm405_vm1, %v377_v31  ;;  %6939 = vmatmul.msk.f32.gmra.mxu3 %vm405_vm1, %v377_v31 }
 0x3a0   : > { %13326 = vst [vmem:[#allocation384_spill] sm:$0xff] %v8845_v53 }
 0x3a1   : > { %6552 = vmatmul.msk.f32.gmra.mxu0 %vm405_vm1, %v377_v31  ;;  %6681 = vmatmul.msk.f32.gmra.mxu1 %vm405_vm1, %v377_v31 }
 0x3a2   : > { %v8851_v32 = vpop.f32.mrf.mxu2  ;;  %v8853_v46 = vpop.f32.mrf.mxu3 }
 0x3a3   : > { %13327 = vst [vmem:[#allocation385_spill] sm:$0xff] %v8851_v32 }
 0x3a4   : > { %13328 = vst [vmem:[#allocation386_spill] sm:$0xff] %v8853_v46  ;;  %v379_v46 = vld [vmem:[%s12449_s0 + $0x388] sm:$0xff] }
 0x3a6   : > { %v8858_v35 = vpop.f32.mrf.mxu0  ;;  %v8860_v57 = vpop.f32.mrf.mxu1 }
 0x3a7   : > { %13329 = vst [vmem:[#allocation387_spill] sm:$0xff] %v8858_v35  ;;  %6811 = vmatmul.msk.f32.gmra.mxu2 %vm405_vm1, %v378_v3  ;;  %6940 = vmatmul.msk.f32.gmra.mxu3 %vm405_vm1, %v378_v3 }
 0x3a8   : > { %13330 = vst [vmem:[#allocation388_spill] sm:$0xff] %v8860_v57 }
 0x3a9   : > { %6553 = vmatmul.msk.f32.gmra.mxu0 %vm405_vm1, %v378_v3  ;;  %6682 = vmatmul.msk.f32.gmra.mxu1 %vm405_vm1, %v378_v3 }
 0x3aa   : > { %v8866_v31 = vpop.f32.mrf.mxu2  ;;  %v8868_v32 = vpop.f32.mrf.mxu3 }
 0x3ab   : > { %13331 = vst [vmem:[#allocation389_spill] sm:$0xff] %v8866_v31 }
 0x3ac   : > { %13332 = vst [vmem:[#allocation390_spill] sm:$0xff] %v8868_v32  ;;  %v380_v32 = vld [vmem:[%s12449_s0 + $0x390] sm:$0xff] }
 0x3ae   : > { %v8873_v53 = vpop.f32.mrf.mxu0  ;;  %v8875_v35 = vpop.f32.mrf.mxu1 }
 0x3af   : > { %13333 = vst [vmem:[#allocation391_spill] sm:$0xff] %v8873_v53  ;;  %6812 = vmatmul.msk.f32.gmra.mxu2 %vm405_vm1, %v379_v46  ;;  %6941 = vmatmul.msk.f32.gmra.mxu3 %vm405_vm1, %v379_v46 }
 0x3b0   : > { %13334 = vst [vmem:[#allocation392_spill] sm:$0xff] %v8875_v35 }
 0x3b1   : > { %6554 = vmatmul.msk.f32.gmra.mxu0 %vm405_vm1, %v379_v46  ;;  %6683 = vmatmul.msk.f32.gmra.mxu1 %vm405_vm1, %v379_v46 }
 0x3b2   : > { %v8881_v3 = vpop.f32.mrf.mxu2  ;;  %v8883_v31 = vpop.f32.mrf.mxu3 }
 0x3b3   : > { %13335 = vst [vmem:[#allocation393_spill] sm:$0xff] %v8881_v3 }
 0x3b4   : > { %13336 = vst [vmem:[#allocation394_spill] sm:$0xff] %v8883_v31  ;;  %v381_v31 = vld [vmem:[%s12449_s0 + $0x398] sm:$0xff] }
 0x3b6   : > { %v8888_v57 = vpop.f32.mrf.mxu0  ;;  %v8890_v53 = vpop.f32.mrf.mxu1 }
 0x3b7   : > { %13337 = vst [vmem:[#allocation395_spill] sm:$0xff] %v8888_v57  ;;  %6813 = vmatmul.msk.f32.gmra.mxu2 %vm405_vm1, %v380_v32  ;;  %6942 = vmatmul.msk.f32.gmra.mxu3 %vm405_vm1, %v380_v32 }
 0x3b8   : > { %13338 = vst [vmem:[#allocation396_spill] sm:$0xff] %v8890_v53 }
 0x3b9   : > { %6555 = vmatmul.msk.f32.gmra.mxu0 %vm405_vm1, %v380_v32  ;;  %6684 = vmatmul.msk.f32.gmra.mxu1 %vm405_vm1, %v380_v32 }
 0x3ba   : > { %v8896_v46 = vpop.f32.mrf.mxu2  ;;  %v8898_v3 = vpop.f32.mrf.mxu3 }
 0x3bb   : > { %13339 = vst [vmem:[#allocation397_spill] sm:$0xff] %v8896_v46 }
 0x3bc   : > { %13340 = vst [vmem:[#allocation398_spill] sm:$0xff] %v8898_v3  ;;  %v382_v3 = vld [vmem:[%s12449_s0 + $0x3a0] sm:$0xff] }
 0x3be   : > { %v8903_v35 = vpop.f32.mrf.mxu0  ;;  %v8905_v57 = vpop.f32.mrf.mxu1 }
 0x3bf   : > { %13341 = vst [vmem:[#allocation399_spill] sm:$0xff] %v8903_v35  ;;  %6814 = vmatmul.msk.f32.gmra.mxu2 %vm405_vm1, %v381_v31  ;;  %6943 = vmatmul.msk.f32.gmra.mxu3 %vm405_vm1, %v381_v31 }
 0x3c0   : > { %13342 = vst [vmem:[#allocation400_spill] sm:$0xff] %v8905_v57 }
 0x3c1   : > { %6556 = vmatmul.msk.f32.gmra.mxu0 %vm405_vm1, %v381_v31  ;;  %6685 = vmatmul.msk.f32.gmra.mxu1 %vm405_vm1, %v381_v31 }
 0x3c2   : > { %v8911_v32 = vpop.f32.mrf.mxu2  ;;  %v8913_v46 = vpop.f32.mrf.mxu3 }
 0x3c3   : > { %13343 = vst [vmem:[#allocation401_spill] sm:$0xff] %v8911_v32 }
 0x3c4   : > { %13344 = vst [vmem:[#allocation402_spill] sm:$0xff] %v8913_v46  ;;  %v383_v46 = vld [vmem:[%s12449_s0 + $0x3a8] sm:$0xff] }
 0x3c6   : > { %v8918_v53 = vpop.f32.mrf.mxu0  ;;  %v8920_v35 = vpop.f32.mrf.mxu1 }
 0x3c7   : > { %13345 = vst [vmem:[#allocation403_spill] sm:$0xff] %v8918_v53  ;;  %6815 = vmatmul.msk.f32.gmra.mxu2 %vm405_vm1, %v382_v3  ;;  %6944 = vmatmul.msk.f32.gmra.mxu3 %vm405_vm1, %v382_v3 }
 0x3c8   : > { %13346 = vst [vmem:[#allocation404_spill] sm:$0xff] %v8920_v35 }
 0x3c9   : > { %6557 = vmatmul.msk.f32.gmra.mxu0 %vm405_vm1, %v382_v3  ;;  %6686 = vmatmul.msk.f32.gmra.mxu1 %vm405_vm1, %v382_v3 }
 0x3ca   : > { %v8926_v31 = vpop.f32.mrf.mxu2  ;;  %v8928_v32 = vpop.f32.mrf.mxu3 }
 0x3cb   : > { %13347 = vst [vmem:[#allocation405_spill] sm:$0xff] %v8926_v31 }
 0x3cc   : > { %13348 = vst [vmem:[#allocation406_spill] sm:$0xff] %v8928_v32  ;;  %v384_v32 = vld [vmem:[%s12449_s0 + $0x3b0] sm:$0xff] }
 0x3ce   : > { %v8933_v57 = vpop.f32.mrf.mxu0  ;;  %v8935_v53 = vpop.f32.mrf.mxu1 }
 0x3cf   : > { %13349 = vst [vmem:[#allocation407_spill] sm:$0xff] %v8933_v57  ;;  %6816 = vmatmul.msk.f32.gmra.mxu2 %vm405_vm1, %v383_v46  ;;  %6945 = vmatmul.msk.f32.gmra.mxu3 %vm405_vm1, %v383_v46 }
 0x3d0   : > { %13350 = vst [vmem:[#allocation408_spill] sm:$0xff] %v8935_v53 }
 0x3d1   : > { %6558 = vmatmul.msk.f32.gmra.mxu0 %vm405_vm1, %v383_v46  ;;  %6687 = vmatmul.msk.f32.gmra.mxu1 %vm405_vm1, %v383_v46 }
 0x3d2   : > { %v8941_v3 = vpop.f32.mrf.mxu2  ;;  %v8943_v31 = vpop.f32.mrf.mxu3 }
 0x3d3   : > { %13351 = vst [vmem:[#allocation409_spill] sm:$0xff] %v8941_v3 }
 0x3d4   : > { %13352 = vst [vmem:[#allocation410_spill] sm:$0xff] %v8943_v31  ;;  %v385_v31 = vld [vmem:[%s12449_s0 + $0x3b8] sm:$0xff] }
 0x3d6   : > { %v8948_v35 = vpop.f32.mrf.mxu0  ;;  %v8950_v57 = vpop.f32.mrf.mxu1 }
 0x3d7   : > { %13353 = vst [vmem:[#allocation411_spill] sm:$0xff] %v8948_v35  ;;  %6817 = vmatmul.msk.f32.gmra.mxu2 %vm405_vm1, %v384_v32  ;;  %6946 = vmatmul.msk.f32.gmra.mxu3 %vm405_vm1, %v384_v32 }
 0x3d8   : > { %13354 = vst [vmem:[#allocation412_spill] sm:$0xff] %v8950_v57 }
 0x3d9   : > { %6559 = vmatmul.msk.f32.gmra.mxu0 %vm405_vm1, %v384_v32  ;;  %6688 = vmatmul.msk.f32.gmra.mxu1 %vm405_vm1, %v384_v32 }
 0x3da   : > { %v8956_v46 = vpop.f32.mrf.mxu2  ;;  %v8958_v3 = vpop.f32.mrf.mxu3 }
 0x3db   : > { %13355 = vst [vmem:[#allocation413_spill] sm:$0xff] %v8956_v46 }
 0x3dc   : > { %13356 = vst [vmem:[#allocation414_spill] sm:$0xff] %v8958_v3  ;;  %v386_v3 = vld [vmem:[%s12449_s0 + $0x3c0] sm:$0xff] }
 0x3de   : > { %v8963_v53 = vpop.f32.mrf.mxu0  ;;  %v8965_v35 = vpop.f32.mrf.mxu1 }
 0x3df   : > { %13357 = vst [vmem:[#allocation415_spill] sm:$0xff] %v8963_v53  ;;  %6818 = vmatmul.msk.f32.gmra.mxu2 %vm405_vm1, %v385_v31  ;;  %6947 = vmatmul.msk.f32.gmra.mxu3 %vm405_vm1, %v385_v31 }
 0x3e0   : > { %13358 = vst [vmem:[#allocation416_spill] sm:$0xff] %v8965_v35 }
 0x3e1   : > { %6560 = vmatmul.msk.f32.gmra.mxu0 %vm405_vm1, %v385_v31  ;;  %6689 = vmatmul.msk.f32.gmra.mxu1 %vm405_vm1, %v385_v31 }
 0x3e2   : > { %v8971_v32 = vpop.f32.mrf.mxu2  ;;  %v8973_v46 = vpop.f32.mrf.mxu3 }
 0x3e3   : > { %13359 = vst [vmem:[#allocation417_spill] sm:$0xff] %v8971_v32 }
 0x3e4   : > { %13360 = vst [vmem:[#allocation418_spill] sm:$0xff] %v8973_v46  ;;  %v387_v46 = vld [vmem:[%s12449_s0 + $0x3c8] sm:$0xff] }
 0x3e6   : > { %v8978_v57 = vpop.f32.mrf.mxu0  ;;  %v8980_v53 = vpop.f32.mrf.mxu1 }
 0x3e7   : > { %13361 = vst [vmem:[#allocation419_spill] sm:$0xff] %v8978_v57  ;;  %6819 = vmatmul.msk.f32.gmra.mxu2 %vm405_vm1, %v386_v3  ;;  %6948 = vmatmul.msk.f32.gmra.mxu3 %vm405_vm1, %v386_v3 }
 0x3e8   : > { %13362 = vst [vmem:[#allocation420_spill] sm:$0xff] %v8980_v53 }
 0x3e9   : > { %6561 = vmatmul.msk.f32.gmra.mxu0 %vm405_vm1, %v386_v3  ;;  %6690 = vmatmul.msk.f32.gmra.mxu1 %vm405_vm1, %v386_v3 }
 0x3ea   : > { %v8986_v31 = vpop.f32.mrf.mxu2  ;;  %v8988_v32 = vpop.f32.mrf.mxu3 }
 0x3eb   : > { %13363 = vst [vmem:[#allocation421_spill] sm:$0xff] %v8986_v31 }
 0x3ec   : > { %13364 = vst [vmem:[#allocation422_spill] sm:$0xff] %v8988_v32  ;;  %v388_v32 = vld [vmem:[%s12449_s0 + $0x3d0] sm:$0xff] }
 0x3ee   : > { %v8993_v35 = vpop.f32.mrf.mxu0  ;;  %v8995_v57 = vpop.f32.mrf.mxu1 }
 0x3ef   : > { %13365 = vst [vmem:[#allocation423_spill] sm:$0xff] %v8993_v35  ;;  %6820 = vmatmul.msk.f32.gmra.mxu2 %vm405_vm1, %v387_v46  ;;  %6949 = vmatmul.msk.f32.gmra.mxu3 %vm405_vm1, %v387_v46 }
 0x3f0   : > { %13366 = vst [vmem:[#allocation424_spill] sm:$0xff] %v8995_v57 }
 0x3f1   : > { %6562 = vmatmul.msk.f32.gmra.mxu0 %vm405_vm1, %v387_v46  ;;  %6691 = vmatmul.msk.f32.gmra.mxu1 %vm405_vm1, %v387_v46 }
 0x3f2   : > { %v9001_v3 = vpop.f32.mrf.mxu2  ;;  %v9003_v31 = vpop.f32.mrf.mxu3 }
 0x3f3   : > { %13367 = vst [vmem:[#allocation425_spill] sm:$0xff] %v9001_v3 }
 0x3f4   : > { %13368 = vst [vmem:[#allocation426_spill] sm:$0xff] %v9003_v31  ;;  %v389_v31 = vld [vmem:[%s12449_s0 + $0x3d8] sm:$0xff] }
 0x3f6   : > { %v9008_v53 = vpop.f32.mrf.mxu0  ;;  %v9010_v35 = vpop.f32.mrf.mxu1 }
 0x3f7   : > { %13369 = vst [vmem:[#allocation427_spill] sm:$0xff] %v9008_v53  ;;  %6821 = vmatmul.msk.f32.gmra.mxu2 %vm405_vm1, %v388_v32  ;;  %6950 = vmatmul.msk.f32.gmra.mxu3 %vm405_vm1, %v388_v32 }
 0x3f8   : > { %13370 = vst [vmem:[#allocation428_spill] sm:$0xff] %v9010_v35 }
 0x3f9   : > { %6563 = vmatmul.msk.f32.gmra.mxu0 %vm405_vm1, %v388_v32  ;;  %6692 = vmatmul.msk.f32.gmra.mxu1 %vm405_vm1, %v388_v32 }
 0x3fa   : > { %v9016_v46 = vpop.f32.mrf.mxu2  ;;  %v9018_v3 = vpop.f32.mrf.mxu3 }
 0x3fb   : > { %13371 = vst [vmem:[#allocation429_spill] sm:$0xff] %v9016_v46 }
 0x3fc   : > { %13372 = vst [vmem:[#allocation430_spill] sm:$0xff] %v9018_v3  ;;  %v390_v3 = vld [vmem:[%s12449_s0 + $0x3e0] sm:$0xff] }
 0x3fe   : > { %v9023_v57 = vpop.f32.mrf.mxu0  ;;  %v9025_v53 = vpop.f32.mrf.mxu1 }
 0x3ff   : > { %13373 = vst [vmem:[#allocation431_spill] sm:$0xff] %v9023_v57  ;;  %6822 = vmatmul.msk.f32.gmra.mxu2 %vm405_vm1, %v389_v31  ;;  %6951 = vmatmul.msk.f32.gmra.mxu3 %vm405_vm1, %v389_v31 }
 0x400   : > { %13374 = vst [vmem:[#allocation432_spill] sm:$0xff] %v9025_v53 }
 0x401   : > { %6564 = vmatmul.msk.f32.gmra.mxu0 %vm405_vm1, %v389_v31  ;;  %6693 = vmatmul.msk.f32.gmra.mxu1 %vm405_vm1, %v389_v31 }
 0x402   : > { %v9031_v32 = vpop.f32.mrf.mxu2  ;;  %v9033_v46 = vpop.f32.mrf.mxu3 }
 0x403   : > { %13375 = vst [vmem:[#allocation433_spill] sm:$0xff] %v9031_v32 }
 0x404   : > { %13376 = vst [vmem:[#allocation434_spill] sm:$0xff] %v9033_v46  ;;  %v391_v46 = vld [vmem:[%s12449_s0 + $0x3e8] sm:$0xff] }
 0x406   : > { %v9038_v35 = vpop.f32.mrf.mxu0  ;;  %v9040_v57 = vpop.f32.mrf.mxu1 }
 0x407   : > { %13377 = vst [vmem:[#allocation435_spill] sm:$0xff] %v9038_v35  ;;  %6823 = vmatmul.msk.f32.gmra.mxu2 %vm405_vm1, %v390_v3  ;;  %6952 = vmatmul.msk.f32.gmra.mxu3 %vm405_vm1, %v390_v3 }
 0x408   : > { %13378 = vst [vmem:[#allocation436_spill] sm:$0xff] %v9040_v57 }
 0x409   : > { %6565 = vmatmul.msk.f32.gmra.mxu0 %vm405_vm1, %v390_v3  ;;  %6694 = vmatmul.msk.f32.gmra.mxu1 %vm405_vm1, %v390_v3 }
 0x40a   : > { %v9046_v31 = vpop.f32.mrf.mxu2  ;;  %v9048_v32 = vpop.f32.mrf.mxu3 }
 0x40b   : > { %13379 = vst [vmem:[#allocation437_spill] sm:$0xff] %v9046_v31 }
 0x40c   : > { %13380 = vst [vmem:[#allocation438_spill] sm:$0xff] %v9048_v32  ;;  %v392_v32 = vld [vmem:[%s12449_s0 + $0x3f0] sm:$0xff] }
 0x40e   : > { %v9053_v53 = vpop.f32.mrf.mxu0  ;;  %v9055_v35 = vpop.f32.mrf.mxu1 }
 0x40f   : > { %13381 = vst [vmem:[#allocation439_spill] sm:$0xff] %v9053_v53  ;;  %6824 = vmatmul.msk.f32.gmra.mxu2 %vm405_vm1, %v391_v46  ;;  %6953 = vmatmul.msk.f32.gmra.mxu3 %vm405_vm1, %v391_v46 }
 0x410   : > { %13382 = vst [vmem:[#allocation440_spill] sm:$0xff] %v9055_v35 }
 0x411   : > { %6566 = vmatmul.msk.f32.gmra.mxu0 %vm405_vm1, %v391_v46  ;;  %6695 = vmatmul.msk.f32.gmra.mxu1 %vm405_vm1, %v391_v46 }
 0x412   : > { %v9061_v3 = vpop.f32.mrf.mxu2  ;;  %v9063_v31 = vpop.f32.mrf.mxu3 }
 0x413   : > { %13383 = vst [vmem:[#allocation441_spill] sm:$0xff] %v9061_v3 }
 0x414   : > { %13384 = vst [vmem:[#allocation442_spill] sm:$0xff] %v9063_v31  ;;  %v393_v31 = vld [vmem:[%s12449_s0 + $0x3f8] sm:$0xff] }
 0x416   : > { %v9068_v57 = vpop.f32.mrf.mxu0  ;;  %v9070_v53 = vpop.f32.mrf.mxu1 }
 0x417   : > { %13385 = vst [vmem:[#allocation443_spill] sm:$0xff] %v9068_v57  ;;  %6825 = vmatmul.msk.f32.gmra.mxu2 %vm405_vm1, %v392_v32  ;;  %6954 = vmatmul.msk.f32.gmra.mxu3 %vm405_vm1, %v392_v32 }
 0x418   : > { %13386 = vst [vmem:[#allocation444_spill] sm:$0xff] %v9070_v53 }
 0x419   : > { %6567 = vmatmul.msk.f32.gmra.mxu0 %vm405_vm1, %v392_v32  ;;  %6696 = vmatmul.msk.f32.gmra.mxu1 %vm405_vm1, %v392_v32 }
 0x41a   : > { %v9076_v46 = vpop.f32.mrf.mxu2  ;;  %v9078_v3 = vpop.f32.mrf.mxu3 }
 0x41b   : > { %13387 = vst [vmem:[#allocation445_spill] sm:$0xff] %v9076_v46 }
 0x41c   : > { %13388 = vst [vmem:[#allocation446_spill] sm:$0xff] %v9078_v3 }
 0x41e   : > { %v9083_v35 = vpop.f32.mrf.mxu0  ;;  %v9085_v57 = vpop.f32.mrf.mxu1 }
 0x41f   : > { %13389 = vst [vmem:[#allocation447_spill] sm:$0xff] %v9083_v35  ;;  %6826 = vmatmul.msk.f32.gmra.mxu2 %vm405_vm1, %v393_v31  ;;  %6955 = vmatmul.msk.f32.gmra.mxu3 %vm405_vm1, %v393_v31 }
 0x420   : > { %13390 = vst [vmem:[#allocation448_spill] sm:$0xff] %v9085_v57 }
 0x421   : > { %6568 = vmatmul.msk.f32.gmra.mxu0 %vm405_vm1, %v393_v31  ;;  %6697 = vmatmul.msk.f32.gmra.mxu1 %vm405_vm1, %v393_v31 }
 0x422   : > { %v9091_v32 = vpop.f32.mrf.mxu2  ;;  %v9093_v46 = vpop.f32.mrf.mxu3 }
 0x423   : > { %13391 = vst [vmem:[#allocation449_spill] sm:$0xff] %v9091_v32 }
 0x424   : > { %13392 = vst [vmem:[#allocation450_spill] sm:$0xff] %v9093_v46 }
 0x426   : > { %v9095_v3 = vpop.f32.mrf.mxu0  ;;  %v9097_v53 = vpop.f32.mrf.mxu1 }
 0x427   : > { %13393 = vst [vmem:[#allocation451_spill] sm:$0xff] %v9095_v3 }
 0x428   : > { %13394 = vst [vmem:[#allocation452_spill] sm:$0xff] %v9097_v53 }
 0x42a   : > { %v9099_v29 = vpop.f32.mrf.mxu2  ;;  %v9101_v35 = vpop.f32.mrf.mxu3 }
 0x42b   : > { %13395 = vst [vmem:[#allocation453_spill] sm:$0xff] %v9099_v29 }
 0x42c   : > { %13396 = vst [vmem:[#allocation454_spill] sm:$0xff] %v9101_v35 }
 0x42e   : > { %v9103_v57 = vpop.f32.mrf.mxu0  ;;  %v9105_v7 = vpop.f32.mrf.mxu1 }
 0x42f   : > { %13397 = vst [vmem:[#allocation455_spill] sm:$0xff] %v9103_v57 }
 0x430   : > { %13398 = vst [vmem:[#allocation456_spill] sm:$0xff] %v9105_v7 }
 0x432   : > { %v9107_v8 = vpop.f32.mrf.mxu2  ;;  %v9109_v48 = vpop.f32.mrf.mxu3 }
 0x433   : > { %13399 = vst [vmem:[#allocation457_spill] sm:$0xff] %v9107_v8 }
 0x434   : > { %13400 = vst [vmem:[#allocation458_spill] sm:$0xff] %v9109_v48 }
 0x436   : > { %v9111_v31 = vpop.f32.mrf.mxu0  ;;  %v9113_v32 = vpop.f32.mrf.mxu1 }
 0x437   : > { %13401 = vst [vmem:[#allocation459_spill] sm:$0xff] %v9111_v31 }
 0x438   : > { %13402 = vst [vmem:[#allocation460_spill] sm:$0xff] %v9113_v32 }
 0x43a   : > { %v9115_v46 = vpop.f32.mrf.mxu2  ;;  %v9117_v3 = vpop.f32.mrf.mxu3 }
 0x43b   : > { %13403 = vst [vmem:[#allocation461_spill] sm:$0xff] %v9115_v46 }
 0x43c   : > { %13404 = vst [vmem:[#allocation462_spill] sm:$0xff] %v9117_v3 }
 0x43e   : > { %v9119_v53 = vpop.f32.mrf.mxu0  ;;  %v9121_v29 = vpop.f32.mrf.mxu1 }
 0x43f   : > { %13405 = vst [vmem:[#allocation463_spill] sm:$0xff] %v9119_v53 }
 0x440   : > { %13406 = vst [vmem:[#allocation464_spill] sm:$0xff] %v9121_v29 }
 0x442   : > { %v9123_v35 = vpop.f32.mrf.mxu2  ;;  %v9125_v57 = vpop.f32.mrf.mxu3 }
 0x443   : > { %13407 = vst [vmem:[#allocation465_spill] sm:$0xff] %v9123_v35 }
 0x444   : > { %13408 = vst [vmem:[#allocation466_spill] sm:$0xff] %v9125_v57 }
 0x446   : > { %v9127_v7 = vpop.f32.mrf.mxu0  ;;  %v9129_v8 = vpop.f32.mrf.mxu1 }
 0x447   : > { %13409 = vst [vmem:[#allocation467_spill] sm:$0xff] %v9127_v7 }
 0x448   : > { %13410 = vst [vmem:[#allocation468_spill] sm:$0xff] %v9129_v8 }
 0x44a   : > { %v9131_v48 = vpop.f32.mrf.mxu2  ;;  %v9133_v31 = vpop.f32.mrf.mxu3 }
 0x44b   : > { %13411 = vst [vmem:[#allocation469_spill] sm:$0xff] %v9131_v48 }
 0x44c   : > { %13412 = vst [vmem:[#allocation470_spill] sm:$0xff] %v9133_v31 }
 0x44e   : > { %v9135_v32 = vpop.f32.mrf.mxu0  ;;  %v9137_v46 = vpop.f32.mrf.mxu1 }
 0x44f   : > { %13413 = vst [vmem:[#allocation471_spill] sm:$0xff] %v9135_v32 }
 0x450   : > { %13414 = vst [vmem:[#allocation472_spill] sm:$0xff] %v9137_v46 }
 0x452   : > { %v9139_v3 = vpop.f32.mrf.mxu2  ;;  %v9141_v53 = vpop.f32.mrf.mxu3 }
 0x453   : > { %13415 = vst [vmem:[#allocation473_spill] sm:$0xff] %v9139_v3 }
 0x454   : > { %13416 = vst [vmem:[#allocation474_spill] sm:$0xff] %v9141_v53 }
 0x456   : > { %v9143_v29 = vpop.f32.mrf.mxu0  ;;  %v9145_v35 = vpop.f32.mrf.mxu1 }
 0x457   : > { %13417 = vst [vmem:[#allocation475_spill] sm:$0xff] %v9143_v29 }
 0x458   : > { %13418 = vst [vmem:[#allocation476_spill] sm:$0xff] %v9145_v35 }
 0x45a   : > { %v9147_v57 = vpop.f32.mrf.mxu2  ;;  %v9149_v7 = vpop.f32.mrf.mxu3 }
 0x45b   : > { %13419 = vst [vmem:[#allocation477_spill] sm:$0xff] %v9147_v57 }
 0x45c   : > { %13420 = vst [vmem:[#allocation478_spill] sm:$0xff] %v9149_v7 }
 0x45e   : > { %v9151_v8 = vpop.f32.mrf.mxu0  ;;  %v9153_v48 = vpop.f32.mrf.mxu1 }
 0x45f   : > { %13421 = vst [vmem:[#allocation479_spill] sm:$0xff] %v9151_v8 }
 0x460   : > { %13422 = vst [vmem:[#allocation480_spill] sm:$0xff] %v9153_v48 }
 0x462   : > { %v9155_v31 = vpop.f32.mrf.mxu2  ;;  %v9157_v32 = vpop.f32.mrf.mxu3 }
 0x463   : > { %13423 = vst [vmem:[#allocation481_spill] sm:$0xff] %v9155_v31 }
 0x464   : > { %13424 = vst [vmem:[#allocation482_spill] sm:$0xff] %v9157_v32 }
 0x466   : > { %v9159_v46 = vpop.f32.mrf.mxu0  ;;  %v9161_v3 = vpop.f32.mrf.mxu1 }
 0x467   : > { %13425 = vst [vmem:[#allocation483_spill] sm:$0xff] %v9159_v46 }
 0x468   : > { %13426 = vst [vmem:[#allocation484_spill] sm:$0xff] %v9161_v3 }
 0x46a   : > { %v9163_v53 = vpop.f32.mrf.mxu2  ;;  %v9165_v29 = vpop.f32.mrf.mxu3 }
 0x46b   : > { %13427 = vst [vmem:[#allocation485_spill] sm:$0xff] %v9163_v53 }
 0x46c   : > { %13428 = vst [vmem:[#allocation486_spill] sm:$0xff] %v9165_v29 }
 0x46e   : > { %v9167_v35 = vpop.f32.mrf.mxu0  ;;  %v9169_v57 = vpop.f32.mrf.mxu1 }
 0x46f   : > { %13429 = vst [vmem:[#allocation487_spill] sm:$0xff] %v9167_v35 }
 0x470   : > { %13430 = vst [vmem:[#allocation488_spill] sm:$0xff] %v9169_v57 }
 0x472   : > { %v9171_v7 = vpop.f32.mrf.mxu2  ;;  %v9173_v8 = vpop.f32.mrf.mxu3 }
 0x473   : > { %13431 = vst [vmem:[#allocation489_spill] sm:$0xff] %v9171_v7 }
 0x474   : > { %13432 = vst [vmem:[#allocation490_spill] sm:$0xff] %v9173_v8 }
 0x476   : > { %v9175_v48 = vpop.f32.mrf.mxu0  ;;  %v9177_v31 = vpop.f32.mrf.mxu1 }
 0x477   : > { %13433 = vst [vmem:[#allocation491_spill] sm:$0xff] %v9175_v48 }
 0x478   : > { %13434 = vst [vmem:[#allocation492_spill] sm:$0xff] %v9177_v31 }
 0x47a   : > { %v9179_v32 = vpop.f32.mrf.mxu2  ;;  %v9181_v46 = vpop.f32.mrf.mxu3 }
 0x47b   : > { %13435 = vst [vmem:[#allocation493_spill] sm:$0xff] %v9179_v32 }
 0x47c   : > { %13436 = vst [vmem:[#allocation494_spill] sm:$0xff] %v9181_v46 }
 0x47e   : > { %v9183_v3 = vpop.f32.mrf.mxu0  ;;  %v9185_v53 = vpop.f32.mrf.mxu1 }
 0x47f   : > { %13437 = vst [vmem:[#allocation495_spill] sm:$0xff] %v9183_v3 }
 0x480   : > { %13438 = vst [vmem:[#allocation496_spill] sm:$0xff] %v9185_v53 }
 0x482   : > { %v9187_v29 = vpop.f32.mrf.mxu2  ;;  %v9189_v35 = vpop.f32.mrf.mxu3 }
 0x483   : > { %13439 = vst [vmem:[#allocation497_spill] sm:$0xff] %v9187_v29 }
 0x484   : > { %13440 = vst [vmem:[#allocation498_spill] sm:$0xff] %v9189_v35 }
 0x486   : > { %v9191_v57 = vpop.f32.mrf.mxu0  ;;  %v9193_v7 = vpop.f32.mrf.mxu1 }
 0x487   : > { %13441 = vst [vmem:[#allocation499_spill] sm:$0xff] %v9191_v57 }
 0x488   : > { %13442 = vst [vmem:[#allocation500_spill] sm:$0xff] %v9193_v7 }
 0x48a   : > { %v9195_v8 = vpop.f32.mrf.mxu2  ;;  %v9197_v48 = vpop.f32.mrf.mxu3 }
 0x48b   : > { %13443 = vst [vmem:[#allocation501_spill] sm:$0xff] %v9195_v8 }
 0x48c   : > { %13444 = vst [vmem:[#allocation502_spill] sm:$0xff] %v9197_v48 }
 0x48e   : > { %v9199_v31 = vpop.f32.mrf.mxu0  ;;  %v9201_v32 = vpop.f32.mrf.mxu1 }
 0x48f   : > { %13445 = vst [vmem:[#allocation503_spill] sm:$0xff] %v9199_v31 }
 0x490   : > { %13446 = vst [vmem:[#allocation504_spill] sm:$0xff] %v9201_v32 }
 0x492   : > { %v9203_v46 = vpop.f32.mrf.mxu2  ;;  %v9205_v3 = vpop.f32.mrf.mxu3 }
 0x493   : > { %13447 = vst [vmem:[#allocation505_spill] sm:$0xff] %v9203_v46 }
 0x494   : > { %13448 = vst [vmem:[#allocation506_spill] sm:$0xff] %v9205_v3 }
 0x496   : > { %v9207_v53 = vpop.f32.mrf.mxu0  ;;  %v9209_v29 = vpop.f32.mrf.mxu1 }
 0x497   : > { %13449 = vst [vmem:[#allocation507_spill] sm:$0xff] %v9207_v53 }
 0x498   : > { %13450 = vst [vmem:[#allocation508_spill] sm:$0xff] %v9209_v29 }
 0x49a   : > { %v9211_v35 = vpop.f32.mrf.mxu2  ;;  %v9213_v57 = vpop.f32.mrf.mxu3 }
 0x49b   : > { %13451 = vst [vmem:[#allocation509_spill] sm:$0xff] %v9211_v35 }
 0x49c   : > { %13452 = vst [vmem:[#allocation510_spill] sm:$0xff] %v9213_v57 }
 0x49e   : > { %v9215_v7 = vpop.f32.mrf.mxu0  ;;  %v9217_v8 = vpop.f32.mrf.mxu1 }
 0x49f   : > { %13453 = vst [vmem:[#allocation511_spill] sm:$0xff] %v9215_v7 }
 0x4a0   : > { %13454 = vst [vmem:[#allocation512_spill] sm:$0xff] %v9217_v8  ;;  %2405 = sbr.rel (%p6956_p8) target bundleno = 2110 (0x83e), region = 56 }
 0x4a2   : > { %v9219_v48 = vpop.f32.mrf.mxu2  ;;  %v9221_v31 = vpop.f32.mrf.mxu3 }
 0x4a3   : > { %13455 = vst [vmem:[#allocation513_spill] sm:$0xff] %v9219_v48 }
 0x4a4   : > { %13456 = vst [vmem:[#allocation514_spill] sm:$0xff] %v9221_v31 }
 0x4a5   : > { %2406 = vmatpush.msra.mxu0 %v7643_v19  ;;  %2446 = vmatpush.msra.mxu2 %v8123_v1 }
 0x4a6   : > { %2426 = vmatpush.msra.mxu1 %v7883_v25  ;;  %2466 = vmatpush.msra.mxu3 %v8363_v24 }
 0x4a7   : > { %2407 = vmatpush.msra.mxu0 %v7628_v58  ;;  %2447 = vmatpush.msra.mxu2 %v8108_v17 }
 0x4a8   : > { %2427 = vmatpush.msra.mxu1 %v7868_v42  ;;  %2467 = vmatpush.msra.mxu3 %v8348_v30 }
 0x4a9   : > { %2408 = vmatpush.msra.mxu0 %v7613_v33  ;;  %2448 = vmatpush.msra.mxu2 %v8093_v6 }
 0x4aa   : > { %2428 = vmatpush.msra.mxu1 %v7853_v4  ;;  %2468 = vmatpush.msra.mxu3 %v8333_v37 }
 0x4ab   : > { %2409 = vmatpush.msra.mxu0 %v7598_v20  ;;  %2449 = vmatpush.msra.mxu2 %v8078_v51 }
 0x4ac   : > { %2429 = vmatpush.msra.mxu1 %v7838_v22  ;;  %2469 = vmatpush.msra.mxu3 %v8318_v16 }
 0x4ad   : > { %2410 = vmatpush.msra.mxu0 %v7583_v15  ;;  %2450 = vmatpush.msra.mxu2 %v8063_v61 }
 0x4ae   : > { %2430 = vmatpush.msra.mxu1 %v7823_v12  ;;  %2470 = vmatpush.msra.mxu3 %v8303_v28 }
 0x4af   : > { %2411 = vmatpush.msra.mxu0 %v7568_v10  ;;  %2451 = vmatpush.msra.mxu2 %v8048_v60 }
 0x4b0   : > { %2431 = vmatpush.msra.mxu1 %v7808_v2  ;;  %2471 = vmatpush.msra.mxu3 %v8288_v43 }
 0x4b1   : > { %2412 = vmatpush.msra.mxu0 %v7553_v5  ;;  %2452 = vmatpush.msra.mxu2 %v8033_v18 }
 0x4b2   : > { %2432 = vmatpush.msra.mxu1 %v7793_v56  ;;  %2472 = vmatpush.msra.mxu3 %v8273_v63 }
 0x4b3   : > { %2413 = vmatpush.msra.mxu0 %v7538_v0  ;;  %2453 = vmatpush.msra.mxu2 %v8018_v50 }
 0x4b4   : > { %2433 = vmatpush.msra.mxu1 %v7778_v9  ;;  %2473 = vmatpush.msra.mxu3 %v8258_v13 }
 0x4b5   : > { %2414 = vmatpush.msra.mxu0 %v7523_v59  ;;  %2454 = vmatpush.msra.mxu2 %v8003_v36 }
 0x4b6   : > { %2434 = vmatpush.msra.mxu1 %v7763_v41  ;;  %2474 = vmatpush.msra.mxu3 %v8243_v11 }
 0x4b7   : > { %2415 = vmatpush.msra.mxu0 %v7508_v54  ;;  %2455 = vmatpush.msra.mxu2 %v7988_v45 }
 0x4b8   : > { %2435 = vmatpush.msra.mxu1 %v7748_v47  ;;  %2475 = vmatpush.msra.mxu3 %v8228_v38 }
 0x4b9   : > { %2416 = vmatpush.msra.mxu0 %v7493_v49  ;;  %2456 = vmatpush.msra.mxu2 %v7973_v52 }
 0x4ba   : > { %2436 = vmatpush.msra.mxu1 %v7733_v26  ;;  %2476 = vmatpush.msra.mxu3 %v8213_v62  ;;  %v13457_v26 = vld [vmem:[#allocation139_spill] sm:$0xff] }
 0x4bb   : > { %2417 = vmatpush.msra.mxu0 %v7478_v44  ;;  %2457 = vmatpush.msra.mxu2 %v7958_v40  ;;  %v13458_v62 = vld [vmem:[#allocation79_spill] sm:$0xff]  ;;  %v13460_v40 = vld [vmem:[#allocation20_spill] sm:$0xff] }
 0x4bc   : > { %2437 = vmatpush.msra.mxu1 %v7718_v27  ;;  %2477 = vmatpush.msra.mxu3 %v8198_v55  ;;  %v13459_v44 = vld [vmem:[#allocation203_spill] sm:$0xff] }
 0x4bd   : > { %2418 = vmatpush.msra.mxu0 %v7463_v39  ;;  %2458 = vmatpush.msra.mxu2 %v7943_v14  ;;  %v13461_v27 = vld [vmem:[#allocation135_spill] sm:$0xff]  ;;  %v13464_v14 = vld [vmem:[#allocation16_spill] sm:$0xff] }
 0x4be   : > { %2438 = vmatpush.msra.mxu1 %v7703_v23  ;;  %2478 = vmatpush.msra.mxu3 %v8183_v21  ;;  %v13462_v55 = vld [vmem:[#allocation75_spill] sm:$0xff] }
 0x4bf   : > { %2419 = vmatpush.msra.mxu0 %v7448_v34  ;;  %2459 = vmatpush.msra.mxu2 %v13457_v26  ;;  %v13463_v39 = vld [vmem:[#allocation199_spill] sm:$0xff] }
 0x4c0   : > { %2439 = vmatpush.msra.mxu1 %v13458_v62  ;;  %2479 = vmatpush.msra.mxu3 %v13459_v44  ;;  %v13465_v23 = vld [vmem:[#allocation131_spill] sm:$0xff] }
 0x4c1   : > { %2420 = vmatpush.msra.mxu0 %v13460_v40  ;;  %2460 = vmatpush.msra.mxu2 %v13461_v27  ;;  %v13466_v21 = vld [vmem:[#allocation319_spill] sm:$0xff] }
 0x4c2   : > { %2440 = vmatpush.msra.mxu1 %v13462_v55  ;;  %2480 = vmatpush.msra.mxu3 %v13463_v39  ;;  %v13467_v34 = vld [vmem:[#allocation447_spill] sm:$0xff] }
 0x4c3   : > { %2421 = vmatpush.msra.mxu0 %v13464_v14  ;;  %2461 = vmatpush.msra.mxu2 %v13465_v23  ;;  %v13468_v26 = vld [vmem:[#allocation71_spill] sm:$0xff] }
 0x4c4   : > { %2441 = vmatpush.msra.mxu1 %v13468_v26  ;;  %v13469_v62 = vld [vmem:[#allocation195_spill] sm:$0xff] }
 0x4c5   : > { %2486 = vmatpush.msrb.mxu0 %v13466_v21  ;;  %2526 = vmatpush.msrb.mxu2 %v13467_v34  ;;  %v13470_v44 = vld [vmem:[#allocation315_spill] sm:$0xff] }
 0x4c6   : > { %2481 = vmatpush.msra.mxu3 %v13469_v62  ;;  %v13471_v40 = vld [vmem:[#allocation383_spill] sm:$0xff] }
 0x4c7   : > { %2487 = vmatpush.msrb.mxu0 %v13470_v44  ;;  %2506 = vmatpush.msrb.mxu1 %v13471_v40  ;;  %v13472_v27 = vld [vmem:[#allocation443_spill] sm:$0xff] }
 0x4c8   : > { %2527 = vmatpush.msrb.mxu2 %v13472_v27  ;;  %2546 = vmatpush.msrb.mxu3 %v9215_v7  ;;  %v13473_v39 = vld [vmem:[#allocation311_spill] sm:$0xff] }
 0x4c9   : > { %2488 = vmatpush.msrb.mxu0 %v13473_v39  ;;  %v13474_v55 = vld [vmem:[#allocation379_spill] sm:$0xff] }
 0x4ca   : > { %2507 = vmatpush.msrb.mxu1 %v13474_v55  ;;  %v13475_v23 = vld [vmem:[#allocation439_spill] sm:$0xff]  ;;  %2547 = vmatpush.msrb.mxu3 %v9207_v53 }
 0x4cb   : > { %2528 = vmatpush.msrb.mxu2 %v13475_v23  ;;  %v13476_v34 = vld [vmem:[#allocation307_spill] sm:$0xff] }
 0x4cc   : > { %2489 = vmatpush.msrb.mxu0 %v13476_v34  ;;  %v13477_v26 = vld [vmem:[#allocation375_spill] sm:$0xff] }
 0x4cd   : > { %2508 = vmatpush.msrb.mxu1 %v13477_v26  ;;  %v13478_v62 = vld [vmem:[#allocation435_spill] sm:$0xff] }
 0x4ce   : > { %2529 = vmatpush.msrb.mxu2 %v13478_v62  ;;  %v13479_v44 = vld [vmem:[#allocation503_spill] sm:$0xff] }
 0x4cf   : > { %2548 = vmatpush.msrb.mxu3 %v13479_v44  ;;  %v13480_v40 = vld [vmem:[#allocation303_spill] sm:$0xff] }
 0x4d0   : > { %2490 = vmatpush.msrb.mxu0 %v13480_v40  ;;  %v13481_v27 = vld [vmem:[#allocation371_spill] sm:$0xff] }
 0x4d1   : > { %2509 = vmatpush.msrb.mxu1 %v13481_v27  ;;  %v13482_v7 = vld [vmem:[#allocation431_spill] sm:$0xff] }
 0x4d2   : > { %2530 = vmatpush.msrb.mxu2 %v13482_v7  ;;  %v13483_v39 = vld [vmem:[#allocation499_spill] sm:$0xff] }
 0x4d3   : > { %2549 = vmatpush.msrb.mxu3 %v13483_v39  ;;  %v13484_v55 = vld [vmem:[#allocation299_spill] sm:$0xff] }
 0x4d4   : > { %2491 = vmatpush.msrb.mxu0 %v13484_v55  ;;  %v13485_v23 = vld [vmem:[#allocation367_spill] sm:$0xff] }
 0x4d5   : > { %2510 = vmatpush.msrb.mxu1 %v13485_v23  ;;  %v13486_v53 = vld [vmem:[#allocation427_spill] sm:$0xff] }
 0x4d6   : > { %2531 = vmatpush.msrb.mxu2 %v13486_v53  ;;  %v13487_v34 = vld [vmem:[#allocation495_spill] sm:$0xff] }
 0x4d7   : > { %2550 = vmatpush.msrb.mxu3 %v13487_v34  ;;  %v13488_v26 = vld [vmem:[#allocation295_spill] sm:$0xff] }
 0x4d8   : > { %2492 = vmatpush.msrb.mxu0 %v13488_v26  ;;  %v13489_v62 = vld [vmem:[#allocation363_spill] sm:$0xff] }
 0x4d9   : > { %2511 = vmatpush.msrb.mxu1 %v13489_v62  ;;  %v13490_v44 = vld [vmem:[#allocation423_spill] sm:$0xff] }
 0x4da   : > { %2532 = vmatpush.msrb.mxu2 %v13490_v44  ;;  %v13491_v40 = vld [vmem:[#allocation491_spill] sm:$0xff] }
 0x4db   : > { %2551 = vmatpush.msrb.mxu3 %v13491_v40  ;;  %v13492_v27 = vld [vmem:[#allocation291_spill] sm:$0xff] }
 0x4dc   : > { %2493 = vmatpush.msrb.mxu0 %v13492_v27  ;;  %v13493_v7 = vld [vmem:[#allocation359_spill] sm:$0xff] }
 0x4dd   : > { %2512 = vmatpush.msrb.mxu1 %v13493_v7  ;;  %v13494_v39 = vld [vmem:[#allocation419_spill] sm:$0xff] }
 0x4de   : > { %2533 = vmatpush.msrb.mxu2 %v13494_v39  ;;  %v13495_v55 = vld [vmem:[#allocation487_spill] sm:$0xff] }
 0x4df   : > { %2552 = vmatpush.msrb.mxu3 %v13495_v55  ;;  %v13496_v23 = vld [vmem:[#allocation287_spill] sm:$0xff] }
 0x4e0   : > { %2494 = vmatpush.msrb.mxu0 %v13496_v23  ;;  %v13497_v53 = vld [vmem:[#allocation355_spill] sm:$0xff] }
 0x4e1   : > { %2513 = vmatpush.msrb.mxu1 %v13497_v53  ;;  %v13498_v34 = vld [vmem:[#allocation415_spill] sm:$0xff] }
 0x4e2   : > { %2534 = vmatpush.msrb.mxu2 %v13498_v34  ;;  %v13499_v26 = vld [vmem:[#allocation483_spill] sm:$0xff] }
 0x4e3   : > { %2553 = vmatpush.msrb.mxu3 %v13499_v26  ;;  %v13500_v62 = vld [vmem:[#allocation283_spill] sm:$0xff] }
 0x4e4   : > { %2495 = vmatpush.msrb.mxu0 %v13500_v62  ;;  %v13501_v44 = vld [vmem:[#allocation351_spill] sm:$0xff] }
 0x4e5   : > { %2514 = vmatpush.msrb.mxu1 %v13501_v44  ;;  %v13502_v40 = vld [vmem:[#allocation411_spill] sm:$0xff] }
 0x4e6   : > { %2535 = vmatpush.msrb.mxu2 %v13502_v40  ;;  %v13503_v27 = vld [vmem:[#allocation479_spill] sm:$0xff] }
 0x4e7   : > { %2554 = vmatpush.msrb.mxu3 %v13503_v27  ;;  %v13504_v7 = vld [vmem:[#allocation279_spill] sm:$0xff] }
 0x4e8   : > { %2496 = vmatpush.msrb.mxu0 %v13504_v7  ;;  %v13505_v39 = vld [vmem:[#allocation347_spill] sm:$0xff] }
 0x4e9   : > { %2515 = vmatpush.msrb.mxu1 %v13505_v39  ;;  %v13506_v55 = vld [vmem:[#allocation407_spill] sm:$0xff] }
 0x4ea   : > { %2536 = vmatpush.msrb.mxu2 %v13506_v55  ;;  %v13507_v23 = vld [vmem:[#allocation475_spill] sm:$0xff] }
 0x4eb   : > { %2555 = vmatpush.msrb.mxu3 %v13507_v23  ;;  %v13508_v53 = vld [vmem:[#allocation275_spill] sm:$0xff] }
 0x4ec   : > { %2497 = vmatpush.msrb.mxu0 %v13508_v53  ;;  %v13509_v34 = vld [vmem:[#allocation343_spill] sm:$0xff] }
 0x4ed   : > { %2516 = vmatpush.msrb.mxu1 %v13509_v34  ;;  %v13510_v26 = vld [vmem:[#allocation403_spill] sm:$0xff] }
 0x4ee   : > { %2537 = vmatpush.msrb.mxu2 %v13510_v26  ;;  %v13511_v62 = vld [vmem:[#allocation471_spill] sm:$0xff] }
 0x4ef   : > { %2556 = vmatpush.msrb.mxu3 %v13511_v62  ;;  %v13512_v44 = vld [vmem:[#allocation271_spill] sm:$0xff] }
 0x4f0   : > { %2498 = vmatpush.msrb.mxu0 %v13512_v44  ;;  %v13513_v40 = vld [vmem:[#allocation339_spill] sm:$0xff] }
 0x4f1   : > { %2517 = vmatpush.msrb.mxu1 %v13513_v40  ;;  %v13514_v27 = vld [vmem:[#allocation399_spill] sm:$0xff]  ;;  %v12915_v40 = vmov 1.0  }
 0x4f2   : > { %2538 = vmatpush.msrb.mxu2 %v13514_v27  ;;  %v13515_v7 = vld [vmem:[#allocation467_spill] sm:$0xff]  ;;  %2422 = vmatmul.f32.vlgmr.msra.gmra.mxu0 %v12915_v40  ;;  %v13537_v27 = vld [vmem:[#allocation124_spill] sm:$0xff] }
 0x4f3   : > { %2557 = vmatpush.msrb.mxu3 %v13515_v7  ;;  %v13516_v39 = vld [vmem:[#allocation267_spill] sm:$0xff]  ;;  %2462 = vmatmul.f32.vlgmr.msra.gmra.mxu2 %v12915_v40 }
 0x4f4   : > { %2499 = vmatpush.msrb.mxu0 %v13516_v39  ;;  %v13517_v55 = vld [vmem:[#allocation335_spill] sm:$0xff]  ;;  %2482 = vmatmul.f32.vlgmr.msra.gmra.mxu3 %v12915_v40 }
 0x4f5   : > { %2518 = vmatpush.msrb.mxu1 %v13517_v55  ;;  %v13518_v23 = vld [vmem:[#allocation395_spill] sm:$0xff] }
 0x4f6   : > { %2539 = vmatpush.msrb.mxu2 %v13518_v23  ;;  %v13519_v53 = vld [vmem:[#allocation463_spill] sm:$0xff]  ;;  %2442 = vmatmul.f32.vlgmr.msra.gmra.mxu1 %v12915_v40 }
 0x4f7   : > { %2558 = vmatpush.msrb.mxu3 %v13519_v53  ;;  %v13520_v34 = vld [vmem:[#allocation263_spill] sm:$0xff]  ;;  %v13536_v53 = vld [vmem:[#allocation60_spill] sm:$0xff] }
 0x4f8   : > { %2500 = vmatpush.msrb.mxu0 %v13520_v34  ;;  %v13521_v26 = vld [vmem:[#allocation331_spill] sm:$0xff] }
 0x4f9   : > { %2519 = vmatpush.msrb.mxu1 %v13521_v26  ;;  %v13522_v62 = vld [vmem:[#allocation391_spill] sm:$0xff]  ;;  %v13528_v26 = vld [vmem:[#allocation68_spill] sm:$0xff] }
 0x4fa   : > { %2540 = vmatpush.msrb.mxu2 %v13522_v62  ;;  %v13523_v44 = vld [vmem:[#allocation459_spill] sm:$0xff]  ;;  %v13529_v62 = vld [vmem:[#allocation192_spill] sm:$0xff] }
 0x4fb   : > { %2559 = vmatpush.msrb.mxu3 %v13523_v44  ;;  %v13524_v7 = vld [vmem:[#allocation259_spill] sm:$0xff] }
 0x4fc   : > { %2501 = vmatpush.msrb.mxu0 %v13524_v7  ;;  %v13525_v39 = vld [vmem:[#allocation327_spill] sm:$0xff]  ;;  %v13532_v7 = vld [vmem:[#allocation64_spill] sm:$0xff] }
 0x4fd   : > { %2520 = vmatpush.msrb.mxu1 %v13525_v39  ;;  %v13526_v55 = vld [vmem:[#allocation387_spill] sm:$0xff]  ;;  %v13533_v39 = vld [vmem:[#allocation128_spill] sm:$0xff]  ;;  %2502 = vmatmul.f32.vlgmr.msrb.gmra.mxu0 %v12915_v40 }
 0x4fe   : > { %2541 = vmatpush.msrb.mxu2 %v13526_v55  ;;  %v13527_v23 = vld [vmem:[#allocation455_spill] sm:$0xff]  ;;  %2566 = vmatpush.msra.mxu0 %v13528_v26  ;;  %v13534_v55 = vld [vmem:[#allocation188_spill] sm:$0xff] }
 0x4ff   : > { %2560 = vmatpush.msrb.mxu3 %v13527_v23  ;;  %v13530_v44 = vld [vmem:[#allocation323_spill] sm:$0xff]  ;;  %v13535_v23 = vld [vmem:[#allocation256_spill] sm:$0xff]  ;;  %2542 = vmatmul.f32.vlgmr.msrb.gmra.mxu2 %v12915_v40 }
 0x500   : > { %2606 = vmatpush.msra.mxu2 %v13529_v62  ;;  %2521 = vmatpush.msrb.mxu1 %v13530_v44  ;;  %v13531_v34 = vld [vmem:[#allocation451_spill] sm:$0xff]  ;;  %v13538_v26 = vld [vmem:[#allocation184_spill] sm:$0xff] }
 0x501   : > { %2561 = vmatpush.msrb.mxu3 %v13531_v34  ;;  %2567 = vmatpush.msra.mxu0 %v13532_v7  ;;  %v13539_v62 = vld [vmem:[#allocation252_spill] sm:$0xff]  ;;  %v13540_v34 = vld [vmem:[#allocation57_spill] sm:$0xff] }
 0x502   : > { %2586 = vmatpush.msra.mxu1 %v13533_v39  ;;  %2607 = vmatpush.msra.mxu2 %v13534_v55  ;;  %v13541_v44 = vld [vmem:[#allocation120_spill] sm:$0xff] }
 0x503   : > { %2626 = vmatpush.msra.mxu3 %v13535_v23  ;;  %2568 = vmatpush.msra.mxu0 %v13536_v53  ;;  %v13542_v7 = vld [vmem:[#allocation180_spill] sm:$0xff]  ;;  %v13544_v53 = vld [vmem:[#allocation54_spill] sm:$0xff] }
 0x504   : > { %2587 = vmatpush.msra.mxu1 %v13537_v27  ;;  %2608 = vmatpush.msra.mxu2 %v13538_v26  ;;  %v13543_v39 = vld [vmem:[#allocation248_spill] sm:$0xff] }
 0x505   : > { %2627 = vmatpush.msra.mxu3 %v13539_v62  ;;  %2569 = vmatpush.msra.mxu0 %v13540_v34  ;;  %v13545_v27 = vld [vmem:[#allocation116_spill] sm:$0xff]  ;;  %v13548_v34 = vld [vmem:[#allocation51_spill] sm:$0xff] }
 0x506   : > { %2588 = vmatpush.msra.mxu1 %v13541_v44  ;;  %2609 = vmatpush.msra.mxu2 %v13542_v7  ;;  %v13546_v26 = vld [vmem:[#allocation176_spill] sm:$0xff] }
 0x507   : > { %2628 = vmatpush.msra.mxu3 %v13543_v39  ;;  %2570 = vmatpush.msra.mxu0 %v13544_v53  ;;  %v13547_v62 = vld [vmem:[#allocation244_spill] sm:$0xff] }
 0x508   : > { %2562 = vmatmul.f32.vlgmr.msrb.gmra.mxu3 %v12915_v40  ;;  %2589 = vmatpush.msra.mxu1 %v13545_v27  ;;  %v13549_v44 = vld [vmem:[#allocation112_spill] sm:$0xff] }
 0x509   : > { %2610 = vmatpush.msra.mxu2 %v13546_v26  ;;  %2629 = vmatpush.msra.mxu3 %v13547_v62  ;;  %v13550_v7 = vld [vmem:[#allocation172_spill] sm:$0xff]  ;;  %v13556_v26 = vld [vmem:[#allocation45_spill] sm:$0xff] }
 0x50a   : > { %2522 = vmatmul.f32.vlgmr.msrb.gmra.mxu1 %v12915_v40  ;;  %2571 = vmatpush.msra.mxu0 %v13548_v34  ;;  %v13551_v39 = vld [vmem:[#allocation240_spill] sm:$0xff] }
 0x50b   : > { %2590 = vmatpush.msra.mxu1 %v13549_v44  ;;  %2611 = vmatpush.msra.mxu2 %v13550_v7  ;;  %v13552_v23 = vld [vmem:[#allocation48_spill] sm:$0xff]  ;;  %v13560_v44 = vld [vmem:[#allocation42_spill] sm:$0xff]  ;;  %v13561_v7 = vld [vmem:[#allocation101_spill] sm:$0xff] }
 0x50c   : > { %2630 = vmatpush.msra.mxu3 %v13551_v39  ;;  %2572 = vmatpush.msra.mxu0 %v13552_v23  ;;  %v13553_v55 = vld [vmem:[#allocation108_spill] sm:$0xff] }
 0x50d   : > { %2591 = vmatpush.msra.mxu1 %v13553_v55  ;;  %v13554_v53 = vld [vmem:[#allocation168_spill] sm:$0xff]  ;;  %v13564_v55 = vld [vmem:[#allocation39_spill] sm:$0xff] }
 0x50e   : > { %2612 = vmatpush.msra.mxu2 %v13554_v53  ;;  %v13555_v27 = vld [vmem:[#allocation236_spill] sm:$0xff]  ;;  %2573 = vmatpush.msra.mxu0 %v13556_v26  ;;  %v13565_v53 = vld [vmem:[#allocation98_spill] sm:$0xff] }
 0x50f   : > { %2631 = vmatpush.msra.mxu3 %v13555_v27  ;;  %v13557_v62 = vld [vmem:[#allocation104_spill] sm:$0xff] }
 0x510   : > { %2592 = vmatpush.msra.mxu1 %v13557_v62  ;;  %v13558_v40 = vld [vmem:[#allocation164_spill] sm:$0xff]  ;;  %2574 = vmatpush.msra.mxu0 %v13560_v44 }
 0x511   : > { %2613 = vmatpush.msra.mxu2 %v13558_v40  ;;  %v13559_v34 = vld [vmem:[#allocation232_spill] sm:$0xff]  ;;  %v13569_v40 = vld [vmem:[#allocation95_spill] sm:$0xff] }
 0x512   : > { %2632 = vmatpush.msra.mxu3 %v13559_v34  ;;  %2593 = vmatpush.msra.mxu1 %v13561_v7  ;;  %v13562_v39 = vld [vmem:[#allocation160_spill] sm:$0xff]  ;;  %v13572_v7 = vld [vmem:[#allocation33_spill] sm:$0xff] }
 0x513   : > { %2614 = vmatpush.msra.mxu2 %v13562_v39  ;;  %v13563_v23 = vld [vmem:[#allocation228_spill] sm:$0xff]  ;;  %2575 = vmatpush.msra.mxu0 %v13564_v55 }
 0x514   : > { %2633 = vmatpush.msra.mxu3 %v13563_v23  ;;  %2594 = vmatpush.msra.mxu1 %v13565_v53  ;;  %v13566_v27 = vld [vmem:[#allocation156_spill] sm:$0xff]  ;;  %v13576_v53 = vld [vmem:[#allocation29_spill] sm:$0xff] }
 0x515   : > { %2615 = vmatpush.msra.mxu2 %v13566_v27  ;;  %v13567_v26 = vld [vmem:[#allocation224_spill] sm:$0xff] }
 0x516   : > { %2634 = vmatpush.msra.mxu3 %v13567_v26  ;;  %v13568_v62 = vld [vmem:[#allocation36_spill] sm:$0xff]  ;;  %2595 = vmatpush.msra.mxu1 %v13569_v40  ;;  %v13580_v40 = vld [vmem:[#allocation25_spill] sm:$0xff] }
 0x517   : > { %2576 = vmatpush.msra.mxu0 %v13568_v62  ;;  %v13570_v34 = vld [vmem:[#allocation152_spill] sm:$0xff] }
 0x518   : > { %2616 = vmatpush.msra.mxu2 %v13570_v34  ;;  %v13571_v44 = vld [vmem:[#allocation220_spill] sm:$0xff] }
 0x519   : > { %2635 = vmatpush.msra.mxu3 %v13571_v44  ;;  %2577 = vmatpush.msra.mxu0 %v13572_v7  ;;  %v13573_v39 = vld [vmem:[#allocation92_spill] sm:$0xff] }
 0x51a   : > { %2596 = vmatpush.msra.mxu1 %v13573_v39  ;;  %v13574_v23 = vld [vmem:[#allocation148_spill] sm:$0xff]  ;;  %v13584_v39 = vld [vmem:[#allocation21_spill] sm:$0xff] }
 0x51b   : > { %2617 = vmatpush.msra.mxu2 %v13574_v23  ;;  %v13575_v55 = vld [vmem:[#allocation216_spill] sm:$0xff]  ;;  %2578 = vmatpush.msra.mxu0 %v13576_v53 }
 0x51c   : > { %2636 = vmatpush.msra.mxu3 %v13575_v55  ;;  %v13577_v27 = vld [vmem:[#allocation88_spill] sm:$0xff] }
 0x51d   : > { %2597 = vmatpush.msra.mxu1 %v13577_v27  ;;  %v13578_v26 = vld [vmem:[#allocation144_spill] sm:$0xff]  ;;  %2579 = vmatpush.msra.mxu0 %v13580_v40  ;;  %v13588_v27 = vld [vmem:[#allocation17_spill] sm:$0xff] }
 0x51e   : > { %2618 = vmatpush.msra.mxu2 %v13578_v26  ;;  %v13579_v62 = vld [vmem:[#allocation212_spill] sm:$0xff] }
 0x51f   : > { %2637 = vmatpush.msra.mxu3 %v13579_v62  ;;  %v13581_v34 = vld [vmem:[#allocation84_spill] sm:$0xff]  ;;  %2580 = vmatpush.msra.mxu0 %v13584_v39 }
 0x520   : > { %2598 = vmatpush.msra.mxu1 %v13581_v34  ;;  %v13582_v44 = vld [vmem:[#allocation140_spill] sm:$0xff] }
 0x521   : > { %2619 = vmatpush.msra.mxu2 %v13582_v44  ;;  %v13583_v7 = vld [vmem:[#allocation208_spill] sm:$0xff]  ;;  %2581 = vmatpush.msra.mxu0 %v13588_v27 }
 0x522   : > { %2638 = vmatpush.msra.mxu3 %v13583_v7  ;;  %v13585_v23 = vld [vmem:[#allocation80_spill] sm:$0xff] }
 0x523   : > { %2599 = vmatpush.msra.mxu1 %v13585_v23  ;;  %v13586_v55 = vld [vmem:[#allocation136_spill] sm:$0xff] }
 0x524   : > { %2620 = vmatpush.msra.mxu2 %v13586_v55  ;;  %v13587_v53 = vld [vmem:[#allocation204_spill] sm:$0xff] }
 0x525   : > { %2639 = vmatpush.msra.mxu3 %v13587_v53  ;;  %v13589_v26 = vld [vmem:[#allocation76_spill] sm:$0xff] }
 0x526   : > { %2600 = vmatpush.msra.mxu1 %v13589_v26  ;;  %v13590_v62 = vld [vmem:[#allocation132_spill] sm:$0xff] }
 0x527   : > { %2621 = vmatpush.msra.mxu2 %v13590_v62  ;;  %v13591_v40 = vld [vmem:[#allocation200_spill] sm:$0xff] }
 0x528   : > { %2640 = vmatpush.msra.mxu3 %v13591_v40  ;;  %v13592_v34 = vld [vmem:[#allocation320_spill] sm:$0xff] }
 0x529   : > { %2646 = vmatpush.msrb.mxu0 %v13592_v34  ;;  %v13593_v44 = vld [vmem:[#allocation448_spill] sm:$0xff] }
 0x52a   : > { %2686 = vmatpush.msrb.mxu2 %v13593_v44  ;;  %v13594_v7 = vld [vmem:[#allocation72_spill] sm:$0xff] }
 0x52b   : > { %2601 = vmatpush.msra.mxu1 %v13594_v7  ;;  %v13595_v39 = vld [vmem:[#allocation196_spill] sm:$0xff] }
 0x52c   : > { %2641 = vmatpush.msra.mxu3 %v13595_v39  ;;  %v13596_v23 = vld [vmem:[#allocation316_spill] sm:$0xff] }
 0x52d   : > { %2647 = vmatpush.msrb.mxu0 %v13596_v23  ;;  %v13597_v55 = vld [vmem:[#allocation384_spill] sm:$0xff]  ;;  %v13672_v23 = vld [vmem:[#allocation177_spill] sm:$0xff] }
 0x52e   : > { %2666 = vmatpush.msrb.mxu1 %v13597_v55  ;;  %v13598_v53 = vld [vmem:[#allocation444_spill] sm:$0xff]  ;;  %2706 = vmatpush.msrb.mxu3 %v9217_v8 }
 0x52f   : > { %2687 = vmatpush.msrb.mxu2 %v13598_v53  ;;  %v13599_v26 = vld [vmem:[#allocation312_spill] sm:$0xff] }
 0x530   : > { %2648 = vmatpush.msrb.mxu0 %v13599_v26  ;;  %v13600_v62 = vld [vmem:[#allocation380_spill] sm:$0xff]  ;;  %2707 = vmatpush.msrb.mxu3 %v9209_v29 }
 0x531   : > { %2667 = vmatpush.msrb.mxu1 %v13600_v62  ;;  %v13601_v40 = vld [vmem:[#allocation440_spill] sm:$0xff] }
 0x532   : > { %2688 = vmatpush.msrb.mxu2 %v13601_v40  ;;  %v13602_v44 = vld [vmem:[#allocation308_spill] sm:$0xff]  ;;  %2708 = vmatpush.msrb.mxu3 %v9201_v32 }
 0x533   : > { %2649 = vmatpush.msrb.mxu0 %v13602_v44  ;;  %v13603_v7 = vld [vmem:[#allocation376_spill] sm:$0xff] }
 0x534   : > { %2668 = vmatpush.msrb.mxu1 %v13603_v7  ;;  %v13604_v39 = vld [vmem:[#allocation436_spill] sm:$0xff] }
 0x535   : > { %2689 = vmatpush.msrb.mxu2 %v13604_v39  ;;  %v13605_v55 = vld [vmem:[#allocation304_spill] sm:$0xff] }
 0x536   : > { %2650 = vmatpush.msrb.mxu0 %v13605_v55  ;;  %v13606_v53 = vld [vmem:[#allocation372_spill] sm:$0xff] }
 0x537   : > { %2669 = vmatpush.msrb.mxu1 %v13606_v53  ;;  %v13607_v8 = vld [vmem:[#allocation432_spill] sm:$0xff] }
 0x538   : > { %2690 = vmatpush.msrb.mxu2 %v13607_v8  ;;  %v13608_v26 = vld [vmem:[#allocation500_spill] sm:$0xff] }
 0x539   : > { %2709 = vmatpush.msrb.mxu3 %v13608_v26  ;;  %v13609_v62 = vld [vmem:[#allocation300_spill] sm:$0xff] }
 0x53a   : > { %2651 = vmatpush.msrb.mxu0 %v13609_v62  ;;  %v13610_v40 = vld [vmem:[#allocation368_spill] sm:$0xff] }
 0x53b   : > { %2670 = vmatpush.msrb.mxu1 %v13610_v40  ;;  %v13611_v29 = vld [vmem:[#allocation428_spill] sm:$0xff] }
 0x53c   : > { %2691 = vmatpush.msrb.mxu2 %v13611_v29  ;;  %v13612_v44 = vld [vmem:[#allocation496_spill] sm:$0xff] }
 0x53d   : > { %2710 = vmatpush.msrb.mxu3 %v13612_v44  ;;  %v13613_v7 = vld [vmem:[#allocation296_spill] sm:$0xff] }
 0x53e   : > { %2652 = vmatpush.msrb.mxu0 %v13613_v7  ;;  %v13614_v39 = vld [vmem:[#allocation364_spill] sm:$0xff] }
 0x53f   : > { %2671 = vmatpush.msrb.mxu1 %v13614_v39  ;;  %v13615_v32 = vld [vmem:[#allocation424_spill] sm:$0xff] }
 0x540   : > { %2692 = vmatpush.msrb.mxu2 %v13615_v32  ;;  %v13616_v55 = vld [vmem:[#allocation492_spill] sm:$0xff] }
 0x541   : > { %2711 = vmatpush.msrb.mxu3 %v13616_v55  ;;  %v13617_v53 = vld [vmem:[#allocation292_spill] sm:$0xff] }
 0x542   : > { %2653 = vmatpush.msrb.mxu0 %v13617_v53  ;;  %v13618_v8 = vld [vmem:[#allocation360_spill] sm:$0xff] }
 0x543   : > { %2672 = vmatpush.msrb.mxu1 %v13618_v8  ;;  %v13619_v26 = vld [vmem:[#allocation420_spill] sm:$0xff] }
 0x544   : > { %2693 = vmatpush.msrb.mxu2 %v13619_v26  ;;  %v13620_v62 = vld [vmem:[#allocation488_spill] sm:$0xff] }
 0x545   : > { %2712 = vmatpush.msrb.mxu3 %v13620_v62  ;;  %v13621_v40 = vld [vmem:[#allocation288_spill] sm:$0xff] }
 0x546   : > { %2654 = vmatpush.msrb.mxu0 %v13621_v40  ;;  %v13622_v29 = vld [vmem:[#allocation356_spill] sm:$0xff] }
 0x547   : > { %2673 = vmatpush.msrb.mxu1 %v13622_v29  ;;  %v13623_v44 = vld [vmem:[#allocation416_spill] sm:$0xff] }
 0x548   : > { %2694 = vmatpush.msrb.mxu2 %v13623_v44  ;;  %v13624_v7 = vld [vmem:[#allocation484_spill] sm:$0xff] }
 0x549   : > { %2713 = vmatpush.msrb.mxu3 %v13624_v7  ;;  %v13625_v39 = vld [vmem:[#allocation284_spill] sm:$0xff] }
 0x54a   : > { %2655 = vmatpush.msrb.mxu0 %v13625_v39  ;;  %v13626_v32 = vld [vmem:[#allocation352_spill] sm:$0xff] }
 0x54b   : > { %2674 = vmatpush.msrb.mxu1 %v13626_v32  ;;  %v13627_v55 = vld [vmem:[#allocation412_spill] sm:$0xff]  ;;  %v13637_v32 = vmov 1.0  }
 0x54c   : > { %2695 = vmatpush.msrb.mxu2 %v13627_v55  ;;  %v13628_v53 = vld [vmem:[#allocation480_spill] sm:$0xff]  ;;  %2582 = vmatmul.f32.vlgmr.msra.gmra.mxu0 %v13637_v32 }
 0x54d   : > { %2714 = vmatpush.msrb.mxu3 %v13628_v53  ;;  %v13629_v8 = vld [vmem:[#allocation280_spill] sm:$0xff]  ;;  %2622 = vmatmul.f32.vlgmr.msra.gmra.mxu2 %v13637_v32 }
 0x54e   : > { %2656 = vmatpush.msrb.mxu0 %v13629_v8  ;;  %v13630_v26 = vld [vmem:[#allocation348_spill] sm:$0xff]  ;;  %2642 = vmatmul.f32.vlgmr.msra.gmra.mxu3 %v13637_v32 }
 0x54f   : > { %2675 = vmatpush.msrb.mxu1 %v13630_v26  ;;  %v13631_v62 = vld [vmem:[#allocation408_spill] sm:$0xff] }
 0x550   : > { %2696 = vmatpush.msrb.mxu2 %v13631_v62  ;;  %v13632_v40 = vld [vmem:[#allocation476_spill] sm:$0xff]  ;;  %2602 = vmatmul.f32.vlgmr.msra.gmra.mxu1 %v13637_v32 }
 0x551   : > { %2715 = vmatpush.msrb.mxu3 %v13632_v40  ;;  %v13633_v29 = vld [vmem:[#allocation276_spill] sm:$0xff] }
 0x552   : > { %2657 = vmatpush.msrb.mxu0 %v13633_v29  ;;  %v13634_v44 = vld [vmem:[#allocation344_spill] sm:$0xff] }
 0x553   : > { %2676 = vmatpush.msrb.mxu1 %v13634_v44  ;;  %v13635_v7 = vld [vmem:[#allocation404_spill] sm:$0xff] }
 0x554   : > { %2697 = vmatpush.msrb.mxu2 %v13635_v7  ;;  %v13636_v39 = vld [vmem:[#allocation472_spill] sm:$0xff] }
 0x555   : > { %2716 = vmatpush.msrb.mxu3 %v13636_v39  ;;  %v13638_v55 = vld [vmem:[#allocation272_spill] sm:$0xff] }
 0x556   : > { %2658 = vmatpush.msrb.mxu0 %v13638_v55  ;;  %v13639_v53 = vld [vmem:[#allocation340_spill] sm:$0xff] }
 0x557   : > { %2677 = vmatpush.msrb.mxu1 %v13639_v53  ;;  %v13640_v8 = vld [vmem:[#allocation400_spill] sm:$0xff] }
 0x558   : > { %2698 = vmatpush.msrb.mxu2 %v13640_v8  ;;  %v13641_v26 = vld [vmem:[#allocation468_spill] sm:$0xff] }
 0x559   : > { %2717 = vmatpush.msrb.mxu3 %v13641_v26  ;;  %v13642_v29 = vld [vmem:[#allocation268_spill] sm:$0xff] }
 0x55a   : > { %2659 = vmatpush.msrb.mxu0 %v13642_v29  ;;  %v13643_v44 = vld [vmem:[#allocation336_spill] sm:$0xff] }
 0x55b   : > { %2678 = vmatpush.msrb.mxu1 %v13643_v44  ;;  %v13644_v7 = vld [vmem:[#allocation396_spill] sm:$0xff] }
 0x55c   : > { %2699 = vmatpush.msrb.mxu2 %v13644_v7  ;;  %v13645_v39 = vld [vmem:[#allocation464_spill] sm:$0xff]  ;;  %v13655_v7 = vld [vmem:[#allocation193_spill] sm:$0xff] }
 0x55d   : > { %2718 = vmatpush.msrb.mxu3 %v13645_v39  ;;  %v13646_v55 = vld [vmem:[#allocation264_spill] sm:$0xff]  ;;  %v13654_v39 = vld [vmem:[#allocation69_spill] sm:$0xff] }
 0x55e   : > { %2660 = vmatpush.msrb.mxu0 %v13646_v55  ;;  %v13647_v53 = vld [vmem:[#allocation332_spill] sm:$0xff] }
 0x55f   : > { %2679 = vmatpush.msrb.mxu1 %v13647_v53  ;;  %v13648_v8 = vld [vmem:[#allocation392_spill] sm:$0xff] }
 0x560   : > { %2700 = vmatpush.msrb.mxu2 %v13648_v8  ;;  %v13649_v26 = vld [vmem:[#allocation460_spill] sm:$0xff]  ;;  %v13667_v8 = vld [vmem:[#allocation121_spill] sm:$0xff] }
 0x561   : > { %2719 = vmatpush.msrb.mxu3 %v13649_v26  ;;  %v13650_v40 = vld [vmem:[#allocation260_spill] sm:$0xff]  ;;  %v13666_v26 = vld [vmem:[#allocation58_spill] sm:$0xff] }
 0x562   : > { %2661 = vmatpush.msrb.mxu0 %v13650_v40  ;;  %v13651_v62 = vld [vmem:[#allocation328_spill] sm:$0xff]  ;;  %v13658_v40 = vld [vmem:[#allocation65_spill] sm:$0xff] }
 0x563   : > { %2680 = vmatpush.msrb.mxu1 %v13651_v62  ;;  %v13652_v29 = vld [vmem:[#allocation388_spill] sm:$0xff]  ;;  %2662 = vmatmul.f32.vlgmr.msrb.gmra.mxu0 %v13637_v32  ;;  %v13659_v62 = vld [vmem:[#allocation129_spill] sm:$0xff] }
 0x564   : > { %2701 = vmatpush.msrb.mxu2 %v13652_v29  ;;  %v13653_v44 = vld [vmem:[#allocation456_spill] sm:$0xff]  ;;  %2726 = vmatpush.msra.mxu0 %v13654_v39  ;;  %v13660_v29 = vld [vmem:[#allocation189_spill] sm:$0xff] }
 0x565   : > { %2720 = vmatpush.msrb.mxu3 %v13653_v44  ;;  %2702 = vmatmul.f32.vlgmr.msrb.gmra.mxu2 %v13637_v32  ;;  %v13656_v55 = vld [vmem:[#allocation324_spill] sm:$0xff]  ;;  %v13661_v44 = vld [vmem:[#allocation257_spill] sm:$0xff] }
 0x566   : > { %2766 = vmatpush.msra.mxu2 %v13655_v7  ;;  %2681 = vmatpush.msrb.mxu1 %v13656_v55  ;;  %v13657_v53 = vld [vmem:[#allocation452_spill] sm:$0xff]  ;;  %v13662_v39 = vld [vmem:[#allocation61_spill] sm:$0xff] }
 0x567   : > { %2721 = vmatpush.msrb.mxu3 %v13657_v53  ;;  %2727 = vmatpush.msra.mxu0 %v13658_v40  ;;  %v13663_v7 = vld [vmem:[#allocation125_spill] sm:$0xff] }
 0x568   : > { %2722 = vmatmul.f32.vlgmr.msrb.gmra.mxu3 %v13637_v32  ;;  %2746 = vmatpush.msra.mxu1 %v13659_v62  ;;  %v13664_v55 = vld [vmem:[#allocation185_spill] sm:$0xff] }
 0x569   : > { %2767 = vmatpush.msra.mxu2 %v13660_v29  ;;  %2786 = vmatpush.msra.mxu3 %v13661_v44  ;;  %v13665_v53 = vld [vmem:[#allocation253_spill] sm:$0xff]  ;;  %v13670_v29 = vld [vmem:[#allocation55_spill] sm:$0xff] }
 0x56a   : > { %2682 = vmatmul.f32.vlgmr.msrb.gmra.mxu1 %v13637_v32  ;;  %2728 = vmatpush.msra.mxu0 %v13662_v39  ;;  %v13668_v40 = vld [vmem:[#allocation181_spill] sm:$0xff] }
 0x56b   : > { %2747 = vmatpush.msra.mxu1 %v13663_v7  ;;  %2768 = vmatpush.msra.mxu2 %v13664_v55  ;;  %v13669_v62 = vld [vmem:[#allocation249_spill] sm:$0xff]  ;;  %v13674_v7 = vld [vmem:[#allocation52_spill] sm:$0xff] }
 0x56c   : > { %2787 = vmatpush.msra.mxu3 %v13665_v53  ;;  %2729 = vmatpush.msra.mxu0 %v13666_v26  ;;  %v13671_v44 = vld [vmem:[#allocation117_spill] sm:$0xff] }
 0x56d   : > { %2748 = vmatpush.msra.mxu1 %v13667_v8  ;;  %2769 = vmatpush.msra.mxu2 %v13668_v40  ;;  %v13673_v39 = vld [vmem:[#allocation245_spill] sm:$0xff] }
 0x56e   : > { %2788 = vmatpush.msra.mxu3 %v13669_v62  ;;  %2730 = vmatpush.msra.mxu0 %v13670_v29  ;;  %v13675_v55 = vld [vmem:[#allocation113_spill] sm:$0xff] }
 0x56f   : > { %2749 = vmatpush.msra.mxu1 %v13671_v44  ;;  %2770 = vmatpush.msra.mxu2 %v13672_v23  ;;  %v13676_v53 = vld [vmem:[#allocation173_spill] sm:$0xff]  ;;  %v13682_v44 = vld [vmem:[#allocation46_spill] sm:$0xff] }
 0x570   : > { %2789 = vmatpush.msra.mxu3 %v13673_v39  ;;  %2731 = vmatpush.msra.mxu0 %v13674_v7  ;;  %v13677_v26 = vld [vmem:[#allocation241_spill] sm:$0xff] }
 0x571   : > { %2750 = vmatpush.msra.mxu1 %v13675_v55  ;;  %2771 = vmatpush.msra.mxu2 %v13676_v53  ;;  %v13678_v8 = vld [vmem:[#allocation49_spill] sm:$0xff]  ;;  %v13686_v55 = vld [vmem:[#allocation43_spill] sm:$0xff]  ;;  %v13687_v53 = vld [vmem:[#allocation102_spill] sm:$0xff] }
 0x572   : > { %2790 = vmatpush.msra.mxu3 %v13677_v26  ;;  %2732 = vmatpush.msra.mxu0 %v13678_v8  ;;  %v13679_v40 = vld [vmem:[#allocation109_spill] sm:$0xff] }
 0x573   : > { %2751 = vmatpush.msra.mxu1 %v13679_v40  ;;  %v13680_v62 = vld [vmem:[#allocation169_spill] sm:$0xff]  ;;  %v13690_v40 = vld [vmem:[#allocation40_spill] sm:$0xff] }
 0x574   : > { %2772 = vmatpush.msra.mxu2 %v13680_v62  ;;  %v13681_v29 = vld [vmem:[#allocation237_spill] sm:$0xff]  ;;  %2733 = vmatpush.msra.mxu0 %v13682_v44  ;;  %v13691_v62 = vld [vmem:[#allocation99_spill] sm:$0xff] }
 0x575   : > { %2791 = vmatpush.msra.mxu3 %v13681_v29  ;;  %v13683_v23 = vld [vmem:[#allocation105_spill] sm:$0xff] }
 0x576   : > { %2752 = vmatpush.msra.mxu1 %v13683_v23  ;;  %v13684_v39 = vld [vmem:[#allocation165_spill] sm:$0xff]  ;;  %2734 = vmatpush.msra.mxu0 %v13686_v55 }
 0x577   : > { %2773 = vmatpush.msra.mxu2 %v13684_v39  ;;  %v13685_v7 = vld [vmem:[#allocation233_spill] sm:$0xff]  ;;  %v13695_v39 = vld [vmem:[#allocation96_spill] sm:$0xff] }
 0x578   : > { %2792 = vmatpush.msra.mxu3 %v13685_v7  ;;  %2753 = vmatpush.msra.mxu1 %v13687_v53  ;;  %v13688_v26 = vld [vmem:[#allocation161_spill] sm:$0xff]  ;;  %v13698_v53 = vld [vmem:[#allocation34_spill] sm:$0xff] }
 0x579   : > { %2774 = vmatpush.msra.mxu2 %v13688_v26  ;;  %v13689_v8 = vld [vmem:[#allocation229_spill] sm:$0xff]  ;;  %2735 = vmatpush.msra.mxu0 %v13690_v40 }
 0x57a   : > { %2793 = vmatpush.msra.mxu3 %v13689_v8  ;;  %2754 = vmatpush.msra.mxu1 %v13691_v62  ;;  %v13692_v29 = vld [vmem:[#allocation157_spill] sm:$0xff]  ;;  %v13702_v62 = vld [vmem:[#allocation30_spill] sm:$0xff] }
 0x57b   : > { %2775 = vmatpush.msra.mxu2 %v13692_v29  ;;  %v13693_v44 = vld [vmem:[#allocation225_spill] sm:$0xff] }
 0x57c   : > { %2794 = vmatpush.msra.mxu3 %v13693_v44  ;;  %v13694_v23 = vld [vmem:[#allocation37_spill] sm:$0xff]  ;;  %2755 = vmatpush.msra.mxu1 %v13695_v39  ;;  %v13706_v39 = vld [vmem:[#allocation26_spill] sm:$0xff] }
 0x57d   : > { %2736 = vmatpush.msra.mxu0 %v13694_v23  ;;  %v13696_v7 = vld [vmem:[#allocation153_spill] sm:$0xff] }
 0x57e   : > { %2776 = vmatpush.msra.mxu2 %v13696_v7  ;;  %v13697_v55 = vld [vmem:[#allocation221_spill] sm:$0xff] }
 0x57f   : > { %2795 = vmatpush.msra.mxu3 %v13697_v55  ;;  %2737 = vmatpush.msra.mxu0 %v13698_v53  ;;  %v13699_v26 = vld [vmem:[#allocation93_spill] sm:$0xff] }
 0x580   : > { %2756 = vmatpush.msra.mxu1 %v13699_v26  ;;  %v13700_v8 = vld [vmem:[#allocation149_spill] sm:$0xff]  ;;  %v13710_v26 = vld [vmem:[#allocation22_spill] sm:$0xff] }
 0x581   : > { %2777 = vmatpush.msra.mxu2 %v13700_v8  ;;  %v13701_v40 = vld [vmem:[#allocation217_spill] sm:$0xff]  ;;  %2738 = vmatpush.msra.mxu0 %v13702_v62 }
 0x582   : > { %2796 = vmatpush.msra.mxu3 %v13701_v40  ;;  %v13703_v29 = vld [vmem:[#allocation89_spill] sm:$0xff] }
 0x583   : > { %2757 = vmatpush.msra.mxu1 %v13703_v29  ;;  %v13704_v44 = vld [vmem:[#allocation145_spill] sm:$0xff]  ;;  %2739 = vmatpush.msra.mxu0 %v13706_v39  ;;  %v13714_v29 = vld [vmem:[#allocation18_spill] sm:$0xff] }
 0x584   : > { %2778 = vmatpush.msra.mxu2 %v13704_v44  ;;  %v13705_v23 = vld [vmem:[#allocation213_spill] sm:$0xff] }
 0x585   : > { %2797 = vmatpush.msra.mxu3 %v13705_v23  ;;  %v13707_v7 = vld [vmem:[#allocation85_spill] sm:$0xff]  ;;  %2740 = vmatpush.msra.mxu0 %v13710_v26 }
 0x586   : > { %2758 = vmatpush.msra.mxu1 %v13707_v7  ;;  %v13708_v55 = vld [vmem:[#allocation141_spill] sm:$0xff] }
 0x587   : > { %2779 = vmatpush.msra.mxu2 %v13708_v55  ;;  %v13709_v53 = vld [vmem:[#allocation209_spill] sm:$0xff]  ;;  %2741 = vmatpush.msra.mxu0 %v13714_v29 }
 0x588   : > { %2798 = vmatpush.msra.mxu3 %v13709_v53  ;;  %v13711_v8 = vld [vmem:[#allocation81_spill] sm:$0xff]  ;;  %2742 = vmatmul.f32.vlgmr.msra.gmra.mxu0 %v13637_v32 }
 0x589   : > { %2759 = vmatpush.msra.mxu1 %v13711_v8  ;;  %v13712_v40 = vld [vmem:[#allocation137_spill] sm:$0xff] }
 0x58a   : > { %2780 = vmatpush.msra.mxu2 %v13712_v40  ;;  %v13713_v62 = vld [vmem:[#allocation205_spill] sm:$0xff] }
 0x58b   : > { %2799 = vmatpush.msra.mxu3 %v13713_v62  ;;  %v13715_v44 = vld [vmem:[#allocation77_spill] sm:$0xff] }
 0x58c   : > { %2760 = vmatpush.msra.mxu1 %v13715_v44  ;;  %v13716_v23 = vld [vmem:[#allocation133_spill] sm:$0xff] }
 0x58d   : > { %2781 = vmatpush.msra.mxu2 %v13716_v23  ;;  %v13717_v39 = vld [vmem:[#allocation201_spill] sm:$0xff] }
 0x58e   : > { %2800 = vmatpush.msra.mxu3 %v13717_v39  ;;  %v13718_v7 = vld [vmem:[#allocation321_spill] sm:$0xff]  ;;  %2782 = vmatmul.f32.vlgmr.msra.gmra.mxu2 %v13637_v32 }
 0x58f   : > { %2806 = vmatpush.msrb.mxu0 %v13718_v7  ;;  %v13719_v55 = vld [vmem:[#allocation449_spill] sm:$0xff] }
 0x590   : > { %2846 = vmatpush.msrb.mxu2 %v13719_v55  ;;  %v13720_v53 = vld [vmem:[#allocation73_spill] sm:$0xff] }
 0x591   : > { %2761 = vmatpush.msra.mxu1 %v13720_v53  ;;  %v13721_v26 = vld [vmem:[#allocation197_spill] sm:$0xff] }
 0x592   : > { %2801 = vmatpush.msra.mxu3 %v13721_v26  ;;  %v13722_v8 = vld [vmem:[#allocation317_spill] sm:$0xff]  ;;  %2762 = vmatmul.f32.vlgmr.msra.gmra.mxu1 %v13637_v32 }
 0x593   : > { %2807 = vmatpush.msrb.mxu0 %v13722_v8  ;;  %v13723_v40 = vld [vmem:[#allocation385_spill] sm:$0xff]  ;;  %2802 = vmatmul.f32.vlgmr.msra.gmra.mxu3 %v13637_v32 }
 0x594   : > { %2826 = vmatpush.msrb.mxu1 %v13723_v40  ;;  %v13724_v62 = vld [vmem:[#allocation445_spill] sm:$0xff]  ;;  %2866 = vmatpush.msrb.mxu3 %v9219_v48 }
 0x595   : > { %2847 = vmatpush.msrb.mxu2 %v13724_v62  ;;  %v13725_v44 = vld [vmem:[#allocation313_spill] sm:$0xff] }
 0x596   : > { %2808 = vmatpush.msrb.mxu0 %v13725_v44  ;;  %v13726_v23 = vld [vmem:[#allocation381_spill] sm:$0xff]  ;;  %2867 = vmatpush.msrb.mxu3 %v9211_v35 }
 0x597   : > { %2827 = vmatpush.msrb.mxu1 %v13726_v23  ;;  %v13727_v39 = vld [vmem:[#allocation441_spill] sm:$0xff] }
 0x598   : > { %2848 = vmatpush.msrb.mxu2 %v13727_v39  ;;  %v13728_v55 = vld [vmem:[#allocation309_spill] sm:$0xff]  ;;  %2868 = vmatpush.msrb.mxu3 %v9203_v46 }
 0x599   : > { %2809 = vmatpush.msrb.mxu0 %v13728_v55  ;;  %v13729_v53 = vld [vmem:[#allocation377_spill] sm:$0xff] }
 0x59a   : > { %2828 = vmatpush.msrb.mxu1 %v13729_v53  ;;  %v13730_v26 = vld [vmem:[#allocation437_spill] sm:$0xff] }
 0x59b   : > { %2849 = vmatpush.msrb.mxu2 %v13730_v26  ;;  %v13731_v40 = vld [vmem:[#allocation305_spill] sm:$0xff] }
 0x59c   : > { %2810 = vmatpush.msrb.mxu0 %v13731_v40  ;;  %v13732_v62 = vld [vmem:[#allocation373_spill] sm:$0xff] }
 0x59d   : > { %2829 = vmatpush.msrb.mxu1 %v13732_v62  ;;  %v13733_v48 = vld [vmem:[#allocation433_spill] sm:$0xff] }
 0x59e   : > { %2850 = vmatpush.msrb.mxu2 %v13733_v48  ;;  %v13734_v44 = vld [vmem:[#allocation501_spill] sm:$0xff] }
 0x59f   : > { %2869 = vmatpush.msrb.mxu3 %v13734_v44  ;;  %v13735_v23 = vld [vmem:[#allocation301_spill] sm:$0xff] }
 0x5a0   : > { %2811 = vmatpush.msrb.mxu0 %v13735_v23  ;;  %v13736_v39 = vld [vmem:[#allocation369_spill] sm:$0xff] }
 0x5a1   : > { %2830 = vmatpush.msrb.mxu1 %v13736_v39  ;;  %v13737_v35 = vld [vmem:[#allocation429_spill] sm:$0xff] }
 0x5a2   : > { %2851 = vmatpush.msrb.mxu2 %v13737_v35  ;;  %v13738_v55 = vld [vmem:[#allocation497_spill] sm:$0xff] }
 0x5a3   : > { %2870 = vmatpush.msrb.mxu3 %v13738_v55  ;;  %v13739_v53 = vld [vmem:[#allocation297_spill] sm:$0xff] }
 0x5a4   : > { %2812 = vmatpush.msrb.mxu0 %v13739_v53  ;;  %v13740_v26 = vld [vmem:[#allocation365_spill] sm:$0xff] }
 0x5a5   : > { %2831 = vmatpush.msrb.mxu1 %v13740_v26  ;;  %v13741_v46 = vld [vmem:[#allocation425_spill] sm:$0xff] }
 0x5a6   : > { %2852 = vmatpush.msrb.mxu2 %v13741_v46  ;;  %v13742_v40 = vld [vmem:[#allocation493_spill] sm:$0xff] }
 0x5a7   : > { %2871 = vmatpush.msrb.mxu3 %v13742_v40  ;;  %v13743_v62 = vld [vmem:[#allocation293_spill] sm:$0xff] }
 0x5a8   : > { %2813 = vmatpush.msrb.mxu0 %v13743_v62  ;;  %v13744_v48 = vld [vmem:[#allocation361_spill] sm:$0xff] }
 0x5a9   : > { %2832 = vmatpush.msrb.mxu1 %v13744_v48  ;;  %v13745_v44 = vld [vmem:[#allocation421_spill] sm:$0xff] }
 0x5aa   : > { %2853 = vmatpush.msrb.mxu2 %v13745_v44  ;;  %v13746_v23 = vld [vmem:[#allocation489_spill] sm:$0xff] }
 0x5ab   : > { %2872 = vmatpush.msrb.mxu3 %v13746_v23  ;;  %v13747_v39 = vld [vmem:[#allocation289_spill] sm:$0xff] }
 0x5ac   : > { %2814 = vmatpush.msrb.mxu0 %v13747_v39  ;;  %v13748_v35 = vld [vmem:[#allocation357_spill] sm:$0xff] }
 0x5ad   : > { %2833 = vmatpush.msrb.mxu1 %v13748_v35  ;;  %v13749_v55 = vld [vmem:[#allocation417_spill] sm:$0xff] }
 0x5ae   : > { %2854 = vmatpush.msrb.mxu2 %v13749_v55  ;;  %v13750_v53 = vld [vmem:[#allocation485_spill] sm:$0xff] }
 0x5af   : > { %2873 = vmatpush.msrb.mxu3 %v13750_v53  ;;  %v13751_v26 = vld [vmem:[#allocation285_spill] sm:$0xff] }
 0x5b0   : > { %2815 = vmatpush.msrb.mxu0 %v13751_v26  ;;  %v13752_v46 = vld [vmem:[#allocation353_spill] sm:$0xff] }
 0x5b1   : > { %2834 = vmatpush.msrb.mxu1 %v13752_v46  ;;  %v13753_v40 = vld [vmem:[#allocation413_spill] sm:$0xff]  ;;  %v13797_v46 = vld [vmem:[#allocation178_spill] sm:$0xff] }
 0x5b2   : > { %2855 = vmatpush.msrb.mxu2 %v13753_v40  ;;  %v13754_v62 = vld [vmem:[#allocation481_spill] sm:$0xff] }
 0x5b3   : > { %2874 = vmatpush.msrb.mxu3 %v13754_v62  ;;  %v13755_v48 = vld [vmem:[#allocation281_spill] sm:$0xff] }
 0x5b4   : > { %2816 = vmatpush.msrb.mxu0 %v13755_v48  ;;  %v13756_v44 = vld [vmem:[#allocation349_spill] sm:$0xff] }
 0x5b5   : > { %2835 = vmatpush.msrb.mxu1 %v13756_v44  ;;  %v13757_v23 = vld [vmem:[#allocation409_spill] sm:$0xff] }
 0x5b6   : > { %2856 = vmatpush.msrb.mxu2 %v13757_v23  ;;  %v13758_v39 = vld [vmem:[#allocation477_spill] sm:$0xff] }
 0x5b7   : > { %2875 = vmatpush.msrb.mxu3 %v13758_v39  ;;  %v13759_v35 = vld [vmem:[#allocation277_spill] sm:$0xff] }
 0x5b8   : > { %2817 = vmatpush.msrb.mxu0 %v13759_v35  ;;  %v13760_v55 = vld [vmem:[#allocation345_spill] sm:$0xff] }
 0x5b9   : > { %2836 = vmatpush.msrb.mxu1 %v13760_v55  ;;  %v13761_v53 = vld [vmem:[#allocation405_spill] sm:$0xff] }
 0x5ba   : > { %2857 = vmatpush.msrb.mxu2 %v13761_v53  ;;  %v13762_v26 = vld [vmem:[#allocation473_spill] sm:$0xff] }
 0x5bb   : > { %2876 = vmatpush.msrb.mxu3 %v13762_v26  ;;  %v13763_v40 = vld [vmem:[#allocation273_spill] sm:$0xff] }
 0x5bc   : > { %2818 = vmatpush.msrb.mxu0 %v13763_v40  ;;  %v13764_v62 = vld [vmem:[#allocation341_spill] sm:$0xff] }
 0x5bd   : > { %2837 = vmatpush.msrb.mxu1 %v13764_v62  ;;  %v13765_v48 = vld [vmem:[#allocation401_spill] sm:$0xff] }
 0x5be   : > { %2858 = vmatpush.msrb.mxu2 %v13765_v48  ;;  %v13766_v44 = vld [vmem:[#allocation469_spill] sm:$0xff] }
 0x5bf   : > { %2877 = vmatpush.msrb.mxu3 %v13766_v44  ;;  %v13767_v35 = vld [vmem:[#allocation269_spill] sm:$0xff] }
 0x5c0   : > { %2819 = vmatpush.msrb.mxu0 %v13767_v35  ;;  %v13768_v55 = vld [vmem:[#allocation337_spill] sm:$0xff] }
 0x5c1   : > { %2838 = vmatpush.msrb.mxu1 %v13768_v55  ;;  %v13769_v53 = vld [vmem:[#allocation397_spill] sm:$0xff] }
 0x5c2   : > { %2859 = vmatpush.msrb.mxu2 %v13769_v53  ;;  %v13770_v26 = vld [vmem:[#allocation465_spill] sm:$0xff]  ;;  %v13780_v53 = vld [vmem:[#allocation194_spill] sm:$0xff] }
 0x5c3   : > { %2878 = vmatpush.msrb.mxu3 %v13770_v26  ;;  %v13771_v40 = vld [vmem:[#allocation265_spill] sm:$0xff]  ;;  %v13779_v26 = vld [vmem:[#allocation70_spill] sm:$0xff] }
 0x5c4   : > { %2820 = vmatpush.msrb.mxu0 %v13771_v40  ;;  %v13772_v62 = vld [vmem:[#allocation333_spill] sm:$0xff] }
 0x5c5   : > { %2839 = vmatpush.msrb.mxu1 %v13772_v62  ;;  %v13773_v48 = vld [vmem:[#allocation393_spill] sm:$0xff] }
 0x5c6   : > { %2860 = vmatpush.msrb.mxu2 %v13773_v48  ;;  %v13774_v44 = vld [vmem:[#allocation461_spill] sm:$0xff]  ;;  %v13792_v48 = vld [vmem:[#allocation122_spill] sm:$0xff] }
 0x5c7   : > { %2879 = vmatpush.msrb.mxu3 %v13774_v44  ;;  %v13775_v39 = vld [vmem:[#allocation261_spill] sm:$0xff]  ;;  %v13791_v44 = vld [vmem:[#allocation59_spill] sm:$0xff] }
 0x5c8   : > { %2821 = vmatpush.msrb.mxu0 %v13775_v39  ;;  %v13776_v23 = vld [vmem:[#allocation329_spill] sm:$0xff]  ;;  %v13783_v39 = vld [vmem:[#allocation66_spill] sm:$0xff] }
 0x5c9   : > { %2840 = vmatpush.msrb.mxu1 %v13776_v23  ;;  %v13777_v35 = vld [vmem:[#allocation389_spill] sm:$0xff]  ;;  %2822 = vmatmul.f32.vlgmr.msrb.gmra.mxu0 %v13637_v32  ;;  %v13784_v23 = vld [vmem:[#allocation130_spill] sm:$0xff] }
 0x5ca   : > { %2861 = vmatpush.msrb.mxu2 %v13777_v35  ;;  %v13778_v55 = vld [vmem:[#allocation457_spill] sm:$0xff]  ;;  %2886 = vmatpush.msra.mxu0 %v13779_v26  ;;  %v13785_v35 = vld [vmem:[#allocation190_spill] sm:$0xff] }
 0x5cb   : > { %2880 = vmatpush.msrb.mxu3 %v13778_v55  ;;  %2862 = vmatmul.f32.vlgmr.msrb.gmra.mxu2 %v13637_v32  ;;  %v13781_v40 = vld [vmem:[#allocation325_spill] sm:$0xff]  ;;  %v13786_v55 = vld [vmem:[#allocation258_spill] sm:$0xff] }
 0x5cc   : > { %2926 = vmatpush.msra.mxu2 %v13780_v53  ;;  %2841 = vmatpush.msrb.mxu1 %v13781_v40  ;;  %v13782_v62 = vld [vmem:[#allocation453_spill] sm:$0xff]  ;;  %v13787_v26 = vld [vmem:[#allocation62_spill] sm:$0xff] }
 0x5cd   : > { %2881 = vmatpush.msrb.mxu3 %v13782_v62  ;;  %2887 = vmatpush.msra.mxu0 %v13783_v39  ;;  %v13788_v53 = vld [vmem:[#allocation126_spill] sm:$0xff] }
 0x5ce   : > { %2882 = vmatmul.f32.vlgmr.msrb.gmra.mxu3 %v13637_v32  ;;  %2906 = vmatpush.msra.mxu1 %v13784_v23  ;;  %v13789_v40 = vld [vmem:[#allocation186_spill] sm:$0xff] }
 0x5cf   : > { %2927 = vmatpush.msra.mxu2 %v13785_v35  ;;  %2946 = vmatpush.msra.mxu3 %v13786_v55  ;;  %v13790_v62 = vld [vmem:[#allocation254_spill] sm:$0xff]  ;;  %v13795_v35 = vld [vmem:[#allocation56_spill] sm:$0xff] }
 0x5d0   : > { %2842 = vmatmul.f32.vlgmr.msrb.gmra.mxu1 %v13637_v32  ;;  %2888 = vmatpush.msra.mxu0 %v13787_v26  ;;  %v13793_v39 = vld [vmem:[#allocation182_spill] sm:$0xff] }
 0x5d1   : > { %2907 = vmatpush.msra.mxu1 %v13788_v53  ;;  %2928 = vmatpush.msra.mxu2 %v13789_v40  ;;  %v13794_v23 = vld [vmem:[#allocation250_spill] sm:$0xff]  ;;  %v13799_v53 = vld [vmem:[#allocation53_spill] sm:$0xff] }
 0x5d2   : > { %2947 = vmatpush.msra.mxu3 %v13790_v62  ;;  %2889 = vmatpush.msra.mxu0 %v13791_v44  ;;  %v13796_v55 = vld [vmem:[#allocation118_spill] sm:$0xff] }
 0x5d3   : > { %2908 = vmatpush.msra.mxu1 %v13792_v48  ;;  %2929 = vmatpush.msra.mxu2 %v13793_v39  ;;  %v13798_v26 = vld [vmem:[#allocation246_spill] sm:$0xff] }
 0x5d4   : > { %2948 = vmatpush.msra.mxu3 %v13794_v23  ;;  %2890 = vmatpush.msra.mxu0 %v13795_v35  ;;  %v13800_v40 = vld [vmem:[#allocation114_spill] sm:$0xff] }
 0x5d5   : > { %2909 = vmatpush.msra.mxu1 %v13796_v55  ;;  %2930 = vmatpush.msra.mxu2 %v13797_v46  ;;  %v13801_v62 = vld [vmem:[#allocation174_spill] sm:$0xff]  ;;  %v13807_v55 = vld [vmem:[#allocation47_spill] sm:$0xff] }
 0x5d6   : > { %2949 = vmatpush.msra.mxu3 %v13798_v26  ;;  %2891 = vmatpush.msra.mxu0 %v13799_v53  ;;  %v13802_v44 = vld [vmem:[#allocation242_spill] sm:$0xff] }
 0x5d7   : > { %2910 = vmatpush.msra.mxu1 %v13800_v40  ;;  %2931 = vmatpush.msra.mxu2 %v13801_v62  ;;  %v13803_v48 = vld [vmem:[#allocation50_spill] sm:$0xff]  ;;  %v13811_v40 = vld [vmem:[#allocation44_spill] sm:$0xff]  ;;  %v13812_v62 = vld [vmem:[#allocation103_spill] sm:$0xff] }
 0x5d8   : > { %2950 = vmatpush.msra.mxu3 %v13802_v44  ;;  %2892 = vmatpush.msra.mxu0 %v13803_v48  ;;  %v13804_v39 = vld [vmem:[#allocation110_spill] sm:$0xff] }
 0x5d9   : > { %2911 = vmatpush.msra.mxu1 %v13804_v39  ;;  %v13805_v23 = vld [vmem:[#allocation170_spill] sm:$0xff]  ;;  %v13815_v39 = vld [vmem:[#allocation41_spill] sm:$0xff] }
 0x5da   : > { %2932 = vmatpush.msra.mxu2 %v13805_v23  ;;  %v13806_v35 = vld [vmem:[#allocation238_spill] sm:$0xff]  ;;  %2893 = vmatpush.msra.mxu0 %v13807_v55  ;;  %v13816_v23 = vld [vmem:[#allocation100_spill] sm:$0xff] }
 0x5db   : > { %2951 = vmatpush.msra.mxu3 %v13806_v35  ;;  %v13808_v46 = vld [vmem:[#allocation106_spill] sm:$0xff] }
 0x5dc   : > { %2912 = vmatpush.msra.mxu1 %v13808_v46  ;;  %v13809_v26 = vld [vmem:[#allocation166_spill] sm:$0xff]  ;;  %2894 = vmatpush.msra.mxu0 %v13811_v40 }
 0x5dd   : > { %2933 = vmatpush.msra.mxu2 %v13809_v26  ;;  %v13810_v53 = vld [vmem:[#allocation234_spill] sm:$0xff]  ;;  %v13820_v26 = vld [vmem:[#allocation97_spill] sm:$0xff] }
 0x5de   : > { %2952 = vmatpush.msra.mxu3 %v13810_v53  ;;  %2913 = vmatpush.msra.mxu1 %v13812_v62  ;;  %v13813_v44 = vld [vmem:[#allocation162_spill] sm:$0xff]  ;;  %v13823_v62 = vld [vmem:[#allocation35_spill] sm:$0xff] }
 0x5df   : > { %2934 = vmatpush.msra.mxu2 %v13813_v44  ;;  %v13814_v48 = vld [vmem:[#allocation230_spill] sm:$0xff]  ;;  %2895 = vmatpush.msra.mxu0 %v13815_v39 }
 0x5e0   : > { %2953 = vmatpush.msra.mxu3 %v13814_v48  ;;  %2914 = vmatpush.msra.mxu1 %v13816_v23  ;;  %v13817_v35 = vld [vmem:[#allocation158_spill] sm:$0xff]  ;;  %v13827_v23 = vld [vmem:[#allocation31_spill] sm:$0xff] }
 0x5e1   : > { %2935 = vmatpush.msra.mxu2 %v13817_v35  ;;  %v13818_v55 = vld [vmem:[#allocation226_spill] sm:$0xff] }
 0x5e2   : > { %2954 = vmatpush.msra.mxu3 %v13818_v55  ;;  %v13819_v46 = vld [vmem:[#allocation38_spill] sm:$0xff]  ;;  %2915 = vmatpush.msra.mxu1 %v13820_v26  ;;  %v13831_v26 = vld [vmem:[#allocation27_spill] sm:$0xff] }
 0x5e3   : > { %2896 = vmatpush.msra.mxu0 %v13819_v46  ;;  %v13821_v53 = vld [vmem:[#allocation154_spill] sm:$0xff] }
 0x5e4   : > { %2936 = vmatpush.msra.mxu2 %v13821_v53  ;;  %v13822_v40 = vld [vmem:[#allocation222_spill] sm:$0xff] }
 0x5e5   : > { %2955 = vmatpush.msra.mxu3 %v13822_v40  ;;  %2897 = vmatpush.msra.mxu0 %v13823_v62  ;;  %v13824_v44 = vld [vmem:[#allocation94_spill] sm:$0xff] }
 0x5e6   : > { %2916 = vmatpush.msra.mxu1 %v13824_v44  ;;  %v13825_v48 = vld [vmem:[#allocation150_spill] sm:$0xff]  ;;  %v13835_v44 = vld [vmem:[#allocation23_spill] sm:$0xff] }
 0x5e7   : > { %2937 = vmatpush.msra.mxu2 %v13825_v48  ;;  %v13826_v39 = vld [vmem:[#allocation218_spill] sm:$0xff]  ;;  %2898 = vmatpush.msra.mxu0 %v13827_v23 }
 0x5e8   : > { %2956 = vmatpush.msra.mxu3 %v13826_v39  ;;  %v13828_v35 = vld [vmem:[#allocation90_spill] sm:$0xff] }
 0x5e9   : > { %2917 = vmatpush.msra.mxu1 %v13828_v35  ;;  %v13829_v55 = vld [vmem:[#allocation146_spill] sm:$0xff]  ;;  %2899 = vmatpush.msra.mxu0 %v13831_v26  ;;  %v13839_v35 = vld [vmem:[#allocation19_spill] sm:$0xff] }
 0x5ea   : > { %2938 = vmatpush.msra.mxu2 %v13829_v55  ;;  %v13830_v46 = vld [vmem:[#allocation214_spill] sm:$0xff] }
 0x5eb   : > { %2957 = vmatpush.msra.mxu3 %v13830_v46  ;;  %v13832_v53 = vld [vmem:[#allocation86_spill] sm:$0xff]  ;;  %2900 = vmatpush.msra.mxu0 %v13835_v44 }
 0x5ec   : > { %2918 = vmatpush.msra.mxu1 %v13832_v53  ;;  %v13833_v40 = vld [vmem:[#allocation142_spill] sm:$0xff] }
 0x5ed   : > { %2939 = vmatpush.msra.mxu2 %v13833_v40  ;;  %v13834_v62 = vld [vmem:[#allocation210_spill] sm:$0xff]  ;;  %2901 = vmatpush.msra.mxu0 %v13839_v35 }
 0x5ee   : > { %2958 = vmatpush.msra.mxu3 %v13834_v62  ;;  %v13836_v48 = vld [vmem:[#allocation82_spill] sm:$0xff]  ;;  %2902 = vmatmul.f32.vlgmr.msra.gmra.mxu0 %v13637_v32 }
 0x5ef   : > { %2919 = vmatpush.msra.mxu1 %v13836_v48  ;;  %v13837_v39 = vld [vmem:[#allocation138_spill] sm:$0xff] }
 0x5f0   : > { %2940 = vmatpush.msra.mxu2 %v13837_v39  ;;  %v13838_v23 = vld [vmem:[#allocation206_spill] sm:$0xff] }
 0x5f1   : > { %2959 = vmatpush.msra.mxu3 %v13838_v23  ;;  %v13840_v55 = vld [vmem:[#allocation78_spill] sm:$0xff] }
 0x5f2   : > { %2920 = vmatpush.msra.mxu1 %v13840_v55  ;;  %v13841_v46 = vld [vmem:[#allocation134_spill] sm:$0xff] }
 0x5f3   : > { %2941 = vmatpush.msra.mxu2 %v13841_v46  ;;  %v13842_v26 = vld [vmem:[#allocation202_spill] sm:$0xff] }
 0x5f4   : > { %2960 = vmatpush.msra.mxu3 %v13842_v26  ;;  %v13843_v53 = vld [vmem:[#allocation322_spill] sm:$0xff]  ;;  %2942 = vmatmul.f32.vlgmr.msra.gmra.mxu2 %v13637_v32 }
 0x5f5   : > { %2966 = vmatpush.msrb.mxu0 %v13843_v53  ;;  %v13844_v40 = vld [vmem:[#allocation450_spill] sm:$0xff] }
 0x5f6   : > { %3006 = vmatpush.msrb.mxu2 %v13844_v40  ;;  %v13845_v62 = vld [vmem:[#allocation74_spill] sm:$0xff] }
 0x5f7   : > { %2921 = vmatpush.msra.mxu1 %v13845_v62  ;;  %v13846_v44 = vld [vmem:[#allocation198_spill] sm:$0xff] }
 0x5f8   : > { %2961 = vmatpush.msra.mxu3 %v13846_v44  ;;  %v13847_v48 = vld [vmem:[#allocation318_spill] sm:$0xff]  ;;  %2922 = vmatmul.f32.vlgmr.msra.gmra.mxu1 %v13637_v32 }
 0x5f9   : > { %2967 = vmatpush.msrb.mxu0 %v13847_v48  ;;  %v13848_v39 = vld [vmem:[#allocation386_spill] sm:$0xff]  ;;  %2962 = vmatmul.f32.vlgmr.msra.gmra.mxu3 %v13637_v32 }
 0x5fa   : > { %2986 = vmatpush.msrb.mxu1 %v13848_v39  ;;  %v13849_v23 = vld [vmem:[#allocation446_spill] sm:$0xff]  ;;  %3026 = vmatpush.msrb.mxu3 %v9221_v31 }
 0x5fb   : > { %3007 = vmatpush.msrb.mxu2 %v13849_v23  ;;  %v13850_v55 = vld [vmem:[#allocation314_spill] sm:$0xff] }
 0x5fc   : > { %2968 = vmatpush.msrb.mxu0 %v13850_v55  ;;  %v13851_v46 = vld [vmem:[#allocation382_spill] sm:$0xff]  ;;  %3027 = vmatpush.msrb.mxu3 %v9213_v57 }
 0x5fd   : > { %2987 = vmatpush.msrb.mxu1 %v13851_v46  ;;  %v13852_v26 = vld [vmem:[#allocation442_spill] sm:$0xff] }
 0x5fe   : > { %3008 = vmatpush.msrb.mxu2 %v13852_v26  ;;  %v13853_v40 = vld [vmem:[#allocation310_spill] sm:$0xff]  ;;  %3028 = vmatpush.msrb.mxu3 %v9205_v3 }
 0x5ff   : > { %2969 = vmatpush.msrb.mxu0 %v13853_v40  ;;  %v13854_v62 = vld [vmem:[#allocation378_spill] sm:$0xff] }
 0x600   : > { %2988 = vmatpush.msrb.mxu1 %v13854_v62  ;;  %v13855_v44 = vld [vmem:[#allocation438_spill] sm:$0xff] }
 0x601   : > { %3009 = vmatpush.msrb.mxu2 %v13855_v44  ;;  %v13856_v39 = vld [vmem:[#allocation306_spill] sm:$0xff] }
 0x602   : > { %2970 = vmatpush.msrb.mxu0 %v13856_v39  ;;  %v13857_v23 = vld [vmem:[#allocation374_spill] sm:$0xff] }
 0x603   : > { %2989 = vmatpush.msrb.mxu1 %v13857_v23  ;;  %v13858_v31 = vld [vmem:[#allocation434_spill] sm:$0xff] }
 0x604   : > { %3010 = vmatpush.msrb.mxu2 %v13858_v31  ;;  %v13859_v55 = vld [vmem:[#allocation502_spill] sm:$0xff] }
 0x605   : > { %3029 = vmatpush.msrb.mxu3 %v13859_v55  ;;  %v13860_v46 = vld [vmem:[#allocation302_spill] sm:$0xff] }
 0x606   : > { %2971 = vmatpush.msrb.mxu0 %v13860_v46  ;;  %v13861_v26 = vld [vmem:[#allocation370_spill] sm:$0xff] }
 0x607   : > { %2990 = vmatpush.msrb.mxu1 %v13861_v26  ;;  %v13862_v57 = vld [vmem:[#allocation430_spill] sm:$0xff] }
 0x608   : > { %3011 = vmatpush.msrb.mxu2 %v13862_v57  ;;  %v13863_v40 = vld [vmem:[#allocation498_spill] sm:$0xff] }
 0x609   : > { %3030 = vmatpush.msrb.mxu3 %v13863_v40  ;;  %v13864_v62 = vld [vmem:[#allocation298_spill] sm:$0xff] }
 0x60a   : > { %2972 = vmatpush.msrb.mxu0 %v13864_v62  ;;  %v13865_v44 = vld [vmem:[#allocation366_spill] sm:$0xff] }
 0x60b   : > { %2991 = vmatpush.msrb.mxu1 %v13865_v44  ;;  %v13866_v3 = vld [vmem:[#allocation426_spill] sm:$0xff] }
 0x60c   : > { %3012 = vmatpush.msrb.mxu2 %v13866_v3  ;;  %v13867_v39 = vld [vmem:[#allocation494_spill] sm:$0xff] }
 0x60d   : > { %3031 = vmatpush.msrb.mxu3 %v13867_v39  ;;  %v13868_v23 = vld [vmem:[#allocation294_spill] sm:$0xff] }
 0x60e   : > { %2973 = vmatpush.msrb.mxu0 %v13868_v23  ;;  %v13869_v31 = vld [vmem:[#allocation362_spill] sm:$0xff] }
 0x60f   : > { %2992 = vmatpush.msrb.mxu1 %v13869_v31  ;;  %v13870_v55 = vld [vmem:[#allocation422_spill] sm:$0xff] }
 0x610   : > { %3013 = vmatpush.msrb.mxu2 %v13870_v55  ;;  %v13871_v46 = vld [vmem:[#allocation490_spill] sm:$0xff] }
 0x611   : > { %3032 = vmatpush.msrb.mxu3 %v13871_v46  ;;  %v13872_v26 = vld [vmem:[#allocation290_spill] sm:$0xff] }
 0x612   : > { %2974 = vmatpush.msrb.mxu0 %v13872_v26  ;;  %v13873_v57 = vld [vmem:[#allocation358_spill] sm:$0xff] }
 0x613   : > { %2993 = vmatpush.msrb.mxu1 %v13873_v57  ;;  %v13874_v40 = vld [vmem:[#allocation418_spill] sm:$0xff] }
 0x614   : > { %3014 = vmatpush.msrb.mxu2 %v13874_v40  ;;  %v13875_v62 = vld [vmem:[#allocation486_spill] sm:$0xff] }
 0x615   : > { %3033 = vmatpush.msrb.mxu3 %v13875_v62  ;;  %v13876_v44 = vld [vmem:[#allocation286_spill] sm:$0xff] }
 0x616   : > { %2975 = vmatpush.msrb.mxu0 %v13876_v44  ;;  %v13877_v3 = vld [vmem:[#allocation354_spill] sm:$0xff] }
 0x617   : > { %2994 = vmatpush.msrb.mxu1 %v13877_v3  ;;  %v13878_v39 = vld [vmem:[#allocation414_spill] sm:$0xff] }
 0x618   : > { %3015 = vmatpush.msrb.mxu2 %v13878_v39  ;;  %v13879_v23 = vld [vmem:[#allocation482_spill] sm:$0xff] }
 0x619   : > { %3034 = vmatpush.msrb.mxu3 %v13879_v23  ;;  %v13880_v31 = vld [vmem:[#allocation282_spill] sm:$0xff] }
 0x61a   : > { %2976 = vmatpush.msrb.mxu0 %v13880_v31  ;;  %v13881_v55 = vld [vmem:[#allocation350_spill] sm:$0xff] }
 0x61b   : > { %2995 = vmatpush.msrb.mxu1 %v13881_v55  ;;  %v13882_v46 = vld [vmem:[#allocation410_spill] sm:$0xff] }
 0x61c   : > { %3016 = vmatpush.msrb.mxu2 %v13882_v46  ;;  %v13883_v26 = vld [vmem:[#allocation478_spill] sm:$0xff] }
 0x61d   : > { %3035 = vmatpush.msrb.mxu3 %v13883_v26  ;;  %v13884_v57 = vld [vmem:[#allocation278_spill] sm:$0xff] }
 0x61e   : > { %2977 = vmatpush.msrb.mxu0 %v13884_v57  ;;  %v13885_v40 = vld [vmem:[#allocation346_spill] sm:$0xff] }
 0x61f   : > { %2996 = vmatpush.msrb.mxu1 %v13885_v40  ;;  %v13886_v62 = vld [vmem:[#allocation406_spill] sm:$0xff] }
 0x620   : > { %3017 = vmatpush.msrb.mxu2 %v13886_v62  ;;  %v13887_v44 = vld [vmem:[#allocation474_spill] sm:$0xff] }
 0x621   : > { %3036 = vmatpush.msrb.mxu3 %v13887_v44  ;;  %v13888_v39 = vld [vmem:[#allocation274_spill] sm:$0xff] }
 0x622   : > { %2978 = vmatpush.msrb.mxu0 %v13888_v39  ;;  %v13889_v23 = vld [vmem:[#allocation342_spill] sm:$0xff] }
 0x623   : > { %2997 = vmatpush.msrb.mxu1 %v13889_v23  ;;  %v13890_v31 = vld [vmem:[#allocation402_spill] sm:$0xff] }
 0x624   : > { %3018 = vmatpush.msrb.mxu2 %v13890_v31  ;;  %v13891_v55 = vld [vmem:[#allocation470_spill] sm:$0xff] }
 0x625   : > { %3037 = vmatpush.msrb.mxu3 %v13891_v55  ;;  %v13892_v57 = vld [vmem:[#allocation270_spill] sm:$0xff]  ;;  %v3106_v55 = vmul.f32 %v7643_v19, %v7643_v19  ;;  %v3170_v19 = vmul.f32 %v7883_v25, %v7883_v25  ;;  %v3162_v25 = vmul.f32 %v7853_v4, %v7853_v4 }
 0x626   : > { %2979 = vmatpush.msrb.mxu0 %v13892_v57  ;;  %v13893_v40 = vld [vmem:[#allocation338_spill] sm:$0xff] }
 0x627   : > { %2998 = vmatpush.msrb.mxu1 %v13893_v40  ;;  %v13894_v62 = vld [vmem:[#allocation398_spill] sm:$0xff]  ;;  %v3234_v40 = vmul.f32 %v8123_v1, %v8123_v1  ;;  %v3230_v1 = vmul.f32 %v8108_v17, %v8108_v17  ;;  %v3294_v17 = vmul.f32 %v8348_v30, %v8348_v30  ;;  %v3286_v30 = vmul.f32 %v8318_v16, %v8318_v16 }
 0x628   : > { %3019 = vmatpush.msrb.mxu2 %v13894_v62  ;;  %v13895_v44 = vld [vmem:[#allocation466_spill] sm:$0xff] }
 0x629   : > { %3038 = vmatpush.msrb.mxu3 %v13895_v44  ;;  %v13896_v39 = vld [vmem:[#allocation266_spill] sm:$0xff] }
 0x62a   : > { %2980 = vmatpush.msrb.mxu0 %v13896_v39  ;;  %v13897_v23 = vld [vmem:[#allocation334_spill] sm:$0xff] }
 0x62b   : > { %2999 = vmatpush.msrb.mxu1 %v13897_v23  ;;  %v13898_v31 = vld [vmem:[#allocation394_spill] sm:$0xff]  ;;  %v3102_v23 = vmul.f32 %v7628_v58, %v7628_v58  ;;  %v3098_v58 = vmul.f32 %v7613_v33, %v7613_v33 }
 0x62c   : > { %3020 = vmatpush.msrb.mxu2 %v13898_v31  ;;  %v13899_v26 = vld [vmem:[#allocation462_spill] sm:$0xff] }
 0x62d   : > { %3039 = vmatpush.msrb.mxu3 %v13899_v26  ;;  %v13900_v57 = vld [vmem:[#allocation262_spill] sm:$0xff] }
 0x62e   : > { %2981 = vmatpush.msrb.mxu0 %v13900_v57  ;;  %v13901_v62 = vld [vmem:[#allocation330_spill] sm:$0xff] }
 0x62f   : > { %3000 = vmatpush.msrb.mxu1 %v13901_v62  ;;  %v13902_v44 = vld [vmem:[#allocation390_spill] sm:$0xff]  ;;  %2982 = vmatmul.f32.vlgmr.msrb.gmra.mxu0 %v13637_v32 }
 0x630   : > { %3021 = vmatpush.msrb.mxu2 %v13902_v44  ;;  %v13903_v46 = vld [vmem:[#allocation458_spill] sm:$0xff]  ;;  %3558 = vmatpush.msra.mxu0 %v3106_v55  ;;  %v3298_v44 = vmul.f32 %v8363_v24, %v8363_v24  ;;  %v3166_v55 = vmul.f32 %v7868_v42, %v7868_v42  ;;  %v3094_v24 = vmul.f32 %v7598_v20, %v7598_v20 }
 0x631   : > { %3040 = vmatpush.msrb.mxu3 %v13903_v46  ;;  %3022 = vmatmul.f32.vlgmr.msrb.gmra.mxu2 %v13637_v32  ;;  %v13904_v57 = vld [vmem:[#allocation326_spill] sm:$0xff] }
 0x632   : > { %3598 = vmatpush.msra.mxu2 %v3234_v40  ;;  %3001 = vmatpush.msrb.mxu1 %v13904_v57  ;;  %v13905_v62 = vld [vmem:[#allocation454_spill] sm:$0xff]  ;;  %v3226_v40 = vmul.f32 %v8093_v6, %v8093_v6  ;;  %v3290_v6 = vmul.f32 %v8333_v37, %v8333_v37  ;;  %v13906_v37 = vld [vmem:[#allocation32_spill] sm:$0xff] }
 0x633   : > { %3041 = vmatpush.msrb.mxu3 %v13905_v62  ;;  %3559 = vmatpush.msra.mxu0 %v3102_v23  ;;  %v3222_v23 = vmul.f32 %v8078_v51, %v8078_v51  ;;  %v14015_v51 = vld [vmem:[#allocation236_spill] sm:$0xff] }
 0x634   : > { %3042 = vmatmul.f32.vlgmr.msrb.gmra.mxu3 %v13637_v32  ;;  %3578 = vmatpush.msra.mxu1 %v3170_v19  ;;  %v3158_v19 = vmul.f32 %v7838_v22, %v7838_v22 }
 0x635   : > { %3599 = vmatpush.msra.mxu2 %v3230_v1  ;;  %3618 = vmatpush.msra.mxu3 %v3298_v44  ;;  %v3090_v1 = vmul.f32 %v7583_v15, %v7583_v15  ;;  %v3218_v44 = vmul.f32 %v8063_v61, %v8063_v61 }
 0x636   : > { %3002 = vmatmul.f32.vlgmr.msrb.gmra.mxu1 %v13637_v32  ;;  %3560 = vmatpush.msra.mxu0 %v3098_v58  ;;  %v3086_v58 = vmul.f32 %v7568_v10, %v7568_v10 }
 0x637   : > { %3579 = vmatpush.msra.mxu1 %v3166_v55  ;;  %3600 = vmatpush.msra.mxu2 %v3226_v40  ;;  %v3154_v55 = vmul.f32 %v7823_v12, %v7823_v12  ;;  %v3214_v40 = vmul.f32 %v8048_v60, %v8048_v60  ;;  %v14019_v60 = vld [vmem:[#allocation232_spill] sm:$0xff] }
 0x638   : > { %3619 = vmatpush.msra.mxu3 %v3294_v17  ;;  %3561 = vmatpush.msra.mxu0 %v3094_v24  ;;  %v3282_v17 = vmul.f32 %v8303_v28, %v8303_v28  ;;  %v3082_v24 = vmul.f32 %v7553_v5, %v7553_v5  ;;  %v13908_v28 = vld [vmem:[#allocation147_spill] sm:$0xff] }
 0x639   : > { %3580 = vmatpush.msra.mxu1 %v3162_v25  ;;  %3601 = vmatpush.msra.mxu2 %v3222_v23  ;;  %v3150_v25 = vmul.f32 %v7808_v2, %v7808_v2  ;;  %v3210_v23 = vmul.f32 %v8033_v18, %v8033_v18  ;;  %v14021_v18 = vld [vmem:[#allocation101_spill] sm:$0xff] }
 0x63a   : > { %3620 = vmatpush.msra.mxu3 %v3290_v6  ;;  %3562 = vmatpush.msra.mxu0 %v3090_v1  ;;  %v3278_v6 = vmul.f32 %v8288_v43, %v8288_v43  ;;  %v3078_v1 = vmul.f32 %v7538_v0, %v7538_v0 }
 0x63b   : > { %3581 = vmatpush.msra.mxu1 %v3158_v19  ;;  %3602 = vmatpush.msra.mxu2 %v3218_v44  ;;  %v3146_v19 = vmul.f32 %v7793_v56, %v7793_v56  ;;  %v3206_v44 = vmul.f32 %v8018_v50, %v8018_v50 }
 0x63c   : > { %3621 = vmatpush.msra.mxu3 %v3286_v30  ;;  %3563 = vmatpush.msra.mxu0 %v3086_v58  ;;  %v3274_v30 = vmul.f32 %v8273_v63, %v8273_v63  ;;  %v3074_v58 = vmul.f32 %v7523_v59, %v7523_v59  ;;  %v13910_v63 = vld [vmem:[#allocation28_spill] sm:$0xff] }
 0x63d   : > { %3582 = vmatpush.msra.mxu1 %v3154_v55  ;;  %3603 = vmatpush.msra.mxu2 %v3214_v40  ;;  %v3142_v55 = vmul.f32 %v7778_v9, %v7778_v9  ;;  %v3202_v40 = vmul.f32 %v8003_v36, %v8003_v36 }
 0x63e   : > { %3622 = vmatpush.msra.mxu3 %v3282_v17  ;;  %3564 = vmatpush.msra.mxu0 %v3082_v24  ;;  %v3270_v17 = vmul.f32 %v8258_v13, %v8258_v13  ;;  %v3070_v24 = vmul.f32 %v7508_v54, %v7508_v54 }
 0x63f   : > { %3583 = vmatpush.msra.mxu1 %v3150_v25  ;;  %3604 = vmatpush.msra.mxu2 %v3210_v23  ;;  %v3138_v25 = vmul.f32 %v7763_v41, %v7763_v41  ;;  %v3198_v23 = vmul.f32 %v7988_v45, %v7988_v45 }
 0x640   : > { %3623 = vmatpush.msra.mxu3 %v3278_v6  ;;  %3565 = vmatpush.msra.mxu0 %v3078_v1  ;;  %v3266_v6 = vmul.f32 %v8243_v11, %v8243_v11  ;;  %v3066_v1 = vmul.f32 %v7493_v49, %v7493_v49 }
 0x641   : > { %3584 = vmatpush.msra.mxu1 %v3146_v19  ;;  %3605 = vmatpush.msra.mxu2 %v3206_v44  ;;  %v3134_v19 = vmul.f32 %v7748_v47, %v7748_v47  ;;  %v3194_v44 = vmul.f32 %v7973_v52, %v7973_v52 }
 0x642   : > { %3624 = vmatpush.msra.mxu3 %v3274_v30  ;;  %3566 = vmatpush.msra.mxu0 %v3074_v58  ;;  %v3262_v30 = vmul.f32 %v8228_v38, %v8228_v38  ;;  %v3062_v58 = vmul.f32 %v13906_v37, %v13906_v37  ;;  %v13912_v37 = vld [vmem:[#allocation143_spill] sm:$0xff] }
 0x643   : > { %3585 = vmatpush.msra.mxu1 %v3142_v55  ;;  %3606 = vmatpush.msra.mxu2 %v3202_v40  ;;  %v13907_v55 = vld [vmem:[#allocation91_spill] sm:$0xff]  ;;  %v3190_v40 = vmul.f32 %v13908_v28, %v13908_v28  ;;  %v13914_v28 = vld [vmem:[#allocation24_spill] sm:$0xff] }
 0x644   : > { %3625 = vmatpush.msra.mxu3 %v3270_v17  ;;  %3567 = vmatpush.msra.mxu0 %v3070_v24  ;;  %v3130_v16 = vmul.f32 %v13907_v55, %v13907_v55  ;;  %v13909_v17 = vld [vmem:[#allocation215_spill] sm:$0xff]  ;;  %v3058_v24 = vmul.f32 %v13910_v63, %v13910_v63 }
 0x645   : > { %3586 = vmatpush.msra.mxu1 %v3138_v25  ;;  %3607 = vmatpush.msra.mxu2 %v3198_v23  ;;  %v3258_v43 = vmul.f32 %v13909_v17, %v13909_v17  ;;  %v13911_v25 = vld [vmem:[#allocation87_spill] sm:$0xff]  ;;  %v3186_v23 = vmul.f32 %v13912_v37, %v13912_v37  ;;  %v13918_v37 = vld [vmem:[#allocation20_spill] sm:$0xff] }
 0x646   : > { %3626 = vmatpush.msra.mxu3 %v3266_v6  ;;  %3568 = vmatpush.msra.mxu0 %v3066_v1  ;;  %v3126_v13 = vmul.f32 %v13911_v25, %v13911_v25  ;;  %v13913_v6 = vld [vmem:[#allocation211_spill] sm:$0xff]  ;;  %v3054_v1 = vmul.f32 %v13914_v28, %v13914_v28 }
 0x647   : > { %3587 = vmatpush.msra.mxu1 %v3134_v19  ;;  %3608 = vmatpush.msra.mxu2 %v3194_v44  ;;  %v3254_v55 = vmul.f32 %v13913_v6, %v13913_v6  ;;  %v13915_v19 = vld [vmem:[#allocation83_spill] sm:$0xff] }
 0x648   : > { %3627 = vmatpush.msra.mxu3 %v3262_v30  ;;  %3569 = vmatpush.msra.mxu0 %v3062_v58  ;;  %v3122_v17 = vmul.f32 %v13915_v19, %v13915_v19  ;;  %v13916_v63 = vld [vmem:[#allocation139_spill] sm:$0xff]  ;;  %v3050_v58 = vmul.f32 %v13918_v37, %v13918_v37 }
 0x649   : > { %3588 = vmatpush.msra.mxu1 %v3130_v16  ;;  %3609 = vmatpush.msra.mxu2 %v3190_v40  ;;  %v3182_v44 = vmul.f32 %v13916_v63, %v13916_v63  ;;  %v13917_v30 = vld [vmem:[#allocation207_spill] sm:$0xff] }
 0x64a   : > { %3628 = vmatpush.msra.mxu3 %v3258_v43  ;;  %v3250_v25 = vmul.f32 %v13917_v30, %v13917_v30  ;;  %3570 = vmatpush.msra.mxu0 %v3058_v24  ;;  %v13919_v16 = vld [vmem:[#allocation79_spill] sm:$0xff]  ;;  %v3046_v24 = vmul.f32 %v13464_v14, %v13464_v14 }
 0x64b   : > { %3589 = vmatpush.msra.mxu1 %v3126_v13  ;;  %v3118_v6 = vmul.f32 %v13919_v16, %v13919_v16  ;;  %3610 = vmatpush.msra.mxu2 %v3186_v23  ;;  %v13920_v28 = vld [vmem:[#allocation135_spill] sm:$0xff] }
 0x64c   : > { %3629 = vmatpush.msra.mxu3 %v3254_v55  ;;  %v3178_v40 = vmul.f32 %v13920_v28, %v13920_v28  ;;  %v13921_v43 = vld [vmem:[#allocation203_spill] sm:$0xff]  ;;  %3571 = vmatpush.msra.mxu0 %v3054_v1  ;;  %v3362_v1 = vmul.f32 %v13466_v21, %v13466_v21 }
 0x64d   : > { %v3246_v19 = vmul.f32 %v13921_v43, %v13921_v43  ;;  %3590 = vmatpush.msra.mxu1 %v3122_v17  ;;  %v13922_v13 = vld [vmem:[#allocation75_spill] sm:$0xff]  ;;  %3611 = vmatpush.msra.mxu2 %v3182_v44 }
 0x64e   : > { %v3114_v63 = vmul.f32 %v13922_v13, %v13922_v13  ;;  %3630 = vmatpush.msra.mxu3 %v3250_v25  ;;  %v13923_v30 = vld [vmem:[#allocation131_spill] sm:$0xff]  ;;  %3572 = vmatpush.msra.mxu0 %v3050_v58 }
 0x64f   : > { %v3174_v23 = vmul.f32 %v13923_v30, %v13923_v30  ;;  %v13924_v55 = vld [vmem:[#allocation199_spill] sm:$0xff]  ;;  %3591 = vmatpush.msra.mxu1 %v3118_v6  ;;  %3612 = vmatpush.msra.mxu2 %v3178_v40 }
 0x650   : > { %v3242_v37 = vmul.f32 %v13924_v55, %v13924_v55  ;;  %v13925_v17 = vld [vmem:[#allocation447_spill] sm:$0xff]  ;;  %3631 = vmatpush.msra.mxu3 %v3246_v19  ;;  %3573 = vmatpush.msra.mxu0 %v3046_v24 }
 0x651   : > { %v3490_v16 = vmul.f32 %v13925_v17, %v13925_v17  ;;  %v13926_v14 = vld [vmem:[#allocation71_spill] sm:$0xff]  ;;  %3592 = vmatpush.msra.mxu1 %v3114_v63  ;;  %3613 = vmatpush.msra.mxu2 %v3174_v23 }
 0x652   : > { %v3110_v44 = vmul.f32 %v13926_v14, %v13926_v14  ;;  %v13927_v25 = vld [vmem:[#allocation195_spill] sm:$0xff]  ;;  %3632 = vmatpush.msra.mxu3 %v3242_v37  ;;  %3638 = vmatpush.msrb.mxu0 %v3362_v1 }
 0x653   : > { %v3238_v28 = vmul.f32 %v13927_v25, %v13927_v25  ;;  %v13928_v43 = vld [vmem:[#allocation315_spill] sm:$0xff]  ;;  %3678 = vmatpush.msrb.mxu2 %v3490_v16  ;;  %3574 = vmatmul.f32.vlgmr.msra.gmra.mxu0 %v13637_v32 }
 0x654   : > { %v3358_v58 = vmul.f32 %v13928_v43, %v13928_v43  ;;  %v13929_v6 = vld [vmem:[#allocation383_spill] sm:$0xff]  ;;  %3593 = vmatpush.msra.mxu1 %v3110_v44  ;;  %3614 = vmatmul.f32.vlgmr.msra.gmra.mxu2 %v13637_v32 }
 0x655   : > { %v3426_v13 = vmul.f32 %v13929_v6, %v13929_v6  ;;  %v13930_v21 = vld [vmem:[#allocation443_spill] sm:$0xff]  ;;  %3633 = vmatpush.msra.mxu3 %v3238_v28  ;;  %3594 = vmatmul.f32.vlgmr.msra.gmra.mxu1 %v13637_v32 }
 0x656   : > { %v3486_v40 = vmul.f32 %v13930_v21, %v13930_v21  ;;  %v13931_v19 = vld [vmem:[#allocation511_spill] sm:$0xff]  ;;  %3639 = vmatpush.msrb.mxu0 %v3358_v58  ;;  %3634 = vmatmul.f32.vlgmr.msra.gmra.mxu3 %v13637_v32 }
 0x657   : > { %v3554_v30 = vmul.f32 %v13931_v19, %v13931_v19  ;;  %v13932_v55 = vld [vmem:[#allocation311_spill] sm:$0xff]  ;;  %3658 = vmatpush.msrb.mxu1 %v3426_v13 }
 0x658   : > { %v3354_v24 = vmul.f32 %v13932_v55, %v13932_v55  ;;  %v13933_v63 = vld [vmem:[#allocation379_spill] sm:$0xff]  ;;  %3679 = vmatpush.msrb.mxu2 %v3486_v40 }
 0x659   : > { %v3422_v17 = vmul.f32 %v13933_v63, %v13933_v63  ;;  %v13934_v14 = vld [vmem:[#allocation439_spill] sm:$0xff]  ;;  %3698 = vmatpush.msrb.mxu3 %v3554_v30 }
 0x65a   : > { %v3482_v23 = vmul.f32 %v13934_v14, %v13934_v14  ;;  %v13935_v37 = vld [vmem:[#allocation507_spill] sm:$0xff]  ;;  %3640 = vmatpush.msrb.mxu0 %v3354_v24 }
 0x65b   : > { %v3550_v25 = vmul.f32 %v13935_v37, %v13935_v37  ;;  %v13936_v43 = vld [vmem:[#allocation307_spill] sm:$0xff]  ;;  %3659 = vmatpush.msrb.mxu1 %v3422_v17 }
 0x65c   : > { %v3350_v1 = vmul.f32 %v13936_v43, %v13936_v43  ;;  %v13937_v16 = vld [vmem:[#allocation375_spill] sm:$0xff]  ;;  %3680 = vmatpush.msrb.mxu2 %v3482_v23 }
 0x65d   : > { %v3418_v6 = vmul.f32 %v13937_v16, %v13937_v16  ;;  %v13938_v21 = vld [vmem:[#allocation435_spill] sm:$0xff]  ;;  %3699 = vmatpush.msrb.mxu3 %v3550_v25 }
 0x65e   : > { %v3478_v44 = vmul.f32 %v13938_v21, %v13938_v21  ;;  %v13939_v28 = vld [vmem:[#allocation503_spill] sm:$0xff]  ;;  %3641 = vmatpush.msrb.mxu0 %v3350_v1 }
 0x65f   : > { %v3546_v19 = vmul.f32 %v13939_v28, %v13939_v28  ;;  %v13940_v55 = vld [vmem:[#allocation303_spill] sm:$0xff]  ;;  %3660 = vmatpush.msrb.mxu1 %v3418_v6 }
 0x660   : > { %v3346_v58 = vmul.f32 %v13940_v55, %v13940_v55  ;;  %v13941_v13 = vld [vmem:[#allocation371_spill] sm:$0xff]  ;;  %3681 = vmatpush.msrb.mxu2 %v3478_v44 }
 0x661   : > { %v3414_v63 = vmul.f32 %v13941_v13, %v13941_v13  ;;  %v13942_v14 = vld [vmem:[#allocation431_spill] sm:$0xff]  ;;  %3700 = vmatpush.msrb.mxu3 %v3546_v19 }
 0x662   : > { %v3474_v40 = vmul.f32 %v13942_v14, %v13942_v14  ;;  %v13943_v30 = vld [vmem:[#allocation499_spill] sm:$0xff]  ;;  %3642 = vmatpush.msrb.mxu0 %v3346_v58 }
 0x663   : > { %v3542_v37 = vmul.f32 %v13943_v30, %v13943_v30  ;;  %v13944_v43 = vld [vmem:[#allocation299_spill] sm:$0xff]  ;;  %3661 = vmatpush.msrb.mxu1 %v3414_v63 }
 0x664   : > { %v3342_v24 = vmul.f32 %v13944_v43, %v13944_v43  ;;  %v13945_v17 = vld [vmem:[#allocation367_spill] sm:$0xff]  ;;  %3682 = vmatpush.msrb.mxu2 %v3474_v40 }
 0x665   : > { %v3410_v16 = vmul.f32 %v13945_v17, %v13945_v17  ;;  %v13946_v21 = vld [vmem:[#allocation427_spill] sm:$0xff]  ;;  %3701 = vmatpush.msrb.mxu3 %v3542_v37 }
 0x666   : > { %v3470_v23 = vmul.f32 %v13946_v21, %v13946_v21  ;;  %v13947_v25 = vld [vmem:[#allocation495_spill] sm:$0xff]  ;;  %3643 = vmatpush.msrb.mxu0 %v3342_v24 }
 0x667   : > { %v3538_v28 = vmul.f32 %v13947_v25, %v13947_v25  ;;  %v13948_v55 = vld [vmem:[#allocation295_spill] sm:$0xff]  ;;  %3662 = vmatpush.msrb.mxu1 %v3410_v16 }
 0x668   : > { %v3338_v1 = vmul.f32 %v13948_v55, %v13948_v55  ;;  %v13949_v6 = vld [vmem:[#allocation363_spill] sm:$0xff]  ;;  %3683 = vmatpush.msrb.mxu2 %v3470_v23 }
 0x669   : > { %v3406_v13 = vmul.f32 %v13949_v6, %v13949_v6  ;;  %v13950_v14 = vld [vmem:[#allocation423_spill] sm:$0xff]  ;;  %3702 = vmatpush.msrb.mxu3 %v3538_v28 }
 0x66a   : > { %v3466_v44 = vmul.f32 %v13950_v14, %v13950_v14  ;;  %v13951_v19 = vld [vmem:[#allocation491_spill] sm:$0xff]  ;;  %3644 = vmatpush.msrb.mxu0 %v3338_v1 }
 0x66b   : > { %v3534_v30 = vmul.f32 %v13951_v19, %v13951_v19  ;;  %v13952_v43 = vld [vmem:[#allocation291_spill] sm:$0xff]  ;;  %3663 = vmatpush.msrb.mxu1 %v3406_v13 }
 0x66c   : > { %v3334_v58 = vmul.f32 %v13952_v43, %v13952_v43  ;;  %v13953_v63 = vld [vmem:[#allocation359_spill] sm:$0xff]  ;;  %3684 = vmatpush.msrb.mxu2 %v3466_v44 }
 0x66d   : > { %v3402_v17 = vmul.f32 %v13953_v63, %v13953_v63  ;;  %v13954_v21 = vld [vmem:[#allocation419_spill] sm:$0xff]  ;;  %3703 = vmatpush.msrb.mxu3 %v3534_v30 }
 0x66e   : > { %v3462_v40 = vmul.f32 %v13954_v21, %v13954_v21  ;;  %v13955_v37 = vld [vmem:[#allocation487_spill] sm:$0xff]  ;;  %3645 = vmatpush.msrb.mxu0 %v3334_v58 }
 0x66f   : > { %v3530_v25 = vmul.f32 %v13955_v37, %v13955_v37  ;;  %v13956_v55 = vld [vmem:[#allocation287_spill] sm:$0xff]  ;;  %3664 = vmatpush.msrb.mxu1 %v3402_v17 }
 0x670   : > { %v3330_v24 = vmul.f32 %v13956_v55, %v13956_v55  ;;  %v13957_v16 = vld [vmem:[#allocation355_spill] sm:$0xff]  ;;  %3685 = vmatpush.msrb.mxu2 %v3462_v40 }
 0x671   : > { %v3398_v6 = vmul.f32 %v13957_v16, %v13957_v16  ;;  %v13958_v14 = vld [vmem:[#allocation415_spill] sm:$0xff]  ;;  %3704 = vmatpush.msrb.mxu3 %v3530_v25 }
 0x672   : > { %v3458_v23 = vmul.f32 %v13958_v14, %v13958_v14  ;;  %v13959_v28 = vld [vmem:[#allocation483_spill] sm:$0xff]  ;;  %3646 = vmatpush.msrb.mxu0 %v3330_v24 }
 0x673   : > { %v3526_v19 = vmul.f32 %v13959_v28, %v13959_v28  ;;  %v13960_v43 = vld [vmem:[#allocation283_spill] sm:$0xff]  ;;  %3665 = vmatpush.msrb.mxu1 %v3398_v6 }
 0x674   : > { %v3326_v1 = vmul.f32 %v13960_v43, %v13960_v43  ;;  %v13961_v13 = vld [vmem:[#allocation351_spill] sm:$0xff]  ;;  %3686 = vmatpush.msrb.mxu2 %v3458_v23 }
 0x675   : > { %v3394_v63 = vmul.f32 %v13961_v13, %v13961_v13  ;;  %v13962_v21 = vld [vmem:[#allocation411_spill] sm:$0xff]  ;;  %3705 = vmatpush.msrb.mxu3 %v3526_v19 }
 0x676   : > { %v3454_v44 = vmul.f32 %v13962_v21, %v13962_v21  ;;  %v13963_v30 = vld [vmem:[#allocation479_spill] sm:$0xff]  ;;  %3647 = vmatpush.msrb.mxu0 %v3326_v1 }
 0x677   : > { %v3522_v37 = vmul.f32 %v13963_v30, %v13963_v30  ;;  %v13964_v55 = vld [vmem:[#allocation279_spill] sm:$0xff]  ;;  %3666 = vmatpush.msrb.mxu1 %v3394_v63 }
 0x678   : > { %v3322_v58 = vmul.f32 %v13964_v55, %v13964_v55  ;;  %v13965_v17 = vld [vmem:[#allocation347_spill] sm:$0xff]  ;;  %3687 = vmatpush.msrb.mxu2 %v3454_v44 }
 0x679   : > { %v3390_v16 = vmul.f32 %v13965_v17, %v13965_v17  ;;  %v13966_v14 = vld [vmem:[#allocation407_spill] sm:$0xff]  ;;  %3706 = vmatpush.msrb.mxu3 %v3522_v37 }
 0x67a   : > { %v3450_v40 = vmul.f32 %v13966_v14, %v13966_v14  ;;  %v13967_v25 = vld [vmem:[#allocation475_spill] sm:$0xff]  ;;  %3648 = vmatpush.msrb.mxu0 %v3322_v58 }
 0x67b   : > { %v3518_v28 = vmul.f32 %v13967_v25, %v13967_v25  ;;  %v13968_v43 = vld [vmem:[#allocation275_spill] sm:$0xff]  ;;  %3667 = vmatpush.msrb.mxu1 %v3390_v16 }
 0x67c   : > { %v3318_v24 = vmul.f32 %v13968_v43, %v13968_v43  ;;  %v13969_v6 = vld [vmem:[#allocation343_spill] sm:$0xff]  ;;  %3688 = vmatpush.msrb.mxu2 %v3450_v40 }
 0x67d   : > { %v3386_v13 = vmul.f32 %v13969_v6, %v13969_v6  ;;  %v13970_v21 = vld [vmem:[#allocation403_spill] sm:$0xff]  ;;  %3707 = vmatpush.msrb.mxu3 %v3518_v28 }
 0x67e   : > { %v3446_v23 = vmul.f32 %v13970_v21, %v13970_v21  ;;  %v13971_v19 = vld [vmem:[#allocation471_spill] sm:$0xff]  ;;  %3649 = vmatpush.msrb.mxu0 %v3318_v24 }
 0x67f   : > { %v3514_v30 = vmul.f32 %v13971_v19, %v13971_v19  ;;  %v13972_v55 = vld [vmem:[#allocation271_spill] sm:$0xff]  ;;  %3668 = vmatpush.msrb.mxu1 %v3386_v13 }
 0x680   : > { %v3314_v1 = vmul.f32 %v13972_v55, %v13972_v55  ;;  %v13973_v63 = vld [vmem:[#allocation339_spill] sm:$0xff]  ;;  %3689 = vmatpush.msrb.mxu2 %v3446_v23 }
 0x681   : > { %v3382_v17 = vmul.f32 %v13973_v63, %v13973_v63  ;;  %v13974_v14 = vld [vmem:[#allocation399_spill] sm:$0xff]  ;;  %3708 = vmatpush.msrb.mxu3 %v3514_v30 }
 0x682   : > { %v3442_v44 = vmul.f32 %v13974_v14, %v13974_v14  ;;  %v13975_v37 = vld [vmem:[#allocation467_spill] sm:$0xff]  ;;  %3650 = vmatpush.msrb.mxu0 %v3314_v1 }
 0x683   : > { %v3510_v25 = vmul.f32 %v13975_v37, %v13975_v37  ;;  %v13976_v43 = vld [vmem:[#allocation267_spill] sm:$0xff]  ;;  %3669 = vmatpush.msrb.mxu1 %v3382_v17 }
 0x684   : > { %v3310_v58 = vmul.f32 %v13976_v43, %v13976_v43  ;;  %v13977_v16 = vld [vmem:[#allocation335_spill] sm:$0xff]  ;;  %3690 = vmatpush.msrb.mxu2 %v3442_v44 }
 0x685   : > { %v3378_v6 = vmul.f32 %v13977_v16, %v13977_v16  ;;  %v13978_v21 = vld [vmem:[#allocation395_spill] sm:$0xff]  ;;  %3709 = vmatpush.msrb.mxu3 %v3510_v25 }
 0x686   : > { %v3438_v40 = vmul.f32 %v13978_v21, %v13978_v21  ;;  %v13979_v28 = vld [vmem:[#allocation463_spill] sm:$0xff]  ;;  %3651 = vmatpush.msrb.mxu0 %v3310_v58  ;;  %v13988_v58 = vld [vmem:[#allocation68_spill] sm:$0xff] }
 0x687   : > { %v3506_v19 = vmul.f32 %v13979_v28, %v13979_v28  ;;  %v13980_v55 = vld [vmem:[#allocation263_spill] sm:$0xff]  ;;  %3670 = vmatpush.msrb.mxu1 %v3378_v6  ;;  %v3107_v6 = vmul.f32 %v13988_v58, %v13988_v58 }
 0x688   : > { %v3306_v24 = vmul.f32 %v13980_v55, %v13980_v55  ;;  %v13981_v13 = vld [vmem:[#allocation331_spill] sm:$0xff]  ;;  %3691 = vmatpush.msrb.mxu2 %v3438_v40  ;;  %v10020_v55 = vpop.f32.mrf.mxu0  ;;  %v13989_v40 = vld [vmem:[#allocation192_spill] sm:$0xff] }
 0x689   : > { %v3374_v63 = vmul.f32 %v13981_v13, %v13981_v13  ;;  %v13982_v14 = vld [vmem:[#allocation391_spill] sm:$0xff]  ;;  %3710 = vmatpush.msrb.mxu3 %v3506_v19  ;;  %v3235_v19 = vmul.f32 %v13989_v40, %v13989_v40  ;;  %v13997_v40 = vld [vmem:[#allocation124_spill] sm:$0xff] }
 0x68a   : > { %v3434_v23 = vmul.f32 %v13982_v14, %v13982_v14  ;;  %v13983_v30 = vld [vmem:[#allocation459_spill] sm:$0xff]  ;;  %3652 = vmatpush.msrb.mxu0 %v3306_v24 }
 0x68b   : > { %v3502_v37 = vmul.f32 %v13983_v30, %v13983_v30  ;;  %v13984_v43 = vld [vmem:[#allocation259_spill] sm:$0xff]  ;;  %3671 = vmatpush.msrb.mxu1 %v3374_v63  ;;  %v10031_v30 = vpop.f32.mrf.mxu1 }
 0x68c   : > { %v3302_v1 = vmul.f32 %v13984_v43, %v13984_v43  ;;  %v13985_v17 = vld [vmem:[#allocation327_spill] sm:$0xff]  ;;  %3692 = vmatpush.msrb.mxu2 %v3434_v23  ;;  %v13992_v23 = vld [vmem:[#allocation64_spill] sm:$0xff] }
 0x68d   : > { %v3370_v16 = vmul.f32 %v13985_v17, %v13985_v17  ;;  %v13986_v21 = vld [vmem:[#allocation387_spill] sm:$0xff]  ;;  %3711 = vmatpush.msrb.mxu3 %v3502_v37  ;;  %v3103_v37 = vmul.f32 %v13992_v23, %v13992_v23  ;;  %v13993_v43 = vld [vmem:[#allocation128_spill] sm:$0xff]  ;;  %v10038_v17 = vpop.f32.mrf.mxu2 }
 0x68e   : > { %v3430_v44 = vmul.f32 %v13986_v21, %v13986_v21  ;;  %v13987_v25 = vld [vmem:[#allocation455_spill] sm:$0xff]  ;;  %3653 = vmatpush.msrb.mxu0 %v3302_v1  ;;  %v3171_v1 = vmul.f32 %v13993_v43, %v13993_v43  ;;  %v13999_v23 = vld [vmem:[#allocation252_spill] sm:$0xff] }
 0x68f   : > { %v3498_v28 = vmul.f32 %v13987_v25, %v13987_v25  ;;  %v13990_v13 = vld [vmem:[#allocation323_spill] sm:$0xff]  ;;  %3672 = vmatpush.msrb.mxu1 %v3370_v16  ;;  %v13994_v16 = vld [vmem:[#allocation188_spill] sm:$0xff]  ;;  %v3295_v43 = vmul.f32 %v13999_v23, %v13999_v23  ;;  %3654 = vmatmul.f32.vlgmr.msrb.gmra.mxu0 %v13637_v32 }
 0x690   : > { %v3366_v24 = vmul.f32 %v13990_v13, %v13990_v13  ;;  %3693 = vmatpush.msrb.mxu2 %v3430_v44  ;;  %v13991_v63 = vld [vmem:[#allocation451_spill] sm:$0xff]  ;;  %3718 = vmatpush.msra.mxu0 %v3107_v6  ;;  %v3231_v21 = vmul.f32 %v13994_v16, %v13994_v16  ;;  %v13995_v44 = vld [vmem:[#allocation256_spill] sm:$0xff]  ;;  %v3167_v13 = vmul.f32 %v13997_v40, %v13997_v40  ;;  %v10054_v16 = vpop.f32.mrf.mxu3  ;;  %v10064_v11 = vpop.f32.mrf.mxu0 }
 0x691   : > { %v3494_v14 = vmul.f32 %v13991_v63, %v13991_v63  ;;  %3712 = vmatpush.msrb.mxu3 %v3498_v28  ;;  %v3299_v25 = vmul.f32 %v13995_v44, %v13995_v44  ;;  %v13996_v28 = vld [vmem:[#allocation60_spill] sm:$0xff]  ;;  %3694 = vmatmul.f32.vlgmr.msrb.gmra.mxu2 %v13637_v32 }
 0x692   : > { %3758 = vmatpush.msra.mxu2 %v3235_v19  ;;  %3673 = vmatpush.msrb.mxu1 %v3366_v24  ;;  %v3099_v58 = vmul.f32 %v13996_v28, %v13996_v28  ;;  %v13998_v63 = vld [vmem:[#allocation184_spill] sm:$0xff]  ;;  %v14000_v19 = vld [vmem:[#allocation57_spill] sm:$0xff] }
 0x693   : > { %3713 = vmatpush.msrb.mxu3 %v3494_v14  ;;  %v3227_v6 = vmul.f32 %v13998_v63, %v13998_v63  ;;  %3719 = vmatpush.msra.mxu0 %v3103_v37  ;;  %v3095_v24 = vmul.f32 %v14000_v19, %v14000_v19  ;;  %v14001_v44 = vld [vmem:[#allocation120_spill] sm:$0xff]  ;;  %v14004_v37 = vld [vmem:[#allocation54_spill] sm:$0xff] }
 0x694   : > { %3738 = vmatpush.msra.mxu1 %v3171_v1  ;;  %3759 = vmatpush.msra.mxu2 %v3231_v21  ;;  %v3163_v14 = vmul.f32 %v14001_v44, %v14001_v44  ;;  %v14002_v28 = vld [vmem:[#allocation180_spill] sm:$0xff]  ;;  %v3091_v1 = vmul.f32 %v14004_v37, %v14004_v37 }
 0x695   : > { %3778 = vmatpush.msra.mxu3 %v3299_v25  ;;  %v3223_v40 = vmul.f32 %v14002_v28, %v14002_v28  ;;  %3720 = vmatpush.msra.mxu0 %v3099_v58  ;;  %v14003_v63 = vld [vmem:[#allocation248_spill] sm:$0xff]  ;;  %v10075_v28 = vpop.f32.mrf.mxu1  ;;  %v10082_v37 = vpop.f32.mrf.mxu2 }
 0x696   : > { %3739 = vmatpush.msra.mxu1 %v3167_v13  ;;  %v3291_v23 = vmul.f32 %v14003_v63, %v14003_v63  ;;  %3760 = vmatpush.msra.mxu2 %v3227_v6  ;;  %v14005_v21 = vld [vmem:[#allocation116_spill] sm:$0xff]  ;;  %v14008_v6 = vld [vmem:[#allocation51_spill] sm:$0xff] }
 0x697   : > { %3779 = vmatpush.msra.mxu3 %v3295_v43  ;;  %3721 = vmatpush.msra.mxu0 %v3095_v24  ;;  %v3159_v25 = vmul.f32 %v14005_v21, %v14005_v21  ;;  %v14006_v19 = vld [vmem:[#allocation176_spill] sm:$0xff]  ;;  %v3087_v43 = vmul.f32 %v14008_v6, %v14008_v6 }
 0x698   : > { %v3219_v58 = vmul.f32 %v14006_v19, %v14006_v19  ;;  %3740 = vmatpush.msra.mxu1 %v3163_v14  ;;  %3761 = vmatpush.msra.mxu2 %v3223_v40  ;;  %v14007_v13 = vld [vmem:[#allocation244_spill] sm:$0xff]  ;;  %v10098_v61 = vpop.f32.mrf.mxu3 }
 0x699   : > { %v3287_v44 = vmul.f32 %v14007_v13, %v14007_v13  ;;  %3780 = vmatpush.msra.mxu3 %v3291_v23  ;;  %v14009_v24 = vld [vmem:[#allocation112_spill] sm:$0xff]  ;;  %3722 = vmatpush.msra.mxu0 %v3091_v1 }
 0x69a   : > { %v3155_v63 = vmul.f32 %v14009_v24, %v14009_v24  ;;  %3714 = vmatmul.f32.vlgmr.msrb.gmra.mxu3 %v13637_v32  ;;  %v14010_v14 = vld [vmem:[#allocation172_spill] sm:$0xff]  ;;  %3741 = vmatpush.msra.mxu1 %v3159_v25  ;;  %v14016_v25 = vld [vmem:[#allocation45_spill] sm:$0xff] }
 0x69b   : > { %v3215_v40 = vmul.f32 %v14010_v14, %v14010_v14  ;;  %v14011_v21 = vld [vmem:[#allocation240_spill] sm:$0xff]  ;;  %3762 = vmatpush.msra.mxu2 %v3219_v58  ;;  %3781 = vmatpush.msra.mxu3 %v3287_v44  ;;  %v3279_v14 = vmul.f32 %v14015_v51, %v14015_v51  ;;  %v3079_v58 = vmul.f32 %v14016_v25, %v14016_v25 }
 0x69c   : > { %v3283_v19 = vmul.f32 %v14011_v21, %v14011_v21  ;;  %v14012_v23 = vld [vmem:[#allocation48_spill] sm:$0xff]  ;;  %3674 = vmatmul.f32.vlgmr.msrb.gmra.mxu1 %v13637_v32  ;;  %3723 = vmatpush.msra.mxu0 %v3087_v43  ;;  %v3275_v51 = vmul.f32 %v14019_v60, %v14019_v60  ;;  %v14020_v43 = vld [vmem:[#allocation42_spill] sm:$0xff]  ;;  %v3143_v25 = vmul.f32 %v14021_v18, %v14021_v18  ;;  %v14024_v60 = vld [vmem:[#allocation39_spill] sm:$0xff] }
 0x69d   : > { %v3083_v13 = vmul.f32 %v14012_v23, %v14012_v23  ;;  %v14013_v6 = vld [vmem:[#allocation108_spill] sm:$0xff]  ;;  %3742 = vmatpush.msra.mxu1 %v3155_v63  ;;  %3763 = vmatpush.msra.mxu2 %v3215_v40  ;;  %v3075_v63 = vmul.f32 %v14020_v43, %v14020_v43  ;;  %v10124_v36 = vpop.f32.mrf.mxu2 }
 0x69e   : > { %v3151_v38 = vmul.f32 %v14013_v6, %v14013_v6  ;;  %v14014_v24 = vld [vmem:[#allocation168_spill] sm:$0xff]  ;;  %v10104_v6 = vpop.f32.mrf.mxu0  ;;  %3782 = vmatpush.msra.mxu3 %v3283_v19 }
 0x69f   : > { %v3211_v1 = vmul.f32 %v14014_v24, %v14014_v24  ;;  %v14017_v21 = vld [vmem:[#allocation104_spill] sm:$0xff]  ;;  %3724 = vmatpush.msra.mxu0 %v3083_v13  ;;  %v14025_v13 = vld [vmem:[#allocation98_spill] sm:$0xff] }
 0x6a0   : > { %v3147_v23 = vmul.f32 %v14017_v21, %v14017_v21  ;;  %v14018_v44 = vld [vmem:[#allocation164_spill] sm:$0xff]  ;;  %3743 = vmatpush.msra.mxu1 %v3151_v38  ;;  %3783 = vmatpush.msra.mxu3 %v3279_v14  ;;  %v3071_v38 = vmul.f32 %v14024_v60, %v14024_v60  ;;  %v3139_v43 = vmul.f32 %v14025_v13, %v14025_v13 }
 0x6a1   : > { %v3207_v24 = vmul.f32 %v14018_v44, %v14018_v44  ;;  %3764 = vmatpush.msra.mxu2 %v3211_v1  ;;  %v14022_v21 = vld [vmem:[#allocation160_spill] sm:$0xff]  ;;  %v10118_v44 = vpop.f32.mrf.mxu1  ;;  %3725 = vmatpush.msra.mxu0 %v3079_v58 }
 0x6a2   : > { %v3203_v40 = vmul.f32 %v14022_v21, %v14022_v21  ;;  %v14023_v19 = vld [vmem:[#allocation228_spill] sm:$0xff]  ;;  %3744 = vmatpush.msra.mxu1 %v3147_v23  ;;  %3784 = vmatpush.msra.mxu3 %v3275_v51 }
 0x6a3   : > { %v3271_v50 = vmul.f32 %v14023_v19, %v14023_v19  ;;  %3765 = vmatpush.msra.mxu2 %v3207_v24  ;;  %v14026_v18 = vld [vmem:[#allocation156_spill] sm:$0xff]  ;;  %3726 = vmatpush.msra.mxu0 %v3075_v63  ;;  %v14029_v19 = vld [vmem:[#allocation95_spill] sm:$0xff]  ;;  %v14032_v63 = vld [vmem:[#allocation33_spill] sm:$0xff] }
 0x6a4   : > { %v3199_v1 = vmul.f32 %v14026_v18, %v14026_v18  ;;  %v14027_v14 = vld [vmem:[#allocation224_spill] sm:$0xff]  ;;  %3745 = vmatpush.msra.mxu1 %v3143_v25  ;;  %v3135_v60 = vmul.f32 %v14029_v19, %v14029_v19  ;;  %v10138_v18 = vpop.f32.mrf.mxu3  ;;  %v3063_v25 = vmul.f32 %v14032_v63, %v14032_v63 }
 0x6a5   : > { %v3267_v21 = vmul.f32 %v14027_v14, %v14027_v14  ;;  %v14028_v58 = vld [vmem:[#allocation36_spill] sm:$0xff]  ;;  %3766 = vmatpush.msra.mxu2 %v3203_v40  ;;  %3785 = vmatpush.msra.mxu3 %v3271_v50  ;;  %v10172_v4 = vpop.f32.mrf.mxu2 }
 0x6a6   : > { %v3067_v23 = vmul.f32 %v14028_v58, %v14028_v58  ;;  %v14030_v13 = vld [vmem:[#allocation152_spill] sm:$0xff]  ;;  %3727 = vmatpush.msra.mxu0 %v3071_v38  ;;  %3746 = vmatpush.msra.mxu1 %v3139_v43  ;;  %v10152_v63 = vpop.f32.mrf.mxu0 }
 0x6a7   : > { %v3195_v24 = vmul.f32 %v14030_v13, %v14030_v13  ;;  %v14031_v51 = vld [vmem:[#allocation220_spill] sm:$0xff]  ;;  %3767 = vmatpush.msra.mxu2 %v3199_v1  ;;  %3786 = vmatpush.msra.mxu3 %v3267_v21 }
 0x6a8   : > { %v3263_v45 = vmul.f32 %v14031_v51, %v14031_v51  ;;  %v14033_v14 = vld [vmem:[#allocation92_spill] sm:$0xff]  ;;  %3728 = vmatpush.msra.mxu0 %v3067_v23  ;;  %3747 = vmatpush.msra.mxu1 %v3135_v60  ;;  %v14036_v51 = vld [vmem:[#allocation29_spill] sm:$0xff] }
 0x6a9   : > { %v3131_v58 = vmul.f32 %v14033_v14, %v14033_v14  ;;  %v14034_v40 = vld [vmem:[#allocation148_spill] sm:$0xff]  ;;  %v3059_v38 = vmul.f32 %v14036_v51, %v14036_v51  ;;  %3768 = vmatpush.msra.mxu2 %v3195_v24  ;;  %v14040_v23 = vld [vmem:[#allocation25_spill] sm:$0xff] }
 0x6aa   : > { %v3191_v50 = vmul.f32 %v14034_v40, %v14034_v40  ;;  %v14035_v19 = vld [vmem:[#allocation216_spill] sm:$0xff]  ;;  %3787 = vmatpush.msra.mxu3 %v3263_v45  ;;  %3729 = vmatpush.msra.mxu0 %v3063_v25  ;;  %v3055_v60 = vmul.f32 %v14040_v23, %v14040_v23  ;;  %v14044_v25 = vld [vmem:[#allocation21_spill] sm:$0xff] }
 0x6ab   : > { %v3259_v13 = vmul.f32 %v14035_v19, %v14035_v19  ;;  %v14037_v43 = vld [vmem:[#allocation88_spill] sm:$0xff]  ;;  %3748 = vmatpush.msra.mxu1 %v3131_v58  ;;  %v3051_v58 = vmul.f32 %v14044_v25, %v14044_v25 }
 0x6ac   : > { %v3127_v52 = vmul.f32 %v14037_v43, %v14037_v43  ;;  %v14038_v1 = vld [vmem:[#allocation144_spill] sm:$0xff]  ;;  %3769 = vmatpush.msra.mxu2 %v3191_v50  ;;  %3730 = vmatpush.msra.mxu0 %v3059_v38 }
 0x6ad   : > { %v3187_v21 = vmul.f32 %v14038_v1, %v14038_v1  ;;  %v14039_v14 = vld [vmem:[#allocation212_spill] sm:$0xff]  ;;  %3788 = vmatpush.msra.mxu3 %v3259_v13  ;;  %v10166_v1 = vpop.f32.mrf.mxu1  ;;  %v2783_v12 = vpop.f32.mrf.mxu2 }
 0x6ae   : > { %v3255_v40 = vmul.f32 %v14039_v14, %v14039_v14  ;;  %v14041_v19 = vld [vmem:[#allocation84_spill] sm:$0xff]  ;;  %3749 = vmatpush.msra.mxu1 %v3127_v52  ;;  %3731 = vmatpush.msra.mxu0 %v3055_v60  ;;  %v3047_v52 = vmul.f32 %v13588_v27, %v13588_v27  ;;  %v3363_v60 = vmul.f32 %v13592_v34, %v13592_v34 }
 0x6af   : > { %v3123_v51 = vmul.f32 %v14041_v19, %v14041_v19  ;;  %v14042_v43 = vld [vmem:[#allocation140_spill] sm:$0xff]  ;;  %3770 = vmatpush.msra.mxu2 %v3187_v21 }
 0x6b0   : > { %v3183_v24 = vmul.f32 %v14042_v43, %v14042_v43  ;;  %v14043_v45 = vld [vmem:[#allocation208_spill] sm:$0xff]  ;;  %3789 = vmatpush.msra.mxu3 %v3255_v40  ;;  %3732 = vmatpush.msra.mxu0 %v3051_v58 }
 0x6b1   : > { %v3251_v42 = vmul.f32 %v14043_v45, %v14043_v45  ;;  %v14045_v14 = vld [vmem:[#allocation80_spill] sm:$0xff]  ;;  %3750 = vmatpush.msra.mxu1 %v3123_v51 }
 0x6b2   : > { %v3119_v23 = vmul.f32 %v14045_v14, %v14045_v14  ;;  %v14046_v50 = vld [vmem:[#allocation136_spill] sm:$0xff]  ;;  %3771 = vmatpush.msra.mxu2 %v3183_v24  ;;  %3733 = vmatpush.msra.mxu0 %v3047_v52 }
 0x6b3   : > { %v3179_v13 = vmul.f32 %v14046_v50, %v14046_v50  ;;  %v14047_v19 = vld [vmem:[#allocation204_spill] sm:$0xff]  ;;  %3790 = vmatpush.msra.mxu3 %v3251_v42  ;;  %v10186_v50 = vpop.f32.mrf.mxu3  ;;  %3734 = vmatmul.f32.vlgmr.msra.gmra.mxu0 %v13637_v32 }
 0x6b4   : > { %v3247_v43 = vmul.f32 %v14047_v19, %v14047_v19  ;;  %v14048_v38 = vld [vmem:[#allocation76_spill] sm:$0xff]  ;;  %3751 = vmatpush.msra.mxu1 %v3119_v23  ;;  %v2743_v19 = vpop.f32.mrf.mxu0  ;;  %3798 = vmatpush.msrb.mxu0 %v3363_v60 }
 0x6b5   : > { %v3115_v45 = vmul.f32 %v14048_v38, %v14048_v38  ;;  %v14049_v25 = vld [vmem:[#allocation132_spill] sm:$0xff]  ;;  %3772 = vmatpush.msra.mxu2 %v3179_v13 }
 0x6b6   : > { %v3175_v21 = vmul.f32 %v14049_v25, %v14049_v25  ;;  %v14050_v40 = vld [vmem:[#allocation200_spill] sm:$0xff]  ;;  %3791 = vmatpush.msra.mxu3 %v3247_v43 }
 0x6b7   : > { %v3243_v14 = vmul.f32 %v14050_v40, %v14050_v40  ;;  %v14051_v51 = vld [vmem:[#allocation448_spill] sm:$0xff]  ;;  %3752 = vmatpush.msra.mxu1 %v3115_v45 }
 0x6b8   : > { %v3491_v27 = vmul.f32 %v14051_v51, %v14051_v51  ;;  %v14052_v42 = vld [vmem:[#allocation72_spill] sm:$0xff]  ;;  %v2604_v51 = vadd.f32 %v10118_v44, %v10104_v6  ;;  %3773 = vmatpush.msra.mxu2 %v3175_v21 }
 0x6b9   : > { %v3111_v24 = vmul.f32 %v14052_v42, %v14052_v42  ;;  %v14053_v38 = vld [vmem:[#allocation196_spill] sm:$0xff]  ;;  %3792 = vmatpush.msra.mxu3 %v3243_v14  ;;  %3774 = vmatmul.f32.vlgmr.msra.gmra.mxu2 %v13637_v32 }
 0x6ba   : > { %v3239_v25 = vmul.f32 %v14053_v38, %v14053_v38  ;;  %v14054_v40 = vld [vmem:[#allocation316_spill] sm:$0xff]  ;;  %v2763_v38 = vpop.f32.mrf.mxu1  ;;  %3838 = vmatpush.msrb.mxu2 %v3491_v27 }
 0x6bb   : > { %v3359_v58 = vmul.f32 %v14054_v40, %v14054_v40  ;;  %v14055_v23 = vld [vmem:[#allocation384_spill] sm:$0xff]  ;;  %3753 = vmatpush.msra.mxu1 %v3111_v24  ;;  %v2624_v24 = vadd.f32 %v10124_v36, %v2604_v51  ;;  %v2764_v2 = vadd.f32 %v2763_v38, %v2743_v19 }
 0x6bc   : > { %v3427_v34 = vmul.f32 %v14055_v23, %v14055_v23  ;;  %v14056_v13 = vld [vmem:[#allocation444_spill] sm:$0xff]  ;;  %3793 = vmatpush.msra.mxu3 %v3239_v25  ;;  %3754 = vmatmul.f32.vlgmr.msra.gmra.mxu1 %v13637_v32 }
 0x6bd   : > { %v3487_v43 = vmul.f32 %v14056_v13, %v14056_v13  ;;  %v14057_v42 = vld [vmem:[#allocation512_spill] sm:$0xff]  ;;  %v2444_v13 = vadd.f32 %v10031_v30, %v10020_v55  ;;  %3799 = vmatpush.msrb.mxu0 %v3359_v58  ;;  %v2803_v55 = vpop.f32.mrf.mxu3  ;;  %3794 = vmatmul.f32.vlgmr.msra.gmra.mxu3 %v13637_v32 }
 0x6be   : > { %v3555_v22 = vmul.f32 %v14057_v42, %v14057_v42  ;;  %v14058_v52 = vld [vmem:[#allocation312_spill] sm:$0xff]  ;;  %3818 = vmatpush.msrb.mxu1 %v3427_v34 }
 0x6bf   : > { %v3355_v45 = vmul.f32 %v14058_v52, %v14058_v52  ;;  %v14059_v40 = vld [vmem:[#allocation380_spill] sm:$0xff]  ;;  %3839 = vmatpush.msrb.mxu2 %v3487_v43 }
 0x6c0   : > { %v3423_v23 = vmul.f32 %v14059_v40, %v14059_v40  ;;  %v14060_v6 = vld [vmem:[#allocation440_spill] sm:$0xff]  ;;  %3858 = vmatpush.msrb.mxu3 %v3555_v22 }
 0x6c1   : > { %v3483_v44 = vmul.f32 %v14060_v6, %v14060_v6  ;;  %v14061_v21 = vld [vmem:[#allocation508_spill] sm:$0xff]  ;;  %3800 = vmatpush.msrb.mxu0 %v3355_v45 }
 0x6c2   : > { %v3551_v14 = vmul.f32 %v14061_v21, %v14061_v21  ;;  %v14062_v60 = vld [vmem:[#allocation308_spill] sm:$0xff]  ;;  %3819 = vmatpush.msrb.mxu1 %v3423_v23 }
 0x6c3   : > { %v3351_v27 = vmul.f32 %v14062_v60, %v14062_v60  ;;  %v14063_v42 = vld [vmem:[#allocation376_spill] sm:$0xff]  ;;  %3840 = vmatpush.msrb.mxu2 %v3483_v44  ;;  %v2823_v44 = vpop.f32.mrf.mxu0 }
 0x6c4   : > { %v3419_v52 = vmul.f32 %v14063_v42, %v14063_v42  ;;  %v14064_v25 = vld [vmem:[#allocation436_spill] sm:$0xff]  ;;  %3859 = vmatpush.msrb.mxu3 %v3551_v14  ;;  %v2464_v42 = vadd.f32 %v10038_v17, %v2444_v13  ;;  %v2784_v17 = vadd.f32 %v2783_v12, %v2764_v2 }
 0x6c5   : > { %v3479_v40 = vmul.f32 %v14064_v25, %v14064_v25  ;;  %v14065_v6 = vld [vmem:[#allocation504_spill] sm:$0xff]  ;;  %3801 = vmatpush.msrb.mxu0 %v3351_v27  ;;  %v2644_v25 = vadd.f32 %v10138_v18, %v2624_v24 }
 0x6c6   : > { %v3547_v21 = vmul.f32 %v14065_v6, %v14065_v6  ;;  %v14066_v30 = vld [vmem:[#allocation304_spill] sm:$0xff]  ;;  %3820 = vmatpush.msrb.mxu1 %v3419_v52 }
 0x6c7   : > { %v3347_v58 = vmul.f32 %v14066_v30, %v14066_v30  ;;  %v14067_v34 = vld [vmem:[#allocation372_spill] sm:$0xff]  ;;  %3841 = vmatpush.msrb.mxu2 %v3479_v40 }
 0x6c8   : > { %v3415_v60 = vmul.f32 %v14067_v34, %v14067_v34  ;;  %v14068_v36 = vld [vmem:[#allocation432_spill] sm:$0xff]  ;;  %3860 = vmatpush.msrb.mxu3 %v3547_v21 }
 0x6c9   : > { %v3475_v22 = vmul.f32 %v14068_v36, %v14068_v36  ;;  %v14069_v51 = vld [vmem:[#allocation500_spill] sm:$0xff]  ;;  %3802 = vmatpush.msrb.mxu0 %v3347_v58 }
 0x6ca   : > { %v3543_v43 = vmul.f32 %v14069_v51, %v14069_v51  ;;  %v14070_v19 = vld [vmem:[#allocation300_spill] sm:$0xff]  ;;  %3821 = vmatpush.msrb.mxu1 %v3415_v60  ;;  %v2484_v51 = vadd.f32 %v10054_v16, %v2464_v42  ;;  %v2804_v42 = vadd.f32 %v2803_v55, %v2784_v17 }
 0x6cb   : > { %v3343_v38 = vmul.f32 %v14070_v19, %v14070_v19  ;;  %v14071_v45 = vld [vmem:[#allocation368_spill] sm:$0xff]  ;;  %3842 = vmatpush.msrb.mxu2 %v3475_v22  ;;  %v2843_v19 = vpop.f32.mrf.mxu1  ;;  %v2664_v22 = vadd.f32 %v10152_v63, %v2644_v25 }
 0x6cc   : > { %v3411_v23 = vmul.f32 %v14071_v45, %v14071_v45  ;;  %v14072_v14 = vld [vmem:[#allocation428_spill] sm:$0xff]  ;;  %3861 = vmatpush.msrb.mxu3 %v3543_v43  ;;  %v10257_v43 = vpop.f32.mrf.mxu2 }
 0x6cd   : > { %v3471_v6 = vmul.f32 %v14072_v14, %v14072_v14  ;;  %v14073_v30 = vld [vmem:[#allocation496_spill] sm:$0xff]  ;;  %3803 = vmatpush.msrb.mxu0 %v3343_v38 }
 0x6ce   : > { %v3539_v34 = vmul.f32 %v14073_v30, %v14073_v30  ;;  %v14074_v13 = vld [vmem:[#allocation296_spill] sm:$0xff]  ;;  %3822 = vmatpush.msrb.mxu1 %v3411_v23 }
 0x6cf   : > { %v3339_v27 = vmul.f32 %v14074_v13, %v14074_v13  ;;  %v14075_v52 = vld [vmem:[#allocation364_spill] sm:$0xff]  ;;  %3843 = vmatpush.msrb.mxu2 %v3471_v6 }
 0x6d0   : > { %v3407_v36 = vmul.f32 %v14075_v52, %v14075_v52  ;;  %v14076_v18 = vld [vmem:[#allocation424_spill] sm:$0xff]  ;;  %3862 = vmatpush.msrb.mxu3 %v3539_v34 }
 0x6d1   : > { %v3467_v24 = vmul.f32 %v14076_v18, %v14076_v18  ;;  %v14077_v40 = vld [vmem:[#allocation492_spill] sm:$0xff]  ;;  %3804 = vmatpush.msrb.mxu0 %v3339_v27  ;;  %v2504_v18 = vadd.f32 %v10064_v11, %v2484_v51  ;;  %v2903_v51 = vpop.f32.mrf.mxu0 }
 0x6d2   : > { %v3535_v21 = vmul.f32 %v14077_v40, %v14077_v40  ;;  %v14078_v2 = vld [vmem:[#allocation292_spill] sm:$0xff]  ;;  %3823 = vmatpush.msrb.mxu1 %v3407_v36  ;;  %v10272_v40 = vpop.f32.mrf.mxu3 }
 0x6d3   : > { %v3335_v12 = vmul.f32 %v14078_v2, %v14078_v2  ;;  %v14079_v58 = vld [vmem:[#allocation360_spill] sm:$0xff]  ;;  %3844 = vmatpush.msrb.mxu2 %v3467_v24  ;;  %v2684_v24 = vadd.f32 %v10166_v1, %v2664_v22 }
 0x6d4   : > { %v3403_v60 = vmul.f32 %v14079_v58, %v14079_v58  ;;  %v14080_v45 = vld [vmem:[#allocation420_spill] sm:$0xff]  ;;  %3863 = vmatpush.msrb.mxu3 %v3535_v21 }
 0x6d5   : > { %v3463_v14 = vmul.f32 %v14080_v45, %v14080_v45  ;;  %v14081_v30 = vld [vmem:[#allocation488_spill] sm:$0xff]  ;;  %3805 = vmatpush.msrb.mxu0 %v3335_v12  ;;  %v2824_v45 = vadd.f32 %v2823_v44, %v2804_v42 }
 0x6d6   : > { %v3531_v16 = vmul.f32 %v14081_v30, %v14081_v30  ;;  %v14082_v38 = vld [vmem:[#allocation288_spill] sm:$0xff]  ;;  %3824 = vmatpush.msrb.mxu1 %v3403_v60 }
 0x6d7   : > { %v3331_v23 = vmul.f32 %v14082_v38, %v14082_v38  ;;  %v14083_v13 = vld [vmem:[#allocation356_spill] sm:$0xff]  ;;  %3845 = vmatpush.msrb.mxu2 %v3463_v14 }
 0x6d8   : > { %v3399_v52 = vmul.f32 %v14083_v13, %v14083_v13  ;;  %v14084_v63 = vld [vmem:[#allocation416_spill] sm:$0xff]  ;;  %3864 = vmatpush.msrb.mxu3 %v3531_v16  ;;  %v2524_v13 = vadd.f32 %v10075_v28, %v2504_v18  ;;  %v2704_v28 = vadd.f32 %v10172_v4, %v2684_v24  ;;  %v2844_v18 = vadd.f32 %v2843_v19, %v2824_v45 }
 0x6d9   : > { %v3459_v25 = vmul.f32 %v14084_v63, %v14084_v63  ;;  %v14085_v6 = vld [vmem:[#allocation484_spill] sm:$0xff]  ;;  %3806 = vmatpush.msrb.mxu0 %v3331_v23  ;;  %v2923_v63 = vpop.f32.mrf.mxu1 }
 0x6da   : > { %v3527_v34 = vmul.f32 %v14085_v6, %v14085_v6  ;;  %v14086_v55 = vld [vmem:[#allocation284_spill] sm:$0xff]  ;;  %3825 = vmatpush.msrb.mxu1 %v3399_v52  ;;  %v2963_v19 = vpop.f32.mrf.mxu3  ;;  %v2544_v24 = vadd.f32 %v10082_v37, %v2524_v13 }
 0x6db   : > { %v3327_v17 = vmul.f32 %v14086_v55, %v14086_v55  ;;  %v14087_v27 = vld [vmem:[#allocation352_spill] sm:$0xff]  ;;  %3846 = vmatpush.msrb.mxu2 %v3459_v25 }
 0x6dc   : > { %v3395_v36 = vmul.f32 %v14087_v27, %v14087_v27  ;;  %v14088_v21 = vld [vmem:[#allocation412_spill] sm:$0xff]  ;;  %3865 = vmatpush.msrb.mxu3 %v3527_v34  ;;  %v2924_v27 = vadd.f32 %v2923_v63, %v2903_v51 }
 0x6dd   : > { %v3455_v2 = vmul.f32 %v14088_v21, %v14088_v21  ;;  %v14089_v58 = vld [vmem:[#allocation480_spill] sm:$0xff]  ;;  %3807 = vmatpush.msrb.mxu0 %v3327_v17  ;;  %v2943_v21 = vpop.f32.mrf.mxu2 }
 0x6de   : > { %v3523_v11 = vmul.f32 %v14089_v58, %v14089_v58  ;;  %v14090_v12 = vld [vmem:[#allocation280_spill] sm:$0xff]  ;;  %3826 = vmatpush.msrb.mxu1 %v3395_v36 }
 0x6df   : > { %v3323_v60 = vmul.f32 %v14090_v12, %v14090_v12  ;;  %v14091_v30 = vld [vmem:[#allocation348_spill] sm:$0xff]  ;;  %3847 = vmatpush.msrb.mxu2 %v3455_v2 }
 0x6e0   : > { %v3391_v38 = vmul.f32 %v14091_v30, %v14091_v30  ;;  %v14092_v1 = vld [vmem:[#allocation408_spill] sm:$0xff]  ;;  %3866 = vmatpush.msrb.mxu3 %v3523_v11  ;;  %v2944_v30 = vadd.f32 %v2943_v21, %v2924_v27 }
 0x6e1   : > { %v3451_v22 = vmul.f32 %v14092_v1, %v14092_v1  ;;  %v14093_v14 = vld [vmem:[#allocation476_spill] sm:$0xff]  ;;  %3808 = vmatpush.msrb.mxu0 %v3323_v60  ;;  %v2864_v1 = vadd.f32 %v10257_v43, %v2844_v18 }
 0x6e2   : > { %v3519_v16 = vmul.f32 %v14093_v14, %v14093_v14  ;;  %v14094_v44 = vld [vmem:[#allocation276_spill] sm:$0xff]  ;;  %3827 = vmatpush.msrb.mxu1 %v3391_v38  ;;  %v2964_v38 = vadd.f32 %v2963_v19, %v2944_v30  ;;  %v14114_v19 = vld [vmem:[#allocation69_spill] sm:$0xff] }
 0x6e3   : > { %v3319_v42 = vmul.f32 %v14094_v44, %v14094_v44  ;;  %v14095_v23 = vld [vmem:[#allocation344_spill] sm:$0xff]  ;;  %3848 = vmatpush.msrb.mxu2 %v3451_v22 }
 0x6e4   : > { %v3387_v52 = vmul.f32 %v14095_v23, %v14095_v23  ;;  %v14096_v25 = vld [vmem:[#allocation404_spill] sm:$0xff]  ;;  %3867 = vmatpush.msrb.mxu3 %v3519_v16  ;;  %v2983_v23 = vpop.f32.mrf.mxu0 }
 0x6e5   : > { %v3447_v6 = vmul.f32 %v14096_v25, %v14096_v25  ;;  %v14097_v34 = vld [vmem:[#allocation472_spill] sm:$0xff]  ;;  %3809 = vmatpush.msrb.mxu0 %v3319_v42  ;;  %v2724_v42 = vadd.f32 %v10186_v50, %v2704_v28  ;;  %v2884_v28 = vadd.f32 %v10272_v40, %v2864_v1  ;;  %v3023_v40 = vpop.f32.mrf.mxu2 }
 0x6e6   : > { %v3515_v55 = vmul.f32 %v14097_v34, %v14097_v34  ;;  %v14098_v17 = vld [vmem:[#allocation272_spill] sm:$0xff]  ;;  %3828 = vmatpush.msrb.mxu1 %v3387_v52  ;;  %v2564_v34 = vadd.f32 %v10098_v61, %v2544_v24  ;;  %v3003_v61 = vpop.f32.mrf.mxu1  ;;  %v3108_v24 = vmul.f32 %v14114_v19, %v14114_v19  ;;  %v14129_v19 = vld [vmem:[#allocation249_spill] sm:$0xff] }
 0x6e7   : > { %v3315_v36 = vmul.f32 %v14098_v17, %v14098_v17  ;;  %v14099_v2 = vld [vmem:[#allocation340_spill] sm:$0xff]  ;;  %3849 = vmatpush.msrb.mxu2 %v3447_v6  ;;  %v2984_v6 = vadd.f32 %v2983_v23, %v2964_v38 }
 0x6e8   : > { %v3383_v58 = vmul.f32 %v14099_v2, %v14099_v2  ;;  %v14100_v11 = vld [vmem:[#allocation400_spill] sm:$0xff]  ;;  %3868 = vmatpush.msrb.mxu3 %v3515_v55 }
 0x6e9   : > { %v3443_v12 = vmul.f32 %v14100_v11, %v14100_v11  ;;  %v14101_v51 = vld [vmem:[#allocation468_spill] sm:$0xff]  ;;  %3810 = vmatpush.msrb.mxu0 %v3315_v36 }
 0x6ea   : > { %v3511_v4 = vmul.f32 %v14101_v51, %v14101_v51  ;;  %v14102_v45 = vld [vmem:[#allocation268_spill] sm:$0xff]  ;;  %3829 = vmatpush.msrb.mxu1 %v3383_v58  ;;  %v3004_v51 = vadd.f32 %v3003_v61, %v2984_v6  ;;  %v4204_v6 = vld [vmem:[#allocation2] sm:$0x1] }
 0x6eb   : > { %v3311_v60 = vmul.f32 %v14102_v45, %v14102_v45  ;;  %v14103_v22 = vld [vmem:[#allocation336_spill] sm:$0xff]  ;;  %3850 = vmatpush.msrb.mxu2 %v3443_v12  ;;  %v14115_v45 = vld [vmem:[#allocation193_spill] sm:$0xff] }
 0x6ec   : > { %v3379_v14 = vmul.f32 %v14103_v22, %v14103_v22  ;;  %v14104_v16 = vld [vmem:[#allocation396_spill] sm:$0xff]  ;;  %3869 = vmatpush.msrb.mxu3 %v3511_v4  ;;  %v4198_v4 = vadd.f32 %v2724_v42, %v2564_v34  ;;  %v3024_v22 = vadd.f32 %v3023_v40, %v3004_v51  ;;  %v14121_v34 = vld [vmem:[#allocation257_spill] sm:$0xff] }
 0x6ed   : > { %v3439_v44 = vmul.f32 %v14104_v16, %v14104_v16  ;;  %v14105_v37 = vld [vmem:[#allocation464_spill] sm:$0xff]  ;;  %3811 = vmatpush.msrb.mxu0 %v3311_v60  ;;  %v3236_v60 = vmul.f32 %v14115_v45, %v14115_v45  ;;  %v14128_v40 = vld [vmem:[#allocation181_spill] sm:$0xff]  ;;  %v14130_v45 = vld [vmem:[#allocation55_spill] sm:$0xff] }
 0x6ee   : > { %v3507_v13 = vmul.f32 %v14105_v37, %v14105_v37  ;;  %v14106_v43 = vld [vmem:[#allocation264_spill] sm:$0xff]  ;;  %3830 = vmatpush.msrb.mxu1 %v3379_v14  ;;  %v4199_v42 = vadd.f32 %v4198_v4, %v2884_v28  ;;  %v14118_v37 = vld [vmem:[#allocation65_spill] sm:$0xff]  ;;  %v3224_v4 = vmul.f32 %v14128_v40, %v14128_v40 }
 0x6ef   : > { %v3307_v52 = vmul.f32 %v14106_v43, %v14106_v43  ;;  %v14107_v63 = vld [vmem:[#allocation332_spill] sm:$0xff]  ;;  %3851 = vmatpush.msrb.mxu2 %v3439_v44  ;;  %v3043_v44 = vpop.f32.mrf.mxu3  ;;  %v14119_v43 = vld [vmem:[#allocation129_spill] sm:$0xff] }
 0x6f0   : > { %v3375_v25 = vmul.f32 %v14107_v63, %v14107_v63  ;;  %v14108_v50 = vld [vmem:[#allocation392_spill] sm:$0xff]  ;;  %3870 = vmatpush.msrb.mxu3 %v3507_v13  ;;  %v3104_v13 = vmul.f32 %v14118_v37, %v14118_v37  ;;  %v3044_v23 = vadd.f32 %v3043_v44, %v3024_v22  ;;  %v14120_v63 = vld [vmem:[#allocation189_spill] sm:$0xff] }
 0x6f1   : > { %v3435_v55 = vmul.f32 %v14108_v50, %v14108_v50  ;;  %v14109_v27 = vld [vmem:[#allocation460_spill] sm:$0xff]  ;;  %3812 = vmatpush.msrb.mxu0 %v3307_v52  ;;  %v3172_v52 = vmul.f32 %v14119_v43, %v14119_v43  ;;  %v3300_v50 = vmul.f32 %v14121_v34, %v14121_v34  ;;  %v14123_v28 = vld [vmem:[#allocation125_spill] sm:$0xff] }
 0x6f2   : > { %v3503_v21 = vmul.f32 %v14109_v27, %v14109_v27  ;;  %v14110_v18 = vld [vmem:[#allocation260_spill] sm:$0xff]  ;;  %3831 = vmatpush.msrb.mxu1 %v3375_v25  ;;  %v3232_v25 = vmul.f32 %v14120_v63, %v14120_v63  ;;  %v14122_v27 = vld [vmem:[#allocation61_spill] sm:$0xff] }
 0x6f3   : > { %v3303_v17 = vmul.f32 %v14110_v18, %v14110_v18  ;;  %v14111_v36 = vld [vmem:[#allocation328_spill] sm:$0xff]  ;;  %3852 = vmatpush.msrb.mxu2 %v3435_v55  ;;  %v4200_v55 = vadd.f32 %v4199_v42, %v3044_v23  ;;  %v3168_v18 = vmul.f32 %v14123_v28, %v14123_v28  ;;  %v14132_v22 = vld [vmem:[#allocation177_spill] sm:$0xff] }
 0x6f4   : > { %v3371_v2 = vmul.f32 %v14111_v36, %v14111_v36  ;;  %v14112_v58 = vld [vmem:[#allocation388_spill] sm:$0xff]  ;;  %3871 = vmatpush.msrb.mxu3 %v3503_v21  ;;  %v3100_v21 = vmul.f32 %v14122_v27, %v14122_v27  ;;  %v14136_v43 = vld [vmem:[#allocation173_spill] sm:$0xff] }
 0x6f5   : > { %v3431_v11 = vmul.f32 %v14112_v58, %v14112_v58  ;;  %v14113_v12 = vld [vmem:[#allocation456_spill] sm:$0xff]  ;;  %3813 = vmatpush.msrb.mxu0 %v3303_v17  ;;  %v14124_v17 = vld [vmem:[#allocation185_spill] sm:$0xff]  ;;  %v4205_v58 = vadd.f32 %v4204_v6, %v4200_v55 }
 0x6f6   : > { %v3499_v30 = vmul.f32 %v14113_v12, %v14113_v12  ;;  %v14116_v38 = vld [vmem:[#allocation324_spill] sm:$0xff]  ;;  %3832 = vmatpush.msrb.mxu1 %v3371_v2  ;;  %3814 = vmatmul.f32.vlgmr.msrb.gmra.mxu0 %v13637_v32  ;;  %v3228_v36 = vmul.f32 %v14124_v17, %v14124_v17  ;;  %v14125_v2 = vld [vmem:[#allocation253_spill] sm:$0xff]  ;;  %v14142_v17 = vld [vmem:[#allocation46_spill] sm:$0xff] }
 0x6f7   : > { %v3367_v1 = vmul.f32 %v14116_v38, %v14116_v38  ;;  %v14117_v14 = vld [vmem:[#allocation452_spill] sm:$0xff]  ;;  %3853 = vmatpush.msrb.mxu2 %v3431_v11  ;;  %3878 = vmatpush.msra.mxu0 %v3108_v24  ;;  %v3296_v61 = vmul.f32 %v14125_v2, %v14125_v2  ;;  %v14126_v11 = vld [vmem:[#allocation58_spill] sm:$0xff]  ;;  %v3292_v24 = vmul.f32 %v14129_v19, %v14129_v19  ;;  %v14131_v38 = vld [vmem:[#allocation117_spill] sm:$0xff] }
 0x6f8   : > { %v3495_v16 = vmul.f32 %v14117_v14, %v14117_v14  ;;  %3872 = vmatpush.msrb.mxu3 %v3499_v30  ;;  %3854 = vmatmul.f32.vlgmr.msrb.gmra.mxu2 %v13637_v32  ;;  %v3096_v12 = vmul.f32 %v14126_v11, %v14126_v11  ;;  %v14127_v30 = vld [vmem:[#allocation121_spill] sm:$0xff]  ;;  %4206 = vst [vmem:[#allocation2] sm:$0x1] %v4205_v58  ;;  %v14134_v42 = vld [vmem:[#allocation52_spill] sm:$0xff] }
 0x6f9   : > { %3918 = vmatpush.msra.mxu2 %v3236_v60  ;;  %3833 = vmatpush.msrb.mxu1 %v3367_v1  ;;  %v3164_v51 = vmul.f32 %v14127_v30, %v14127_v30  ;;  %v3092_v60 = vmul.f32 %v14130_v45, %v14130_v45  ;;  %v3160_v1 = vmul.f32 %v14131_v38, %v14131_v38  ;;  %v14137_v63 = vld [vmem:[#allocation241_spill] sm:$0xff] }
 0x6fa   : > { %3873 = vmatpush.msrb.mxu3 %v3495_v16  ;;  %3879 = vmatpush.msra.mxu0 %v3104_v13  ;;  %v3220_v14 = vmul.f32 %v14132_v22, %v14132_v22  ;;  %v14133_v16 = vld [vmem:[#allocation245_spill] sm:$0xff]  ;;  %v3088_v37 = vmul.f32 %v14134_v42, %v14134_v42 }
 0x6fb   : > { %3874 = vmatmul.f32.vlgmr.msrb.gmra.mxu3 %v13637_v32  ;;  %3898 = vmatpush.msra.mxu1 %v3172_v52  ;;  %v3288_v44 = vmul.f32 %v14133_v16, %v14133_v16  ;;  %v14135_v13 = vld [vmem:[#allocation113_spill] sm:$0xff]  ;;  %v3216_v52 = vmul.f32 %v14136_v43, %v14136_v43 }
 0x6fc   : > { %3919 = vmatpush.msra.mxu2 %v3232_v25  ;;  %3938 = vmatpush.msra.mxu3 %v3300_v50  ;;  %v3156_v23 = vmul.f32 %v14135_v13, %v14135_v13  ;;  %v3284_v25 = vmul.f32 %v14137_v63, %v14137_v63  ;;  %v14138_v6 = vld [vmem:[#allocation49_spill] sm:$0xff] }
 0x6fd   : > { %3834 = vmatmul.f32.vlgmr.msrb.gmra.mxu1 %v13637_v32  ;;  %3880 = vmatpush.msra.mxu0 %v3100_v21  ;;  %v3084_v34 = vmul.f32 %v14138_v6, %v14138_v6  ;;  %v14139_v50 = vld [vmem:[#allocation109_spill] sm:$0xff] }
 0x6fe   : > { %3899 = vmatpush.msra.mxu1 %v3168_v18  ;;  %3920 = vmatpush.msra.mxu2 %v3228_v36  ;;  %v3152_v55 = vmul.f32 %v14139_v50, %v14139_v50  ;;  %v14140_v27 = vld [vmem:[#allocation169_spill] sm:$0xff]  ;;  %v3080_v36 = vmul.f32 %v14142_v17, %v14142_v17 }
 0x6ff   : > { %3939 = vmatpush.msra.mxu3 %v3296_v61  ;;  %3881 = vmatpush.msra.mxu0 %v3096_v12  ;;  %v3212_v21 = vmul.f32 %v14140_v27, %v14140_v27  ;;  %v14141_v28 = vld [vmem:[#allocation237_spill] sm:$0xff] }
 0x700   : > { %3900 = vmatpush.msra.mxu1 %v3164_v51  ;;  %3921 = vmatpush.msra.mxu2 %v3224_v4  ;;  %v3280_v18 = vmul.f32 %v14141_v28, %v14141_v28  ;;  %v14143_v2 = vld [vmem:[#allocation105_spill] sm:$0xff]  ;;  %v14146_v51 = vld [vmem:[#allocation43_spill] sm:$0xff]  ;;  %v14147_v4 = vld [vmem:[#allocation102_spill] sm:$0xff] }
 0x701   : > { %3940 = vmatpush.msra.mxu3 %v3292_v24  ;;  %3882 = vmatpush.msra.mxu0 %v3092_v60  ;;  %v3148_v61 = vmul.f32 %v14143_v2, %v14143_v2  ;;  %v14144_v58 = vld [vmem:[#allocation165_spill] sm:$0xff]  ;;  %v3076_v40 = vmul.f32 %v14146_v51, %v14146_v51  ;;  %v3144_v19 = vmul.f32 %v14147_v4, %v14147_v4 }
 0x702   : > { %3901 = vmatpush.msra.mxu1 %v3160_v1  ;;  %3922 = vmatpush.msra.mxu2 %v3220_v14  ;;  %v3208_v11 = vmul.f32 %v14144_v58, %v14144_v58  ;;  %v14145_v12 = vld [vmem:[#allocation233_spill] sm:$0xff]  ;;  %v14150_v1 = vld [vmem:[#allocation40_spill] sm:$0xff]  ;;  %v14151_v14 = vld [vmem:[#allocation99_spill] sm:$0xff] }
 0x703   : > { %3941 = vmatpush.msra.mxu3 %v3288_v44  ;;  %3883 = vmatpush.msra.mxu0 %v3088_v37  ;;  %v3276_v30 = vmul.f32 %v14145_v12, %v14145_v12  ;;  %v14148_v24 = vld [vmem:[#allocation161_spill] sm:$0xff]  ;;  %v3072_v22 = vmul.f32 %v14150_v1, %v14150_v1  ;;  %v3140_v16 = vmul.f32 %v14151_v14, %v14151_v14 }
 0x704   : > { %3902 = vmatpush.msra.mxu1 %v3156_v23  ;;  %3923 = vmatpush.msra.mxu2 %v3216_v52  ;;  %v3204_v45 = vmul.f32 %v14148_v24, %v14148_v24  ;;  %v14149_v60 = vld [vmem:[#allocation229_spill] sm:$0xff]  ;;  %v14155_v52 = vld [vmem:[#allocation96_spill] sm:$0xff] }
 0x705   : > { %3942 = vmatpush.msra.mxu3 %v3284_v25  ;;  %3884 = vmatpush.msra.mxu0 %v3084_v34  ;;  %v3272_v38 = vmul.f32 %v14149_v60, %v14149_v60  ;;  %v14152_v44 = vld [vmem:[#allocation157_spill] sm:$0xff]  ;;  %v3136_v63 = vmul.f32 %v14155_v52, %v14155_v52 }
 0x706   : > { %3903 = vmatpush.msra.mxu1 %v3152_v55  ;;  %3924 = vmatpush.msra.mxu2 %v3212_v21  ;;  %v3200_v42 = vmul.f32 %v14152_v44, %v14152_v44  ;;  %v14153_v37 = vld [vmem:[#allocation225_spill] sm:$0xff]  ;;  %v14158_v55 = vld [vmem:[#allocation34_spill] sm:$0xff] }
 0x707   : > { %3943 = vmatpush.msra.mxu3 %v3280_v18  ;;  %3885 = vmatpush.msra.mxu0 %v3080_v36  ;;  %v3268_v13 = vmul.f32 %v14153_v37, %v14153_v37  ;;  %v14154_v23 = vld [vmem:[#allocation37_spill] sm:$0xff]  ;;  %v3064_v27 = vmul.f32 %v14158_v55, %v14158_v55 }
 0x708   : > { %3904 = vmatpush.msra.mxu1 %v3148_v61  ;;  %3925 = vmatpush.msra.mxu2 %v3208_v11  ;;  %v3068_v43 = vmul.f32 %v14154_v23, %v14154_v23  ;;  %v14156_v25 = vld [vmem:[#allocation153_spill] sm:$0xff]  ;;  %v14162_v61 = vld [vmem:[#allocation30_spill] sm:$0xff] }
 0x709   : > { %3944 = vmatpush.msra.mxu3 %v3276_v30  ;;  %3886 = vmatpush.msra.mxu0 %v3076_v40  ;;  %v3196_v6 = vmul.f32 %v14156_v25, %v14156_v25  ;;  %v14157_v34 = vld [vmem:[#allocation221_spill] sm:$0xff]  ;;  %v3060_v58 = vmul.f32 %v14162_v61, %v14162_v61  ;;  %v3360_v61 = vmul.f32 %v13722_v8, %v13722_v8 }
 0x70a   : > { %3905 = vmatpush.msra.mxu1 %v3144_v19  ;;  %3926 = vmatpush.msra.mxu2 %v3204_v45  ;;  %v3264_v50 = vmul.f32 %v14157_v34, %v14157_v34  ;;  %v14159_v21 = vld [vmem:[#allocation93_spill] sm:$0xff]  ;;  %v14166_v19 = vld [vmem:[#allocation26_spill] sm:$0xff] }
 0x70b   : > { %3945 = vmatpush.msra.mxu3 %v3272_v38  ;;  %3887 = vmatpush.msra.mxu0 %v3072_v22  ;;  %v3132_v28 = vmul.f32 %v14159_v21, %v14159_v21  ;;  %v14160_v18 = vld [vmem:[#allocation149_spill] sm:$0xff]  ;;  %v3056_v24 = vmul.f32 %v14166_v19, %v14166_v19  ;;  %v3364_v21 = vmul.f32 %v13718_v7, %v13718_v7 }
 0x70c   : > { %3906 = vmatpush.msra.mxu1 %v3140_v16  ;;  %3927 = vmatpush.msra.mxu2 %v3200_v42  ;;  %v3192_v17 = vmul.f32 %v14160_v18, %v14160_v18  ;;  %v14161_v36 = vld [vmem:[#allocation217_spill] sm:$0xff]  ;;  %v14170_v16 = vld [vmem:[#allocation22_spill] sm:$0xff] }
 0x70d   : > { %3946 = vmatpush.msra.mxu3 %v3268_v13  ;;  %v3260_v2 = vmul.f32 %v14161_v36, %v14161_v36  ;;  %3888 = vmatpush.msra.mxu0 %v3068_v43  ;;  %v14163_v11 = vld [vmem:[#allocation89_spill] sm:$0xff]  ;;  %v3052_v44 = vmul.f32 %v14170_v16, %v14170_v16 }
 0x70e   : > { %3907 = vmatpush.msra.mxu1 %v3136_v63  ;;  %v3128_v12 = vmul.f32 %v14163_v11, %v14163_v11  ;;  %3928 = vmatpush.msra.mxu2 %v3196_v6  ;;  %v14164_v30 = vld [vmem:[#allocation145_spill] sm:$0xff]  ;;  %v3048_v63 = vmul.f32 %v13714_v29, %v13714_v29 }
 0x70f   : > { %3947 = vmatpush.msra.mxu3 %v3264_v50  ;;  %v3188_v51 = vmul.f32 %v14164_v30, %v14164_v30  ;;  %v14165_v40 = vld [vmem:[#allocation213_spill] sm:$0xff]  ;;  %3889 = vmatpush.msra.mxu0 %v3064_v27 }
 0x710   : > { %v3256_v4 = vmul.f32 %v14165_v40, %v14165_v40  ;;  %3908 = vmatpush.msra.mxu1 %v3132_v28  ;;  %v14167_v45 = vld [vmem:[#allocation85_spill] sm:$0xff]  ;;  %3929 = vmatpush.msra.mxu2 %v3192_v17 }
 0x711   : > { %v3124_v60 = vmul.f32 %v14167_v45, %v14167_v45  ;;  %3948 = vmatpush.msra.mxu3 %v3260_v2  ;;  %v14168_v38 = vld [vmem:[#allocation141_spill] sm:$0xff]  ;;  %3890 = vmatpush.msra.mxu0 %v3060_v58 }
 0x712   : > { %v3184_v1 = vmul.f32 %v14168_v38, %v14168_v38  ;;  %v14169_v22 = vld [vmem:[#allocation209_spill] sm:$0xff]  ;;  %3909 = vmatpush.msra.mxu1 %v3128_v12  ;;  %3930 = vmatpush.msra.mxu2 %v3188_v51 }
 0x713   : > { %v3252_v14 = vmul.f32 %v14169_v22, %v14169_v22  ;;  %v14171_v42 = vld [vmem:[#allocation81_spill] sm:$0xff]  ;;  %3949 = vmatpush.msra.mxu3 %v3256_v4  ;;  %3891 = vmatpush.msra.mxu0 %v3056_v24 }
 0x714   : > { %v3120_v37 = vmul.f32 %v14171_v42, %v14171_v42  ;;  %v14172_v13 = vld [vmem:[#allocation137_spill] sm:$0xff]  ;;  %3910 = vmatpush.msra.mxu1 %v3124_v60  ;;  %3931 = vmatpush.msra.mxu2 %v3184_v1 }
 0x715   : > { %v3180_v23 = vmul.f32 %v14172_v13, %v14172_v13  ;;  %v14173_v43 = vld [vmem:[#allocation205_spill] sm:$0xff]  ;;  %3950 = vmatpush.msra.mxu3 %v3252_v14  ;;  %3892 = vmatpush.msra.mxu0 %v3052_v44 }
 0x716   : > { %v3248_v52 = vmul.f32 %v14173_v43, %v14173_v43  ;;  %v14174_v25 = vld [vmem:[#allocation77_spill] sm:$0xff]  ;;  %3911 = vmatpush.msra.mxu1 %v3120_v37 }
 0x717   : > { %v3116_v6 = vmul.f32 %v14174_v25, %v14174_v25  ;;  %v14175_v34 = vld [vmem:[#allocation133_spill] sm:$0xff]  ;;  %3932 = vmatpush.msra.mxu2 %v3180_v23  ;;  %3893 = vmatpush.msra.mxu0 %v3048_v63 }
 0x718   : > { %v3176_v50 = vmul.f32 %v14175_v34, %v14175_v34  ;;  %v14176_v55 = vld [vmem:[#allocation201_spill] sm:$0xff]  ;;  %3951 = vmatpush.msra.mxu3 %v3248_v52  ;;  %3894 = vmatmul.f32.vlgmr.msra.gmra.mxu0 %v13637_v32 }
 0x719   : > { %v3244_v27 = vmul.f32 %v14176_v55, %v14176_v55  ;;  %v14177_v28 = vld [vmem:[#allocation449_spill] sm:$0xff]  ;;  %3912 = vmatpush.msra.mxu1 %v3116_v6  ;;  %3958 = vmatpush.msrb.mxu0 %v3364_v21 }
 0x71a   : > { %v3492_v18 = vmul.f32 %v14177_v28, %v14177_v28  ;;  %v14178_v29 = vld [vmem:[#allocation73_spill] sm:$0xff]  ;;  %3933 = vmatpush.msra.mxu2 %v3176_v50 }
 0x71b   : > { %v3112_v17 = vmul.f32 %v14178_v29, %v14178_v29  ;;  %v14179_v36 = vld [vmem:[#allocation197_spill] sm:$0xff]  ;;  %3952 = vmatpush.msra.mxu3 %v3244_v27  ;;  %3959 = vmatpush.msrb.mxu0 %v3360_v61 }
 0x71c   : > { %v3240_v2 = vmul.f32 %v14179_v36, %v14179_v36  ;;  %v14180_v58 = vld [vmem:[#allocation385_spill] sm:$0xff]  ;;  %3998 = vmatpush.msrb.mxu2 %v3492_v18 }
 0x71d   : > { %v3428_v11 = vmul.f32 %v14180_v58, %v14180_v58  ;;  %v14181_v7 = vld [vmem:[#allocation445_spill] sm:$0xff]  ;;  %3913 = vmatpush.msra.mxu1 %v3112_v17  ;;  %3934 = vmatmul.f32.vlgmr.msra.gmra.mxu2 %v13637_v32 }
 0x71e   : > { %v3488_v12 = vmul.f32 %v14181_v7, %v14181_v7  ;;  %v14182_v30 = vld [vmem:[#allocation513_spill] sm:$0xff]  ;;  %3953 = vmatpush.msra.mxu3 %v3240_v2  ;;  %3914 = vmatmul.f32.vlgmr.msra.gmra.mxu1 %v13637_v32 }
 0x71f   : > { %v3556_v51 = vmul.f32 %v14182_v30, %v14182_v30  ;;  %v14183_v40 = vld [vmem:[#allocation313_spill] sm:$0xff]  ;;  %3978 = vmatpush.msrb.mxu1 %v3428_v11  ;;  %3954 = vmatmul.f32.vlgmr.msra.gmra.mxu3 %v13637_v32 }
 0x720   : > { %v3356_v4 = vmul.f32 %v14183_v40, %v14183_v40  ;;  %v14184_v19 = vld [vmem:[#allocation381_spill] sm:$0xff]  ;;  %3999 = vmatpush.msrb.mxu2 %v3488_v12 }
 0x721   : > { %v3424_v24 = vmul.f32 %v14184_v19, %v14184_v19  ;;  %v14185_v8 = vld [vmem:[#allocation441_spill] sm:$0xff]  ;;  %4018 = vmatpush.msrb.mxu3 %v3556_v51 }
 0x722   : > { %v3484_v45 = vmul.f32 %v14185_v8, %v14185_v8  ;;  %v14186_v60 = vld [vmem:[#allocation509_spill] sm:$0xff]  ;;  %3960 = vmatpush.msrb.mxu0 %v3356_v4 }
 0x723   : > { %v3552_v38 = vmul.f32 %v14186_v60, %v14186_v60  ;;  %v14187_v1 = vld [vmem:[#allocation309_spill] sm:$0xff]  ;;  %3979 = vmatpush.msrb.mxu1 %v3424_v24 }
 0x724   : > { %v3352_v22 = vmul.f32 %v14187_v1, %v14187_v1  ;;  %v14188_v14 = vld [vmem:[#allocation377_spill] sm:$0xff]  ;;  %4000 = vmatpush.msrb.mxu2 %v3484_v45 }
 0x725   : > { %v3420_v16 = vmul.f32 %v14188_v14, %v14188_v14  ;;  %v14189_v44 = vld [vmem:[#allocation437_spill] sm:$0xff]  ;;  %4019 = vmatpush.msrb.mxu3 %v3552_v38 }
 0x726   : > { %v3480_v42 = vmul.f32 %v14189_v44, %v14189_v44  ;;  %v14190_v37 = vld [vmem:[#allocation505_spill] sm:$0xff]  ;;  %3961 = vmatpush.msrb.mxu0 %v3352_v22 }
 0x727   : > { %v3548_v13 = vmul.f32 %v14190_v37, %v14190_v37  ;;  %v14191_v23 = vld [vmem:[#allocation305_spill] sm:$0xff]  ;;  %3980 = vmatpush.msrb.mxu1 %v3420_v16 }
 0x728   : > { %v3348_v43 = vmul.f32 %v14191_v23, %v14191_v23  ;;  %v14192_v52 = vld [vmem:[#allocation373_spill] sm:$0xff]  ;;  %4001 = vmatpush.msrb.mxu2 %v3480_v42 }
 0x729   : > { %v3416_v63 = vmul.f32 %v14192_v52, %v14192_v52  ;;  %v14193_v25 = vld [vmem:[#allocation433_spill] sm:$0xff]  ;;  %4020 = vmatpush.msrb.mxu3 %v3548_v13 }
 0x72a   : > { %v3476_v6 = vmul.f32 %v14193_v25, %v14193_v25  ;;  %v14194_v34 = vld [vmem:[#allocation501_spill] sm:$0xff]  ;;  %3962 = vmatpush.msrb.mxu0 %v3348_v43 }
 0x72b   : > { %v3544_v50 = vmul.f32 %v14194_v34, %v14194_v34  ;;  %v14195_v55 = vld [vmem:[#allocation301_spill] sm:$0xff]  ;;  %3981 = vmatpush.msrb.mxu1 %v3416_v63 }
 0x72c   : > { %v3344_v27 = vmul.f32 %v14195_v55, %v14195_v55  ;;  %v14196_v21 = vld [vmem:[#allocation369_spill] sm:$0xff]  ;;  %4002 = vmatpush.msrb.mxu2 %v3476_v6 }
 0x72d   : > { %v3412_v28 = vmul.f32 %v14196_v21, %v14196_v21  ;;  %v14197_v18 = vld [vmem:[#allocation429_spill] sm:$0xff]  ;;  %4021 = vmatpush.msrb.mxu3 %v3544_v50 }
 0x72e   : > { %v3472_v29 = vmul.f32 %v14197_v18, %v14197_v18  ;;  %v14198_v17 = vld [vmem:[#allocation497_spill] sm:$0xff]  ;;  %3963 = vmatpush.msrb.mxu0 %v3344_v27 }
 0x72f   : > { %v3540_v36 = vmul.f32 %v14198_v17, %v14198_v17  ;;  %v14199_v2 = vld [vmem:[#allocation297_spill] sm:$0xff]  ;;  %3982 = vmatpush.msrb.mxu1 %v3412_v28 }
 0x730   : > { %v3340_v61 = vmul.f32 %v14199_v2, %v14199_v2  ;;  %v14200_v58 = vld [vmem:[#allocation365_spill] sm:$0xff]  ;;  %4003 = vmatpush.msrb.mxu2 %v3472_v29 }
 0x731   : > { %v3408_v11 = vmul.f32 %v14200_v58, %v14200_v58  ;;  %v14201_v7 = vld [vmem:[#allocation425_spill] sm:$0xff]  ;;  %4022 = vmatpush.msrb.mxu3 %v3540_v36 }
 0x732   : > { %v3468_v12 = vmul.f32 %v14201_v7, %v14201_v7  ;;  %v14202_v30 = vld [vmem:[#allocation493_spill] sm:$0xff]  ;;  %3964 = vmatpush.msrb.mxu0 %v3340_v61 }
 0x733   : > { %v3536_v51 = vmul.f32 %v14202_v30, %v14202_v30  ;;  %v14203_v40 = vld [vmem:[#allocation293_spill] sm:$0xff]  ;;  %3983 = vmatpush.msrb.mxu1 %v3408_v11 }
 0x734   : > { %v3336_v4 = vmul.f32 %v14203_v40, %v14203_v40  ;;  %v14204_v19 = vld [vmem:[#allocation361_spill] sm:$0xff]  ;;  %4004 = vmatpush.msrb.mxu2 %v3468_v12 }
 0x735   : > { %v3404_v24 = vmul.f32 %v14204_v19, %v14204_v19  ;;  %v14205_v8 = vld [vmem:[#allocation421_spill] sm:$0xff]  ;;  %4023 = vmatpush.msrb.mxu3 %v3536_v51 }
 0x736   : > { %v3464_v45 = vmul.f32 %v14205_v8, %v14205_v8  ;;  %v14206_v60 = vld [vmem:[#allocation489_spill] sm:$0xff]  ;;  %3965 = vmatpush.msrb.mxu0 %v3336_v4 }
 0x737   : > { %v3532_v38 = vmul.f32 %v14206_v60, %v14206_v60  ;;  %v14207_v1 = vld [vmem:[#allocation289_spill] sm:$0xff]  ;;  %3984 = vmatpush.msrb.mxu1 %v3404_v24 }
 0x738   : > { %v3332_v22 = vmul.f32 %v14207_v1, %v14207_v1  ;;  %v14208_v14 = vld [vmem:[#allocation357_spill] sm:$0xff]  ;;  %4005 = vmatpush.msrb.mxu2 %v3464_v45 }
 0x739   : > { %v3400_v16 = vmul.f32 %v14208_v14, %v14208_v14  ;;  %v14209_v44 = vld [vmem:[#allocation417_spill] sm:$0xff]  ;;  %4024 = vmatpush.msrb.mxu3 %v3532_v38 }
 0x73a   : > { %v3460_v42 = vmul.f32 %v14209_v44, %v14209_v44  ;;  %v14210_v37 = vld [vmem:[#allocation485_spill] sm:$0xff]  ;;  %3966 = vmatpush.msrb.mxu0 %v3332_v22 }
 0x73b   : > { %v3528_v13 = vmul.f32 %v14210_v37, %v14210_v37  ;;  %v14211_v23 = vld [vmem:[#allocation285_spill] sm:$0xff]  ;;  %3985 = vmatpush.msrb.mxu1 %v3400_v16 }
 0x73c   : > { %v3328_v43 = vmul.f32 %v14211_v23, %v14211_v23  ;;  %v14212_v52 = vld [vmem:[#allocation353_spill] sm:$0xff]  ;;  %4006 = vmatpush.msrb.mxu2 %v3460_v42 }
 0x73d   : > { %v3396_v63 = vmul.f32 %v14212_v52, %v14212_v52  ;;  %v14213_v25 = vld [vmem:[#allocation413_spill] sm:$0xff]  ;;  %4025 = vmatpush.msrb.mxu3 %v3528_v13 }
 0x73e   : > { %v3456_v6 = vmul.f32 %v14213_v25, %v14213_v25  ;;  %v14214_v34 = vld [vmem:[#allocation481_spill] sm:$0xff]  ;;  %3967 = vmatpush.msrb.mxu0 %v3328_v43 }
 0x73f   : > { %v3524_v50 = vmul.f32 %v14214_v34, %v14214_v34  ;;  %v14215_v55 = vld [vmem:[#allocation281_spill] sm:$0xff]  ;;  %3986 = vmatpush.msrb.mxu1 %v3396_v63 }
 0x740   : > { %v3324_v27 = vmul.f32 %v14215_v55, %v14215_v55  ;;  %v14216_v21 = vld [vmem:[#allocation349_spill] sm:$0xff]  ;;  %4007 = vmatpush.msrb.mxu2 %v3456_v6 }
 0x741   : > { %v3392_v28 = vmul.f32 %v14216_v21, %v14216_v21  ;;  %v14217_v18 = vld [vmem:[#allocation409_spill] sm:$0xff]  ;;  %4026 = vmatpush.msrb.mxu3 %v3524_v50 }
 0x742   : > { %v3452_v29 = vmul.f32 %v14217_v18, %v14217_v18  ;;  %v14218_v17 = vld [vmem:[#allocation477_spill] sm:$0xff]  ;;  %3968 = vmatpush.msrb.mxu0 %v3324_v27 }
 0x743   : > { %v3520_v36 = vmul.f32 %v14218_v17, %v14218_v17  ;;  %v14219_v2 = vld [vmem:[#allocation277_spill] sm:$0xff]  ;;  %3987 = vmatpush.msrb.mxu1 %v3392_v28 }
 0x744   : > { %v3320_v61 = vmul.f32 %v14219_v2, %v14219_v2  ;;  %v14220_v58 = vld [vmem:[#allocation345_spill] sm:$0xff]  ;;  %4008 = vmatpush.msrb.mxu2 %v3452_v29  ;;  %v14239_v2 = vld [vmem:[#allocation70_spill] sm:$0xff] }
 0x745   : > { %v3388_v11 = vmul.f32 %v14220_v58, %v14220_v58  ;;  %v14221_v7 = vld [vmem:[#allocation405_spill] sm:$0xff]  ;;  %4027 = vmatpush.msrb.mxu3 %v3520_v36  ;;  %v14240_v58 = vld [vmem:[#allocation194_spill] sm:$0xff] }
 0x746   : > { %v3448_v12 = vmul.f32 %v14221_v7, %v14221_v7  ;;  %v14222_v30 = vld [vmem:[#allocation473_spill] sm:$0xff]  ;;  %3969 = vmatpush.msrb.mxu0 %v3320_v61  ;;  %v3109_v61 = vmul.f32 %v14239_v2, %v14239_v2 }
 0x747   : > { %v3516_v51 = vmul.f32 %v14222_v30, %v14222_v30  ;;  %v14223_v40 = vld [vmem:[#allocation273_spill] sm:$0xff]  ;;  %3988 = vmatpush.msrb.mxu1 %v3388_v11  ;;  %v3237_v11 = vmul.f32 %v14240_v58, %v14240_v58  ;;  %v14260_v58 = vld [vmem:[#allocation114_spill] sm:$0xff] }
 0x748   : > { %v3316_v4 = vmul.f32 %v14223_v40, %v14223_v40  ;;  %v14224_v19 = vld [vmem:[#allocation341_spill] sm:$0xff]  ;;  %4009 = vmatpush.msrb.mxu2 %v3448_v12  ;;  %v14243_v40 = vld [vmem:[#allocation66_spill] sm:$0xff] }
 0x749   : > { %v3384_v24 = vmul.f32 %v14224_v19, %v14224_v19  ;;  %v14225_v8 = vld [vmem:[#allocation401_spill] sm:$0xff]  ;;  %4028 = vmatpush.msrb.mxu3 %v3516_v51  ;;  %v14244_v19 = vld [vmem:[#allocation130_spill] sm:$0xff] }
 0x74a   : > { %v3444_v45 = vmul.f32 %v14225_v8, %v14225_v8  ;;  %v14226_v60 = vld [vmem:[#allocation469_spill] sm:$0xff]  ;;  %3970 = vmatpush.msrb.mxu0 %v3316_v4  ;;  %v3105_v4 = vmul.f32 %v14243_v40, %v14243_v40  ;;  %v14245_v8 = vld [vmem:[#allocation190_spill] sm:$0xff] }
 0x74b   : > { %v3512_v38 = vmul.f32 %v14226_v60, %v14226_v60  ;;  %v14227_v1 = vld [vmem:[#allocation269_spill] sm:$0xff]  ;;  %3989 = vmatpush.msrb.mxu1 %v3384_v24  ;;  %v3173_v24 = vmul.f32 %v14244_v19, %v14244_v19  ;;  %v14246_v60 = vld [vmem:[#allocation258_spill] sm:$0xff] }
 0x74c   : > { %v3312_v22 = vmul.f32 %v14227_v1, %v14227_v1  ;;  %v14228_v14 = vld [vmem:[#allocation337_spill] sm:$0xff]  ;;  %4010 = vmatpush.msrb.mxu2 %v3444_v45  ;;  %v3233_v45 = vmul.f32 %v14245_v8, %v14245_v8  ;;  %v14247_v1 = vld [vmem:[#allocation62_spill] sm:$0xff] }
 0x74d   : > { %v3380_v16 = vmul.f32 %v14228_v14, %v14228_v14  ;;  %v14229_v44 = vld [vmem:[#allocation397_spill] sm:$0xff]  ;;  %4029 = vmatpush.msrb.mxu3 %v3512_v38  ;;  %v3301_v38 = vmul.f32 %v14246_v60, %v14246_v60  ;;  %v14248_v14 = vld [vmem:[#allocation126_spill] sm:$0xff] }
 0x74e   : > { %v3440_v42 = vmul.f32 %v14229_v44, %v14229_v44  ;;  %v14230_v37 = vld [vmem:[#allocation465_spill] sm:$0xff]  ;;  %3971 = vmatpush.msrb.mxu0 %v3312_v22  ;;  %v3101_v22 = vmul.f32 %v14247_v1, %v14247_v1  ;;  %v14249_v44 = vld [vmem:[#allocation186_spill] sm:$0xff]  ;;  %v14267_v1 = vld [vmem:[#allocation47_spill] sm:$0xff] }
 0x74f   : > { %v3508_v13 = vmul.f32 %v14230_v37, %v14230_v37  ;;  %v14231_v23 = vld [vmem:[#allocation265_spill] sm:$0xff]  ;;  %3990 = vmatpush.msrb.mxu1 %v3380_v16  ;;  %v3169_v16 = vmul.f32 %v14248_v14, %v14248_v14  ;;  %v14250_v37 = vld [vmem:[#allocation254_spill] sm:$0xff] }
 0x750   : > { %v3308_v43 = vmul.f32 %v14231_v23, %v14231_v23  ;;  %v14232_v52 = vld [vmem:[#allocation333_spill] sm:$0xff]  ;;  %4011 = vmatpush.msrb.mxu2 %v3440_v42  ;;  %v3229_v42 = vmul.f32 %v14249_v44, %v14249_v44  ;;  %v14251_v23 = vld [vmem:[#allocation59_spill] sm:$0xff]  ;;  %v14263_v40 = vld [vmem:[#allocation50_spill] sm:$0xff] }
 0x751   : > { %v3376_v63 = vmul.f32 %v14232_v52, %v14232_v52  ;;  %v14233_v25 = vld [vmem:[#allocation393_spill] sm:$0xff]  ;;  %4030 = vmatpush.msrb.mxu3 %v3508_v13  ;;  %v3297_v13 = vmul.f32 %v14250_v37, %v14250_v37  ;;  %v14252_v52 = vld [vmem:[#allocation122_spill] sm:$0xff] }
 0x752   : > { %v3436_v6 = vmul.f32 %v14233_v25, %v14233_v25  ;;  %v14234_v34 = vld [vmem:[#allocation461_spill] sm:$0xff]  ;;  %3972 = vmatpush.msrb.mxu0 %v3308_v43  ;;  %v3097_v43 = vmul.f32 %v14251_v23, %v14251_v23  ;;  %v14253_v25 = vld [vmem:[#allocation182_spill] sm:$0xff]  ;;  %v14271_v23 = vld [vmem:[#allocation44_spill] sm:$0xff] }
 0x753   : > { %v3504_v50 = vmul.f32 %v14234_v34, %v14234_v34  ;;  %v14235_v55 = vld [vmem:[#allocation261_spill] sm:$0xff]  ;;  %3991 = vmatpush.msrb.mxu1 %v3376_v63  ;;  %v3165_v63 = vmul.f32 %v14252_v52, %v14252_v52  ;;  %v14254_v34 = vld [vmem:[#allocation250_spill] sm:$0xff]  ;;  %v14272_v52 = vld [vmem:[#allocation103_spill] sm:$0xff] }
 0x754   : > { %v3304_v27 = vmul.f32 %v14235_v55, %v14235_v55  ;;  %v14236_v21 = vld [vmem:[#allocation329_spill] sm:$0xff]  ;;  %4012 = vmatpush.msrb.mxu2 %v3436_v6  ;;  %v3225_v6 = vmul.f32 %v14253_v25, %v14253_v25  ;;  %v14255_v55 = vld [vmem:[#allocation56_spill] sm:$0xff]  ;;  %v14264_v19 = vld [vmem:[#allocation110_spill] sm:$0xff] }
 0x755   : > { %v3372_v28 = vmul.f32 %v14236_v21, %v14236_v21  ;;  %v14237_v18 = vld [vmem:[#allocation389_spill] sm:$0xff]  ;;  %4031 = vmatpush.msrb.mxu3 %v3504_v50  ;;  %v3293_v50 = vmul.f32 %v14254_v34, %v14254_v34  ;;  %v14256_v21 = vld [vmem:[#allocation118_spill] sm:$0xff] }
 0x756   : > { %v3432_v29 = vmul.f32 %v14237_v18, %v14237_v18  ;;  %v14238_v17 = vld [vmem:[#allocation457_spill] sm:$0xff]  ;;  %3973 = vmatpush.msrb.mxu0 %v3304_v27  ;;  %v3093_v27 = vmul.f32 %v14255_v55, %v14255_v55  ;;  %v14257_v18 = vld [vmem:[#allocation178_spill] sm:$0xff] }
 0x757   : > { %v3500_v36 = vmul.f32 %v14238_v17, %v14238_v17  ;;  %v14241_v7 = vld [vmem:[#allocation325_spill] sm:$0xff]  ;;  %3992 = vmatpush.msrb.mxu1 %v3372_v28  ;;  %3974 = vmatmul.f32.vlgmr.msrb.gmra.mxu0 %v13637_v32  ;;  %v3161_v28 = vmul.f32 %v14256_v21, %v14256_v21  ;;  %v14258_v17 = vld [vmem:[#allocation246_spill] sm:$0xff]  ;;  %v14276_v21 = vld [vmem:[#allocation100_spill] sm:$0xff] }
 0x758   : > { %v3368_v12 = vmul.f32 %v14241_v7, %v14241_v7  ;;  %v14242_v30 = vld [vmem:[#allocation453_spill] sm:$0xff]  ;;  %4013 = vmatpush.msrb.mxu2 %v3432_v29  ;;  %4038 = vmatpush.msra.mxu0 %v3109_v61  ;;  %v3221_v29 = vmul.f32 %v14257_v18, %v14257_v18  ;;  %v14261_v7 = vld [vmem:[#allocation174_spill] sm:$0xff] }
 0x759   : > { %v3496_v51 = vmul.f32 %v14242_v30, %v14242_v30  ;;  %4032 = vmatpush.msrb.mxu3 %v3500_v36  ;;  %4014 = vmatmul.f32.vlgmr.msrb.gmra.mxu2 %v13637_v32  ;;  %v3289_v36 = vmul.f32 %v14258_v17, %v14258_v17  ;;  %v14259_v2 = vld [vmem:[#allocation53_spill] sm:$0xff]  ;;  %v14262_v30 = vld [vmem:[#allocation242_spill] sm:$0xff] }
 0x75a   : > { %4078 = vmatpush.msra.mxu2 %v3237_v11  ;;  %3993 = vmatpush.msrb.mxu1 %v3368_v12  ;;  %v3089_v61 = vmul.f32 %v14259_v2, %v14259_v2  ;;  %v3157_v11 = vmul.f32 %v14260_v58, %v14260_v58  ;;  %v3217_v12 = vmul.f32 %v14261_v7, %v14261_v7  ;;  %v14265_v8 = vld [vmem:[#allocation170_spill] sm:$0xff]  ;;  %v14275_v55 = vld [vmem:[#allocation41_spill] sm:$0xff] }
 0x75b   : > { %4033 = vmatpush.msrb.mxu3 %v3496_v51  ;;  %4039 = vmatpush.msra.mxu0 %v3105_v4  ;;  %v3285_v51 = vmul.f32 %v14262_v30, %v14262_v30  ;;  %v3085_v4 = vmul.f32 %v14263_v40, %v14263_v40  ;;  %v14266_v60 = vld [vmem:[#allocation238_spill] sm:$0xff]  ;;  %v14280_v58 = vld [vmem:[#allocation97_spill] sm:$0xff]  ;;  %v14283_v40 = vld [vmem:[#allocation35_spill] sm:$0xff] }
 0x75c   : > { %4034 = vmatmul.f32.vlgmr.msrb.gmra.mxu3 %v13637_v32  ;;  %4058 = vmatpush.msra.mxu1 %v3173_v24  ;;  %v3153_v24 = vmul.f32 %v14264_v19, %v14264_v19  ;;  %v14268_v14 = vld [vmem:[#allocation106_spill] sm:$0xff] }
 0x75d   : > { %4079 = vmatpush.msra.mxu2 %v3233_v45  ;;  %4098 = vmatpush.msra.mxu3 %v3301_v38  ;;  %v3213_v45 = vmul.f32 %v14265_v8, %v14265_v8  ;;  %v3281_v38 = vmul.f32 %v14266_v60, %v14266_v60  ;;  %v14269_v44 = vld [vmem:[#allocation166_spill] sm:$0xff] }
 0x75e   : > { %3994 = vmatmul.f32.vlgmr.msrb.gmra.mxu1 %v13637_v32  ;;  %4040 = vmatpush.msra.mxu0 %v3101_v22  ;;  %v3081_v22 = vmul.f32 %v14267_v1, %v14267_v1  ;;  %v14270_v37 = vld [vmem:[#allocation234_spill] sm:$0xff]  ;;  %v14287_v1 = vld [vmem:[#allocation31_spill] sm:$0xff] }
 0x75f   : > { %4059 = vmatpush.msra.mxu1 %v3169_v16  ;;  %4080 = vmatpush.msra.mxu2 %v3229_v42  ;;  %v3149_v16 = vmul.f32 %v14268_v14, %v14268_v14  ;;  %v3209_v42 = vmul.f32 %v14269_v44, %v14269_v44  ;;  %v14273_v25 = vld [vmem:[#allocation162_spill] sm:$0xff] }
 0x760   : > { %4099 = vmatpush.msra.mxu3 %v3297_v13  ;;  %4041 = vmatpush.msra.mxu0 %v3097_v43  ;;  %v3277_v13 = vmul.f32 %v14270_v37, %v14270_v37  ;;  %v3077_v43 = vmul.f32 %v14271_v23, %v14271_v23  ;;  %v14274_v34 = vld [vmem:[#allocation230_spill] sm:$0xff]  ;;  %v14291_v23 = vld [vmem:[#allocation27_spill] sm:$0xff] }
 0x761   : > { %4060 = vmatpush.msra.mxu1 %v3165_v63  ;;  %4081 = vmatpush.msra.mxu2 %v3225_v6  ;;  %v3145_v63 = vmul.f32 %v14272_v52, %v14272_v52  ;;  %v3205_v6 = vmul.f32 %v14273_v25, %v14273_v25  ;;  %v14277_v18 = vld [vmem:[#allocation158_spill] sm:$0xff] }
 0x762   : > { %4100 = vmatpush.msra.mxu3 %v3293_v50  ;;  %4042 = vmatpush.msra.mxu0 %v3093_v27  ;;  %v3273_v50 = vmul.f32 %v14274_v34, %v14274_v34  ;;  %v3073_v27 = vmul.f32 %v14275_v55, %v14275_v55  ;;  %v14278_v17 = vld [vmem:[#allocation226_spill] sm:$0xff]  ;;  %v14295_v55 = vld [vmem:[#allocation23_spill] sm:$0xff] }
 0x763   : > { %4061 = vmatpush.msra.mxu1 %v3161_v28  ;;  %4082 = vmatpush.msra.mxu2 %v3221_v29  ;;  %v3141_v28 = vmul.f32 %v14276_v21, %v14276_v21  ;;  %v3201_v29 = vmul.f32 %v14277_v18, %v14277_v18  ;;  %v14279_v2 = vld [vmem:[#allocation38_spill] sm:$0xff] }
 0x764   : > { %4101 = vmatpush.msra.mxu3 %v3289_v36  ;;  %4043 = vmatpush.msra.mxu0 %v3089_v61  ;;  %v3269_v36 = vmul.f32 %v14278_v17, %v14278_v17  ;;  %v3069_v61 = vmul.f32 %v14279_v2, %v14279_v2  ;;  %v14281_v7 = vld [vmem:[#allocation154_spill] sm:$0xff]  ;;  %v3049_v2 = vmul.f32 %v13839_v35, %v13839_v35 }
 0x765   : > { %4062 = vmatpush.msra.mxu1 %v3157_v11  ;;  %4083 = vmatpush.msra.mxu2 %v3217_v12  ;;  %v3137_v11 = vmul.f32 %v14280_v58, %v14280_v58  ;;  %v3197_v12 = vmul.f32 %v14281_v7, %v14281_v7  ;;  %v14282_v30 = vld [vmem:[#allocation222_spill] sm:$0xff] }
 0x766   : > { %4102 = vmatpush.msra.mxu3 %v3285_v51  ;;  %4044 = vmatpush.msra.mxu0 %v3085_v4  ;;  %v3265_v51 = vmul.f32 %v14282_v30, %v14282_v30  ;;  %v3065_v4 = vmul.f32 %v14283_v40, %v14283_v40  ;;  %v14284_v19 = vld [vmem:[#allocation94_spill] sm:$0xff] }
 0x767   : > { %4063 = vmatpush.msra.mxu1 %v3153_v24  ;;  %4084 = vmatpush.msra.mxu2 %v3213_v45  ;;  %v3133_v24 = vmul.f32 %v14284_v19, %v14284_v19  ;;  %v14285_v8 = vld [vmem:[#allocation150_spill] sm:$0xff] }
 0x768   : > { %4103 = vmatpush.msra.mxu3 %v3281_v38  ;;  %4045 = vmatpush.msra.mxu0 %v3081_v22  ;;  %v3193_v45 = vmul.f32 %v14285_v8, %v14285_v8  ;;  %v14286_v60 = vld [vmem:[#allocation218_spill] sm:$0xff]  ;;  %v3061_v22 = vmul.f32 %v14287_v1, %v14287_v1 }
 0x769   : > { %4064 = vmatpush.msra.mxu1 %v3149_v16  ;;  %4085 = vmatpush.msra.mxu2 %v3209_v42  ;;  %v3261_v38 = vmul.f32 %v14286_v60, %v14286_v60  ;;  %v14288_v14 = vld [vmem:[#allocation90_spill] sm:$0xff] }
 0x76a   : > { %4104 = vmatpush.msra.mxu3 %v3277_v13  ;;  %4046 = vmatpush.msra.mxu0 %v3077_v43  ;;  %v3129_v16 = vmul.f32 %v14288_v14, %v14288_v14  ;;  %v14289_v44 = vld [vmem:[#allocation146_spill] sm:$0xff]  ;;  %v3057_v43 = vmul.f32 %v14291_v23, %v14291_v23 }
 0x76b   : > { %4065 = vmatpush.msra.mxu1 %v3145_v63  ;;  %4086 = vmatpush.msra.mxu2 %v3205_v6  ;;  %v3189_v42 = vmul.f32 %v14289_v44, %v14289_v44  ;;  %v14290_v37 = vld [vmem:[#allocation214_spill] sm:$0xff] }
 0x76c   : > { %4105 = vmatpush.msra.mxu3 %v3273_v50  ;;  %4047 = vmatpush.msra.mxu0 %v3073_v27  ;;  %v3257_v13 = vmul.f32 %v14290_v37, %v14290_v37  ;;  %v14292_v52 = vld [vmem:[#allocation86_spill] sm:$0xff]  ;;  %v3053_v27 = vmul.f32 %v14295_v55, %v14295_v55 }
 0x76d   : > { %4066 = vmatpush.msra.mxu1 %v3141_v28  ;;  %4087 = vmatpush.msra.mxu2 %v3201_v29  ;;  %v3125_v63 = vmul.f32 %v14292_v52, %v14292_v52  ;;  %v14293_v25 = vld [vmem:[#allocation142_spill] sm:$0xff] }
 0x76e   : > { %4106 = vmatpush.msra.mxu3 %v3269_v36  ;;  %4048 = vmatpush.msra.mxu0 %v3069_v61  ;;  %v3185_v6 = vmul.f32 %v14293_v25, %v14293_v25  ;;  %v14294_v34 = vld [vmem:[#allocation210_spill] sm:$0xff] }
 0x76f   : > { %4067 = vmatpush.msra.mxu1 %v3137_v11  ;;  %4088 = vmatpush.msra.mxu2 %v3197_v12  ;;  %v3253_v50 = vmul.f32 %v14294_v34, %v14294_v34  ;;  %v14296_v21 = vld [vmem:[#allocation82_spill] sm:$0xff] }
 0x770   : > { %4107 = vmatpush.msra.mxu3 %v3265_v51  ;;  %4049 = vmatpush.msra.mxu0 %v3065_v4  ;;  %v3121_v28 = vmul.f32 %v14296_v21, %v14296_v21  ;;  %v14297_v18 = vld [vmem:[#allocation138_spill] sm:$0xff]  ;;  %v3365_v51 = vmul.f32 %v13843_v53, %v13843_v53 }
 0x771   : > { %4068 = vmatpush.msra.mxu1 %v3133_v24  ;;  %4089 = vmatpush.msra.mxu2 %v3193_v45  ;;  %v3181_v29 = vmul.f32 %v14297_v18, %v14297_v18  ;;  %v14298_v17 = vld [vmem:[#allocation206_spill] sm:$0xff]  ;;  %v3361_v45 = vmul.f32 %v13847_v48, %v13847_v48 }
 0x772   : > { %4108 = vmatpush.msra.mxu3 %v3261_v38  ;;  %4050 = vmatpush.msra.mxu0 %v3061_v22  ;;  %v3249_v36 = vmul.f32 %v14298_v17, %v14298_v17  ;;  %v14299_v61 = vld [vmem:[#allocation78_spill] sm:$0xff] }
 0x773   : > { %4069 = vmatpush.msra.mxu1 %v3129_v16  ;;  %4090 = vmatpush.msra.mxu2 %v3189_v42  ;;  %v3117_v58 = vmul.f32 %v14299_v61, %v14299_v61  ;;  %v14300_v11 = vld [vmem:[#allocation134_spill] sm:$0xff] }
 0x774   : > { %4109 = vmatpush.msra.mxu3 %v3257_v13  ;;  %4051 = vmatpush.msra.mxu0 %v3057_v43  ;;  %v3177_v7 = vmul.f32 %v14300_v11, %v14300_v11  ;;  %v14301_v12 = vld [vmem:[#allocation202_spill] sm:$0xff] }
 0x775   : > { %4070 = vmatpush.msra.mxu1 %v3125_v63  ;;  %4091 = vmatpush.msra.mxu2 %v3185_v6  ;;  %v3245_v30 = vmul.f32 %v14301_v12, %v14301_v12  ;;  %v14302_v40 = vld [vmem:[#allocation450_spill] sm:$0xff] }
 0x776   : > { %4110 = vmatpush.msra.mxu3 %v3253_v50  ;;  %4052 = vmatpush.msra.mxu0 %v3053_v27  ;;  %v3493_v4 = vmul.f32 %v14302_v40, %v14302_v40  ;;  %v14303_v35 = vld [vmem:[#allocation74_spill] sm:$0xff] }
 0x777   : > { %4071 = vmatpush.msra.mxu1 %v3121_v28  ;;  %4092 = vmatpush.msra.mxu2 %v3181_v29  ;;  %v3113_v19 = vmul.f32 %v14303_v35, %v14303_v35  ;;  %v14304_v24 = vld [vmem:[#allocation198_spill] sm:$0xff] }
 0x778   : > { %4111 = vmatpush.msra.mxu3 %v3249_v36  ;;  %v3241_v8 = vmul.f32 %v14304_v24, %v14304_v24  ;;  %4053 = vmatpush.msra.mxu0 %v3049_v2  ;;  %v14305_v60 = vld [vmem:[#allocation386_spill] sm:$0xff] }
 0x779   : > { %4072 = vmatpush.msra.mxu1 %v3117_v58  ;;  %v3429_v38 = vmul.f32 %v14305_v60, %v14305_v60  ;;  %4093 = vmatpush.msra.mxu2 %v3177_v7  ;;  %v14306_v53 = vld [vmem:[#allocation446_spill] sm:$0xff] }
 0x77a   : > { %4112 = vmatpush.msra.mxu3 %v3245_v30  ;;  %v3489_v1 = vmul.f32 %v14306_v53, %v14306_v53  ;;  %v14307_v22 = vld [vmem:[#allocation514_spill] sm:$0xff]  ;;  %4118 = vmatpush.msrb.mxu0 %v3365_v51 }
 0x77b   : > { %v3557_v14 = vmul.f32 %v14307_v22, %v14307_v22  ;;  %4158 = vmatpush.msrb.mxu2 %v3493_v4  ;;  %v14308_v16 = vld [vmem:[#allocation314_spill] sm:$0xff]  ;;  %4073 = vmatpush.msra.mxu1 %v3113_v19 }
 0x77c   : > { %v3357_v44 = vmul.f32 %v14308_v16, %v14308_v16  ;;  %v14309_v42 = vld [vmem:[#allocation382_spill] sm:$0xff]  ;;  %4113 = vmatpush.msra.mxu3 %v3241_v8  ;;  %4119 = vmatpush.msrb.mxu0 %v3361_v45 }
 0x77d   : > { %v3425_v37 = vmul.f32 %v14309_v42, %v14309_v42  ;;  %v14310_v48 = vld [vmem:[#allocation442_spill] sm:$0xff]  ;;  %4138 = vmatpush.msrb.mxu1 %v3429_v38  ;;  %4159 = vmatpush.msrb.mxu2 %v3489_v1 }
 0x77e   : > { %v3485_v13 = vmul.f32 %v14310_v48, %v14310_v48  ;;  %v14311_v23 = vld [vmem:[#allocation510_spill] sm:$0xff]  ;;  %4178 = vmatpush.msrb.mxu3 %v3557_v14  ;;  %4120 = vmatpush.msrb.mxu0 %v3357_v44 }
 0x77f   : > { %v3553_v43 = vmul.f32 %v14311_v23, %v14311_v23  ;;  %v14312_v52 = vld [vmem:[#allocation310_spill] sm:$0xff]  ;;  %4139 = vmatpush.msrb.mxu1 %v3425_v37  ;;  %4094 = vmatmul.f32.vlgmr.msra.gmra.mxu2 %v13637_v32 }
 0x780   : > { %v3353_v63 = vmul.f32 %v14312_v52, %v14312_v52  ;;  %v14313_v25 = vld [vmem:[#allocation378_spill] sm:$0xff]  ;;  %4160 = vmatpush.msrb.mxu2 %v3485_v13  ;;  %4054 = vmatmul.f32.vlgmr.msra.gmra.mxu0 %v13637_v32 }
 0x781   : > { %v3421_v6 = vmul.f32 %v14313_v25, %v14313_v25  ;;  %v14314_v34 = vld [vmem:[#allocation438_spill] sm:$0xff]  ;;  %4179 = vmatpush.msrb.mxu3 %v3553_v43  ;;  %4074 = vmatmul.f32.vlgmr.msra.gmra.mxu1 %v13637_v32 }
 0x782   : > { %v3481_v50 = vmul.f32 %v14314_v34, %v14314_v34  ;;  %v14315_v55 = vld [vmem:[#allocation506_spill] sm:$0xff]  ;;  %4121 = vmatpush.msrb.mxu0 %v3353_v63  ;;  %4114 = vmatmul.f32.vlgmr.msra.gmra.mxu3 %v13637_v32 }
 0x783   : > { %v3549_v27 = vmul.f32 %v14315_v55, %v14315_v55  ;;  %v14316_v21 = vld [vmem:[#allocation306_spill] sm:$0xff]  ;;  %4140 = vmatpush.msrb.mxu1 %v3421_v6 }
 0x784   : > { %v3349_v28 = vmul.f32 %v14316_v21, %v14316_v21  ;;  %v14317_v18 = vld [vmem:[#allocation374_spill] sm:$0xff]  ;;  %4161 = vmatpush.msrb.mxu2 %v3481_v50 }
 0x785   : > { %v3417_v29 = vmul.f32 %v14317_v18, %v14317_v18  ;;  %v14318_v17 = vld [vmem:[#allocation434_spill] sm:$0xff]  ;;  %4180 = vmatpush.msrb.mxu3 %v3549_v27  ;;  %v3397_v27 = vmul.f32 %v13877_v3, %v13877_v3 }
 0x786   : > { %v3477_v36 = vmul.f32 %v14318_v17, %v14318_v17  ;;  %v14319_v2 = vld [vmem:[#allocation502_spill] sm:$0xff]  ;;  %4122 = vmatpush.msrb.mxu0 %v3349_v28 }
 0x787   : > { %v3545_v61 = vmul.f32 %v14319_v2, %v14319_v2  ;;  %v14320_v58 = vld [vmem:[#allocation302_spill] sm:$0xff]  ;;  %4141 = vmatpush.msrb.mxu1 %v3417_v29 }
 0x788   : > { %v3345_v11 = vmul.f32 %v14320_v58, %v14320_v58  ;;  %v14321_v7 = vld [vmem:[#allocation370_spill] sm:$0xff]  ;;  %4162 = vmatpush.msrb.mxu2 %v3477_v36 }
 0x789   : > { %v3413_v12 = vmul.f32 %v14321_v7, %v14321_v7  ;;  %v14322_v30 = vld [vmem:[#allocation430_spill] sm:$0xff]  ;;  %4181 = vmatpush.msrb.mxu3 %v3545_v61 }
 0x78a   : > { %v3473_v51 = vmul.f32 %v14322_v30, %v14322_v30  ;;  %v14323_v40 = vld [vmem:[#allocation498_spill] sm:$0xff]  ;;  %4123 = vmatpush.msrb.mxu0 %v3345_v11 }
 0x78b   : > { %v3541_v4 = vmul.f32 %v14323_v40, %v14323_v40  ;;  %v14324_v35 = vld [vmem:[#allocation298_spill] sm:$0xff]  ;;  %4142 = vmatpush.msrb.mxu1 %v3413_v12 }
 0x78c   : > { %v3341_v19 = vmul.f32 %v14324_v35, %v14324_v35  ;;  %v14325_v24 = vld [vmem:[#allocation366_spill] sm:$0xff]  ;;  %4163 = vmatpush.msrb.mxu2 %v3473_v51 }
 0x78d   : > { %v3409_v8 = vmul.f32 %v14325_v24, %v14325_v24  ;;  %v14326_v45 = vld [vmem:[#allocation426_spill] sm:$0xff]  ;;  %4182 = vmatpush.msrb.mxu3 %v3541_v4 }
 0x78e   : > { %v3469_v60 = vmul.f32 %v14326_v45, %v14326_v45  ;;  %v14327_v38 = vld [vmem:[#allocation494_spill] sm:$0xff]  ;;  %4124 = vmatpush.msrb.mxu0 %v3341_v19 }
 0x78f   : > { %v3537_v53 = vmul.f32 %v14327_v38, %v14327_v38  ;;  %v14328_v1 = vld [vmem:[#allocation294_spill] sm:$0xff]  ;;  %4143 = vmatpush.msrb.mxu1 %v3409_v8 }
 0x790   : > { %v3337_v22 = vmul.f32 %v14328_v1, %v14328_v1  ;;  %v14329_v14 = vld [vmem:[#allocation362_spill] sm:$0xff]  ;;  %4164 = vmatpush.msrb.mxu2 %v3469_v60 }
 0x791   : > { %v3405_v16 = vmul.f32 %v14329_v14, %v14329_v14  ;;  %v14330_v44 = vld [vmem:[#allocation422_spill] sm:$0xff]  ;;  %4183 = vmatpush.msrb.mxu3 %v3537_v53 }
 0x792   : > { %v3465_v42 = vmul.f32 %v14330_v44, %v14330_v44  ;;  %v14331_v37 = vld [vmem:[#allocation490_spill] sm:$0xff]  ;;  %4125 = vmatpush.msrb.mxu0 %v3337_v22 }
 0x793   : > { %v3533_v48 = vmul.f32 %v14331_v37, %v14331_v37  ;;  %v14332_v13 = vld [vmem:[#allocation290_spill] sm:$0xff]  ;;  %4144 = vmatpush.msrb.mxu1 %v3405_v16 }
 0x794   : > { %v3333_v23 = vmul.f32 %v14332_v13, %v14332_v13  ;;  %v14333_v43 = vld [vmem:[#allocation358_spill] sm:$0xff]  ;;  %4165 = vmatpush.msrb.mxu2 %v3465_v42 }
 0x795   : > { %v3401_v52 = vmul.f32 %v14333_v43, %v14333_v43  ;;  %v14334_v63 = vld [vmem:[#allocation418_spill] sm:$0xff]  ;;  %4184 = vmatpush.msrb.mxu3 %v3533_v48 }
 0x796   : > { %v3461_v25 = vmul.f32 %v14334_v63, %v14334_v63  ;;  %v14335_v6 = vld [vmem:[#allocation486_spill] sm:$0xff]  ;;  %4126 = vmatpush.msrb.mxu0 %v3333_v23 }
 0x797   : > { %v3529_v34 = vmul.f32 %v14335_v6, %v14335_v6  ;;  %v14336_v50 = vld [vmem:[#allocation286_spill] sm:$0xff]  ;;  %4145 = vmatpush.msrb.mxu1 %v3401_v52  ;;  %v3309_v52 = vmul.f32 %v13896_v39, %v13896_v39  ;;  %v3437_v6 = vmul.f32 %v13898_v31, %v13898_v31  ;;  %v3497_v31 = vmul.f32 %v13905_v62, %v13905_v62 }
 0x798   : > { %v3329_v55 = vmul.f32 %v14336_v50, %v14336_v50  ;;  %v14337_v21 = vld [vmem:[#allocation414_spill] sm:$0xff]  ;;  %4166 = vmatpush.msrb.mxu2 %v3461_v25 }
 0x799   : > { %v3457_v28 = vmul.f32 %v14337_v21, %v14337_v21  ;;  %v14338_v18 = vld [vmem:[#allocation482_spill] sm:$0xff]  ;;  %4185 = vmatpush.msrb.mxu3 %v3529_v34  ;;  %4146 = vmatpush.msrb.mxu1 %v3397_v27  ;;  %v3505_v34 = vmul.f32 %v13899_v26, %v13899_v26  ;;  %v3369_v26 = vmul.f32 %v13904_v57, %v13904_v57  ;;  %v3615_v57 = vpop.f32.mrf.mxu2 }
 0x79a   : > { %v3525_v29 = vmul.f32 %v14338_v18, %v14338_v18  ;;  %v14339_v17 = vld [vmem:[#allocation282_spill] sm:$0xff]  ;;  %4127 = vmatpush.msrb.mxu0 %v3329_v55  ;;  %v3501_v18 = vmul.f32 %v13903_v46, %v13903_v46  ;;  %v3575_v46 = vpop.f32.mrf.mxu0 }
 0x79b   : > { %v3325_v36 = vmul.f32 %v14339_v17, %v14339_v17  ;;  %v14340_v2 = vld [vmem:[#allocation350_spill] sm:$0xff]  ;;  %4167 = vmatpush.msrb.mxu2 %v3457_v28  ;;  %v3635_v17 = vpop.f32.mrf.mxu3 }
 0x79c   : > { %v3393_v61 = vmul.f32 %v14340_v2, %v14340_v2  ;;  %v14341_v58 = vld [vmem:[#allocation410_spill] sm:$0xff]  ;;  %4186 = vmatpush.msrb.mxu3 %v3525_v29  ;;  %v3595_v29 = vpop.f32.mrf.mxu1 }
 0x79d   : > { %v3453_v3 = vmul.f32 %v14341_v58, %v14341_v58  ;;  %v14342_v11 = vld [vmem:[#allocation478_spill] sm:$0xff]  ;;  %4128 = vmatpush.msrb.mxu0 %v3325_v36 }
 0x79e   : > { %v3521_v7 = vmul.f32 %v14342_v11, %v14342_v11  ;;  %v14343_v12 = vld [vmem:[#allocation278_spill] sm:$0xff]  ;;  %4147 = vmatpush.msrb.mxu1 %v3393_v61 }
 0x79f   : > { %v3321_v30 = vmul.f32 %v14343_v12, %v14343_v12  ;;  %v14344_v51 = vld [vmem:[#allocation346_spill] sm:$0xff]  ;;  %4168 = vmatpush.msrb.mxu2 %v3453_v3 }
 0x7a0   : > { %v3389_v40 = vmul.f32 %v14344_v51, %v14344_v51  ;;  %v14345_v4 = vld [vmem:[#allocation406_spill] sm:$0xff]  ;;  %4187 = vmatpush.msrb.mxu3 %v3521_v7 }
 0x7a1   : > { %v3449_v35 = vmul.f32 %v14345_v4, %v14345_v4  ;;  %v14346_v19 = vld [vmem:[#allocation474_spill] sm:$0xff]  ;;  %4129 = vmatpush.msrb.mxu0 %v3321_v30  ;;  %v3695_v2 = vpop.f32.mrf.mxu2 }
 0x7a2   : > { %v3517_v24 = vmul.f32 %v14346_v19, %v14346_v19  ;;  %v14347_v8 = vld [vmem:[#allocation274_spill] sm:$0xff]  ;;  %4148 = vmatpush.msrb.mxu1 %v3389_v40  ;;  %v3655_v36 = vpop.f32.mrf.mxu0 }
 0x7a3   : > { %v3317_v45 = vmul.f32 %v14347_v8, %v14347_v8  ;;  %v14348_v60 = vld [vmem:[#allocation342_spill] sm:$0xff]  ;;  %4169 = vmatpush.msrb.mxu2 %v3449_v35  ;;  %v3715_v61 = vpop.f32.mrf.mxu3  ;;  %v3596_v8 = vadd.f32 %v3595_v29, %v3575_v46 }
 0x7a4   : > { %v3385_v38 = vmul.f32 %v14348_v60, %v14348_v60  ;;  %v14349_v53 = vld [vmem:[#allocation402_spill] sm:$0xff]  ;;  %4188 = vmatpush.msrb.mxu3 %v3517_v24  ;;  %v3675_v62 = vpop.f32.mrf.mxu1 }
 0x7a5   : > { %v3445_v1 = vmul.f32 %v14349_v53, %v14349_v53  ;;  %v14350_v22 = vld [vmem:[#allocation470_spill] sm:$0xff]  ;;  %4130 = vmatpush.msrb.mxu0 %v3317_v45  ;;  %v3616_v53 = vadd.f32 %v3615_v57, %v3596_v8 }
 0x7a6   : > { %v3513_v14 = vmul.f32 %v14350_v22, %v14350_v22  ;;  %v14351_v16 = vld [vmem:[#allocation270_spill] sm:$0xff]  ;;  %4149 = vmatpush.msrb.mxu1 %v3385_v38 }
 0x7a7   : > { %v3313_v44 = vmul.f32 %v14351_v16, %v14351_v16  ;;  %v14352_v42 = vld [vmem:[#allocation338_spill] sm:$0xff]  ;;  %4170 = vmatpush.msrb.mxu2 %v3445_v1 }
 0x7a8   : > { %v3381_v37 = vmul.f32 %v14352_v42, %v14352_v42  ;;  %v14353_v48 = vld [vmem:[#allocation398_spill] sm:$0xff]  ;;  %4189 = vmatpush.msrb.mxu3 %v3513_v14 }
 0x7a9   : > { %v3441_v13 = vmul.f32 %v14353_v48, %v14353_v48  ;;  %v14354_v23 = vld [vmem:[#allocation466_spill] sm:$0xff]  ;;  %4131 = vmatpush.msrb.mxu0 %v3313_v44  ;;  %v3775_v11 = vpop.f32.mrf.mxu2  ;;  %v3636_v44 = vadd.f32 %v3635_v17, %v3616_v53 }
 0x7aa   : > { %v3509_v43 = vmul.f32 %v14354_v23, %v14354_v23  ;;  %v14355_v63 = vld [vmem:[#allocation334_spill] sm:$0xff]  ;;  %4150 = vmatpush.msrb.mxu1 %v3381_v37  ;;  %v3735_v58 = vpop.f32.mrf.mxu0 }
 0x7ab   : > { %v3377_v25 = vmul.f32 %v14355_v63, %v14355_v63  ;;  %v14356_v50 = vld [vmem:[#allocation262_spill] sm:$0xff]  ;;  %4171 = vmatpush.msrb.mxu2 %v3441_v13  ;;  %4132 = vmatpush.msrb.mxu0 %v3309_v52  ;;  %v3795_v7 = vpop.f32.mrf.mxu3  ;;  %v3656_v23 = vadd.f32 %v3655_v36, %v3636_v44 }
 0x7ac   : > { %v3305_v55 = vmul.f32 %v14356_v50, %v14356_v50  ;;  %v14357_v27 = vld [vmem:[#allocation330_spill] sm:$0xff]  ;;  %4190 = vmatpush.msrb.mxu3 %v3509_v43  ;;  %v3755_v3 = vpop.f32.mrf.mxu1 }
 0x7ad   : > { %v3373_v39 = vmul.f32 %v14357_v27, %v14357_v27  ;;  %v14358_v21 = vld [vmem:[#allocation390_spill] sm:$0xff]  ;;  %4151 = vmatpush.msrb.mxu1 %v3377_v25  ;;  %4172 = vmatpush.msrb.mxu2 %v3437_v6  ;;  %v3676_v50 = vadd.f32 %v3675_v62, %v3656_v23  ;;  %v4207_v62 = vld [vmem:[#allocation3] sm:$0x1] }
 0x7ae   : > { %v3433_v28 = vmul.f32 %v14358_v21, %v14358_v21  ;;  %4191 = vmatpush.msrb.mxu3 %v3505_v34  ;;  %4133 = vmatpush.msrb.mxu0 %v3305_v55 }
 0x7af   : > { %4152 = vmatpush.msrb.mxu1 %v3373_v39  ;;  %4134 = vmatmul.f32.vlgmr.msrb.gmra.mxu0 %v13637_v32 }
 0x7b0   : > { %4173 = vmatpush.msrb.mxu2 %v3433_v28  ;;  %4192 = vmatpush.msrb.mxu3 %v3501_v18  ;;  %v3696_v18 = vadd.f32 %v3695_v2, %v3676_v50 }
 0x7b1   : > { %4174 = vmatmul.f32.vlgmr.msrb.gmra.mxu2 %v13637_v32  ;;  %4153 = vmatpush.msrb.mxu1 %v3369_v26  ;;  %v3855_v51 = vpop.f32.mrf.mxu2 }
 0x7b2   : > { %4193 = vmatpush.msrb.mxu3 %v3497_v31  ;;  %4154 = vmatmul.f32.vlgmr.msrb.gmra.mxu1 %v13637_v32  ;;  %v3815_v12 = vpop.f32.mrf.mxu0  ;;  %v3716_v57 = vadd.f32 %v3715_v61, %v3696_v18 }
 0x7b3   : > { %4194 = vmatmul.f32.vlgmr.msrb.gmra.mxu3 %v13637_v32  ;;  %v3875_v40 = vpop.f32.mrf.mxu3  ;;  %v3756_v32 = vadd.f32 %v3755_v3, %v3735_v58 }
 0x7b4   : > { %v3835_v30 = vpop.f32.mrf.mxu1 }
 0x7b5   : > { %v3776_v38 = vadd.f32 %v3775_v11, %v3756_v32 }
 0x7b7   : > { %v3796_v16 = vadd.f32 %v3795_v7, %v3776_v38 }
 0x7b9   : > { %v3935_v19 = vpop.f32.mrf.mxu2  ;;  %v3816_v13 = vadd.f32 %v3815_v12, %v3796_v16 }
 0x7ba   : > { %v3895_v4 = vpop.f32.mrf.mxu0 }
 0x7bb   : > { %v3955_v24 = vpop.f32.mrf.mxu3  ;;  %v3836_v6 = vadd.f32 %v3835_v30, %v3816_v13 }
 0x7bc   : > { %v3915_v35 = vpop.f32.mrf.mxu1 }
 0x7bd   : > { %v3916_v45 = vadd.f32 %v3915_v35, %v3895_v4  ;;  %v3856_v21 = vadd.f32 %v3855_v51, %v3836_v6 }
 0x7bf   : > { %v3936_v1 = vadd.f32 %v3935_v19, %v3916_v45  ;;  %v3876_v29 = vadd.f32 %v3875_v40, %v3856_v21 }
 0x7c1   : > { %v3956_v42 = vadd.f32 %v3955_v24, %v3936_v1  ;;  %v4201_v3 = vadd.f32 %v3876_v29, %v3716_v57 }
 0x7d4   : > { %v3975_v60 = vpop.f32.mrf.mxu0 }
 0x7d5   : > { %v3976_v43 = vadd.f32 %v3975_v60, %v3956_v42 }
 0x7db   : > { %v3995_v22 = vpop.f32.mrf.mxu1 }
 0x7dc   : > { %v4015_v14 = vpop.f32.mrf.mxu2  ;;  %v3996_v55 = vadd.f32 %v3995_v22, %v3976_v43 }
 0x7de   : > { %v4016_v26 = vadd.f32 %v4015_v14, %v3996_v55 }
 0x7df   : > { %v4035_v37 = vpop.f32.mrf.mxu3 }
 0x7e0   : > { %v4036_v17 = vadd.f32 %v4035_v37, %v4016_v26 }
 0x7e2   : > { %v4202_v12 = vadd.f32 %v4201_v3, %v4036_v17 }
 0x7fd   : > { %v4055_v48 = vpop.f32.mrf.mxu0 }
 0x7fe   : > { %v4075_v52 = vpop.f32.mrf.mxu1 }
 0x7ff   : > { %v4076_v63 = vadd.f32 %v4075_v52, %v4055_v48 }
 0x802   : > { %v4095_v25 = vpop.f32.mrf.mxu2 }
 0x803   : > { %v4096_v34 = vadd.f32 %v4095_v25, %v4076_v63 }
 0x805   : > { %v4115_v27 = vpop.f32.mrf.mxu3 }
 0x806   : > { %v4116_v39 = vadd.f32 %v4115_v27, %v4096_v34 }
 0x82c   : > { %v4135_v28 = vpop.f32.mrf.mxu0 }
 0x82d   : > { %v4136_v31 = vadd.f32 %v4135_v28, %v4116_v39 }
 0x82f   : > { %v4155_v46 = vpop.f32.mrf.mxu1 }
 0x830   : > { %v4156_v36 = vadd.f32 %v4155_v46, %v4136_v31 }
 0x834   : > { %v4175_v58 = vpop.f32.mrf.mxu2 }
 0x835   : > { %v4176_v11 = vadd.f32 %v4175_v58, %v4156_v36 }
 0x836   : > { %v4195_v7 = vpop.f32.mrf.mxu3 }
 0x837   : > { %v4196_v30 = vadd.f32 %v4195_v7, %v4176_v11 }
 0x839   : > { %v4203_v4 = vadd.f32 %v4202_v12, %v4196_v30 }
 0x83b   : > { %v4208_v35 = vadd.f32 %v4207_v62, %v4203_v4 }
 0x83d   : > { %4209 = vst [vmem:[#allocation3] sm:$0x1] %v4208_v35 }
 0x83e PF: > { %p4210_p9 = scmp.eq.s32.totalorder %s7193_s15, 1 }
 0x83f   : > { %v7208_v2 = vmov (%p4210_p9), 4096.0   ;;  %v4215_v32 = vld [vmem:[#allocation2] sm:$0x1] (%p4210_p9)  ;;  %v4229_v13 = vld [vmem:[#allocation9] sm:$0x1] (%p4210_p9) }
 0x840   : > { %4214 = sbr.rel (!%p4210_p9) target bundleno = 2163 (0x873), region = 60  ;;  %7037 = vrcp.f32 (%p4210_p9), %v7208_v2  ;;  %v4243_v63 = vld [vmem:[#allocation11] sm:$0x1] (%p4210_p9) }
 0x844   : > { %v4224_v8 = vld [vmem:[#allocation3] sm:$0x1] (%p4210_p9) }
 0x846   : > { %v7038_v51 = vpop.eup %7037 }
 0x847   : > { %v4217_v61 = vmul.f32 4096.0, %v7038_v51  ;;  %vm4221_vm2 = vweird.f32 %v7038_v51 }
 0x849   : > { %v4218_v40 = vsub.f32 1.0, %v4217_v61 }
 0x84b   : > { %v4219_v19 = vmul.f32 %v7038_v51, %v4218_v40 }
 0x84d   : > { %v4220_v24 = vadd.f32 %v7038_v51, %v4219_v19 }
 0x84f   : > { %v4222_v45 = vsel %vm4221_vm2, %v7038_v51, %v4220_v24 }
 0x850   : > { %v4223_v60 = vmul.f32 %v4222_v45, %v4215_v32  ;;  %v4225_v38 = vmul.f32 %v4224_v8, %v4222_v45 }
 0x852   : > { %v4226_v53 = vmul.f32 %v4223_v60, %v4223_v60 }
 0x854   : > { %v4227_v1 = vsub.f32 %v4225_v38, %v4226_v53 }
 0x856   : > { %v4228_v22 = vmax.f32 %v4227_v1, 0.0 }
 0x858   : > { %v4230_v14 = vadd.f32 1e-05, %v4228_v22 }
 0x85a   : > { %7039 = vrsqrt.f32 %v4230_v14  ;;  %vm4237_vm3 = vweird.f32 %v4230_v14 }
 0x860   : > { %v7040_v16 = vpop.eup %7039 }
 0x861   : > { %v4232_v44 = vmul.f32 %v7040_v16, %v4230_v14  ;;  %vm4238_vm4 = vweird.f32 %v7040_v16 }
 0x862   : > { %vm4239_vm5 = vmor %vm4237_vm3, %vm4238_vm4 }
 0x863   : > { %v4233_v42 = vmul.f32 %v7040_v16, %v4232_v44 }
 0x865   : > { %v4234_v37 = vmul.f32 0.5, %v4233_v42 }
 0x867   : > { %v4235_v48 = vsub.f32 1.5, %v4234_v37 }
 0x869   : > { %v4236_v23 = vmul.f32 %v7040_v16, %v4235_v48 }
 0x86b   : > { %v4240_v43 = vsel %vm4239_vm5, %v7040_v16, %v4236_v23 }
 0x86c   : > { %v4241_v52 = vmul.f32 %v4240_v43, %v4229_v13 }
 0x86e   : > { %4242 = vst [vmem:[#allocation4] sm:$0x1] %v4241_v52  ;;  %v4244_v25 = vmul.f32 %v4241_v52, %v4223_v60 }
 0x870   : > { %v4245_v6 = vsub.f32 %v4243_v63, %v4244_v25 }
 0x872   : > { %4246 = vst [vmem:[#allocation5] sm:$0x1] %v4245_v6 }
 0x873 PF: > { %p6958_p10 = scmp.ne.s32.totalorder %s7193_s15, 1 }
 0x875   : > { %4249 = sbr.rel (%p6958_p10) target bundleno = 2689 (0xa81), region = 64 }
 0x87a   : > { %v10880_v34 = vld [vmem:[#allocation4] ss:$0 sm:$0xff]  ;;  %v10882_v50 = vld [vmem:[#allocation5] ss:$0 sm:$0xff]  ;;  %v14359_v55 = vld [vmem:[#allocation16_spill] sm:$0xff] }
 0x87b   : > { %v4255_v27 = vmul.f32 %v10880_v34, %v14359_v55  ;;  %v14360_v39 = vld [vmem:[#allocation20_spill] sm:$0xff]  ;;  %v4260_v57 = vmul.f32 %v10880_v34, %v7493_v49  ;;  %v4261_v17 = vmul.f32 %v10880_v34, %v7508_v54  ;;  %v4262_v36 = vmul.f32 %v10880_v34, %v7523_v59  ;;  %v14364_v45 = vld [vmem:[#allocation63_spill] sm:$0xff] }
 0x87c   : > { %v4256_v21 = vmul.f32 %v10880_v34, %v14360_v39  ;;  %v14361_v28 = vld [vmem:[#allocation24_spill] sm:$0xff]  ;;  %v4263_v51 = vmul.f32 %v10880_v34, %v7538_v0  ;;  %v4264_v61 = vmul.f32 %v10880_v34, %v7553_v5  ;;  %v4265_v40 = vmul.f32 %v10880_v34, %v7568_v10  ;;  %v14365_v1 = vld [vmem:[#allocation67_spill] sm:$0xff] }
 0x87d   : > { %v4257_v18 = vmul.f32 %v10880_v34, %v14361_v28  ;;  %v14362_v26 = vld [vmem:[#allocation28_spill] sm:$0xff]  ;;  %v4386_v58 = vadd.f32 %v10882_v50, %v4255_v27  ;;  %v4391_v30 = vadd.f32 %v10882_v50, %v4260_v57  ;;  %v4392_v54 = vadd.f32 %v10882_v50, %v4261_v17  ;;  %v14366_v37 = vld [vmem:[#allocation71_spill] sm:$0xff] }
 0x87e   : > { %v4258_v31 = vmul.f32 %v10880_v34, %v14362_v26  ;;  %v14363_v46 = vld [vmem:[#allocation32_spill] sm:$0xff]  ;;  %v4387_v3 = vadd.f32 %v10882_v50, %v4256_v21  ;;  %v4393_v59 = vadd.f32 %v10882_v50, %v4262_v36  ;;  %v4266_v19 = vmul.f32 %v10880_v34, %v7583_v15  ;;  %v14367_v13 = vld [vmem:[#allocation75_spill] sm:$0xff] }
 0x87f   : > { %v4259_v29 = vmul.f32 %v10880_v34, %v14363_v46  ;;  %v4388_v11 = vadd.f32 %v10882_v50, %v4257_v18  ;;  %v4514_v62 = vmax.f32 %v4386_v58, 0.0  ;;  %v4519_v32 = vmax.f32 %v4391_v30, 0.0  ;;  %v14368_v43 = vld [vmem:[#allocation79_spill] sm:$0xff] }
 0x880   : > { %v4389_v7 = vadd.f32 %v10882_v50, %v4258_v31  ;;  %v4515_v49 = vmax.f32 %v4387_v3, 0.0  ;;  %v4267_v24 = vmul.f32 %v10880_v34, %v7598_v20  ;;  %v4268_v8 = vmul.f32 %v10880_v34, %v7613_v33  ;;  %v14369_v6 = vld [vmem:[#allocation83_spill] sm:$0xff] }
 0x881   : > { %v4390_v12 = vadd.f32 %v10882_v50, %v4259_v29  ;;  %v4516_v4 = vmax.f32 %v4388_v11, 0.0  ;;  %4642 = vst [vmem:[#allocation12] sm:$0xff] %v4514_v62  ;;  %v4269_v0 = vmul.f32 %v10880_v34, %v14364_v45  ;;  %v4520_v60 = vmax.f32 %v4392_v54, 0.0  ;;  %v14370_v21 = vld [vmem:[#allocation87_spill] sm:$0xff] }
 0x882   : > { %v4517_v35 = vmax.f32 %v4389_v7, 0.0  ;;  %4643 = vst [vmem:[#allocation12 + $0x20] sm:$0xff] %v4515_v49  ;;  %v4394_v5 = vadd.f32 %v10882_v50, %v4263_v51  ;;  %v4395_v10 = vadd.f32 %v10882_v50, %v4264_v61  ;;  %v4396_v38 = vadd.f32 %v10882_v50, %v4265_v40  ;;  %v14371_v31 = vld [vmem:[#allocation91_spill] sm:$0xff] }
 0x883   : > { %v4518_v2 = vmax.f32 %v4390_v12, 0.0  ;;  %4644 = vst [vmem:[#allocation12 + $0x40] sm:$0xff] %v4516_v4  ;;  %v4521_v15 = vmax.f32 %v4393_v59, 0.0  ;;  %v4397_v53 = vadd.f32 %v10882_v50, %v4266_v19  ;;  %v4270_v20 = vmul.f32 %v10880_v34, %v14365_v1  ;;  %v14372_v54 = vld [vmem:[#allocation107_spill] sm:$0xff] }
 0x884   : > { %4645 = vst [vmem:[#allocation12 + $0x60] sm:$0xff] %v4517_v35  ;;  %v4522_v33 = vmax.f32 %v4394_v5, 0.0  ;;  %v4398_v22 = vadd.f32 %v10882_v50, %v4267_v24  ;;  %v4523_v14 = vmax.f32 %v4395_v10, 0.0  ;;  %v4399_v16 = vadd.f32 %v10882_v50, %v4268_v8  ;;  %v14373_v59 = vld [vmem:[#allocation111_spill] sm:$0xff] }
 0x885   : > { %4646 = vst [vmem:[#allocation12 + $0x80] sm:$0xff] %v4518_v2  ;;  %v4400_v44 = vadd.f32 %v10882_v50, %v4269_v0  ;;  %v4524_v42 = vmax.f32 %v4396_v38, 0.0  ;;  %v4271_v48 = vmul.f32 %v10880_v34, %v14366_v37  ;;  %v4272_v23 = vmul.f32 %v10880_v34, %v14367_v13  ;;  %v14374_v40 = vld [vmem:[#allocation115_spill] sm:$0xff] }
 0x886   : > { %4647 = vst [vmem:[#allocation12 + $0xa0] sm:$0xff] %v4519_v32  ;;  %v4273_v52 = vmul.f32 %v10880_v34, %v14368_v43  ;;  %v4525_v63 = vmax.f32 %v4397_v53, 0.0  ;;  %v4401_v25 = vadd.f32 %v10882_v50, %v4270_v20  ;;  %v4274_v55 = vmul.f32 %v10880_v34, %v14369_v6  ;;  %v14375_v24 = vld [vmem:[#allocation119_spill] sm:$0xff] }
 0x887   : > { %4648 = vst [vmem:[#allocation12 + $0xc0] sm:$0xff] %v4520_v60  ;;  %v4526_v27 = vmax.f32 %v4398_v22, 0.0  ;;  %v4402_v39 = vadd.f32 %v10882_v50, %v4271_v48  ;;  %v4275_v28 = vmul.f32 %v10880_v34, %v14370_v21  ;;  %v4527_v18 = vmax.f32 %v4399_v16, 0.0  ;;  %v14376_v60 = vld [vmem:[#allocation123_spill] sm:$0xff] }
 0x888   : > { %4649 = vst [vmem:[#allocation12 + $0xe0] sm:$0xff] %v4521_v15  ;;  %v4403_v26 = vadd.f32 %v10882_v50, %v4272_v23  ;;  %v4276_v46 = vmul.f32 %v10880_v34, %v14371_v31  ;;  %v4528_v29 = vmax.f32 %v4400_v44, 0.0  ;;  %v4404_v57 = vadd.f32 %v10882_v50, %v4273_v52  ;;  %v14377_v15 = vld [vmem:[#allocation127_spill] sm:$0xff] }
 0x889   : > { %4650 = vst [vmem:[#allocation12 + $0x100] sm:$0xff] %v4522_v33  ;;  %v4277_v17 = vmul.f32 %v10880_v34, %v7748_v47  ;;  %v4529_v36 = vmax.f32 %v4401_v25, 0.0  ;;  %v4405_v58 = vadd.f32 %v10882_v50, %v4274_v55  ;;  %v4278_v3 = vmul.f32 %v10880_v34, %v7763_v41  ;;  %v14378_v33 = vld [vmem:[#allocation131_spill] sm:$0xff] }
 0x88a   : > { %4651 = vst [vmem:[#allocation12 + $0x120] sm:$0xff] %v4523_v14  ;;  %v4530_v11 = vmax.f32 %v4402_v39, 0.0  ;;  %v4406_v7 = vadd.f32 %v10882_v50, %v4275_v28  ;;  %v4279_v12 = vmul.f32 %v10880_v34, %v7778_v9  ;;  %v4531_v30 = vmax.f32 %v4403_v26, 0.0  ;;  %v14379_v44 = vld [vmem:[#allocation135_spill] sm:$0xff] }
 0x88b   : > { %4652 = vst [vmem:[#allocation12 + $0x140] sm:$0xff] %v4524_v42  ;;  %v4407_v62 = vadd.f32 %v10882_v50, %v4276_v46  ;;  %v4280_v47 = vmul.f32 %v10880_v34, %v7793_v56  ;;  %v4532_v49 = vmax.f32 %v4404_v57, 0.0  ;;  %v4408_v4 = vadd.f32 %v10882_v50, %v4277_v17  ;;  %v14380_v13 = vld [vmem:[#allocation139_spill] sm:$0xff] }
 0x88c   : > { %4653 = vst [vmem:[#allocation12 + $0x160] sm:$0xff] %v4525_v63  ;;  %v4281_v41 = vmul.f32 %v10880_v34, %v14372_v54  ;;  %v4533_v35 = vmax.f32 %v4405_v58, 0.0  ;;  %v4409_v2 = vadd.f32 %v10882_v50, %v4278_v3  ;;  %v4282_v9 = vmul.f32 %v10880_v34, %v14373_v59  ;;  %v14381_v63 = vld [vmem:[#allocation143_spill] sm:$0xff] }
 0x88d   : > { %4654 = vst [vmem:[#allocation12 + $0x180] sm:$0xff] %v4526_v27  ;;  %v4534_v51 = vmax.f32 %v4406_v7, 0.0  ;;  %v4410_v61 = vadd.f32 %v10882_v50, %v4279_v12  ;;  %v4283_v56 = vmul.f32 %v10880_v34, %v14374_v40  ;;  %v4535_v19 = vmax.f32 %v4407_v62, 0.0  ;;  %v14382_v27 = vld [vmem:[#allocation147_spill] sm:$0xff] }
 0x88e   : > { %4655 = vst [vmem:[#allocation12 + $0x1a0] sm:$0xff] %v4527_v18  ;;  %v4411_v32 = vadd.f32 %v10882_v50, %v4280_v47  ;;  %v4284_v8 = vmul.f32 %v10880_v34, %v14375_v24  ;;  %v4536_v45 = vmax.f32 %v4408_v4, 0.0  ;;  %v4412_v0 = vadd.f32 %v10882_v50, %v4281_v41  ;;  %v14383_v18 = vld [vmem:[#allocation151_spill] sm:$0xff] }
 0x88f   : > { %4656 = vst [vmem:[#allocation12 + $0x1c0] sm:$0xff] %v4528_v29  ;;  %v4285_v5 = vmul.f32 %v10880_v34, %v14376_v60  ;;  %v4537_v10 = vmax.f32 %v4409_v2, 0.0  ;;  %v4413_v38 = vadd.f32 %v10882_v50, %v4282_v9  ;;  %v4286_v53 = vmul.f32 %v10880_v34, %v14377_v15  ;;  %v14384_v29 = vld [vmem:[#allocation155_spill] sm:$0xff] }
 0x890   : > { %4657 = vst [vmem:[#allocation12 + $0x1e0] sm:$0xff] %v4529_v36  ;;  %v4538_v1 = vmax.f32 %v4410_v61, 0.0  ;;  %v4414_v20 = vadd.f32 %v10882_v50, %v4283_v56  ;;  %v4287_v22 = vmul.f32 %v10880_v34, %v14378_v33  ;;  %v4539_v14 = vmax.f32 %v4411_v32, 0.0  ;;  %v14385_v58 = vld [vmem:[#allocation159_spill] sm:$0xff] }
 0x891   : > { %4658 = vst [vmem:[#allocation12 + $0x200] sm:$0xff] %v4530_v11  ;;  %v4415_v16 = vadd.f32 %v10882_v50, %v4284_v8  ;;  %v4288_v42 = vmul.f32 %v10880_v34, %v14379_v44  ;;  %v4540_v37 = vmax.f32 %v4412_v0, 0.0  ;;  %v4416_v48 = vadd.f32 %v10882_v50, %v4285_v5  ;;  %v14386_v12 = vld [vmem:[#allocation163_spill] sm:$0xff] }
 0x892   : > { %4659 = vst [vmem:[#allocation12 + $0x220] sm:$0xff] %v4531_v30  ;;  %v4289_v23 = vmul.f32 %v10880_v34, %v14380_v13  ;;  %v4541_v43 = vmax.f32 %v4413_v38, 0.0  ;;  %v4417_v52 = vadd.f32 %v10882_v50, %v4286_v53  ;;  %v4290_v25 = vmul.f32 %v10880_v34, %v14381_v63 }
 0x893   : > { %4660 = vst [vmem:[#allocation12 + $0x240] sm:$0xff] %v4532_v49  ;;  %v4542_v6 = vmax.f32 %v4414_v20, 0.0  ;;  %v4418_v55 = vadd.f32 %v10882_v50, %v4287_v22  ;;  %v4291_v39 = vmul.f32 %v10880_v34, %v14382_v27  ;;  %v4543_v21 = vmax.f32 %v4415_v16, 0.0  ;;  %v14387_v49 = vld [vmem:[#allocation167_spill] sm:$0xff] }
 0x894   : > { %4661 = vst [vmem:[#allocation12 + $0x260] sm:$0xff] %v4533_v35  ;;  %v4419_v28 = vadd.f32 %v10882_v50, %v4288_v42  ;;  %v4292_v26 = vmul.f32 %v10880_v34, %v14383_v18  ;;  %v4544_v31 = vmax.f32 %v4416_v48, 0.0  ;;  %v4420_v46 = vadd.f32 %v10882_v50, %v4289_v23  ;;  %v14388_v35 = vld [vmem:[#allocation171_spill] sm:$0xff] }
 0x895   : > { %4662 = vst [vmem:[#allocation12 + $0x280] sm:$0xff] %v4534_v51  ;;  %v4293_v57 = vmul.f32 %v10880_v34, %v14384_v29  ;;  %v4545_v17 = vmax.f32 %v4417_v52, 0.0  ;;  %v4421_v36 = vadd.f32 %v10882_v50, %v4290_v25  ;;  %v4294_v3 = vmul.f32 %v10880_v34, %v14385_v58  ;;  %v14389_v51 = vld [vmem:[#allocation175_spill] sm:$0xff] }
 0x896   : > { %4663 = vst [vmem:[#allocation12 + $0x2a0] sm:$0xff] %v4535_v19  ;;  %v4546_v11 = vmax.f32 %v4418_v55, 0.0  ;;  %v4422_v7 = vadd.f32 %v10882_v50, %v4291_v39  ;;  %v4295_v30 = vmul.f32 %v10880_v34, %v14386_v12  ;;  %v4547_v62 = vmax.f32 %v4419_v28, 0.0  ;;  %v14390_v19 = vld [vmem:[#allocation179_spill] sm:$0xff] }
 0x897   : > { %4664 = vst [vmem:[#allocation12 + $0x2c0] sm:$0xff] %v4536_v45  ;;  %v4423_v47 = vadd.f32 %v10882_v50, %v4292_v26  ;;  %v4296_v4 = vmul.f32 %v10880_v34, %v14387_v49  ;;  %v4548_v54 = vmax.f32 %v4420_v46, 0.0  ;;  %v4424_v41 = vadd.f32 %v10882_v50, %v4293_v57  ;;  %v14391_v45 = vld [vmem:[#allocation183_spill] sm:$0xff] }
 0x898   : > { %4665 = vst [vmem:[#allocation12 + $0x2e0] sm:$0xff] %v4537_v10  ;;  %v4297_v2 = vmul.f32 %v10880_v34, %v14388_v35  ;;  %v4549_v59 = vmax.f32 %v4421_v36, 0.0  ;;  %v4425_v9 = vadd.f32 %v10882_v50, %v4294_v3  ;;  %v4298_v61 = vmul.f32 %v10880_v34, %v14389_v51  ;;  %v14392_v10 = vld [vmem:[#allocation187_spill] sm:$0xff] }
 0x899   : > { %4666 = vst [vmem:[#allocation12 + $0x300] sm:$0xff] %v4538_v1  ;;  %v4550_v40 = vmax.f32 %v4422_v7, 0.0  ;;  %v4426_v56 = vadd.f32 %v10882_v50, %v4295_v30  ;;  %v4299_v32 = vmul.f32 %v10880_v34, %v14390_v19  ;;  %v4551_v24 = vmax.f32 %v4423_v47, 0.0  ;;  %v14393_v1 = vld [vmem:[#allocation191_spill] sm:$0xff] }
 0x89a   : > { %4667 = vst [vmem:[#allocation12 + $0x320] sm:$0xff] %v4539_v14  ;;  %v4427_v8 = vadd.f32 %v10882_v50, %v4296_v4  ;;  %v4300_v0 = vmul.f32 %v10880_v34, %v14391_v45  ;;  %v4552_v60 = vmax.f32 %v4424_v41, 0.0  ;;  %v4428_v5 = vadd.f32 %v10882_v50, %v4297_v2  ;;  %v14394_v14 = vld [vmem:[#allocation195_spill] sm:$0xff] }
 0x89b   : > { %4668 = vst [vmem:[#allocation12 + $0x340] sm:$0xff] %v4540_v37  ;;  %v4301_v38 = vmul.f32 %v10880_v34, %v14392_v10  ;;  %v4553_v15 = vmax.f32 %v4425_v9, 0.0  ;;  %v4429_v53 = vadd.f32 %v10882_v50, %v4298_v61  ;;  %v4302_v20 = vmul.f32 %v10880_v34, %v14393_v1  ;;  %v14395_v37 = vld [vmem:[#allocation199_spill] sm:$0xff] }
 0x89c   : > { %4669 = vst [vmem:[#allocation12 + $0x360] sm:$0xff] %v4541_v43  ;;  %v4554_v33 = vmax.f32 %v4426_v56, 0.0  ;;  %v4430_v22 = vadd.f32 %v10882_v50, %v4299_v32  ;;  %v4303_v16 = vmul.f32 %v10880_v34, %v14394_v14  ;;  %v4555_v44 = vmax.f32 %v4427_v8, 0.0  ;;  %v14396_v43 = vld [vmem:[#allocation203_spill] sm:$0xff] }
 0x89d   : > { %4670 = vst [vmem:[#allocation12 + $0x380] sm:$0xff] %v4542_v6  ;;  %v4431_v42 = vadd.f32 %v10882_v50, %v4300_v0  ;;  %v4304_v48 = vmul.f32 %v10880_v34, %v14395_v37  ;;  %v4556_v13 = vmax.f32 %v4428_v5, 0.0  ;;  %v4432_v23 = vadd.f32 %v10882_v50, %v4301_v38  ;;  %v14397_v6 = vld [vmem:[#allocation207_spill] sm:$0xff] }
 0x89e   : > { %4671 = vst [vmem:[#allocation12 + $0x3a0] sm:$0xff] %v4543_v21  ;;  %v4305_v52 = vmul.f32 %v10880_v34, %v14396_v43  ;;  %v4557_v63 = vmax.f32 %v4429_v53, 0.0  ;;  %v4433_v25 = vadd.f32 %v10882_v50, %v4302_v20  ;;  %v4306_v55 = vmul.f32 %v10880_v34, %v14397_v6  ;;  %v14398_v21 = vld [vmem:[#allocation211_spill] sm:$0xff] }
 0x89f   : > { %4672 = vst [vmem:[#allocation12 + $0x3c0] sm:$0xff] %v4544_v31  ;;  %v4558_v27 = vmax.f32 %v4430_v22, 0.0  ;;  %v4434_v39 = vadd.f32 %v10882_v50, %v4303_v16  ;;  %v4307_v28 = vmul.f32 %v10880_v34, %v14398_v21  ;;  %v4559_v18 = vmax.f32 %v4431_v42, 0.0  ;;  %v14399_v31 = vld [vmem:[#allocation215_spill] sm:$0xff] }
 0x8a0   : > { %4673 = vst [vmem:[#allocation12 + $0x3e0] sm:$0xff] %v4545_v17  ;;  %v4435_v26 = vadd.f32 %v10882_v50, %v4304_v48  ;;  %v4308_v46 = vmul.f32 %v10880_v34, %v14399_v31  ;;  %v4560_v29 = vmax.f32 %v4432_v23, 0.0  ;;  %v4436_v57 = vadd.f32 %v10882_v50, %v4305_v52  ;;  %v14400_v17 = vld [vmem:[#allocation219_spill] sm:$0xff] }
 0x8a1   : > { %4674 = vst [vmem:[#allocation12 + $0x400] sm:$0xff] %v4546_v11  ;;  %v4309_v36 = vmul.f32 %v10880_v34, %v14400_v17  ;;  %v4561_v58 = vmax.f32 %v4433_v25, 0.0  ;;  %v4437_v3 = vadd.f32 %v10882_v50, %v4306_v55  ;;  %v14401_v11 = vld [vmem:[#allocation223_spill] sm:$0xff]  ;;  %v4562_v12 = vmax.f32 %v4434_v39, 0.0 }
 0x8a2   : > { %4675 = vst [vmem:[#allocation12 + $0x420] sm:$0xff] %v4547_v62  ;;  %v4310_v7 = vmul.f32 %v10880_v34, %v14401_v11  ;;  %v4438_v30 = vadd.f32 %v10882_v50, %v4307_v28  ;;  %v14402_v62 = vld [vmem:[#allocation227_spill] sm:$0xff]  ;;  %v4563_v49 = vmax.f32 %v4435_v26, 0.0  ;;  %v4439_v4 = vadd.f32 %v10882_v50, %v4308_v46 }
 0x8a3   : > { %4676 = vst [vmem:[#allocation12 + $0x440] sm:$0xff] %v4548_v54  ;;  %v4311_v47 = vmul.f32 %v10880_v34, %v14402_v62  ;;  %v14403_v54 = vld [vmem:[#allocation231_spill] sm:$0xff]  ;;  %v4564_v35 = vmax.f32 %v4436_v57, 0.0  ;;  %v4440_v2 = vadd.f32 %v10882_v50, %v4309_v36  ;;  %v4565_v51 = vmax.f32 %v4437_v3, 0.0 }
 0x8a4   : > { %4677 = vst [vmem:[#allocation12 + $0x460] sm:$0xff] %v4549_v59  ;;  %v4312_v41 = vmul.f32 %v10880_v34, %v14403_v54  ;;  %v14404_v59 = vld [vmem:[#allocation235_spill] sm:$0xff]  ;;  %v4441_v61 = vadd.f32 %v10882_v50, %v4310_v7  ;;  %v4566_v19 = vmax.f32 %v4438_v30, 0.0  ;;  %v4567_v45 = vmax.f32 %v4439_v4, 0.0 }
 0x8a5   : > { %4678 = vst [vmem:[#allocation12 + $0x480] sm:$0xff] %v4550_v40  ;;  %v4313_v9 = vmul.f32 %v10880_v34, %v14404_v59  ;;  %v14405_v40 = vld [vmem:[#allocation239_spill] sm:$0xff]  ;;  %v4442_v32 = vadd.f32 %v10882_v50, %v4311_v47  ;;  %v4568_v10 = vmax.f32 %v4440_v2, 0.0 }
 0x8a6   : > { %4679 = vst [vmem:[#allocation12 + $0x4a0] sm:$0xff] %v4551_v24  ;;  %v4314_v56 = vmul.f32 %v10880_v34, %v14405_v40  ;;  %v14406_v24 = vld [vmem:[#allocation243_spill] sm:$0xff]  ;;  %v4443_v0 = vadd.f32 %v10882_v50, %v4312_v41  ;;  %v4569_v1 = vmax.f32 %v4441_v61, 0.0 }
 0x8a7   : > { %4680 = vst [vmem:[#allocation12 + $0x4c0] sm:$0xff] %v4552_v60  ;;  %v4315_v8 = vmul.f32 %v10880_v34, %v14406_v24  ;;  %v14407_v60 = vld [vmem:[#allocation247_spill] sm:$0xff]  ;;  %v4444_v38 = vadd.f32 %v10882_v50, %v4313_v9  ;;  %v4570_v14 = vmax.f32 %v4442_v32, 0.0 }
 0x8a8   : > { %4681 = vst [vmem:[#allocation12 + $0x4e0] sm:$0xff] %v4553_v15  ;;  %v4316_v5 = vmul.f32 %v10880_v34, %v14407_v60  ;;  %v14408_v15 = vld [vmem:[#allocation251_spill] sm:$0xff]  ;;  %v4445_v20 = vadd.f32 %v10882_v50, %v4314_v56  ;;  %v4571_v37 = vmax.f32 %v4443_v0, 0.0 }
 0x8a9   : > { %4682 = vst [vmem:[#allocation12 + $0x500] sm:$0xff] %v4554_v33  ;;  %v4317_v53 = vmul.f32 %v10880_v34, %v14408_v15  ;;  %v14409_v33 = vld [vmem:[#allocation255_spill] sm:$0xff]  ;;  %v4446_v16 = vadd.f32 %v10882_v50, %v4315_v8  ;;  %v4572_v43 = vmax.f32 %v4444_v38, 0.0 }
 0x8aa   : > { %4683 = vst [vmem:[#allocation12 + $0x520] sm:$0xff] %v4555_v44  ;;  %v4318_v22 = vmul.f32 %v10880_v34, %v14409_v33  ;;  %v14410_v44 = vld [vmem:[#allocation259_spill] sm:$0xff]  ;;  %v4447_v48 = vadd.f32 %v10882_v50, %v4316_v5  ;;  %v4573_v6 = vmax.f32 %v4445_v20, 0.0 }
 0x8ab   : > { %4684 = vst [vmem:[#allocation12 + $0x540] sm:$0xff] %v4556_v13  ;;  %v4319_v42 = vmul.f32 %v10880_v34, %v14410_v44  ;;  %v14411_v13 = vld [vmem:[#allocation263_spill] sm:$0xff]  ;;  %v4448_v52 = vadd.f32 %v10882_v50, %v4317_v53  ;;  %v4574_v21 = vmax.f32 %v4446_v16, 0.0 }
 0x8ac   : > { %4685 = vst [vmem:[#allocation12 + $0x560] sm:$0xff] %v4557_v63  ;;  %v4320_v23 = vmul.f32 %v10880_v34, %v14411_v13  ;;  %v14412_v63 = vld [vmem:[#allocation267_spill] sm:$0xff]  ;;  %v4449_v55 = vadd.f32 %v10882_v50, %v4318_v22  ;;  %v4575_v31 = vmax.f32 %v4447_v48, 0.0 }
 0x8ad   : > { %4686 = vst [vmem:[#allocation12 + $0x580] sm:$0xff] %v4558_v27  ;;  %v4321_v25 = vmul.f32 %v10880_v34, %v14412_v63  ;;  %v14413_v27 = vld [vmem:[#allocation271_spill] sm:$0xff]  ;;  %v4450_v28 = vadd.f32 %v10882_v50, %v4319_v42  ;;  %v4576_v17 = vmax.f32 %v4448_v52, 0.0 }
 0x8ae   : > { %4687 = vst [vmem:[#allocation12 + $0x5a0] sm:$0xff] %v4559_v18  ;;  %v4322_v39 = vmul.f32 %v10880_v34, %v14413_v27  ;;  %v14414_v18 = vld [vmem:[#allocation275_spill] sm:$0xff]  ;;  %v4451_v46 = vadd.f32 %v10882_v50, %v4320_v23  ;;  %v4577_v11 = vmax.f32 %v4449_v55, 0.0 }
 0x8af   : > { %4688 = vst [vmem:[#allocation12 + $0x5c0] sm:$0xff] %v4560_v29  ;;  %v4323_v26 = vmul.f32 %v10880_v34, %v14414_v18  ;;  %v14415_v29 = vld [vmem:[#allocation279_spill] sm:$0xff]  ;;  %v4452_v36 = vadd.f32 %v10882_v50, %v4321_v25  ;;  %v4578_v62 = vmax.f32 %v4450_v28, 0.0 }
 0x8b0   : > { %4689 = vst [vmem:[#allocation12 + $0x5e0] sm:$0xff] %v4561_v58  ;;  %v4324_v57 = vmul.f32 %v10880_v34, %v14415_v29  ;;  %v14416_v58 = vld [vmem:[#allocation283_spill] sm:$0xff]  ;;  %v4453_v7 = vadd.f32 %v10882_v50, %v4322_v39  ;;  %v4579_v54 = vmax.f32 %v4451_v46, 0.0 }
 0x8b1   : > { %4690 = vst [vmem:[#allocation12 + $0x600] sm:$0xff] %v4562_v12  ;;  %v4325_v3 = vmul.f32 %v10880_v34, %v14416_v58  ;;  %v14417_v12 = vld [vmem:[#allocation287_spill] sm:$0xff]  ;;  %v4454_v47 = vadd.f32 %v10882_v50, %v4323_v26  ;;  %v4580_v59 = vmax.f32 %v4452_v36, 0.0 }
 0x8b2   : > { %4691 = vst [vmem:[#allocation12 + $0x620] sm:$0xff] %v4563_v49  ;;  %v4326_v30 = vmul.f32 %v10880_v34, %v14417_v12  ;;  %v14418_v49 = vld [vmem:[#allocation291_spill] sm:$0xff]  ;;  %v4455_v41 = vadd.f32 %v10882_v50, %v4324_v57  ;;  %v4581_v40 = vmax.f32 %v4453_v7, 0.0 }
 0x8b3   : > { %4692 = vst [vmem:[#allocation12 + $0x640] sm:$0xff] %v4564_v35  ;;  %v4327_v4 = vmul.f32 %v10880_v34, %v14418_v49  ;;  %v14419_v35 = vld [vmem:[#allocation295_spill] sm:$0xff]  ;;  %v4456_v9 = vadd.f32 %v10882_v50, %v4325_v3  ;;  %v4582_v24 = vmax.f32 %v4454_v47, 0.0 }
 0x8b4   : > { %4693 = vst [vmem:[#allocation12 + $0x660] sm:$0xff] %v4565_v51  ;;  %v4328_v2 = vmul.f32 %v10880_v34, %v14419_v35  ;;  %v14420_v51 = vld [vmem:[#allocation299_spill] sm:$0xff]  ;;  %v4457_v56 = vadd.f32 %v10882_v50, %v4326_v30  ;;  %v4583_v60 = vmax.f32 %v4455_v41, 0.0 }
 0x8b5   : > { %4694 = vst [vmem:[#allocation12 + $0x680] sm:$0xff] %v4566_v19  ;;  %v4329_v61 = vmul.f32 %v10880_v34, %v14420_v51  ;;  %v14421_v19 = vld [vmem:[#allocation303_spill] sm:$0xff]  ;;  %v4458_v8 = vadd.f32 %v10882_v50, %v4327_v4  ;;  %v4584_v15 = vmax.f32 %v4456_v9, 0.0 }
 0x8b6   : > { %4695 = vst [vmem:[#allocation12 + $0x6a0] sm:$0xff] %v4567_v45  ;;  %v4330_v32 = vmul.f32 %v10880_v34, %v14421_v19  ;;  %v14422_v45 = vld [vmem:[#allocation307_spill] sm:$0xff]  ;;  %v4459_v5 = vadd.f32 %v10882_v50, %v4328_v2  ;;  %v4585_v33 = vmax.f32 %v4457_v56, 0.0 }
 0x8b7   : > { %4696 = vst [vmem:[#allocation12 + $0x6c0] sm:$0xff] %v4568_v10  ;;  %v4331_v0 = vmul.f32 %v10880_v34, %v14422_v45  ;;  %v14423_v10 = vld [vmem:[#allocation311_spill] sm:$0xff]  ;;  %v4460_v53 = vadd.f32 %v10882_v50, %v4329_v61  ;;  %v4586_v44 = vmax.f32 %v4458_v8, 0.0 }
 0x8b8   : > { %4697 = vst [vmem:[#allocation12 + $0x6e0] sm:$0xff] %v4569_v1  ;;  %v4332_v38 = vmul.f32 %v10880_v34, %v14423_v10  ;;  %v14424_v1 = vld [vmem:[#allocation315_spill] sm:$0xff]  ;;  %v4461_v22 = vadd.f32 %v10882_v50, %v4330_v32  ;;  %v4587_v13 = vmax.f32 %v4459_v5, 0.0 }
 0x8b9   : > { %4698 = vst [vmem:[#allocation12 + $0x700] sm:$0xff] %v4570_v14  ;;  %v4333_v20 = vmul.f32 %v10880_v34, %v14424_v1  ;;  %v14425_v14 = vld [vmem:[#allocation319_spill] sm:$0xff]  ;;  %v4462_v42 = vadd.f32 %v10882_v50, %v4331_v0  ;;  %v4588_v63 = vmax.f32 %v4460_v53, 0.0 }
 0x8ba   : > { %4699 = vst [vmem:[#allocation12 + $0x720] sm:$0xff] %v4571_v37  ;;  %v4334_v16 = vmul.f32 %v10880_v34, %v14425_v14  ;;  %v14426_v37 = vld [vmem:[#allocation323_spill] sm:$0xff]  ;;  %v4463_v23 = vadd.f32 %v10882_v50, %v4332_v38  ;;  %v4589_v27 = vmax.f32 %v4461_v22, 0.0 }
 0x8bb   : > { %4700 = vst [vmem:[#allocation12 + $0x740] sm:$0xff] %v4572_v43  ;;  %v4335_v48 = vmul.f32 %v10880_v34, %v14426_v37  ;;  %v14427_v43 = vld [vmem:[#allocation327_spill] sm:$0xff]  ;;  %v4464_v25 = vadd.f32 %v10882_v50, %v4333_v20  ;;  %v4590_v18 = vmax.f32 %v4462_v42, 0.0 }
 0x8bc   : > { %4701 = vst [vmem:[#allocation12 + $0x760] sm:$0xff] %v4573_v6  ;;  %v4336_v52 = vmul.f32 %v10880_v34, %v14427_v43  ;;  %v14428_v6 = vld [vmem:[#allocation331_spill] sm:$0xff]  ;;  %v4465_v39 = vadd.f32 %v10882_v50, %v4334_v16  ;;  %v4591_v29 = vmax.f32 %v4463_v23, 0.0 }
 0x8bd   : > { %4702 = vst [vmem:[#allocation12 + $0x780] sm:$0xff] %v4574_v21  ;;  %v4337_v55 = vmul.f32 %v10880_v34, %v14428_v6  ;;  %v14429_v21 = vld [vmem:[#allocation335_spill] sm:$0xff]  ;;  %v4466_v26 = vadd.f32 %v10882_v50, %v4335_v48  ;;  %v4592_v58 = vmax.f32 %v4464_v25, 0.0 }
 0x8be   : > { %4703 = vst [vmem:[#allocation12 + $0x7a0] sm:$0xff] %v4575_v31  ;;  %v4338_v28 = vmul.f32 %v10880_v34, %v14429_v21  ;;  %v14430_v31 = vld [vmem:[#allocation339_spill] sm:$0xff]  ;;  %v4467_v57 = vadd.f32 %v10882_v50, %v4336_v52  ;;  %v4593_v12 = vmax.f32 %v4465_v39, 0.0 }
 0x8bf   : > { %4704 = vst [vmem:[#allocation12 + $0x7c0] sm:$0xff] %v4576_v17  ;;  %v4339_v46 = vmul.f32 %v10880_v34, %v14430_v31  ;;  %v14431_v17 = vld [vmem:[#allocation343_spill] sm:$0xff]  ;;  %v4468_v3 = vadd.f32 %v10882_v50, %v4337_v55  ;;  %v4594_v49 = vmax.f32 %v4466_v26, 0.0 }
 0x8c0   : > { %4705 = vst [vmem:[#allocation12 + $0x7e0] sm:$0xff] %v4577_v11  ;;  %v4340_v36 = vmul.f32 %v10880_v34, %v14431_v17  ;;  %v14432_v11 = vld [vmem:[#allocation347_spill] sm:$0xff]  ;;  %v4469_v30 = vadd.f32 %v10882_v50, %v4338_v28  ;;  %v4595_v35 = vmax.f32 %v4467_v57, 0.0 }
 0x8c1   : > { %4706 = vst [vmem:[#allocation12 + $0x800] sm:$0xff] %v4578_v62  ;;  %v4341_v7 = vmul.f32 %v10880_v34, %v14432_v11  ;;  %v14433_v62 = vld [vmem:[#allocation351_spill] sm:$0xff]  ;;  %v4470_v4 = vadd.f32 %v10882_v50, %v4339_v46  ;;  %v4596_v51 = vmax.f32 %v4468_v3, 0.0 }
 0x8c2   : > { %4707 = vst [vmem:[#allocation12 + $0x820] sm:$0xff] %v4579_v54  ;;  %v4342_v47 = vmul.f32 %v10880_v34, %v14433_v62  ;;  %v14434_v54 = vld [vmem:[#allocation355_spill] sm:$0xff]  ;;  %v4471_v2 = vadd.f32 %v10882_v50, %v4340_v36  ;;  %v4597_v19 = vmax.f32 %v4469_v30, 0.0 }
 0x8c3   : > { %4708 = vst [vmem:[#allocation12 + $0x840] sm:$0xff] %v4580_v59  ;;  %v4343_v41 = vmul.f32 %v10880_v34, %v14434_v54  ;;  %v14435_v59 = vld [vmem:[#allocation359_spill] sm:$0xff]  ;;  %v4472_v61 = vadd.f32 %v10882_v50, %v4341_v7  ;;  %v4598_v45 = vmax.f32 %v4470_v4, 0.0 }
 0x8c4   : > { %4709 = vst [vmem:[#allocation12 + $0x860] sm:$0xff] %v4581_v40  ;;  %v4344_v9 = vmul.f32 %v10880_v34, %v14435_v59  ;;  %v14436_v40 = vld [vmem:[#allocation363_spill] sm:$0xff]  ;;  %v4473_v32 = vadd.f32 %v10882_v50, %v4342_v47  ;;  %v4599_v10 = vmax.f32 %v4471_v2, 0.0 }
 0x8c5   : > { %4710 = vst [vmem:[#allocation12 + $0x880] sm:$0xff] %v4582_v24  ;;  %v4345_v56 = vmul.f32 %v10880_v34, %v14436_v40  ;;  %v14437_v24 = vld [vmem:[#allocation367_spill] sm:$0xff]  ;;  %v4474_v0 = vadd.f32 %v10882_v50, %v4343_v41  ;;  %v4600_v1 = vmax.f32 %v4472_v61, 0.0 }
 0x8c6   : > { %4711 = vst [vmem:[#allocation12 + $0x8a0] sm:$0xff] %v4583_v60  ;;  %v4346_v8 = vmul.f32 %v10880_v34, %v14437_v24  ;;  %v14438_v60 = vld [vmem:[#allocation371_spill] sm:$0xff]  ;;  %v4475_v38 = vadd.f32 %v10882_v50, %v4344_v9  ;;  %v4601_v14 = vmax.f32 %v4473_v32, 0.0 }
 0x8c7   : > { %4712 = vst [vmem:[#allocation12 + $0x8c0] sm:$0xff] %v4584_v15  ;;  %v4347_v5 = vmul.f32 %v10880_v34, %v14438_v60  ;;  %v14439_v15 = vld [vmem:[#allocation375_spill] sm:$0xff]  ;;  %v4476_v20 = vadd.f32 %v10882_v50, %v4345_v56  ;;  %v4602_v37 = vmax.f32 %v4474_v0, 0.0 }
 0x8c8   : > { %4713 = vst [vmem:[#allocation12 + $0x8e0] sm:$0xff] %v4585_v33  ;;  %v4348_v53 = vmul.f32 %v10880_v34, %v14439_v15  ;;  %v14440_v33 = vld [vmem:[#allocation379_spill] sm:$0xff]  ;;  %v4477_v16 = vadd.f32 %v10882_v50, %v4346_v8  ;;  %v4603_v43 = vmax.f32 %v4475_v38, 0.0 }
 0x8c9   : > { %4714 = vst [vmem:[#allocation12 + $0x900] sm:$0xff] %v4586_v44  ;;  %v4349_v22 = vmul.f32 %v10880_v34, %v14440_v33  ;;  %v14441_v44 = vld [vmem:[#allocation383_spill] sm:$0xff]  ;;  %v4478_v48 = vadd.f32 %v10882_v50, %v4347_v5  ;;  %v4604_v6 = vmax.f32 %v4476_v20, 0.0 }
 0x8ca   : > { %4715 = vst [vmem:[#allocation12 + $0x920] sm:$0xff] %v4587_v13  ;;  %v4350_v42 = vmul.f32 %v10880_v34, %v14441_v44  ;;  %v14442_v13 = vld [vmem:[#allocation387_spill] sm:$0xff]  ;;  %v4479_v52 = vadd.f32 %v10882_v50, %v4348_v53  ;;  %v4605_v21 = vmax.f32 %v4477_v16, 0.0 }
 0x8cb   : > { %4716 = vst [vmem:[#allocation12 + $0x940] sm:$0xff] %v4588_v63  ;;  %v4351_v23 = vmul.f32 %v10880_v34, %v14442_v13  ;;  %v14443_v63 = vld [vmem:[#allocation391_spill] sm:$0xff]  ;;  %v4480_v55 = vadd.f32 %v10882_v50, %v4349_v22  ;;  %v4606_v31 = vmax.f32 %v4478_v48, 0.0 }
 0x8cc   : > { %4717 = vst [vmem:[#allocation12 + $0x960] sm:$0xff] %v4589_v27  ;;  %v4352_v25 = vmul.f32 %v10880_v34, %v14443_v63  ;;  %v14444_v27 = vld [vmem:[#allocation395_spill] sm:$0xff]  ;;  %v4481_v28 = vadd.f32 %v10882_v50, %v4350_v42  ;;  %v4607_v17 = vmax.f32 %v4479_v52, 0.0 }
 0x8cd   : > { %4718 = vst [vmem:[#allocation12 + $0x980] sm:$0xff] %v4590_v18  ;;  %v4353_v39 = vmul.f32 %v10880_v34, %v14444_v27  ;;  %v14445_v18 = vld [vmem:[#allocation399_spill] sm:$0xff]  ;;  %v4482_v46 = vadd.f32 %v10882_v50, %v4351_v23  ;;  %v4608_v11 = vmax.f32 %v4480_v55, 0.0 }
 0x8ce   : > { %4719 = vst [vmem:[#allocation12 + $0x9a0] sm:$0xff] %v4591_v29  ;;  %v4354_v26 = vmul.f32 %v10880_v34, %v14445_v18  ;;  %v14446_v29 = vld [vmem:[#allocation403_spill] sm:$0xff]  ;;  %v4483_v36 = vadd.f32 %v10882_v50, %v4352_v25  ;;  %v4609_v62 = vmax.f32 %v4481_v28, 0.0 }
 0x8cf   : > { %4720 = vst [vmem:[#allocation12 + $0x9c0] sm:$0xff] %v4592_v58  ;;  %v4355_v57 = vmul.f32 %v10880_v34, %v14446_v29  ;;  %v14447_v58 = vld [vmem:[#allocation407_spill] sm:$0xff]  ;;  %v4484_v7 = vadd.f32 %v10882_v50, %v4353_v39  ;;  %v4610_v54 = vmax.f32 %v4482_v46, 0.0 }
 0x8d0   : > { %4721 = vst [vmem:[#allocation12 + $0x9e0] sm:$0xff] %v4593_v12  ;;  %v4356_v3 = vmul.f32 %v10880_v34, %v14447_v58  ;;  %v14448_v12 = vld [vmem:[#allocation411_spill] sm:$0xff]  ;;  %v4485_v47 = vadd.f32 %v10882_v50, %v4354_v26  ;;  %v4611_v59 = vmax.f32 %v4483_v36, 0.0 }
 0x8d1   : > { %4722 = vst [vmem:[#allocation12 + $0xa00] sm:$0xff] %v4594_v49  ;;  %v4357_v30 = vmul.f32 %v10880_v34, %v14448_v12  ;;  %v14449_v49 = vld [vmem:[#allocation415_spill] sm:$0xff]  ;;  %v4486_v41 = vadd.f32 %v10882_v50, %v4355_v57  ;;  %v4612_v40 = vmax.f32 %v4484_v7, 0.0 }
 0x8d2   : > { %4723 = vst [vmem:[#allocation12 + $0xa20] sm:$0xff] %v4595_v35  ;;  %v4358_v4 = vmul.f32 %v10880_v34, %v14449_v49  ;;  %v14450_v35 = vld [vmem:[#allocation419_spill] sm:$0xff]  ;;  %v4487_v9 = vadd.f32 %v10882_v50, %v4356_v3  ;;  %v4613_v24 = vmax.f32 %v4485_v47, 0.0 }
 0x8d3   : > { %4724 = vst [vmem:[#allocation12 + $0xa40] sm:$0xff] %v4596_v51  ;;  %v4359_v2 = vmul.f32 %v10880_v34, %v14450_v35  ;;  %v14451_v51 = vld [vmem:[#allocation423_spill] sm:$0xff]  ;;  %v4488_v56 = vadd.f32 %v10882_v50, %v4357_v30  ;;  %v4614_v60 = vmax.f32 %v4486_v41, 0.0 }
 0x8d4   : > { %4725 = vst [vmem:[#allocation12 + $0xa60] sm:$0xff] %v4597_v19  ;;  %v4360_v61 = vmul.f32 %v10880_v34, %v14451_v51  ;;  %v14452_v19 = vld [vmem:[#allocation427_spill] sm:$0xff]  ;;  %v4489_v8 = vadd.f32 %v10882_v50, %v4358_v4  ;;  %v4615_v15 = vmax.f32 %v4487_v9, 0.0 }
 0x8d5   : > { %4726 = vst [vmem:[#allocation12 + $0xa80] sm:$0xff] %v4598_v45  ;;  %v4361_v32 = vmul.f32 %v10880_v34, %v14452_v19  ;;  %v14453_v45 = vld [vmem:[#allocation431_spill] sm:$0xff]  ;;  %v4490_v5 = vadd.f32 %v10882_v50, %v4359_v2  ;;  %v4616_v33 = vmax.f32 %v4488_v56, 0.0 }
 0x8d6   : > { %4727 = vst [vmem:[#allocation12 + $0xaa0] sm:$0xff] %v4599_v10  ;;  %v4362_v0 = vmul.f32 %v10880_v34, %v14453_v45  ;;  %v14454_v10 = vld [vmem:[#allocation435_spill] sm:$0xff]  ;;  %v4491_v53 = vadd.f32 %v10882_v50, %v4360_v61  ;;  %v4617_v44 = vmax.f32 %v4489_v8, 0.0 }
 0x8d7   : > { %4728 = vst [vmem:[#allocation12 + $0xac0] sm:$0xff] %v4600_v1  ;;  %v4363_v38 = vmul.f32 %v10880_v34, %v14454_v10  ;;  %v14455_v1 = vld [vmem:[#allocation439_spill] sm:$0xff]  ;;  %v4492_v22 = vadd.f32 %v10882_v50, %v4361_v32  ;;  %v4618_v13 = vmax.f32 %v4490_v5, 0.0 }
 0x8d8   : > { %4729 = vst [vmem:[#allocation12 + $0xae0] sm:$0xff] %v4601_v14  ;;  %v4364_v20 = vmul.f32 %v10880_v34, %v14455_v1  ;;  %v14456_v14 = vld [vmem:[#allocation443_spill] sm:$0xff]  ;;  %v4493_v42 = vadd.f32 %v10882_v50, %v4362_v0  ;;  %v4619_v63 = vmax.f32 %v4491_v53, 0.0 }
 0x8d9   : > { %4730 = vst [vmem:[#allocation12 + $0xb00] sm:$0xff] %v4602_v37  ;;  %v4365_v16 = vmul.f32 %v10880_v34, %v14456_v14  ;;  %v14457_v37 = vld [vmem:[#allocation447_spill] sm:$0xff]  ;;  %v4494_v23 = vadd.f32 %v10882_v50, %v4363_v38  ;;  %v4620_v27 = vmax.f32 %v4492_v22, 0.0 }
 0x8da   : > { %4731 = vst [vmem:[#allocation12 + $0xb20] sm:$0xff] %v4603_v43  ;;  %v4366_v48 = vmul.f32 %v10880_v34, %v14457_v37  ;;  %v14458_v43 = vld [vmem:[#allocation451_spill] sm:$0xff]  ;;  %v4495_v25 = vadd.f32 %v10882_v50, %v4364_v20  ;;  %v4621_v18 = vmax.f32 %v4493_v42, 0.0 }
 0x8db   : > { %4732 = vst [vmem:[#allocation12 + $0xb40] sm:$0xff] %v4604_v6  ;;  %v4367_v52 = vmul.f32 %v10880_v34, %v14458_v43  ;;  %v14459_v6 = vld [vmem:[#allocation455_spill] sm:$0xff]  ;;  %v4496_v39 = vadd.f32 %v10882_v50, %v4365_v16  ;;  %v4622_v29 = vmax.f32 %v4494_v23, 0.0 }
 0x8dc   : > { %4733 = vst [vmem:[#allocation12 + $0xb60] sm:$0xff] %v4605_v21  ;;  %v4368_v55 = vmul.f32 %v10880_v34, %v14459_v6  ;;  %v14460_v21 = vld [vmem:[#allocation459_spill] sm:$0xff]  ;;  %v4497_v26 = vadd.f32 %v10882_v50, %v4366_v48  ;;  %v4623_v58 = vmax.f32 %v4495_v25, 0.0 }
 0x8dd   : > { %4734 = vst [vmem:[#allocation12 + $0xb80] sm:$0xff] %v4606_v31  ;;  %v4369_v28 = vmul.f32 %v10880_v34, %v14460_v21  ;;  %v14461_v31 = vld [vmem:[#allocation463_spill] sm:$0xff]  ;;  %v4498_v57 = vadd.f32 %v10882_v50, %v4367_v52  ;;  %v4624_v12 = vmax.f32 %v4496_v39, 0.0 }
 0x8de   : > { %4735 = vst [vmem:[#allocation12 + $0xba0] sm:$0xff] %v4607_v17  ;;  %v4370_v46 = vmul.f32 %v10880_v34, %v14461_v31  ;;  %v14462_v17 = vld [vmem:[#allocation467_spill] sm:$0xff]  ;;  %v4499_v3 = vadd.f32 %v10882_v50, %v4368_v55  ;;  %v4625_v49 = vmax.f32 %v4497_v26, 0.0 }
 0x8df   : > { %4736 = vst [vmem:[#allocation12 + $0xbc0] sm:$0xff] %v4608_v11  ;;  %v4371_v36 = vmul.f32 %v10880_v34, %v14462_v17  ;;  %v14463_v11 = vld [vmem:[#allocation471_spill] sm:$0xff]  ;;  %v4500_v30 = vadd.f32 %v10882_v50, %v4369_v28  ;;  %v4626_v35 = vmax.f32 %v4498_v57, 0.0 }
 0x8e0   : > { %4737 = vst [vmem:[#allocation12 + $0xbe0] sm:$0xff] %v4609_v62  ;;  %v4372_v7 = vmul.f32 %v10880_v34, %v14463_v11  ;;  %v14464_v62 = vld [vmem:[#allocation475_spill] sm:$0xff]  ;;  %v4501_v4 = vadd.f32 %v10882_v50, %v4370_v46  ;;  %v4627_v51 = vmax.f32 %v4499_v3, 0.0 }
 0x8e1   : > { %4738 = vst [vmem:[#allocation12 + $0xc00] sm:$0xff] %v4610_v54  ;;  %v4373_v47 = vmul.f32 %v10880_v34, %v14464_v62  ;;  %v14465_v54 = vld [vmem:[#allocation479_spill] sm:$0xff]  ;;  %v4502_v2 = vadd.f32 %v10882_v50, %v4371_v36  ;;  %v4628_v19 = vmax.f32 %v4500_v30, 0.0  ;;  %v14479_v30 = vld [vmem:[#allocation36_spill] sm:$0xff] }
 0x8e2   : > { %4739 = vst [vmem:[#allocation12 + $0xc20] sm:$0xff] %v4611_v59  ;;  %v4374_v41 = vmul.f32 %v10880_v34, %v14465_v54  ;;  %v14466_v59 = vld [vmem:[#allocation483_spill] sm:$0xff]  ;;  %v4503_v61 = vadd.f32 %v10882_v50, %v4372_v7  ;;  %v4629_v45 = vmax.f32 %v4501_v4, 0.0 }
 0x8e3   : > { %4740 = vst [vmem:[#allocation12 + $0xc40] sm:$0xff] %v4612_v40  ;;  %v4375_v9 = vmul.f32 %v10880_v34, %v14466_v59  ;;  %v14467_v40 = vld [vmem:[#allocation487_spill] sm:$0xff]  ;;  %v4504_v32 = vadd.f32 %v10882_v50, %v4373_v47  ;;  %v4630_v10 = vmax.f32 %v4502_v2, 0.0  ;;  %v14481_v2 = vld [vmem:[#allocation42_spill] sm:$0xff] }
 0x8e4   : > { %4741 = vst [vmem:[#allocation12 + $0xc60] sm:$0xff] %v4613_v24  ;;  %v4376_v56 = vmul.f32 %v10880_v34, %v14467_v40  ;;  %v14468_v24 = vld [vmem:[#allocation491_spill] sm:$0xff]  ;;  %v4505_v0 = vadd.f32 %v10882_v50, %v4374_v41  ;;  %v4631_v1 = vmax.f32 %v4503_v61, 0.0 }
 0x8e5   : > { %4742 = vst [vmem:[#allocation12 + $0xc80] sm:$0xff] %v4614_v60  ;;  %v4377_v8 = vmul.f32 %v10880_v34, %v14468_v24  ;;  %v14469_v60 = vld [vmem:[#allocation495_spill] sm:$0xff]  ;;  %v4506_v38 = vadd.f32 %v10882_v50, %v4375_v9  ;;  %v4632_v14 = vmax.f32 %v4504_v32, 0.0 }
 0x8e6   : > { %4743 = vst [vmem:[#allocation12 + $0xca0] sm:$0xff] %v4615_v15  ;;  %v4378_v5 = vmul.f32 %v10880_v34, %v14469_v60  ;;  %v14470_v15 = vld [vmem:[#allocation499_spill] sm:$0xff]  ;;  %v4507_v20 = vadd.f32 %v10882_v50, %v4376_v56  ;;  %v4633_v37 = vmax.f32 %v4505_v0, 0.0 }
 0x8e7   : > { %4744 = vst [vmem:[#allocation12 + $0xcc0] sm:$0xff] %v4616_v33  ;;  %v4379_v53 = vmul.f32 %v10880_v34, %v14470_v15  ;;  %v14471_v33 = vld [vmem:[#allocation503_spill] sm:$0xff]  ;;  %v4508_v16 = vadd.f32 %v10882_v50, %v4377_v8  ;;  %v4634_v43 = vmax.f32 %v4506_v38, 0.0 }
 0x8e8   : > { %4745 = vst [vmem:[#allocation12 + $0xce0] sm:$0xff] %v4617_v44  ;;  %v4380_v22 = vmul.f32 %v10880_v34, %v14471_v33  ;;  %v14472_v44 = vld [vmem:[#allocation507_spill] sm:$0xff]  ;;  %v4509_v48 = vadd.f32 %v10882_v50, %v4378_v5  ;;  %v4635_v6 = vmax.f32 %v4507_v20, 0.0 }
 0x8e9   : > { %4746 = vst [vmem:[#allocation12 + $0xd00] sm:$0xff] %v4618_v13  ;;  %v4381_v42 = vmul.f32 %v10880_v34, %v14472_v44  ;;  %v14473_v13 = vld [vmem:[#allocation511_spill] sm:$0xff]  ;;  %v4510_v52 = vadd.f32 %v10882_v50, %v4379_v53  ;;  %v4636_v21 = vmax.f32 %v4508_v16, 0.0 }
 0x8ea   : > { %4747 = vst [vmem:[#allocation12 + $0xd20] sm:$0xff] %v4619_v63  ;;  %v4382_v23 = vmul.f32 %v10880_v34, %v14473_v13  ;;  %v14474_v63 = vld [vmem:[#allocation17_spill] sm:$0xff]  ;;  %v4511_v55 = vadd.f32 %v10882_v50, %v4380_v22  ;;  %v4637_v31 = vmax.f32 %v4509_v48, 0.0  ;;  %v14480_v54 = vld [vmem:[#allocation39_spill] sm:$0xff] }
 0x8eb   : > { %4748 = vst [vmem:[#allocation12 + $0xd40] sm:$0xff] %v4620_v27  ;;  %v4770_v25 = vmul.f32 %v10880_v34, %v14474_v63  ;;  %v14475_v27 = vld [vmem:[#allocation21_spill] sm:$0xff]  ;;  %v4512_v28 = vadd.f32 %v10882_v50, %v4381_v42  ;;  %v4638_v17 = vmax.f32 %v4510_v52, 0.0 }
 0x8ec   : > { %4749 = vst [vmem:[#allocation12 + $0xd60] sm:$0xff] %v4621_v18  ;;  %v4771_v39 = vmul.f32 %v10880_v34, %v14475_v27  ;;  %v14476_v18 = vld [vmem:[#allocation25_spill] sm:$0xff]  ;;  %v4513_v46 = vadd.f32 %v10882_v50, %v4382_v23  ;;  %v4639_v11 = vmax.f32 %v4511_v55, 0.0 }
 0x8ed   : > { %4750 = vst [vmem:[#allocation12 + $0xd80] sm:$0xff] %v4622_v29  ;;  %v4772_v26 = vmul.f32 %v10880_v34, %v14476_v18  ;;  %v14477_v29 = vld [vmem:[#allocation29_spill] sm:$0xff]  ;;  %v4898_v36 = vadd.f32 %v10882_v50, %v4770_v25  ;;  %v4640_v47 = vmax.f32 %v4512_v28, 0.0 }
 0x8ee   : > { %4751 = vst [vmem:[#allocation12 + $0xda0] sm:$0xff] %v4623_v58  ;;  %v4773_v57 = vmul.f32 %v10880_v34, %v14477_v29  ;;  %v14478_v58 = vld [vmem:[#allocation33_spill] sm:$0xff]  ;;  %v4899_v7 = vadd.f32 %v10882_v50, %v4771_v39 }
 0x8ef   : > { %4752 = vst [vmem:[#allocation12 + $0xdc0] sm:$0xff] %v4624_v12  ;;  %v4774_v3 = vmul.f32 %v10880_v34, %v14478_v58  ;;  %v11280_v12 = vld [vmem:[#allocation4] ss:$0 sm:$0xff]  ;;  %v4641_v34 = vmax.f32 %v4513_v46, 0.0  ;;  %v5026_v59 = vmax.f32 %v4898_v36, 0.0 }
 0x8f0   : > { %4753 = vst [vmem:[#allocation12 + $0xde0] sm:$0xff] %v4625_v49  ;;  %v4775_v62 = vmul.f32 %v11280_v12, %v14479_v30  ;;  %v11284_v49 = vld [vmem:[#allocation5] ss:$0 sm:$0xff]  ;;  %v4776_v41 = vmul.f32 %v11280_v12, %v14480_v54  ;;  %v4777_v50 = vmul.f32 %v11280_v12, %v14481_v2  ;;  %v5027_v40 = vmax.f32 %v4899_v7, 0.0 }
 0x8f1   : > { %4754 = vst [vmem:[#allocation12 + $0xe00] sm:$0xff] %v4626_v35  ;;  %v4900_v4 = vadd.f32 %v11284_v49, %v4772_v26  ;;  %v4901_v35 = vadd.f32 %v11284_v49, %v4773_v57  ;;  %v4902_v9 = vadd.f32 %v11284_v49, %v4774_v3 }
 0x8f2   : > { %4755 = vst [vmem:[#allocation12 + $0xe20] sm:$0xff] %v4627_v51  ;;  %v14482_v51 = vld [vmem:[#allocation45_spill] sm:$0xff]  ;;  %v4903_v56 = vadd.f32 %v11284_v49, %v4775_v62  ;;  %v4904_v8 = vadd.f32 %v11284_v49, %v4776_v41  ;;  %v4905_v5 = vadd.f32 %v11284_v49, %v4777_v50 }
 0x8f3   : > { %4756 = vst [vmem:[#allocation12 + $0xe40] sm:$0xff] %v4628_v19  ;;  %v4778_v61 = vmul.f32 %v11280_v12, %v14482_v51  ;;  %v14483_v19 = vld [vmem:[#allocation48_spill] sm:$0xff]  ;;  %v5028_v24 = vmax.f32 %v4900_v4, 0.0  ;;  %v5029_v60 = vmax.f32 %v4901_v35, 0.0  ;;  %v5030_v15 = vmax.f32 %v4902_v9, 0.0 }
 0x8f4   : > { %4757 = vst [vmem:[#allocation12 + $0xe60] sm:$0xff] %v4629_v45  ;;  %v4779_v32 = vmul.f32 %v11280_v12, %v14483_v19  ;;  %v14484_v45 = vld [vmem:[#allocation51_spill] sm:$0xff]  ;;  %v5031_v33 = vmax.f32 %v4903_v56, 0.0  ;;  %v5032_v44 = vmax.f32 %v4904_v8, 0.0  ;;  %v5033_v13 = vmax.f32 %v4905_v5, 0.0 }
 0x8f5   : > { %4758 = vst [vmem:[#allocation12 + $0xe80] sm:$0xff] %v4630_v10  ;;  %v4780_v0 = vmul.f32 %v11280_v12, %v14484_v45  ;;  %v14485_v10 = vld [vmem:[#allocation54_spill] sm:$0xff]  ;;  %v4906_v53 = vadd.f32 %v11284_v49, %v4778_v61 }
 0x8f6   : > { %4759 = vst [vmem:[#allocation12 + $0xea0] sm:$0xff] %v4631_v1  ;;  %v4781_v38 = vmul.f32 %v11280_v12, %v14485_v10  ;;  %v14486_v1 = vld [vmem:[#allocation57_spill] sm:$0xff]  ;;  %v4907_v22 = vadd.f32 %v11284_v49, %v4779_v32 }
 0x8f7   : > { %4760 = vst [vmem:[#allocation12 + $0xec0] sm:$0xff] %v4632_v14  ;;  %v4782_v20 = vmul.f32 %v11280_v12, %v14486_v1  ;;  %v14487_v14 = vld [vmem:[#allocation60_spill] sm:$0xff]  ;;  %v4908_v42 = vadd.f32 %v11284_v49, %v4780_v0  ;;  %v5034_v63 = vmax.f32 %v4906_v53, 0.0 }
 0x8f8   : > { %4761 = vst [vmem:[#allocation12 + $0xee0] sm:$0xff] %v4633_v37  ;;  %v4783_v16 = vmul.f32 %v11280_v12, %v14487_v14  ;;  %v14488_v37 = vld [vmem:[#allocation64_spill] sm:$0xff]  ;;  %v4909_v23 = vadd.f32 %v11284_v49, %v4781_v38  ;;  %v5035_v27 = vmax.f32 %v4907_v22, 0.0 }
 0x8f9   : > { %4762 = vst [vmem:[#allocation12 + $0xf00] sm:$0xff] %v4634_v43  ;;  %v4784_v48 = vmul.f32 %v11280_v12, %v14488_v37  ;;  %v14489_v43 = vld [vmem:[#allocation68_spill] sm:$0xff]  ;;  %v4910_v25 = vadd.f32 %v11284_v49, %v4782_v20  ;;  %v5036_v18 = vmax.f32 %v4908_v42, 0.0 }
 0x8fa   : > { %4763 = vst [vmem:[#allocation12 + $0xf20] sm:$0xff] %v4635_v6  ;;  %v4785_v52 = vmul.f32 %v11280_v12, %v14489_v43  ;;  %v14490_v6 = vld [vmem:[#allocation72_spill] sm:$0xff]  ;;  %v4911_v39 = vadd.f32 %v11284_v49, %v4783_v16  ;;  %v5037_v29 = vmax.f32 %v4909_v23, 0.0 }
 0x8fb   : > { %4764 = vst [vmem:[#allocation12 + $0xf40] sm:$0xff] %v4636_v21  ;;  %v4786_v55 = vmul.f32 %v11280_v12, %v14490_v6  ;;  %v14491_v21 = vld [vmem:[#allocation76_spill] sm:$0xff]  ;;  %v4912_v26 = vadd.f32 %v11284_v49, %v4784_v48  ;;  %v5038_v58 = vmax.f32 %v4910_v25, 0.0 }
 0x8fc   : > { %4765 = vst [vmem:[#allocation12 + $0xf60] sm:$0xff] %v4637_v31  ;;  %v4787_v28 = vmul.f32 %v11280_v12, %v14491_v21  ;;  %v14492_v31 = vld [vmem:[#allocation80_spill] sm:$0xff]  ;;  %v4913_v57 = vadd.f32 %v11284_v49, %v4785_v52  ;;  %v5039_v30 = vmax.f32 %v4911_v39, 0.0 }
 0x8fd   : > { %4766 = vst [vmem:[#allocation12 + $0xf80] sm:$0xff] %v4638_v17  ;;  %v4788_v46 = vmul.f32 %v11280_v12, %v14492_v31  ;;  %v14493_v17 = vld [vmem:[#allocation84_spill] sm:$0xff]  ;;  %v4914_v3 = vadd.f32 %v11284_v49, %v4786_v55  ;;  %v5040_v54 = vmax.f32 %v4912_v26, 0.0 }
 0x8fe   : > { %4767 = vst [vmem:[#allocation12 + $0xfa0] sm:$0xff] %v4639_v11  ;;  %v4789_v36 = vmul.f32 %v11280_v12, %v14493_v17  ;;  %v14494_v11 = vld [vmem:[#allocation88_spill] sm:$0xff]  ;;  %v4915_v62 = vadd.f32 %v11284_v49, %v4787_v28  ;;  %v5041_v2 = vmax.f32 %v4913_v57, 0.0 }
 0x8ff   : > { %4768 = vst [vmem:[#allocation12 + $0xfc0] sm:$0xff] %v4640_v47  ;;  %v4790_v7 = vmul.f32 %v11280_v12, %v14494_v11  ;;  %v14495_v47 = vld [vmem:[#allocation92_spill] sm:$0xff]  ;;  %v4916_v41 = vadd.f32 %v11284_v49, %v4788_v46  ;;  %v5042_v51 = vmax.f32 %v4914_v3, 0.0 }
 0x900   : > { %4769 = vst [vmem:[#allocation12 + $0xfe0] sm:$0xff] %v4641_v34  ;;  %v4791_v4 = vmul.f32 %v11280_v12, %v14495_v47  ;;  %v14496_v34 = vld [vmem:[#allocation95_spill] sm:$0xff]  ;;  %v4917_v50 = vadd.f32 %v11284_v49, %v4789_v36  ;;  %v5043_v19 = vmax.f32 %v4915_v62, 0.0 }
 0x901   : > { %5154 = vst [vmem:[#allocation12 + $0x8] sm:$0xff] %v5026_v59  ;;  %v4792_v35 = vmul.f32 %v11280_v12, %v14496_v34  ;;  %v14497_v59 = vld [vmem:[#allocation98_spill] sm:$0xff]  ;;  %v4918_v61 = vadd.f32 %v11284_v49, %v4790_v7  ;;  %v5044_v45 = vmax.f32 %v4916_v41, 0.0 }
 0x902   : > { %5155 = vst [vmem:[#allocation12 + $0x28] sm:$0xff] %v5027_v40  ;;  %v4793_v9 = vmul.f32 %v11280_v12, %v14497_v59  ;;  %v14498_v40 = vld [vmem:[#allocation101_spill] sm:$0xff]  ;;  %v4919_v32 = vadd.f32 %v11284_v49, %v4791_v4  ;;  %v5045_v10 = vmax.f32 %v4917_v50, 0.0 }
 0x903   : > { %5156 = vst [vmem:[#allocation12 + $0x48] sm:$0xff] %v5028_v24  ;;  %v4794_v56 = vmul.f32 %v11280_v12, %v14498_v40  ;;  %v14499_v24 = vld [vmem:[#allocation104_spill] sm:$0xff]  ;;  %v4920_v0 = vadd.f32 %v11284_v49, %v4792_v35  ;;  %v5046_v1 = vmax.f32 %v4918_v61, 0.0 }
 0x904   : > { %5157 = vst [vmem:[#allocation12 + $0x68] sm:$0xff] %v5029_v60  ;;  %v4795_v8 = vmul.f32 %v11280_v12, %v14499_v24  ;;  %v14500_v60 = vld [vmem:[#allocation108_spill] sm:$0xff]  ;;  %v4921_v38 = vadd.f32 %v11284_v49, %v4793_v9  ;;  %v5047_v14 = vmax.f32 %v4919_v32, 0.0 }
 0x905   : > { %5158 = vst [vmem:[#allocation12 + $0x88] sm:$0xff] %v5030_v15  ;;  %v4796_v5 = vmul.f32 %v11280_v12, %v14500_v60  ;;  %v14501_v15 = vld [vmem:[#allocation112_spill] sm:$0xff]  ;;  %v4922_v20 = vadd.f32 %v11284_v49, %v4794_v56  ;;  %v5048_v37 = vmax.f32 %v4920_v0, 0.0 }
 0x906   : > { %5159 = vst [vmem:[#allocation12 + $0xa8] sm:$0xff] %v5031_v33  ;;  %v4797_v53 = vmul.f32 %v11280_v12, %v14501_v15  ;;  %v14502_v33 = vld [vmem:[#allocation116_spill] sm:$0xff]  ;;  %v4923_v16 = vadd.f32 %v11284_v49, %v4795_v8  ;;  %v5049_v43 = vmax.f32 %v4921_v38, 0.0 }
 0x907   : > { %5160 = vst [vmem:[#allocation12 + $0xc8] sm:$0xff] %v5032_v44  ;;  %v4798_v22 = vmul.f32 %v11280_v12, %v14502_v33  ;;  %v14503_v44 = vld [vmem:[#allocation120_spill] sm:$0xff]  ;;  %v4924_v48 = vadd.f32 %v11284_v49, %v4796_v5  ;;  %v5050_v6 = vmax.f32 %v4922_v20, 0.0 }
 0x908   : > { %5161 = vst [vmem:[#allocation12 + $0xe8] sm:$0xff] %v5033_v13  ;;  %v4799_v42 = vmul.f32 %v11280_v12, %v14503_v44  ;;  %v14504_v13 = vld [vmem:[#allocation124_spill] sm:$0xff]  ;;  %v4925_v52 = vadd.f32 %v11284_v49, %v4797_v53  ;;  %v5051_v21 = vmax.f32 %v4923_v16, 0.0 }
 0x909   : > { %5162 = vst [vmem:[#allocation12 + $0x108] sm:$0xff] %v5034_v63  ;;  %v4800_v23 = vmul.f32 %v11280_v12, %v14504_v13  ;;  %v14505_v63 = vld [vmem:[#allocation128_spill] sm:$0xff]  ;;  %v4926_v55 = vadd.f32 %v11284_v49, %v4798_v22  ;;  %v5052_v31 = vmax.f32 %v4924_v48, 0.0 }
 0x90a   : > { %5163 = vst [vmem:[#allocation12 + $0x128] sm:$0xff] %v5035_v27  ;;  %v4801_v25 = vmul.f32 %v11280_v12, %v14505_v63  ;;  %v14506_v27 = vld [vmem:[#allocation132_spill] sm:$0xff]  ;;  %v4927_v28 = vadd.f32 %v11284_v49, %v4799_v42  ;;  %v5053_v17 = vmax.f32 %v4925_v52, 0.0 }
 0x90b   : > { %5164 = vst [vmem:[#allocation12 + $0x148] sm:$0xff] %v5036_v18  ;;  %v4802_v39 = vmul.f32 %v11280_v12, %v14506_v27  ;;  %v14507_v18 = vld [vmem:[#allocation136_spill] sm:$0xff]  ;;  %v4928_v46 = vadd.f32 %v11284_v49, %v4800_v23  ;;  %v5054_v11 = vmax.f32 %v4926_v55, 0.0 }
 0x90c   : > { %5165 = vst [vmem:[#allocation12 + $0x168] sm:$0xff] %v5037_v29  ;;  %v4803_v26 = vmul.f32 %v11280_v12, %v14507_v18  ;;  %v14508_v29 = vld [vmem:[#allocation140_spill] sm:$0xff]  ;;  %v4929_v36 = vadd.f32 %v11284_v49, %v4801_v25  ;;  %v5055_v47 = vmax.f32 %v4927_v28, 0.0 }
 0x90d   : > { %5166 = vst [vmem:[#allocation12 + $0x188] sm:$0xff] %v5038_v58  ;;  %v4804_v57 = vmul.f32 %v11280_v12, %v14508_v29  ;;  %v14509_v58 = vld [vmem:[#allocation144_spill] sm:$0xff]  ;;  %v4930_v7 = vadd.f32 %v11284_v49, %v4802_v39  ;;  %v5056_v34 = vmax.f32 %v4928_v46, 0.0 }
 0x90e   : > { %5167 = vst [vmem:[#allocation12 + $0x1a8] sm:$0xff] %v5039_v30  ;;  %v4805_v3 = vmul.f32 %v11280_v12, %v14509_v58  ;;  %v14510_v30 = vld [vmem:[#allocation148_spill] sm:$0xff]  ;;  %v4931_v4 = vadd.f32 %v11284_v49, %v4803_v26  ;;  %v5057_v59 = vmax.f32 %v4929_v36, 0.0 }
 0x90f   : > { %5168 = vst [vmem:[#allocation12 + $0x1c8] sm:$0xff] %v5040_v54  ;;  %v4806_v62 = vmul.f32 %v11280_v12, %v14510_v30  ;;  %v14511_v54 = vld [vmem:[#allocation152_spill] sm:$0xff]  ;;  %v4932_v35 = vadd.f32 %v11284_v49, %v4804_v57  ;;  %v5058_v40 = vmax.f32 %v4930_v7, 0.0 }
 0x910   : > { %5169 = vst [vmem:[#allocation12 + $0x1e8] sm:$0xff] %v5041_v2  ;;  %v4807_v41 = vmul.f32 %v11280_v12, %v14511_v54  ;;  %v14512_v2 = vld [vmem:[#allocation156_spill] sm:$0xff]  ;;  %v4933_v9 = vadd.f32 %v11284_v49, %v4805_v3  ;;  %v5059_v24 = vmax.f32 %v4931_v4, 0.0 }
 0x911   : > { %5170 = vst [vmem:[#allocation12 + $0x208] sm:$0xff] %v5042_v51  ;;  %v4808_v50 = vmul.f32 %v11280_v12, %v14512_v2  ;;  %v14513_v51 = vld [vmem:[#allocation160_spill] sm:$0xff]  ;;  %v4934_v56 = vadd.f32 %v11284_v49, %v4806_v62  ;;  %v5060_v60 = vmax.f32 %v4932_v35, 0.0 }
 0x912   : > { %5171 = vst [vmem:[#allocation12 + $0x228] sm:$0xff] %v5043_v19  ;;  %v4809_v61 = vmul.f32 %v11280_v12, %v14513_v51  ;;  %v14514_v19 = vld [vmem:[#allocation164_spill] sm:$0xff]  ;;  %v4935_v8 = vadd.f32 %v11284_v49, %v4807_v41  ;;  %v5061_v15 = vmax.f32 %v4933_v9, 0.0 }
 0x913   : > { %5172 = vst [vmem:[#allocation12 + $0x248] sm:$0xff] %v5044_v45  ;;  %v4810_v32 = vmul.f32 %v11280_v12, %v14514_v19  ;;  %v14515_v45 = vld [vmem:[#allocation168_spill] sm:$0xff]  ;;  %v4936_v5 = vadd.f32 %v11284_v49, %v4808_v50  ;;  %v5062_v33 = vmax.f32 %v4934_v56, 0.0 }
 0x914   : > { %5173 = vst [vmem:[#allocation12 + $0x268] sm:$0xff] %v5045_v10  ;;  %v4811_v0 = vmul.f32 %v11280_v12, %v14515_v45  ;;  %v14516_v10 = vld [vmem:[#allocation172_spill] sm:$0xff]  ;;  %v4937_v53 = vadd.f32 %v11284_v49, %v4809_v61  ;;  %v5063_v44 = vmax.f32 %v4935_v8, 0.0 }
 0x915   : > { %5174 = vst [vmem:[#allocation12 + $0x288] sm:$0xff] %v5046_v1  ;;  %v4812_v38 = vmul.f32 %v11280_v12, %v14516_v10  ;;  %v14517_v1 = vld [vmem:[#allocation176_spill] sm:$0xff]  ;;  %v4938_v22 = vadd.f32 %v11284_v49, %v4810_v32  ;;  %v5064_v13 = vmax.f32 %v4936_v5, 0.0 }
 0x916   : > { %5175 = vst [vmem:[#allocation12 + $0x2a8] sm:$0xff] %v5047_v14  ;;  %v4813_v20 = vmul.f32 %v11280_v12, %v14517_v1  ;;  %v14518_v14 = vld [vmem:[#allocation180_spill] sm:$0xff]  ;;  %v4939_v42 = vadd.f32 %v11284_v49, %v4811_v0  ;;  %v5065_v63 = vmax.f32 %v4937_v53, 0.0 }
 0x917   : > { %5176 = vst [vmem:[#allocation12 + $0x2c8] sm:$0xff] %v5048_v37  ;;  %v4814_v16 = vmul.f32 %v11280_v12, %v14518_v14  ;;  %v14519_v37 = vld [vmem:[#allocation184_spill] sm:$0xff]  ;;  %v4940_v23 = vadd.f32 %v11284_v49, %v4812_v38  ;;  %v5066_v27 = vmax.f32 %v4938_v22, 0.0 }
 0x918   : > { %5177 = vst [vmem:[#allocation12 + $0x2e8] sm:$0xff] %v5049_v43  ;;  %v4815_v48 = vmul.f32 %v11280_v12, %v14519_v37  ;;  %v14520_v43 = vld [vmem:[#allocation188_spill] sm:$0xff]  ;;  %v4941_v25 = vadd.f32 %v11284_v49, %v4813_v20  ;;  %v5067_v18 = vmax.f32 %v4939_v42, 0.0 }
 0x919   : > { %5178 = vst [vmem:[#allocation12 + $0x308] sm:$0xff] %v5050_v6  ;;  %v4816_v52 = vmul.f32 %v11280_v12, %v14520_v43  ;;  %v14521_v6 = vld [vmem:[#allocation192_spill] sm:$0xff]  ;;  %v4942_v39 = vadd.f32 %v11284_v49, %v4814_v16  ;;  %v5068_v29 = vmax.f32 %v4940_v23, 0.0 }
 0x91a   : > { %5179 = vst [vmem:[#allocation12 + $0x328] sm:$0xff] %v5051_v21  ;;  %v4817_v55 = vmul.f32 %v11280_v12, %v14521_v6  ;;  %v14522_v21 = vld [vmem:[#allocation196_spill] sm:$0xff]  ;;  %v4943_v26 = vadd.f32 %v11284_v49, %v4815_v48  ;;  %v5069_v58 = vmax.f32 %v4941_v25, 0.0 }
 0x91b   : > { %5180 = vst [vmem:[#allocation12 + $0x348] sm:$0xff] %v5052_v31  ;;  %v4818_v28 = vmul.f32 %v11280_v12, %v14522_v21  ;;  %v14523_v31 = vld [vmem:[#allocation200_spill] sm:$0xff]  ;;  %v4944_v57 = vadd.f32 %v11284_v49, %v4816_v52  ;;  %v5070_v30 = vmax.f32 %v4942_v39, 0.0 }
 0x91c   : > { %5181 = vst [vmem:[#allocation12 + $0x368] sm:$0xff] %v5053_v17  ;;  %v4819_v46 = vmul.f32 %v11280_v12, %v14523_v31  ;;  %v14524_v17 = vld [vmem:[#allocation204_spill] sm:$0xff]  ;;  %v4945_v3 = vadd.f32 %v11284_v49, %v4817_v55  ;;  %v5071_v54 = vmax.f32 %v4943_v26, 0.0 }
 0x91d   : > { %5182 = vst [vmem:[#allocation12 + $0x388] sm:$0xff] %v5054_v11  ;;  %v4820_v36 = vmul.f32 %v11280_v12, %v14524_v17  ;;  %v14525_v11 = vld [vmem:[#allocation208_spill] sm:$0xff]  ;;  %v4946_v62 = vadd.f32 %v11284_v49, %v4818_v28  ;;  %v5072_v2 = vmax.f32 %v4944_v57, 0.0 }
 0x91e   : > { %5183 = vst [vmem:[#allocation12 + $0x3a8] sm:$0xff] %v5055_v47  ;;  %v4821_v7 = vmul.f32 %v11280_v12, %v14525_v11  ;;  %v14526_v47 = vld [vmem:[#allocation212_spill] sm:$0xff]  ;;  %v4947_v41 = vadd.f32 %v11284_v49, %v4819_v46  ;;  %v5073_v51 = vmax.f32 %v4945_v3, 0.0 }
 0x91f   : > { %5184 = vst [vmem:[#allocation12 + $0x3c8] sm:$0xff] %v5056_v34  ;;  %v4822_v4 = vmul.f32 %v11280_v12, %v14526_v47  ;;  %v14527_v34 = vld [vmem:[#allocation216_spill] sm:$0xff]  ;;  %v4948_v50 = vadd.f32 %v11284_v49, %v4820_v36  ;;  %v5074_v19 = vmax.f32 %v4946_v62, 0.0 }
 0x920   : > { %5185 = vst [vmem:[#allocation12 + $0x3e8] sm:$0xff] %v5057_v59  ;;  %v4823_v35 = vmul.f32 %v11280_v12, %v14527_v34  ;;  %v14528_v59 = vld [vmem:[#allocation220_spill] sm:$0xff]  ;;  %v4949_v61 = vadd.f32 %v11284_v49, %v4821_v7  ;;  %v5075_v45 = vmax.f32 %v4947_v41, 0.0 }
 0x921   : > { %5186 = vst [vmem:[#allocation12 + $0x408] sm:$0xff] %v5058_v40  ;;  %v4824_v9 = vmul.f32 %v11280_v12, %v14528_v59  ;;  %v14529_v40 = vld [vmem:[#allocation224_spill] sm:$0xff]  ;;  %v4950_v32 = vadd.f32 %v11284_v49, %v4822_v4  ;;  %v5076_v10 = vmax.f32 %v4948_v50, 0.0 }
 0x922   : > { %5187 = vst [vmem:[#allocation12 + $0x428] sm:$0xff] %v5059_v24  ;;  %v4825_v56 = vmul.f32 %v11280_v12, %v14529_v40  ;;  %v14530_v24 = vld [vmem:[#allocation228_spill] sm:$0xff]  ;;  %v4951_v0 = vadd.f32 %v11284_v49, %v4823_v35  ;;  %v5077_v1 = vmax.f32 %v4949_v61, 0.0 }
 0x923   : > { %5188 = vst [vmem:[#allocation12 + $0x448] sm:$0xff] %v5060_v60  ;;  %v4826_v8 = vmul.f32 %v11280_v12, %v14530_v24  ;;  %v14531_v60 = vld [vmem:[#allocation232_spill] sm:$0xff]  ;;  %v4952_v38 = vadd.f32 %v11284_v49, %v4824_v9  ;;  %v5078_v14 = vmax.f32 %v4950_v32, 0.0 }
 0x924   : > { %5189 = vst [vmem:[#allocation12 + $0x468] sm:$0xff] %v5061_v15  ;;  %v4827_v5 = vmul.f32 %v11280_v12, %v14531_v60  ;;  %v14532_v15 = vld [vmem:[#allocation236_spill] sm:$0xff]  ;;  %v4953_v20 = vadd.f32 %v11284_v49, %v4825_v56  ;;  %v5079_v37 = vmax.f32 %v4951_v0, 0.0 }
 0x925   : > { %5190 = vst [vmem:[#allocation12 + $0x488] sm:$0xff] %v5062_v33  ;;  %v4828_v53 = vmul.f32 %v11280_v12, %v14532_v15  ;;  %v14533_v33 = vld [vmem:[#allocation240_spill] sm:$0xff]  ;;  %v4954_v16 = vadd.f32 %v11284_v49, %v4826_v8  ;;  %v5080_v43 = vmax.f32 %v4952_v38, 0.0 }
 0x926   : > { %5191 = vst [vmem:[#allocation12 + $0x4a8] sm:$0xff] %v5063_v44  ;;  %v4829_v22 = vmul.f32 %v11280_v12, %v14533_v33  ;;  %v14534_v44 = vld [vmem:[#allocation244_spill] sm:$0xff]  ;;  %v4955_v48 = vadd.f32 %v11284_v49, %v4827_v5  ;;  %v5081_v6 = vmax.f32 %v4953_v20, 0.0 }
 0x927   : > { %5192 = vst [vmem:[#allocation12 + $0x4c8] sm:$0xff] %v5064_v13  ;;  %v4830_v42 = vmul.f32 %v11280_v12, %v14534_v44  ;;  %v14535_v13 = vld [vmem:[#allocation248_spill] sm:$0xff]  ;;  %v4956_v52 = vadd.f32 %v11284_v49, %v4828_v53  ;;  %v5082_v21 = vmax.f32 %v4954_v16, 0.0 }
 0x928   : > { %5193 = vst [vmem:[#allocation12 + $0x4e8] sm:$0xff] %v5065_v63  ;;  %v4831_v23 = vmul.f32 %v11280_v12, %v14535_v13  ;;  %v14536_v63 = vld [vmem:[#allocation252_spill] sm:$0xff]  ;;  %v4957_v55 = vadd.f32 %v11284_v49, %v4829_v22  ;;  %v5083_v31 = vmax.f32 %v4955_v48, 0.0 }
 0x929   : > { %5194 = vst [vmem:[#allocation12 + $0x508] sm:$0xff] %v5066_v27  ;;  %v4832_v25 = vmul.f32 %v11280_v12, %v14536_v63  ;;  %v14537_v27 = vld [vmem:[#allocation256_spill] sm:$0xff]  ;;  %v4958_v28 = vadd.f32 %v11284_v49, %v4830_v42  ;;  %v5084_v17 = vmax.f32 %v4956_v52, 0.0 }
 0x92a   : > { %5195 = vst [vmem:[#allocation12 + $0x528] sm:$0xff] %v5067_v18  ;;  %v4833_v39 = vmul.f32 %v11280_v12, %v14537_v27  ;;  %v14538_v18 = vld [vmem:[#allocation260_spill] sm:$0xff]  ;;  %v4959_v46 = vadd.f32 %v11284_v49, %v4831_v23  ;;  %v5085_v11 = vmax.f32 %v4957_v55, 0.0 }
 0x92b   : > { %5196 = vst [vmem:[#allocation12 + $0x548] sm:$0xff] %v5068_v29  ;;  %v4834_v26 = vmul.f32 %v11280_v12, %v14538_v18  ;;  %v14539_v29 = vld [vmem:[#allocation264_spill] sm:$0xff]  ;;  %v4960_v36 = vadd.f32 %v11284_v49, %v4832_v25  ;;  %v5086_v47 = vmax.f32 %v4958_v28, 0.0 }
 0x92c   : > { %5197 = vst [vmem:[#allocation12 + $0x568] sm:$0xff] %v5069_v58  ;;  %v4835_v57 = vmul.f32 %v11280_v12, %v14539_v29  ;;  %v14540_v58 = vld [vmem:[#allocation268_spill] sm:$0xff]  ;;  %v4961_v7 = vadd.f32 %v11284_v49, %v4833_v39  ;;  %v5087_v34 = vmax.f32 %v4959_v46, 0.0 }
 0x92d   : > { %5198 = vst [vmem:[#allocation12 + $0x588] sm:$0xff] %v5070_v30  ;;  %v4836_v3 = vmul.f32 %v11280_v12, %v14540_v58  ;;  %v14541_v30 = vld [vmem:[#allocation272_spill] sm:$0xff]  ;;  %v4962_v4 = vadd.f32 %v11284_v49, %v4834_v26  ;;  %v5088_v59 = vmax.f32 %v4960_v36, 0.0 }
 0x92e   : > { %5199 = vst [vmem:[#allocation12 + $0x5a8] sm:$0xff] %v5071_v54  ;;  %v4837_v62 = vmul.f32 %v11280_v12, %v14541_v30  ;;  %v14542_v54 = vld [vmem:[#allocation276_spill] sm:$0xff]  ;;  %v4963_v35 = vadd.f32 %v11284_v49, %v4835_v57  ;;  %v5089_v40 = vmax.f32 %v4961_v7, 0.0 }
 0x92f   : > { %5200 = vst [vmem:[#allocation12 + $0x5c8] sm:$0xff] %v5072_v2  ;;  %v4838_v41 = vmul.f32 %v11280_v12, %v14542_v54  ;;  %v14543_v2 = vld [vmem:[#allocation280_spill] sm:$0xff]  ;;  %v4964_v9 = vadd.f32 %v11284_v49, %v4836_v3  ;;  %v5090_v24 = vmax.f32 %v4962_v4, 0.0 }
 0x930   : > { %5201 = vst [vmem:[#allocation12 + $0x5e8] sm:$0xff] %v5073_v51  ;;  %v4839_v50 = vmul.f32 %v11280_v12, %v14543_v2  ;;  %v14544_v51 = vld [vmem:[#allocation284_spill] sm:$0xff]  ;;  %v4965_v56 = vadd.f32 %v11284_v49, %v4837_v62  ;;  %v5091_v60 = vmax.f32 %v4963_v35, 0.0 }
 0x931   : > { %5202 = vst [vmem:[#allocation12 + $0x608] sm:$0xff] %v5074_v19  ;;  %v4840_v61 = vmul.f32 %v11280_v12, %v14544_v51  ;;  %v14545_v19 = vld [vmem:[#allocation288_spill] sm:$0xff]  ;;  %v4966_v8 = vadd.f32 %v11284_v49, %v4838_v41  ;;  %v5092_v15 = vmax.f32 %v4964_v9, 0.0 }
 0x932   : > { %5203 = vst [vmem:[#allocation12 + $0x628] sm:$0xff] %v5075_v45  ;;  %v4841_v32 = vmul.f32 %v11280_v12, %v14545_v19  ;;  %v14546_v45 = vld [vmem:[#allocation292_spill] sm:$0xff]  ;;  %v4967_v5 = vadd.f32 %v11284_v49, %v4839_v50  ;;  %v5093_v33 = vmax.f32 %v4965_v56, 0.0 }
 0x933   : > { %5204 = vst [vmem:[#allocation12 + $0x648] sm:$0xff] %v5076_v10  ;;  %v4842_v0 = vmul.f32 %v11280_v12, %v14546_v45  ;;  %v14547_v10 = vld [vmem:[#allocation296_spill] sm:$0xff]  ;;  %v4968_v53 = vadd.f32 %v11284_v49, %v4840_v61  ;;  %v5094_v44 = vmax.f32 %v4966_v8, 0.0 }
 0x934   : > { %5205 = vst [vmem:[#allocation12 + $0x668] sm:$0xff] %v5077_v1  ;;  %v4843_v38 = vmul.f32 %v11280_v12, %v14547_v10  ;;  %v14548_v1 = vld [vmem:[#allocation300_spill] sm:$0xff]  ;;  %v4969_v22 = vadd.f32 %v11284_v49, %v4841_v32  ;;  %v5095_v13 = vmax.f32 %v4967_v5, 0.0 }
 0x935   : > { %5206 = vst [vmem:[#allocation12 + $0x688] sm:$0xff] %v5078_v14  ;;  %v4844_v20 = vmul.f32 %v11280_v12, %v14548_v1  ;;  %v14549_v14 = vld [vmem:[#allocation304_spill] sm:$0xff]  ;;  %v4970_v42 = vadd.f32 %v11284_v49, %v4842_v0  ;;  %v5096_v63 = vmax.f32 %v4968_v53, 0.0 }
 0x936   : > { %5207 = vst [vmem:[#allocation12 + $0x6a8] sm:$0xff] %v5079_v37  ;;  %v4845_v16 = vmul.f32 %v11280_v12, %v14549_v14  ;;  %v14550_v37 = vld [vmem:[#allocation308_spill] sm:$0xff]  ;;  %v4971_v23 = vadd.f32 %v11284_v49, %v4843_v38  ;;  %v5097_v27 = vmax.f32 %v4969_v22, 0.0 }
 0x937   : > { %5208 = vst [vmem:[#allocation12 + $0x6c8] sm:$0xff] %v5080_v43  ;;  %v4846_v48 = vmul.f32 %v11280_v12, %v14550_v37  ;;  %v14551_v43 = vld [vmem:[#allocation312_spill] sm:$0xff]  ;;  %v4972_v25 = vadd.f32 %v11284_v49, %v4844_v20  ;;  %v5098_v18 = vmax.f32 %v4970_v42, 0.0 }
 0x938   : > { %5209 = vst [vmem:[#allocation12 + $0x6e8] sm:$0xff] %v5081_v6  ;;  %v4847_v52 = vmul.f32 %v11280_v12, %v14551_v43  ;;  %v14552_v6 = vld [vmem:[#allocation316_spill] sm:$0xff]  ;;  %v4973_v39 = vadd.f32 %v11284_v49, %v4845_v16  ;;  %v5099_v29 = vmax.f32 %v4971_v23, 0.0 }
 0x939   : > { %5210 = vst [vmem:[#allocation12 + $0x708] sm:$0xff] %v5082_v21  ;;  %v4848_v55 = vmul.f32 %v11280_v12, %v14552_v6  ;;  %v14553_v21 = vld [vmem:[#allocation320_spill] sm:$0xff]  ;;  %v4974_v26 = vadd.f32 %v11284_v49, %v4846_v48  ;;  %v5100_v58 = vmax.f32 %v4972_v25, 0.0 }
 0x93a   : > { %5211 = vst [vmem:[#allocation12 + $0x728] sm:$0xff] %v5083_v31  ;;  %v4849_v28 = vmul.f32 %v11280_v12, %v14553_v21  ;;  %v14554_v31 = vld [vmem:[#allocation324_spill] sm:$0xff]  ;;  %v4975_v57 = vadd.f32 %v11284_v49, %v4847_v52  ;;  %v5101_v30 = vmax.f32 %v4973_v39, 0.0 }
 0x93b   : > { %5212 = vst [vmem:[#allocation12 + $0x748] sm:$0xff] %v5084_v17  ;;  %v4850_v46 = vmul.f32 %v11280_v12, %v14554_v31  ;;  %v14555_v17 = vld [vmem:[#allocation328_spill] sm:$0xff]  ;;  %v4976_v3 = vadd.f32 %v11284_v49, %v4848_v55  ;;  %v5102_v54 = vmax.f32 %v4974_v26, 0.0 }
 0x93c   : > { %5213 = vst [vmem:[#allocation12 + $0x768] sm:$0xff] %v5085_v11  ;;  %v4851_v36 = vmul.f32 %v11280_v12, %v14555_v17  ;;  %v14556_v11 = vld [vmem:[#allocation332_spill] sm:$0xff]  ;;  %v4977_v62 = vadd.f32 %v11284_v49, %v4849_v28  ;;  %v5103_v2 = vmax.f32 %v4975_v57, 0.0 }
 0x93d   : > { %5214 = vst [vmem:[#allocation12 + $0x788] sm:$0xff] %v5086_v47  ;;  %v4852_v7 = vmul.f32 %v11280_v12, %v14556_v11  ;;  %v14557_v47 = vld [vmem:[#allocation336_spill] sm:$0xff]  ;;  %v4978_v41 = vadd.f32 %v11284_v49, %v4850_v46  ;;  %v5104_v51 = vmax.f32 %v4976_v3, 0.0 }
 0x93e   : > { %5215 = vst [vmem:[#allocation12 + $0x7a8] sm:$0xff] %v5087_v34  ;;  %v4853_v4 = vmul.f32 %v11280_v12, %v14557_v47  ;;  %v14558_v34 = vld [vmem:[#allocation340_spill] sm:$0xff]  ;;  %v4979_v50 = vadd.f32 %v11284_v49, %v4851_v36  ;;  %v5105_v19 = vmax.f32 %v4977_v62, 0.0 }
 0x93f   : > { %5216 = vst [vmem:[#allocation12 + $0x7c8] sm:$0xff] %v5088_v59  ;;  %v4854_v35 = vmul.f32 %v11280_v12, %v14558_v34  ;;  %v14559_v59 = vld [vmem:[#allocation344_spill] sm:$0xff]  ;;  %v4980_v61 = vadd.f32 %v11284_v49, %v4852_v7  ;;  %v5106_v45 = vmax.f32 %v4978_v41, 0.0 }
 0x940   : > { %5217 = vst [vmem:[#allocation12 + $0x7e8] sm:$0xff] %v5089_v40  ;;  %v4855_v9 = vmul.f32 %v11280_v12, %v14559_v59  ;;  %v14560_v40 = vld [vmem:[#allocation348_spill] sm:$0xff]  ;;  %v4981_v32 = vadd.f32 %v11284_v49, %v4853_v4  ;;  %v5107_v10 = vmax.f32 %v4979_v50, 0.0 }
 0x941   : > { %5218 = vst [vmem:[#allocation12 + $0x808] sm:$0xff] %v5090_v24  ;;  %v4856_v56 = vmul.f32 %v11280_v12, %v14560_v40  ;;  %v14561_v24 = vld [vmem:[#allocation352_spill] sm:$0xff]  ;;  %v4982_v0 = vadd.f32 %v11284_v49, %v4854_v35  ;;  %v5108_v1 = vmax.f32 %v4980_v61, 0.0 }
 0x942   : > { %5219 = vst [vmem:[#allocation12 + $0x828] sm:$0xff] %v5091_v60  ;;  %v4857_v8 = vmul.f32 %v11280_v12, %v14561_v24  ;;  %v14562_v60 = vld [vmem:[#allocation356_spill] sm:$0xff]  ;;  %v4983_v38 = vadd.f32 %v11284_v49, %v4855_v9  ;;  %v5109_v14 = vmax.f32 %v4981_v32, 0.0 }
 0x943   : > { %5220 = vst [vmem:[#allocation12 + $0x848] sm:$0xff] %v5092_v15  ;;  %v4858_v5 = vmul.f32 %v11280_v12, %v14562_v60  ;;  %v14563_v15 = vld [vmem:[#allocation360_spill] sm:$0xff]  ;;  %v4984_v20 = vadd.f32 %v11284_v49, %v4856_v56  ;;  %v5110_v37 = vmax.f32 %v4982_v0, 0.0 }
 0x944   : > { %5221 = vst [vmem:[#allocation12 + $0x868] sm:$0xff] %v5093_v33  ;;  %v4859_v53 = vmul.f32 %v11280_v12, %v14563_v15  ;;  %v14564_v33 = vld [vmem:[#allocation364_spill] sm:$0xff]  ;;  %v4985_v16 = vadd.f32 %v11284_v49, %v4857_v8  ;;  %v5111_v43 = vmax.f32 %v4983_v38, 0.0 }
 0x945   : > { %5222 = vst [vmem:[#allocation12 + $0x888] sm:$0xff] %v5094_v44  ;;  %v4860_v22 = vmul.f32 %v11280_v12, %v14564_v33  ;;  %v14565_v44 = vld [vmem:[#allocation368_spill] sm:$0xff]  ;;  %v4986_v48 = vadd.f32 %v11284_v49, %v4858_v5  ;;  %v5112_v6 = vmax.f32 %v4984_v20, 0.0 }
 0x946   : > { %5223 = vst [vmem:[#allocation12 + $0x8a8] sm:$0xff] %v5095_v13  ;;  %v4861_v42 = vmul.f32 %v11280_v12, %v14565_v44  ;;  %v14566_v13 = vld [vmem:[#allocation372_spill] sm:$0xff]  ;;  %v4987_v52 = vadd.f32 %v11284_v49, %v4859_v53  ;;  %v5113_v21 = vmax.f32 %v4985_v16, 0.0 }
 0x947   : > { %5224 = vst [vmem:[#allocation12 + $0x8c8] sm:$0xff] %v5096_v63  ;;  %v4862_v23 = vmul.f32 %v11280_v12, %v14566_v13  ;;  %v14567_v63 = vld [vmem:[#allocation376_spill] sm:$0xff]  ;;  %v4988_v55 = vadd.f32 %v11284_v49, %v4860_v22  ;;  %v5114_v31 = vmax.f32 %v4986_v48, 0.0 }
 0x948   : > { %5225 = vst [vmem:[#allocation12 + $0x8e8] sm:$0xff] %v5097_v27  ;;  %v4863_v25 = vmul.f32 %v11280_v12, %v14567_v63  ;;  %v14568_v27 = vld [vmem:[#allocation380_spill] sm:$0xff]  ;;  %v4989_v28 = vadd.f32 %v11284_v49, %v4861_v42  ;;  %v5115_v17 = vmax.f32 %v4987_v52, 0.0 }
 0x949   : > { %5226 = vst [vmem:[#allocation12 + $0x908] sm:$0xff] %v5098_v18  ;;  %v4864_v39 = vmul.f32 %v11280_v12, %v14568_v27  ;;  %v14569_v18 = vld [vmem:[#allocation384_spill] sm:$0xff]  ;;  %v4990_v46 = vadd.f32 %v11284_v49, %v4862_v23  ;;  %v5116_v11 = vmax.f32 %v4988_v55, 0.0 }
 0x94a   : > { %5227 = vst [vmem:[#allocation12 + $0x928] sm:$0xff] %v5099_v29  ;;  %v4865_v26 = vmul.f32 %v11280_v12, %v14569_v18  ;;  %v14570_v29 = vld [vmem:[#allocation388_spill] sm:$0xff]  ;;  %v4991_v36 = vadd.f32 %v11284_v49, %v4863_v25  ;;  %v5117_v47 = vmax.f32 %v4989_v28, 0.0 }
 0x94b   : > { %5228 = vst [vmem:[#allocation12 + $0x948] sm:$0xff] %v5100_v58  ;;  %v4866_v57 = vmul.f32 %v11280_v12, %v14570_v29  ;;  %v14571_v58 = vld [vmem:[#allocation392_spill] sm:$0xff]  ;;  %v4992_v7 = vadd.f32 %v11284_v49, %v4864_v39  ;;  %v5118_v34 = vmax.f32 %v4990_v46, 0.0 }
 0x94c   : > { %5229 = vst [vmem:[#allocation12 + $0x968] sm:$0xff] %v5101_v30  ;;  %v4867_v3 = vmul.f32 %v11280_v12, %v14571_v58  ;;  %v14572_v30 = vld [vmem:[#allocation396_spill] sm:$0xff]  ;;  %v4993_v4 = vadd.f32 %v11284_v49, %v4865_v26  ;;  %v5119_v59 = vmax.f32 %v4991_v36, 0.0 }
 0x94d   : > { %5230 = vst [vmem:[#allocation12 + $0x988] sm:$0xff] %v5102_v54  ;;  %v4868_v62 = vmul.f32 %v11280_v12, %v14572_v30  ;;  %v14573_v54 = vld [vmem:[#allocation400_spill] sm:$0xff]  ;;  %v4994_v35 = vadd.f32 %v11284_v49, %v4866_v57  ;;  %v5120_v40 = vmax.f32 %v4992_v7, 0.0 }
 0x94e   : > { %5231 = vst [vmem:[#allocation12 + $0x9a8] sm:$0xff] %v5103_v2  ;;  %v4869_v41 = vmul.f32 %v11280_v12, %v14573_v54  ;;  %v14574_v2 = vld [vmem:[#allocation404_spill] sm:$0xff]  ;;  %v4995_v9 = vadd.f32 %v11284_v49, %v4867_v3  ;;  %v5121_v24 = vmax.f32 %v4993_v4, 0.0 }
 0x94f   : > { %5232 = vst [vmem:[#allocation12 + $0x9c8] sm:$0xff] %v5104_v51  ;;  %v4870_v50 = vmul.f32 %v11280_v12, %v14574_v2  ;;  %v14575_v51 = vld [vmem:[#allocation408_spill] sm:$0xff]  ;;  %v4996_v56 = vadd.f32 %v11284_v49, %v4868_v62  ;;  %v5122_v60 = vmax.f32 %v4994_v35, 0.0 }
 0x950   : > { %5233 = vst [vmem:[#allocation12 + $0x9e8] sm:$0xff] %v5105_v19  ;;  %v4871_v61 = vmul.f32 %v11280_v12, %v14575_v51  ;;  %v14576_v19 = vld [vmem:[#allocation412_spill] sm:$0xff]  ;;  %v4997_v8 = vadd.f32 %v11284_v49, %v4869_v41  ;;  %v5123_v15 = vmax.f32 %v4995_v9, 0.0 }
 0x951   : > { %5234 = vst [vmem:[#allocation12 + $0xa08] sm:$0xff] %v5106_v45  ;;  %v4872_v32 = vmul.f32 %v11280_v12, %v14576_v19  ;;  %v14577_v45 = vld [vmem:[#allocation416_spill] sm:$0xff]  ;;  %v4998_v5 = vadd.f32 %v11284_v49, %v4870_v50  ;;  %v5124_v33 = vmax.f32 %v4996_v56, 0.0 }
 0x952   : > { %5235 = vst [vmem:[#allocation12 + $0xa28] sm:$0xff] %v5107_v10  ;;  %v4873_v0 = vmul.f32 %v11280_v12, %v14577_v45  ;;  %v14578_v10 = vld [vmem:[#allocation420_spill] sm:$0xff]  ;;  %v4999_v53 = vadd.f32 %v11284_v49, %v4871_v61  ;;  %v5125_v44 = vmax.f32 %v4997_v8, 0.0 }
 0x953   : > { %5236 = vst [vmem:[#allocation12 + $0xa48] sm:$0xff] %v5108_v1  ;;  %v4874_v38 = vmul.f32 %v11280_v12, %v14578_v10  ;;  %v14579_v1 = vld [vmem:[#allocation424_spill] sm:$0xff]  ;;  %v5000_v22 = vadd.f32 %v11284_v49, %v4872_v32  ;;  %v5126_v13 = vmax.f32 %v4998_v5, 0.0 }
 0x954   : > { %5237 = vst [vmem:[#allocation12 + $0xa68] sm:$0xff] %v5109_v14  ;;  %v4875_v20 = vmul.f32 %v11280_v12, %v14579_v1  ;;  %v14580_v14 = vld [vmem:[#allocation428_spill] sm:$0xff]  ;;  %v5001_v42 = vadd.f32 %v11284_v49, %v4873_v0  ;;  %v5127_v63 = vmax.f32 %v4999_v53, 0.0 }
 0x955   : > { %5238 = vst [vmem:[#allocation12 + $0xa88] sm:$0xff] %v5110_v37  ;;  %v4876_v16 = vmul.f32 %v11280_v12, %v14580_v14  ;;  %v14581_v37 = vld [vmem:[#allocation432_spill] sm:$0xff]  ;;  %v5002_v23 = vadd.f32 %v11284_v49, %v4874_v38  ;;  %v5128_v27 = vmax.f32 %v5000_v22, 0.0 }
 0x956   : > { %5239 = vst [vmem:[#allocation12 + $0xaa8] sm:$0xff] %v5111_v43  ;;  %v4877_v48 = vmul.f32 %v11280_v12, %v14581_v37  ;;  %v14582_v43 = vld [vmem:[#allocation436_spill] sm:$0xff]  ;;  %v5003_v25 = vadd.f32 %v11284_v49, %v4875_v20  ;;  %v5129_v18 = vmax.f32 %v5001_v42, 0.0 }
 0x957   : > { %5240 = vst [vmem:[#allocation12 + $0xac8] sm:$0xff] %v5112_v6  ;;  %v4878_v52 = vmul.f32 %v11280_v12, %v14582_v43  ;;  %v14583_v6 = vld [vmem:[#allocation440_spill] sm:$0xff]  ;;  %v5004_v39 = vadd.f32 %v11284_v49, %v4876_v16  ;;  %v5130_v29 = vmax.f32 %v5002_v23, 0.0 }
 0x958   : > { %5241 = vst [vmem:[#allocation12 + $0xae8] sm:$0xff] %v5113_v21  ;;  %v4879_v55 = vmul.f32 %v11280_v12, %v14583_v6  ;;  %v14584_v21 = vld [vmem:[#allocation444_spill] sm:$0xff]  ;;  %v5005_v26 = vadd.f32 %v11284_v49, %v4877_v48  ;;  %v5131_v58 = vmax.f32 %v5003_v25, 0.0 }
 0x959   : > { %5242 = vst [vmem:[#allocation12 + $0xb08] sm:$0xff] %v5114_v31  ;;  %v4880_v28 = vmul.f32 %v11280_v12, %v14584_v21  ;;  %v14585_v31 = vld [vmem:[#allocation448_spill] sm:$0xff]  ;;  %v5006_v57 = vadd.f32 %v11284_v49, %v4878_v52  ;;  %v5132_v30 = vmax.f32 %v5004_v39, 0.0 }
 0x95a   : > { %5243 = vst [vmem:[#allocation12 + $0xb28] sm:$0xff] %v5115_v17  ;;  %v4881_v46 = vmul.f32 %v11280_v12, %v14585_v31  ;;  %v14586_v17 = vld [vmem:[#allocation452_spill] sm:$0xff]  ;;  %v5007_v3 = vadd.f32 %v11284_v49, %v4879_v55  ;;  %v5133_v54 = vmax.f32 %v5005_v26, 0.0 }
 0x95b   : > { %5244 = vst [vmem:[#allocation12 + $0xb48] sm:$0xff] %v5116_v11  ;;  %v4882_v36 = vmul.f32 %v11280_v12, %v14586_v17  ;;  %v14587_v11 = vld [vmem:[#allocation456_spill] sm:$0xff]  ;;  %v5008_v62 = vadd.f32 %v11284_v49, %v4880_v28  ;;  %v5134_v2 = vmax.f32 %v5006_v57, 0.0 }
 0x95c   : > { %5245 = vst [vmem:[#allocation12 + $0xb68] sm:$0xff] %v5117_v47  ;;  %v4883_v7 = vmul.f32 %v11280_v12, %v14587_v11  ;;  %v14588_v47 = vld [vmem:[#allocation460_spill] sm:$0xff]  ;;  %v5009_v41 = vadd.f32 %v11284_v49, %v4881_v46  ;;  %v5135_v51 = vmax.f32 %v5007_v3, 0.0 }
 0x95d   : > { %5246 = vst [vmem:[#allocation12 + $0xb88] sm:$0xff] %v5118_v34  ;;  %v4884_v4 = vmul.f32 %v11280_v12, %v14588_v47  ;;  %v14589_v34 = vld [vmem:[#allocation464_spill] sm:$0xff]  ;;  %v5010_v50 = vadd.f32 %v11284_v49, %v4882_v36  ;;  %v5136_v19 = vmax.f32 %v5008_v62, 0.0 }
 0x95e   : > { %5247 = vst [vmem:[#allocation12 + $0xba8] sm:$0xff] %v5119_v59  ;;  %v4885_v35 = vmul.f32 %v11280_v12, %v14589_v34  ;;  %v14590_v59 = vld [vmem:[#allocation468_spill] sm:$0xff]  ;;  %v5011_v61 = vadd.f32 %v11284_v49, %v4883_v7  ;;  %v5137_v45 = vmax.f32 %v5009_v41, 0.0 }
 0x95f   : > { %5248 = vst [vmem:[#allocation12 + $0xbc8] sm:$0xff] %v5120_v40  ;;  %v4886_v9 = vmul.f32 %v11280_v12, %v14590_v59  ;;  %v14591_v40 = vld [vmem:[#allocation472_spill] sm:$0xff]  ;;  %v5012_v32 = vadd.f32 %v11284_v49, %v4884_v4  ;;  %v5138_v10 = vmax.f32 %v5010_v50, 0.0 }
 0x960   : > { %5249 = vst [vmem:[#allocation12 + $0xbe8] sm:$0xff] %v5121_v24  ;;  %v4887_v56 = vmul.f32 %v11280_v12, %v14591_v40  ;;  %v14592_v24 = vld [vmem:[#allocation476_spill] sm:$0xff]  ;;  %v5013_v0 = vadd.f32 %v11284_v49, %v4885_v35  ;;  %v5139_v1 = vmax.f32 %v5011_v61, 0.0 }
 0x961   : > { %5250 = vst [vmem:[#allocation12 + $0xc08] sm:$0xff] %v5122_v60  ;;  %v4888_v8 = vmul.f32 %v11280_v12, %v14592_v24  ;;  %v14593_v60 = vld [vmem:[#allocation480_spill] sm:$0xff]  ;;  %v5014_v38 = vadd.f32 %v11284_v49, %v4886_v9  ;;  %v5140_v14 = vmax.f32 %v5012_v32, 0.0  ;;  %v14607_v32 = vld [vmem:[#allocation37_spill] sm:$0xff] }
 0x962   : > { %5251 = vst [vmem:[#allocation12 + $0xc28] sm:$0xff] %v5123_v15  ;;  %v4889_v5 = vmul.f32 %v11280_v12, %v14593_v60  ;;  %v14594_v15 = vld [vmem:[#allocation484_spill] sm:$0xff]  ;;  %v5015_v20 = vadd.f32 %v11284_v49, %v4887_v56  ;;  %v5141_v37 = vmax.f32 %v5013_v0, 0.0 }
 0x963   : > { %5252 = vst [vmem:[#allocation12 + $0xc48] sm:$0xff] %v5124_v33  ;;  %v4890_v53 = vmul.f32 %v11280_v12, %v14594_v15  ;;  %v14595_v33 = vld [vmem:[#allocation488_spill] sm:$0xff]  ;;  %v5016_v16 = vadd.f32 %v11284_v49, %v4888_v8  ;;  %v5142_v43 = vmax.f32 %v5014_v38, 0.0  ;;  %v14609_v38 = vld [vmem:[#allocation43_spill] sm:$0xff] }
 0x964   : > { %5253 = vst [vmem:[#allocation12 + $0xc68] sm:$0xff] %v5125_v44  ;;  %v4891_v22 = vmul.f32 %v11280_v12, %v14595_v33  ;;  %v14596_v44 = vld [vmem:[#allocation492_spill] sm:$0xff]  ;;  %v5017_v48 = vadd.f32 %v11284_v49, %v4889_v5  ;;  %v5143_v6 = vmax.f32 %v5015_v20, 0.0 }
 0x965   : > { %5254 = vst [vmem:[#allocation12 + $0xc88] sm:$0xff] %v5126_v13  ;;  %v4892_v42 = vmul.f32 %v11280_v12, %v14596_v44  ;;  %v14597_v13 = vld [vmem:[#allocation496_spill] sm:$0xff]  ;;  %v5018_v52 = vadd.f32 %v11284_v49, %v4890_v53  ;;  %v5144_v21 = vmax.f32 %v5016_v16, 0.0 }
 0x966   : > { %5255 = vst [vmem:[#allocation12 + $0xca8] sm:$0xff] %v5127_v63  ;;  %v4893_v23 = vmul.f32 %v11280_v12, %v14597_v13  ;;  %v14598_v63 = vld [vmem:[#allocation500_spill] sm:$0xff]  ;;  %v5019_v55 = vadd.f32 %v11284_v49, %v4891_v22  ;;  %v5145_v31 = vmax.f32 %v5017_v48, 0.0 }
 0x967   : > { %5256 = vst [vmem:[#allocation12 + $0xcc8] sm:$0xff] %v5128_v27  ;;  %v4894_v25 = vmul.f32 %v11280_v12, %v14598_v63  ;;  %v14599_v27 = vld [vmem:[#allocation504_spill] sm:$0xff]  ;;  %v5020_v28 = vadd.f32 %v11284_v49, %v4892_v42  ;;  %v5146_v17 = vmax.f32 %v5018_v52, 0.0 }
 0x968   : > { %5257 = vst [vmem:[#allocation12 + $0xce8] sm:$0xff] %v5129_v18  ;;  %v4895_v39 = vmul.f32 %v11280_v12, %v14599_v27  ;;  %v14600_v18 = vld [vmem:[#allocation508_spill] sm:$0xff]  ;;  %v5021_v46 = vadd.f32 %v11284_v49, %v4893_v23  ;;  %v5147_v11 = vmax.f32 %v5019_v55, 0.0 }
 0x969   : > { %5258 = vst [vmem:[#allocation12 + $0xd08] sm:$0xff] %v5130_v29  ;;  %v4896_v26 = vmul.f32 %v11280_v12, %v14600_v18  ;;  %v14601_v29 = vld [vmem:[#allocation512_spill] sm:$0xff]  ;;  %v5022_v36 = vadd.f32 %v11284_v49, %v4894_v25  ;;  %v5148_v47 = vmax.f32 %v5020_v28, 0.0 }
 0x96a   : > { %5259 = vst [vmem:[#allocation12 + $0xd28] sm:$0xff] %v5131_v58  ;;  %v4897_v57 = vmul.f32 %v11280_v12, %v14601_v29  ;;  %v14602_v58 = vld [vmem:[#allocation18_spill] sm:$0xff]  ;;  %v5023_v7 = vadd.f32 %v11284_v49, %v4895_v39  ;;  %v5149_v34 = vmax.f32 %v5021_v46, 0.0  ;;  %v14608_v60 = vld [vmem:[#allocation40_spill] sm:$0xff] }
 0x96b   : > { %5260 = vst [vmem:[#allocation12 + $0xd48] sm:$0xff] %v5132_v30  ;;  %v5282_v3 = vmul.f32 %v11280_v12, %v14602_v58  ;;  %v14603_v30 = vld [vmem:[#allocation22_spill] sm:$0xff]  ;;  %v5024_v4 = vadd.f32 %v11284_v49, %v4896_v26  ;;  %v5150_v59 = vmax.f32 %v5022_v36, 0.0 }
 0x96c   : > { %5261 = vst [vmem:[#allocation12 + $0xd68] sm:$0xff] %v5133_v54  ;;  %v5283_v62 = vmul.f32 %v11280_v12, %v14603_v30  ;;  %v14604_v54 = vld [vmem:[#allocation26_spill] sm:$0xff]  ;;  %v5025_v35 = vadd.f32 %v11284_v49, %v4897_v57  ;;  %v5151_v40 = vmax.f32 %v5023_v7, 0.0 }
 0x96d   : > { %5262 = vst [vmem:[#allocation12 + $0xd88] sm:$0xff] %v5134_v2  ;;  %v5284_v41 = vmul.f32 %v11280_v12, %v14604_v54  ;;  %v14605_v2 = vld [vmem:[#allocation30_spill] sm:$0xff]  ;;  %v5410_v9 = vadd.f32 %v11284_v49, %v5282_v3  ;;  %v5152_v8 = vmax.f32 %v5024_v4, 0.0 }
 0x96e   : > { %5263 = vst [vmem:[#allocation12 + $0xda8] sm:$0xff] %v5135_v51  ;;  %v5285_v50 = vmul.f32 %v11280_v12, %v14605_v2  ;;  %v14606_v51 = vld [vmem:[#allocation34_spill] sm:$0xff]  ;;  %v5411_v56 = vadd.f32 %v11284_v49, %v5283_v62 }
 0x96f   : > { %5264 = vst [vmem:[#allocation12 + $0xdc8] sm:$0xff] %v5136_v19  ;;  %v5286_v61 = vmul.f32 %v11280_v12, %v14606_v51  ;;  %v11668_v19 = vld [vmem:[#allocation4] ss:$0 sm:$0xff]  ;;  %v5153_v12 = vmax.f32 %v5025_v35, 0.0  ;;  %v5538_v15 = vmax.f32 %v5410_v9, 0.0 }
 0x970   : > { %5265 = vst [vmem:[#allocation12 + $0xde8] sm:$0xff] %v5137_v45  ;;  %v5287_v24 = vmul.f32 %v11668_v19, %v14607_v32  ;;  %v11672_v45 = vld [vmem:[#allocation5] ss:$0 sm:$0xff]  ;;  %v5288_v5 = vmul.f32 %v11668_v19, %v14608_v60  ;;  %v5289_v49 = vmul.f32 %v11668_v19, %v14609_v38  ;;  %v5539_v33 = vmax.f32 %v5411_v56, 0.0 }
 0x971   : > { %5266 = vst [vmem:[#allocation12 + $0xe08] sm:$0xff] %v5138_v10  ;;  %v5412_v0 = vadd.f32 %v11672_v45, %v5284_v41  ;;  %v5413_v10 = vadd.f32 %v11672_v45, %v5285_v50  ;;  %v5414_v53 = vadd.f32 %v11672_v45, %v5286_v61 }
 0x972   : > { %5267 = vst [vmem:[#allocation12 + $0xe28] sm:$0xff] %v5139_v1  ;;  %v14610_v1 = vld [vmem:[#allocation46_spill] sm:$0xff]  ;;  %v5415_v22 = vadd.f32 %v11672_v45, %v5287_v24  ;;  %v5416_v42 = vadd.f32 %v11672_v45, %v5288_v5  ;;  %v5417_v23 = vadd.f32 %v11672_v45, %v5289_v49 }
 0x973   : > { %5268 = vst [vmem:[#allocation12 + $0xe48] sm:$0xff] %v5140_v14  ;;  %v5290_v20 = vmul.f32 %v11668_v19, %v14610_v1  ;;  %v14611_v14 = vld [vmem:[#allocation49_spill] sm:$0xff]  ;;  %v5540_v44 = vmax.f32 %v5412_v0, 0.0  ;;  %v5541_v13 = vmax.f32 %v5413_v10, 0.0  ;;  %v5542_v63 = vmax.f32 %v5414_v53, 0.0 }
 0x974   : > { %5269 = vst [vmem:[#allocation12 + $0xe68] sm:$0xff] %v5141_v37  ;;  %v5291_v16 = vmul.f32 %v11668_v19, %v14611_v14  ;;  %v14612_v37 = vld [vmem:[#allocation52_spill] sm:$0xff]  ;;  %v5543_v27 = vmax.f32 %v5415_v22, 0.0  ;;  %v5544_v18 = vmax.f32 %v5416_v42, 0.0  ;;  %v5545_v29 = vmax.f32 %v5417_v23, 0.0 }
 0x975   : > { %5270 = vst [vmem:[#allocation12 + $0xe88] sm:$0xff] %v5142_v43  ;;  %v5292_v48 = vmul.f32 %v11668_v19, %v14612_v37  ;;  %v14613_v43 = vld [vmem:[#allocation55_spill] sm:$0xff]  ;;  %v5418_v25 = vadd.f32 %v11672_v45, %v5290_v20 }
 0x976   : > { %5271 = vst [vmem:[#allocation12 + $0xea8] sm:$0xff] %v5143_v6  ;;  %v5293_v52 = vmul.f32 %v11668_v19, %v14613_v43  ;;  %v14614_v6 = vld [vmem:[#allocation58_spill] sm:$0xff]  ;;  %v5419_v39 = vadd.f32 %v11672_v45, %v5291_v16 }
 0x977   : > { %5272 = vst [vmem:[#allocation12 + $0xec8] sm:$0xff] %v5144_v21  ;;  %v5294_v55 = vmul.f32 %v11668_v19, %v14614_v6  ;;  %v14615_v21 = vld [vmem:[#allocation61_spill] sm:$0xff]  ;;  %v5420_v26 = vadd.f32 %v11672_v45, %v5292_v48  ;;  %v5546_v58 = vmax.f32 %v5418_v25, 0.0 }
 0x978   : > { %5273 = vst [vmem:[#allocation12 + $0xee8] sm:$0xff] %v5145_v31  ;;  %v5295_v28 = vmul.f32 %v11668_v19, %v14615_v21  ;;  %v14616_v31 = vld [vmem:[#allocation65_spill] sm:$0xff]  ;;  %v5421_v57 = vadd.f32 %v11672_v45, %v5293_v52  ;;  %v5547_v30 = vmax.f32 %v5419_v39, 0.0 }
 0x979   : > { %5274 = vst [vmem:[#allocation12 + $0xf08] sm:$0xff] %v5146_v17  ;;  %v5296_v46 = vmul.f32 %v11668_v19, %v14616_v31  ;;  %v14617_v17 = vld [vmem:[#allocation69_spill] sm:$0xff]  ;;  %v5422_v3 = vadd.f32 %v11672_v45, %v5294_v55  ;;  %v5548_v54 = vmax.f32 %v5420_v26, 0.0 }
 0x97a   : > { %5275 = vst [vmem:[#allocation12 + $0xf28] sm:$0xff] %v5147_v11  ;;  %v5297_v36 = vmul.f32 %v11668_v19, %v14617_v17  ;;  %v14618_v11 = vld [vmem:[#allocation73_spill] sm:$0xff]  ;;  %v5423_v62 = vadd.f32 %v11672_v45, %v5295_v28  ;;  %v5549_v2 = vmax.f32 %v5421_v57, 0.0 }
 0x97b   : > { %5276 = vst [vmem:[#allocation12 + $0xf48] sm:$0xff] %v5148_v47  ;;  %v5298_v7 = vmul.f32 %v11668_v19, %v14618_v11  ;;  %v14619_v47 = vld [vmem:[#allocation77_spill] sm:$0xff]  ;;  %v5424_v41 = vadd.f32 %v11672_v45, %v5296_v46  ;;  %v5550_v51 = vmax.f32 %v5422_v3, 0.0 }
 0x97c   : > { %5277 = vst [vmem:[#allocation12 + $0xf68] sm:$0xff] %v5149_v34  ;;  %v5299_v4 = vmul.f32 %v11668_v19, %v14619_v47  ;;  %v14620_v34 = vld [vmem:[#allocation81_spill] sm:$0xff]  ;;  %v5425_v50 = vadd.f32 %v11672_v45, %v5297_v36  ;;  %v5551_v32 = vmax.f32 %v5423_v62, 0.0 }
 0x97d   : > { %5278 = vst [vmem:[#allocation12 + $0xf88] sm:$0xff] %v5150_v59  ;;  %v5300_v35 = vmul.f32 %v11668_v19, %v14620_v34  ;;  %v14621_v59 = vld [vmem:[#allocation85_spill] sm:$0xff]  ;;  %v5426_v61 = vadd.f32 %v11672_v45, %v5298_v7  ;;  %v5552_v60 = vmax.f32 %v5424_v41, 0.0 }
 0x97e   : > { %5279 = vst [vmem:[#allocation12 + $0xfa8] sm:$0xff] %v5151_v40  ;;  %v5301_v9 = vmul.f32 %v11668_v19, %v14621_v59  ;;  %v14622_v40 = vld [vmem:[#allocation89_spill] sm:$0xff]  ;;  %v5427_v24 = vadd.f32 %v11672_v45, %v5299_v4  ;;  %v5553_v38 = vmax.f32 %v5425_v50, 0.0 }
 0x97f   : > { %5280 = vst [vmem:[#allocation12 + $0xfc8] sm:$0xff] %v5152_v8  ;;  %v5302_v56 = vmul.f32 %v11668_v19, %v14622_v40  ;;  %v14623_v8 = vld [vmem:[#allocation93_spill] sm:$0xff]  ;;  %v5428_v5 = vadd.f32 %v11672_v45, %v5300_v35  ;;  %v5554_v1 = vmax.f32 %v5426_v61, 0.0 }
 0x980   : > { %5281 = vst [vmem:[#allocation12 + $0xfe8] sm:$0xff] %v5153_v12  ;;  %v5303_v0 = vmul.f32 %v11668_v19, %v14623_v8  ;;  %v14624_v12 = vld [vmem:[#allocation96_spill] sm:$0xff]  ;;  %v5429_v49 = vadd.f32 %v11672_v45, %v5301_v9  ;;  %v5555_v14 = vmax.f32 %v5427_v24, 0.0 }
 0x981   : > { %5666 = vst [vmem:[#allocation12 + $0x10] sm:$0xff] %v5538_v15  ;;  %v5304_v10 = vmul.f32 %v11668_v19, %v14624_v12  ;;  %v14625_v15 = vld [vmem:[#allocation99_spill] sm:$0xff]  ;;  %v5430_v20 = vadd.f32 %v11672_v45, %v5302_v56  ;;  %v5556_v37 = vmax.f32 %v5428_v5, 0.0 }
 0x982   : > { %5667 = vst [vmem:[#allocation12 + $0x30] sm:$0xff] %v5539_v33  ;;  %v5305_v53 = vmul.f32 %v11668_v19, %v14625_v15  ;;  %v14626_v33 = vld [vmem:[#allocation102_spill] sm:$0xff]  ;;  %v5431_v16 = vadd.f32 %v11672_v45, %v5303_v0  ;;  %v5557_v43 = vmax.f32 %v5429_v49, 0.0 }
 0x983   : > { %5668 = vst [vmem:[#allocation12 + $0x50] sm:$0xff] %v5540_v44  ;;  %v5306_v22 = vmul.f32 %v11668_v19, %v14626_v33  ;;  %v14627_v44 = vld [vmem:[#allocation105_spill] sm:$0xff]  ;;  %v5432_v48 = vadd.f32 %v11672_v45, %v5304_v10  ;;  %v5558_v6 = vmax.f32 %v5430_v20, 0.0 }
 0x984   : > { %5669 = vst [vmem:[#allocation12 + $0x70] sm:$0xff] %v5541_v13  ;;  %v5307_v42 = vmul.f32 %v11668_v19, %v14627_v44  ;;  %v14628_v13 = vld [vmem:[#allocation109_spill] sm:$0xff]  ;;  %v5433_v52 = vadd.f32 %v11672_v45, %v5305_v53  ;;  %v5559_v21 = vmax.f32 %v5431_v16, 0.0 }
 0x985   : > { %5670 = vst [vmem:[#allocation12 + $0x90] sm:$0xff] %v5542_v63  ;;  %v5308_v23 = vmul.f32 %v11668_v19, %v14628_v13  ;;  %v14629_v63 = vld [vmem:[#allocation113_spill] sm:$0xff]  ;;  %v5434_v55 = vadd.f32 %v11672_v45, %v5306_v22  ;;  %v5560_v31 = vmax.f32 %v5432_v48, 0.0 }
 0x986   : > { %5671 = vst [vmem:[#allocation12 + $0xb0] sm:$0xff] %v5543_v27  ;;  %v5309_v25 = vmul.f32 %v11668_v19, %v14629_v63  ;;  %v14630_v27 = vld [vmem:[#allocation117_spill] sm:$0xff]  ;;  %v5435_v28 = vadd.f32 %v11672_v45, %v5307_v42  ;;  %v5561_v17 = vmax.f32 %v5433_v52, 0.0 }
 0x987   : > { %5672 = vst [vmem:[#allocation12 + $0xd0] sm:$0xff] %v5544_v18  ;;  %v5310_v39 = vmul.f32 %v11668_v19, %v14630_v27  ;;  %v14631_v18 = vld [vmem:[#allocation121_spill] sm:$0xff]  ;;  %v5436_v46 = vadd.f32 %v11672_v45, %v5308_v23  ;;  %v5562_v11 = vmax.f32 %v5434_v55, 0.0 }
 0x988   : > { %5673 = vst [vmem:[#allocation12 + $0xf0] sm:$0xff] %v5545_v29  ;;  %v5311_v26 = vmul.f32 %v11668_v19, %v14631_v18  ;;  %v14632_v29 = vld [vmem:[#allocation125_spill] sm:$0xff]  ;;  %v5437_v36 = vadd.f32 %v11672_v45, %v5309_v25  ;;  %v5563_v47 = vmax.f32 %v5435_v28, 0.0 }
 0x989   : > { %5674 = vst [vmem:[#allocation12 + $0x110] sm:$0xff] %v5546_v58  ;;  %v5312_v57 = vmul.f32 %v11668_v19, %v14632_v29  ;;  %v14633_v58 = vld [vmem:[#allocation129_spill] sm:$0xff]  ;;  %v5438_v7 = vadd.f32 %v11672_v45, %v5310_v39  ;;  %v5564_v34 = vmax.f32 %v5436_v46, 0.0 }
 0x98a   : > { %5675 = vst [vmem:[#allocation12 + $0x130] sm:$0xff] %v5547_v30  ;;  %v5313_v3 = vmul.f32 %v11668_v19, %v14633_v58  ;;  %v14634_v30 = vld [vmem:[#allocation133_spill] sm:$0xff]  ;;  %v5439_v4 = vadd.f32 %v11672_v45, %v5311_v26  ;;  %v5565_v59 = vmax.f32 %v5437_v36, 0.0 }
 0x98b   : > { %5676 = vst [vmem:[#allocation12 + $0x150] sm:$0xff] %v5548_v54  ;;  %v5314_v62 = vmul.f32 %v11668_v19, %v14634_v30  ;;  %v14635_v54 = vld [vmem:[#allocation137_spill] sm:$0xff]  ;;  %v5440_v35 = vadd.f32 %v11672_v45, %v5312_v57  ;;  %v5566_v40 = vmax.f32 %v5438_v7, 0.0 }
 0x98c   : > { %5677 = vst [vmem:[#allocation12 + $0x170] sm:$0xff] %v5549_v2  ;;  %v5315_v41 = vmul.f32 %v11668_v19, %v14635_v54  ;;  %v14636_v2 = vld [vmem:[#allocation141_spill] sm:$0xff]  ;;  %v5441_v9 = vadd.f32 %v11672_v45, %v5313_v3  ;;  %v5567_v8 = vmax.f32 %v5439_v4, 0.0 }
 0x98d   : > { %5678 = vst [vmem:[#allocation12 + $0x190] sm:$0xff] %v5550_v51  ;;  %v5316_v50 = vmul.f32 %v11668_v19, %v14636_v2  ;;  %v14637_v51 = vld [vmem:[#allocation145_spill] sm:$0xff]  ;;  %v5442_v56 = vadd.f32 %v11672_v45, %v5314_v62  ;;  %v5568_v12 = vmax.f32 %v5440_v35, 0.0 }
 0x98e   : > { %5679 = vst [vmem:[#allocation12 + $0x1b0] sm:$0xff] %v5551_v32  ;;  %v5317_v61 = vmul.f32 %v11668_v19, %v14637_v51  ;;  %v14638_v32 = vld [vmem:[#allocation149_spill] sm:$0xff]  ;;  %v5443_v0 = vadd.f32 %v11672_v45, %v5315_v41  ;;  %v5569_v15 = vmax.f32 %v5441_v9, 0.0 }
 0x98f   : > { %5680 = vst [vmem:[#allocation12 + $0x1d0] sm:$0xff] %v5552_v60  ;;  %v5318_v24 = vmul.f32 %v11668_v19, %v14638_v32  ;;  %v14639_v60 = vld [vmem:[#allocation153_spill] sm:$0xff]  ;;  %v5444_v10 = vadd.f32 %v11672_v45, %v5316_v50  ;;  %v5570_v33 = vmax.f32 %v5442_v56, 0.0 }
 0x990   : > { %5681 = vst [vmem:[#allocation12 + $0x1f0] sm:$0xff] %v5553_v38  ;;  %v5319_v5 = vmul.f32 %v11668_v19, %v14639_v60  ;;  %v14640_v38 = vld [vmem:[#allocation157_spill] sm:$0xff]  ;;  %v5445_v53 = vadd.f32 %v11672_v45, %v5317_v61  ;;  %v5571_v44 = vmax.f32 %v5443_v0, 0.0 }
 0x991   : > { %5682 = vst [vmem:[#allocation12 + $0x210] sm:$0xff] %v5554_v1  ;;  %v5320_v49 = vmul.f32 %v11668_v19, %v14640_v38  ;;  %v14641_v1 = vld [vmem:[#allocation161_spill] sm:$0xff]  ;;  %v5446_v22 = vadd.f32 %v11672_v45, %v5318_v24  ;;  %v5572_v13 = vmax.f32 %v5444_v10, 0.0 }
 0x992   : > { %5683 = vst [vmem:[#allocation12 + $0x230] sm:$0xff] %v5555_v14  ;;  %v5321_v20 = vmul.f32 %v11668_v19, %v14641_v1  ;;  %v14642_v14 = vld [vmem:[#allocation165_spill] sm:$0xff]  ;;  %v5447_v42 = vadd.f32 %v11672_v45, %v5319_v5  ;;  %v5573_v63 = vmax.f32 %v5445_v53, 0.0 }
 0x993   : > { %5684 = vst [vmem:[#allocation12 + $0x250] sm:$0xff] %v5556_v37  ;;  %v5322_v16 = vmul.f32 %v11668_v19, %v14642_v14  ;;  %v14643_v37 = vld [vmem:[#allocation169_spill] sm:$0xff]  ;;  %v5448_v23 = vadd.f32 %v11672_v45, %v5320_v49  ;;  %v5574_v27 = vmax.f32 %v5446_v22, 0.0 }
 0x994   : > { %5685 = vst [vmem:[#allocation12 + $0x270] sm:$0xff] %v5557_v43  ;;  %v5323_v48 = vmul.f32 %v11668_v19, %v14643_v37  ;;  %v14644_v43 = vld [vmem:[#allocation173_spill] sm:$0xff]  ;;  %v5449_v25 = vadd.f32 %v11672_v45, %v5321_v20  ;;  %v5575_v18 = vmax.f32 %v5447_v42, 0.0 }
 0x995   : > { %5686 = vst [vmem:[#allocation12 + $0x290] sm:$0xff] %v5558_v6  ;;  %v5324_v52 = vmul.f32 %v11668_v19, %v14644_v43  ;;  %v14645_v6 = vld [vmem:[#allocation177_spill] sm:$0xff]  ;;  %v5450_v39 = vadd.f32 %v11672_v45, %v5322_v16  ;;  %v5576_v29 = vmax.f32 %v5448_v23, 0.0 }
 0x996   : > { %5687 = vst [vmem:[#allocation12 + $0x2b0] sm:$0xff] %v5559_v21  ;;  %v5325_v55 = vmul.f32 %v11668_v19, %v14645_v6  ;;  %v14646_v21 = vld [vmem:[#allocation181_spill] sm:$0xff]  ;;  %v5451_v26 = vadd.f32 %v11672_v45, %v5323_v48  ;;  %v5577_v58 = vmax.f32 %v5449_v25, 0.0 }
 0x997   : > { %5688 = vst [vmem:[#allocation12 + $0x2d0] sm:$0xff] %v5560_v31  ;;  %v5326_v28 = vmul.f32 %v11668_v19, %v14646_v21  ;;  %v14647_v31 = vld [vmem:[#allocation185_spill] sm:$0xff]  ;;  %v5452_v57 = vadd.f32 %v11672_v45, %v5324_v52  ;;  %v5578_v30 = vmax.f32 %v5450_v39, 0.0 }
 0x998   : > { %5689 = vst [vmem:[#allocation12 + $0x2f0] sm:$0xff] %v5561_v17  ;;  %v5327_v46 = vmul.f32 %v11668_v19, %v14647_v31  ;;  %v14648_v17 = vld [vmem:[#allocation189_spill] sm:$0xff]  ;;  %v5453_v3 = vadd.f32 %v11672_v45, %v5325_v55  ;;  %v5579_v54 = vmax.f32 %v5451_v26, 0.0 }
 0x999   : > { %5690 = vst [vmem:[#allocation12 + $0x310] sm:$0xff] %v5562_v11  ;;  %v5328_v36 = vmul.f32 %v11668_v19, %v14648_v17  ;;  %v14649_v11 = vld [vmem:[#allocation193_spill] sm:$0xff]  ;;  %v5454_v62 = vadd.f32 %v11672_v45, %v5326_v28  ;;  %v5580_v2 = vmax.f32 %v5452_v57, 0.0 }
 0x99a   : > { %5691 = vst [vmem:[#allocation12 + $0x330] sm:$0xff] %v5563_v47  ;;  %v5329_v7 = vmul.f32 %v11668_v19, %v14649_v11  ;;  %v14650_v47 = vld [vmem:[#allocation197_spill] sm:$0xff]  ;;  %v5455_v41 = vadd.f32 %v11672_v45, %v5327_v46  ;;  %v5581_v51 = vmax.f32 %v5453_v3, 0.0 }
 0x99b   : > { %5692 = vst [vmem:[#allocation12 + $0x350] sm:$0xff] %v5564_v34  ;;  %v5330_v4 = vmul.f32 %v11668_v19, %v14650_v47  ;;  %v14651_v34 = vld [vmem:[#allocation201_spill] sm:$0xff]  ;;  %v5456_v50 = vadd.f32 %v11672_v45, %v5328_v36  ;;  %v5582_v32 = vmax.f32 %v5454_v62, 0.0 }
 0x99c   : > { %5693 = vst [vmem:[#allocation12 + $0x370] sm:$0xff] %v5565_v59  ;;  %v5331_v35 = vmul.f32 %v11668_v19, %v14651_v34  ;;  %v14652_v59 = vld [vmem:[#allocation205_spill] sm:$0xff]  ;;  %v5457_v61 = vadd.f32 %v11672_v45, %v5329_v7  ;;  %v5583_v60 = vmax.f32 %v5455_v41, 0.0 }
 0x99d   : > { %5694 = vst [vmem:[#allocation12 + $0x390] sm:$0xff] %v5566_v40  ;;  %v5332_v9 = vmul.f32 %v11668_v19, %v14652_v59  ;;  %v14653_v40 = vld [vmem:[#allocation209_spill] sm:$0xff]  ;;  %v5458_v24 = vadd.f32 %v11672_v45, %v5330_v4  ;;  %v5584_v38 = vmax.f32 %v5456_v50, 0.0 }
 0x99e   : > { %5695 = vst [vmem:[#allocation12 + $0x3b0] sm:$0xff] %v5567_v8  ;;  %v5333_v56 = vmul.f32 %v11668_v19, %v14653_v40  ;;  %v14654_v8 = vld [vmem:[#allocation213_spill] sm:$0xff]  ;;  %v5459_v5 = vadd.f32 %v11672_v45, %v5331_v35  ;;  %v5585_v1 = vmax.f32 %v5457_v61, 0.0 }
 0x99f   : > { %5696 = vst [vmem:[#allocation12 + $0x3d0] sm:$0xff] %v5568_v12  ;;  %v5334_v0 = vmul.f32 %v11668_v19, %v14654_v8  ;;  %v14655_v12 = vld [vmem:[#allocation217_spill] sm:$0xff]  ;;  %v5460_v49 = vadd.f32 %v11672_v45, %v5332_v9  ;;  %v5586_v14 = vmax.f32 %v5458_v24, 0.0 }
 0x9a0   : > { %5697 = vst [vmem:[#allocation12 + $0x3f0] sm:$0xff] %v5569_v15  ;;  %v5335_v10 = vmul.f32 %v11668_v19, %v14655_v12  ;;  %v14656_v15 = vld [vmem:[#allocation221_spill] sm:$0xff]  ;;  %v5461_v20 = vadd.f32 %v11672_v45, %v5333_v56  ;;  %v5587_v37 = vmax.f32 %v5459_v5, 0.0 }
 0x9a1   : > { %5698 = vst [vmem:[#allocation12 + $0x410] sm:$0xff] %v5570_v33  ;;  %v5336_v53 = vmul.f32 %v11668_v19, %v14656_v15  ;;  %v14657_v33 = vld [vmem:[#allocation225_spill] sm:$0xff]  ;;  %v5462_v16 = vadd.f32 %v11672_v45, %v5334_v0  ;;  %v5588_v43 = vmax.f32 %v5460_v49, 0.0 }
 0x9a2   : > { %5699 = vst [vmem:[#allocation12 + $0x430] sm:$0xff] %v5571_v44  ;;  %v5337_v22 = vmul.f32 %v11668_v19, %v14657_v33  ;;  %v14658_v44 = vld [vmem:[#allocation229_spill] sm:$0xff]  ;;  %v5463_v48 = vadd.f32 %v11672_v45, %v5335_v10  ;;  %v5589_v6 = vmax.f32 %v5461_v20, 0.0 }
 0x9a3   : > { %5700 = vst [vmem:[#allocation12 + $0x450] sm:$0xff] %v5572_v13  ;;  %v5338_v42 = vmul.f32 %v11668_v19, %v14658_v44  ;;  %v14659_v13 = vld [vmem:[#allocation233_spill] sm:$0xff]  ;;  %v5464_v52 = vadd.f32 %v11672_v45, %v5336_v53  ;;  %v5590_v21 = vmax.f32 %v5462_v16, 0.0 }
 0x9a4   : > { %5701 = vst [vmem:[#allocation12 + $0x470] sm:$0xff] %v5573_v63  ;;  %v5339_v23 = vmul.f32 %v11668_v19, %v14659_v13  ;;  %v14660_v63 = vld [vmem:[#allocation237_spill] sm:$0xff]  ;;  %v5465_v55 = vadd.f32 %v11672_v45, %v5337_v22  ;;  %v5591_v31 = vmax.f32 %v5463_v48, 0.0 }
 0x9a5   : > { %5702 = vst [vmem:[#allocation12 + $0x490] sm:$0xff] %v5574_v27  ;;  %v5340_v25 = vmul.f32 %v11668_v19, %v14660_v63  ;;  %v14661_v27 = vld [vmem:[#allocation241_spill] sm:$0xff]  ;;  %v5466_v28 = vadd.f32 %v11672_v45, %v5338_v42  ;;  %v5592_v17 = vmax.f32 %v5464_v52, 0.0 }
 0x9a6   : > { %5703 = vst [vmem:[#allocation12 + $0x4b0] sm:$0xff] %v5575_v18  ;;  %v5341_v39 = vmul.f32 %v11668_v19, %v14661_v27  ;;  %v14662_v18 = vld [vmem:[#allocation245_spill] sm:$0xff]  ;;  %v5467_v46 = vadd.f32 %v11672_v45, %v5339_v23  ;;  %v5593_v11 = vmax.f32 %v5465_v55, 0.0 }
 0x9a7   : > { %5704 = vst [vmem:[#allocation12 + $0x4d0] sm:$0xff] %v5576_v29  ;;  %v5342_v26 = vmul.f32 %v11668_v19, %v14662_v18  ;;  %v14663_v29 = vld [vmem:[#allocation249_spill] sm:$0xff]  ;;  %v5468_v36 = vadd.f32 %v11672_v45, %v5340_v25  ;;  %v5594_v47 = vmax.f32 %v5466_v28, 0.0 }
 0x9a8   : > { %5705 = vst [vmem:[#allocation12 + $0x4f0] sm:$0xff] %v5577_v58  ;;  %v5343_v57 = vmul.f32 %v11668_v19, %v14663_v29  ;;  %v14664_v58 = vld [vmem:[#allocation253_spill] sm:$0xff]  ;;  %v5469_v7 = vadd.f32 %v11672_v45, %v5341_v39  ;;  %v5595_v34 = vmax.f32 %v5467_v46, 0.0 }
 0x9a9   : > { %5706 = vst [vmem:[#allocation12 + $0x510] sm:$0xff] %v5578_v30  ;;  %v5344_v3 = vmul.f32 %v11668_v19, %v14664_v58  ;;  %v14665_v30 = vld [vmem:[#allocation257_spill] sm:$0xff]  ;;  %v5470_v4 = vadd.f32 %v11672_v45, %v5342_v26  ;;  %v5596_v59 = vmax.f32 %v5468_v36, 0.0 }
 0x9aa   : > { %5707 = vst [vmem:[#allocation12 + $0x530] sm:$0xff] %v5579_v54  ;;  %v5345_v62 = vmul.f32 %v11668_v19, %v14665_v30  ;;  %v14666_v54 = vld [vmem:[#allocation261_spill] sm:$0xff]  ;;  %v5471_v35 = vadd.f32 %v11672_v45, %v5343_v57  ;;  %v5597_v40 = vmax.f32 %v5469_v7, 0.0 }
 0x9ab   : > { %5708 = vst [vmem:[#allocation12 + $0x550] sm:$0xff] %v5580_v2  ;;  %v5346_v41 = vmul.f32 %v11668_v19, %v14666_v54  ;;  %v14667_v2 = vld [vmem:[#allocation265_spill] sm:$0xff]  ;;  %v5472_v9 = vadd.f32 %v11672_v45, %v5344_v3  ;;  %v5598_v8 = vmax.f32 %v5470_v4, 0.0 }
 0x9ac   : > { %5709 = vst [vmem:[#allocation12 + $0x570] sm:$0xff] %v5581_v51  ;;  %v5347_v50 = vmul.f32 %v11668_v19, %v14667_v2  ;;  %v14668_v51 = vld [vmem:[#allocation269_spill] sm:$0xff]  ;;  %v5473_v56 = vadd.f32 %v11672_v45, %v5345_v62  ;;  %v5599_v12 = vmax.f32 %v5471_v35, 0.0 }
 0x9ad   : > { %5710 = vst [vmem:[#allocation12 + $0x590] sm:$0xff] %v5582_v32  ;;  %v5348_v61 = vmul.f32 %v11668_v19, %v14668_v51  ;;  %v14669_v32 = vld [vmem:[#allocation273_spill] sm:$0xff]  ;;  %v5474_v0 = vadd.f32 %v11672_v45, %v5346_v41  ;;  %v5600_v15 = vmax.f32 %v5472_v9, 0.0 }
 0x9ae   : > { %5711 = vst [vmem:[#allocation12 + $0x5b0] sm:$0xff] %v5583_v60  ;;  %v5349_v24 = vmul.f32 %v11668_v19, %v14669_v32  ;;  %v14670_v60 = vld [vmem:[#allocation277_spill] sm:$0xff]  ;;  %v5475_v10 = vadd.f32 %v11672_v45, %v5347_v50  ;;  %v5601_v33 = vmax.f32 %v5473_v56, 0.0 }
 0x9af   : > { %5712 = vst [vmem:[#allocation12 + $0x5d0] sm:$0xff] %v5584_v38  ;;  %v5350_v5 = vmul.f32 %v11668_v19, %v14670_v60  ;;  %v14671_v38 = vld [vmem:[#allocation281_spill] sm:$0xff]  ;;  %v5476_v53 = vadd.f32 %v11672_v45, %v5348_v61  ;;  %v5602_v44 = vmax.f32 %v5474_v0, 0.0 }
 0x9b0   : > { %5713 = vst [vmem:[#allocation12 + $0x5f0] sm:$0xff] %v5585_v1  ;;  %v5351_v49 = vmul.f32 %v11668_v19, %v14671_v38  ;;  %v14672_v1 = vld [vmem:[#allocation285_spill] sm:$0xff]  ;;  %v5477_v22 = vadd.f32 %v11672_v45, %v5349_v24  ;;  %v5603_v13 = vmax.f32 %v5475_v10, 0.0 }
 0x9b1   : > { %5714 = vst [vmem:[#allocation12 + $0x610] sm:$0xff] %v5586_v14  ;;  %v5352_v20 = vmul.f32 %v11668_v19, %v14672_v1  ;;  %v14673_v14 = vld [vmem:[#allocation289_spill] sm:$0xff]  ;;  %v5478_v42 = vadd.f32 %v11672_v45, %v5350_v5  ;;  %v5604_v63 = vmax.f32 %v5476_v53, 0.0 }
 0x9b2   : > { %5715 = vst [vmem:[#allocation12 + $0x630] sm:$0xff] %v5587_v37  ;;  %v5353_v16 = vmul.f32 %v11668_v19, %v14673_v14  ;;  %v14674_v37 = vld [vmem:[#allocation293_spill] sm:$0xff]  ;;  %v5479_v23 = vadd.f32 %v11672_v45, %v5351_v49  ;;  %v5605_v27 = vmax.f32 %v5477_v22, 0.0 }
 0x9b3   : > { %5716 = vst [vmem:[#allocation12 + $0x650] sm:$0xff] %v5588_v43  ;;  %v5354_v48 = vmul.f32 %v11668_v19, %v14674_v37  ;;  %v14675_v43 = vld [vmem:[#allocation297_spill] sm:$0xff]  ;;  %v5480_v25 = vadd.f32 %v11672_v45, %v5352_v20  ;;  %v5606_v18 = vmax.f32 %v5478_v42, 0.0 }
 0x9b4   : > { %5717 = vst [vmem:[#allocation12 + $0x670] sm:$0xff] %v5589_v6  ;;  %v5355_v52 = vmul.f32 %v11668_v19, %v14675_v43  ;;  %v14676_v6 = vld [vmem:[#allocation301_spill] sm:$0xff]  ;;  %v5481_v39 = vadd.f32 %v11672_v45, %v5353_v16  ;;  %v5607_v29 = vmax.f32 %v5479_v23, 0.0 }
 0x9b5   : > { %5718 = vst [vmem:[#allocation12 + $0x690] sm:$0xff] %v5590_v21  ;;  %v5356_v55 = vmul.f32 %v11668_v19, %v14676_v6  ;;  %v14677_v21 = vld [vmem:[#allocation305_spill] sm:$0xff]  ;;  %v5482_v26 = vadd.f32 %v11672_v45, %v5354_v48  ;;  %v5608_v58 = vmax.f32 %v5480_v25, 0.0 }
 0x9b6   : > { %5719 = vst [vmem:[#allocation12 + $0x6b0] sm:$0xff] %v5591_v31  ;;  %v5357_v28 = vmul.f32 %v11668_v19, %v14677_v21  ;;  %v14678_v31 = vld [vmem:[#allocation309_spill] sm:$0xff]  ;;  %v5483_v57 = vadd.f32 %v11672_v45, %v5355_v52  ;;  %v5609_v30 = vmax.f32 %v5481_v39, 0.0 }
 0x9b7   : > { %5720 = vst [vmem:[#allocation12 + $0x6d0] sm:$0xff] %v5592_v17  ;;  %v5358_v46 = vmul.f32 %v11668_v19, %v14678_v31  ;;  %v14679_v17 = vld [vmem:[#allocation313_spill] sm:$0xff]  ;;  %v5484_v3 = vadd.f32 %v11672_v45, %v5356_v55  ;;  %v5610_v54 = vmax.f32 %v5482_v26, 0.0 }
 0x9b8   : > { %5721 = vst [vmem:[#allocation12 + $0x6f0] sm:$0xff] %v5593_v11  ;;  %v5359_v36 = vmul.f32 %v11668_v19, %v14679_v17  ;;  %v14680_v11 = vld [vmem:[#allocation317_spill] sm:$0xff]  ;;  %v5485_v62 = vadd.f32 %v11672_v45, %v5357_v28  ;;  %v5611_v2 = vmax.f32 %v5483_v57, 0.0 }
 0x9b9   : > { %5722 = vst [vmem:[#allocation12 + $0x710] sm:$0xff] %v5594_v47  ;;  %v5360_v7 = vmul.f32 %v11668_v19, %v14680_v11  ;;  %v14681_v47 = vld [vmem:[#allocation321_spill] sm:$0xff]  ;;  %v5486_v41 = vadd.f32 %v11672_v45, %v5358_v46  ;;  %v5612_v51 = vmax.f32 %v5484_v3, 0.0 }
 0x9ba   : > { %5723 = vst [vmem:[#allocation12 + $0x730] sm:$0xff] %v5595_v34  ;;  %v5361_v4 = vmul.f32 %v11668_v19, %v14681_v47  ;;  %v14682_v34 = vld [vmem:[#allocation325_spill] sm:$0xff]  ;;  %v5487_v50 = vadd.f32 %v11672_v45, %v5359_v36  ;;  %v5613_v32 = vmax.f32 %v5485_v62, 0.0 }
 0x9bb   : > { %5724 = vst [vmem:[#allocation12 + $0x750] sm:$0xff] %v5596_v59  ;;  %v5362_v35 = vmul.f32 %v11668_v19, %v14682_v34  ;;  %v14683_v59 = vld [vmem:[#allocation329_spill] sm:$0xff]  ;;  %v5488_v61 = vadd.f32 %v11672_v45, %v5360_v7  ;;  %v5614_v60 = vmax.f32 %v5486_v41, 0.0 }
 0x9bc   : > { %5725 = vst [vmem:[#allocation12 + $0x770] sm:$0xff] %v5597_v40  ;;  %v5363_v9 = vmul.f32 %v11668_v19, %v14683_v59  ;;  %v14684_v40 = vld [vmem:[#allocation333_spill] sm:$0xff]  ;;  %v5489_v24 = vadd.f32 %v11672_v45, %v5361_v4  ;;  %v5615_v38 = vmax.f32 %v5487_v50, 0.0 }
 0x9bd   : > { %5726 = vst [vmem:[#allocation12 + $0x790] sm:$0xff] %v5598_v8  ;;  %v5364_v56 = vmul.f32 %v11668_v19, %v14684_v40  ;;  %v14685_v8 = vld [vmem:[#allocation337_spill] sm:$0xff]  ;;  %v5490_v5 = vadd.f32 %v11672_v45, %v5362_v35  ;;  %v5616_v1 = vmax.f32 %v5488_v61, 0.0 }
 0x9be   : > { %5727 = vst [vmem:[#allocation12 + $0x7b0] sm:$0xff] %v5599_v12  ;;  %v5365_v0 = vmul.f32 %v11668_v19, %v14685_v8  ;;  %v14686_v12 = vld [vmem:[#allocation341_spill] sm:$0xff]  ;;  %v5491_v49 = vadd.f32 %v11672_v45, %v5363_v9  ;;  %v5617_v14 = vmax.f32 %v5489_v24, 0.0 }
 0x9bf   : > { %5728 = vst [vmem:[#allocation12 + $0x7d0] sm:$0xff] %v5600_v15  ;;  %v5366_v10 = vmul.f32 %v11668_v19, %v14686_v12  ;;  %v14687_v15 = vld [vmem:[#allocation345_spill] sm:$0xff]  ;;  %v5492_v20 = vadd.f32 %v11672_v45, %v5364_v56  ;;  %v5618_v37 = vmax.f32 %v5490_v5, 0.0 }
 0x9c0   : > { %5729 = vst [vmem:[#allocation12 + $0x7f0] sm:$0xff] %v5601_v33  ;;  %v5367_v53 = vmul.f32 %v11668_v19, %v14687_v15  ;;  %v14688_v33 = vld [vmem:[#allocation349_spill] sm:$0xff]  ;;  %v5493_v16 = vadd.f32 %v11672_v45, %v5365_v0  ;;  %v5619_v43 = vmax.f32 %v5491_v49, 0.0 }
 0x9c1   : > { %5730 = vst [vmem:[#allocation12 + $0x810] sm:$0xff] %v5602_v44  ;;  %v5368_v22 = vmul.f32 %v11668_v19, %v14688_v33  ;;  %v14689_v44 = vld [vmem:[#allocation353_spill] sm:$0xff]  ;;  %v5494_v48 = vadd.f32 %v11672_v45, %v5366_v10  ;;  %v5620_v6 = vmax.f32 %v5492_v20, 0.0 }
 0x9c2   : > { %5731 = vst [vmem:[#allocation12 + $0x830] sm:$0xff] %v5603_v13  ;;  %v5369_v42 = vmul.f32 %v11668_v19, %v14689_v44  ;;  %v14690_v13 = vld [vmem:[#allocation357_spill] sm:$0xff]  ;;  %v5495_v52 = vadd.f32 %v11672_v45, %v5367_v53  ;;  %v5621_v21 = vmax.f32 %v5493_v16, 0.0 }
 0x9c3   : > { %5732 = vst [vmem:[#allocation12 + $0x850] sm:$0xff] %v5604_v63  ;;  %v5370_v23 = vmul.f32 %v11668_v19, %v14690_v13  ;;  %v14691_v63 = vld [vmem:[#allocation361_spill] sm:$0xff]  ;;  %v5496_v55 = vadd.f32 %v11672_v45, %v5368_v22  ;;  %v5622_v31 = vmax.f32 %v5494_v48, 0.0 }
 0x9c4   : > { %5733 = vst [vmem:[#allocation12 + $0x870] sm:$0xff] %v5605_v27  ;;  %v5371_v25 = vmul.f32 %v11668_v19, %v14691_v63  ;;  %v14692_v27 = vld [vmem:[#allocation365_spill] sm:$0xff]  ;;  %v5497_v28 = vadd.f32 %v11672_v45, %v5369_v42  ;;  %v5623_v17 = vmax.f32 %v5495_v52, 0.0 }
 0x9c5   : > { %5734 = vst [vmem:[#allocation12 + $0x890] sm:$0xff] %v5606_v18  ;;  %v5372_v39 = vmul.f32 %v11668_v19, %v14692_v27  ;;  %v14693_v18 = vld [vmem:[#allocation369_spill] sm:$0xff]  ;;  %v5498_v46 = vadd.f32 %v11672_v45, %v5370_v23  ;;  %v5624_v11 = vmax.f32 %v5496_v55, 0.0 }
 0x9c6   : > { %5735 = vst [vmem:[#allocation12 + $0x8b0] sm:$0xff] %v5607_v29  ;;  %v5373_v26 = vmul.f32 %v11668_v19, %v14693_v18  ;;  %v14694_v29 = vld [vmem:[#allocation373_spill] sm:$0xff]  ;;  %v5499_v36 = vadd.f32 %v11672_v45, %v5371_v25  ;;  %v5625_v47 = vmax.f32 %v5497_v28, 0.0 }
 0x9c7   : > { %5736 = vst [vmem:[#allocation12 + $0x8d0] sm:$0xff] %v5608_v58  ;;  %v5374_v57 = vmul.f32 %v11668_v19, %v14694_v29  ;;  %v14695_v58 = vld [vmem:[#allocation377_spill] sm:$0xff]  ;;  %v5500_v7 = vadd.f32 %v11672_v45, %v5372_v39  ;;  %v5626_v34 = vmax.f32 %v5498_v46, 0.0 }
 0x9c8   : > { %5737 = vst [vmem:[#allocation12 + $0x8f0] sm:$0xff] %v5609_v30  ;;  %v5375_v3 = vmul.f32 %v11668_v19, %v14695_v58  ;;  %v14696_v30 = vld [vmem:[#allocation381_spill] sm:$0xff]  ;;  %v5501_v4 = vadd.f32 %v11672_v45, %v5373_v26  ;;  %v5627_v59 = vmax.f32 %v5499_v36, 0.0 }
 0x9c9   : > { %5738 = vst [vmem:[#allocation12 + $0x910] sm:$0xff] %v5610_v54  ;;  %v5376_v62 = vmul.f32 %v11668_v19, %v14696_v30  ;;  %v14697_v54 = vld [vmem:[#allocation385_spill] sm:$0xff]  ;;  %v5502_v35 = vadd.f32 %v11672_v45, %v5374_v57  ;;  %v5628_v40 = vmax.f32 %v5500_v7, 0.0 }
 0x9ca   : > { %5739 = vst [vmem:[#allocation12 + $0x930] sm:$0xff] %v5611_v2  ;;  %v5377_v41 = vmul.f32 %v11668_v19, %v14697_v54  ;;  %v14698_v2 = vld [vmem:[#allocation389_spill] sm:$0xff]  ;;  %v5503_v9 = vadd.f32 %v11672_v45, %v5375_v3  ;;  %v5629_v8 = vmax.f32 %v5501_v4, 0.0 }
 0x9cb   : > { %5740 = vst [vmem:[#allocation12 + $0x950] sm:$0xff] %v5612_v51  ;;  %v5378_v50 = vmul.f32 %v11668_v19, %v14698_v2  ;;  %v14699_v51 = vld [vmem:[#allocation393_spill] sm:$0xff]  ;;  %v5504_v56 = vadd.f32 %v11672_v45, %v5376_v62  ;;  %v5630_v12 = vmax.f32 %v5502_v35, 0.0 }
 0x9cc   : > { %5741 = vst [vmem:[#allocation12 + $0x970] sm:$0xff] %v5613_v32  ;;  %v5379_v61 = vmul.f32 %v11668_v19, %v14699_v51  ;;  %v14700_v32 = vld [vmem:[#allocation397_spill] sm:$0xff]  ;;  %v5505_v0 = vadd.f32 %v11672_v45, %v5377_v41  ;;  %v5631_v15 = vmax.f32 %v5503_v9, 0.0 }
 0x9cd   : > { %5742 = vst [vmem:[#allocation12 + $0x990] sm:$0xff] %v5614_v60  ;;  %v5380_v24 = vmul.f32 %v11668_v19, %v14700_v32  ;;  %v14701_v60 = vld [vmem:[#allocation401_spill] sm:$0xff]  ;;  %v5506_v10 = vadd.f32 %v11672_v45, %v5378_v50  ;;  %v5632_v33 = vmax.f32 %v5504_v56, 0.0 }
 0x9ce   : > { %5743 = vst [vmem:[#allocation12 + $0x9b0] sm:$0xff] %v5615_v38  ;;  %v5381_v5 = vmul.f32 %v11668_v19, %v14701_v60  ;;  %v14702_v38 = vld [vmem:[#allocation405_spill] sm:$0xff]  ;;  %v5507_v53 = vadd.f32 %v11672_v45, %v5379_v61  ;;  %v5633_v44 = vmax.f32 %v5505_v0, 0.0 }
 0x9cf   : > { %5744 = vst [vmem:[#allocation12 + $0x9d0] sm:$0xff] %v5616_v1  ;;  %v5382_v49 = vmul.f32 %v11668_v19, %v14702_v38  ;;  %v14703_v1 = vld [vmem:[#allocation409_spill] sm:$0xff]  ;;  %v5508_v22 = vadd.f32 %v11672_v45, %v5380_v24  ;;  %v5634_v13 = vmax.f32 %v5506_v10, 0.0 }
 0x9d0   : > { %5745 = vst [vmem:[#allocation12 + $0x9f0] sm:$0xff] %v5617_v14  ;;  %v5383_v20 = vmul.f32 %v11668_v19, %v14703_v1  ;;  %v14704_v14 = vld [vmem:[#allocation413_spill] sm:$0xff]  ;;  %v5509_v42 = vadd.f32 %v11672_v45, %v5381_v5  ;;  %v5635_v63 = vmax.f32 %v5507_v53, 0.0 }
 0x9d1   : > { %5746 = vst [vmem:[#allocation12 + $0xa10] sm:$0xff] %v5618_v37  ;;  %v5384_v16 = vmul.f32 %v11668_v19, %v14704_v14  ;;  %v14705_v37 = vld [vmem:[#allocation417_spill] sm:$0xff]  ;;  %v5510_v23 = vadd.f32 %v11672_v45, %v5382_v49  ;;  %v5636_v27 = vmax.f32 %v5508_v22, 0.0 }
 0x9d2   : > { %5747 = vst [vmem:[#allocation12 + $0xa30] sm:$0xff] %v5619_v43  ;;  %v5385_v48 = vmul.f32 %v11668_v19, %v14705_v37  ;;  %v14706_v43 = vld [vmem:[#allocation421_spill] sm:$0xff]  ;;  %v5511_v25 = vadd.f32 %v11672_v45, %v5383_v20  ;;  %v5637_v18 = vmax.f32 %v5509_v42, 0.0 }
 0x9d3   : > { %5748 = vst [vmem:[#allocation12 + $0xa50] sm:$0xff] %v5620_v6  ;;  %v5386_v52 = vmul.f32 %v11668_v19, %v14706_v43  ;;  %v14707_v6 = vld [vmem:[#allocation425_spill] sm:$0xff]  ;;  %v5512_v39 = vadd.f32 %v11672_v45, %v5384_v16  ;;  %v5638_v29 = vmax.f32 %v5510_v23, 0.0 }
 0x9d4   : > { %5749 = vst [vmem:[#allocation12 + $0xa70] sm:$0xff] %v5621_v21  ;;  %v5387_v55 = vmul.f32 %v11668_v19, %v14707_v6  ;;  %v14708_v21 = vld [vmem:[#allocation429_spill] sm:$0xff]  ;;  %v5513_v26 = vadd.f32 %v11672_v45, %v5385_v48  ;;  %v5639_v58 = vmax.f32 %v5511_v25, 0.0 }
 0x9d5   : > { %5750 = vst [vmem:[#allocation12 + $0xa90] sm:$0xff] %v5622_v31  ;;  %v5388_v28 = vmul.f32 %v11668_v19, %v14708_v21  ;;  %v14709_v31 = vld [vmem:[#allocation433_spill] sm:$0xff]  ;;  %v5514_v57 = vadd.f32 %v11672_v45, %v5386_v52  ;;  %v5640_v30 = vmax.f32 %v5512_v39, 0.0 }
 0x9d6   : > { %5751 = vst [vmem:[#allocation12 + $0xab0] sm:$0xff] %v5623_v17  ;;  %v5389_v46 = vmul.f32 %v11668_v19, %v14709_v31  ;;  %v14710_v17 = vld [vmem:[#allocation437_spill] sm:$0xff]  ;;  %v5515_v3 = vadd.f32 %v11672_v45, %v5387_v55  ;;  %v5641_v54 = vmax.f32 %v5513_v26, 0.0 }
 0x9d7   : > { %5752 = vst [vmem:[#allocation12 + $0xad0] sm:$0xff] %v5624_v11  ;;  %v5390_v36 = vmul.f32 %v11668_v19, %v14710_v17  ;;  %v14711_v11 = vld [vmem:[#allocation441_spill] sm:$0xff]  ;;  %v5516_v62 = vadd.f32 %v11672_v45, %v5388_v28  ;;  %v5642_v2 = vmax.f32 %v5514_v57, 0.0 }
 0x9d8   : > { %5753 = vst [vmem:[#allocation12 + $0xaf0] sm:$0xff] %v5625_v47  ;;  %v5391_v7 = vmul.f32 %v11668_v19, %v14711_v11  ;;  %v14712_v47 = vld [vmem:[#allocation445_spill] sm:$0xff]  ;;  %v5517_v41 = vadd.f32 %v11672_v45, %v5389_v46  ;;  %v5643_v51 = vmax.f32 %v5515_v3, 0.0 }
 0x9d9   : > { %5754 = vst [vmem:[#allocation12 + $0xb10] sm:$0xff] %v5626_v34  ;;  %v5392_v4 = vmul.f32 %v11668_v19, %v14712_v47  ;;  %v14713_v34 = vld [vmem:[#allocation449_spill] sm:$0xff]  ;;  %v5518_v50 = vadd.f32 %v11672_v45, %v5390_v36  ;;  %v5644_v32 = vmax.f32 %v5516_v62, 0.0 }
 0x9da   : > { %5755 = vst [vmem:[#allocation12 + $0xb30] sm:$0xff] %v5627_v59  ;;  %v5393_v35 = vmul.f32 %v11668_v19, %v14713_v34  ;;  %v14714_v59 = vld [vmem:[#allocation453_spill] sm:$0xff]  ;;  %v5519_v61 = vadd.f32 %v11672_v45, %v5391_v7  ;;  %v5645_v60 = vmax.f32 %v5517_v41, 0.0 }
 0x9db   : > { %5756 = vst [vmem:[#allocation12 + $0xb50] sm:$0xff] %v5628_v40  ;;  %v5394_v9 = vmul.f32 %v11668_v19, %v14714_v59  ;;  %v14715_v40 = vld [vmem:[#allocation457_spill] sm:$0xff]  ;;  %v5520_v24 = vadd.f32 %v11672_v45, %v5392_v4  ;;  %v5646_v38 = vmax.f32 %v5518_v50, 0.0 }
 0x9dc   : > { %5757 = vst [vmem:[#allocation12 + $0xb70] sm:$0xff] %v5629_v8  ;;  %v5395_v56 = vmul.f32 %v11668_v19, %v14715_v40  ;;  %v14716_v8 = vld [vmem:[#allocation461_spill] sm:$0xff]  ;;  %v5521_v5 = vadd.f32 %v11672_v45, %v5393_v35  ;;  %v5647_v1 = vmax.f32 %v5519_v61, 0.0 }
 0x9dd   : > { %5758 = vst [vmem:[#allocation12 + $0xb90] sm:$0xff] %v5630_v12  ;;  %v5396_v0 = vmul.f32 %v11668_v19, %v14716_v8  ;;  %v14717_v12 = vld [vmem:[#allocation465_spill] sm:$0xff]  ;;  %v5522_v49 = vadd.f32 %v11672_v45, %v5394_v9  ;;  %v5648_v14 = vmax.f32 %v5520_v24, 0.0 }
 0x9de   : > { %5759 = vst [vmem:[#allocation12 + $0xbb0] sm:$0xff] %v5631_v15  ;;  %v5397_v10 = vmul.f32 %v11668_v19, %v14717_v12  ;;  %v14718_v15 = vld [vmem:[#allocation469_spill] sm:$0xff]  ;;  %v5523_v20 = vadd.f32 %v11672_v45, %v5395_v56  ;;  %v5649_v37 = vmax.f32 %v5521_v5, 0.0 }
 0x9df   : > { %5760 = vst [vmem:[#allocation12 + $0xbd0] sm:$0xff] %v5632_v33  ;;  %v5398_v53 = vmul.f32 %v11668_v19, %v14718_v15  ;;  %v14719_v33 = vld [vmem:[#allocation473_spill] sm:$0xff]  ;;  %v5524_v16 = vadd.f32 %v11672_v45, %v5396_v0  ;;  %v5650_v43 = vmax.f32 %v5522_v49, 0.0 }
 0x9e0   : > { %5761 = vst [vmem:[#allocation12 + $0xbf0] sm:$0xff] %v5633_v44  ;;  %v5399_v22 = vmul.f32 %v11668_v19, %v14719_v33  ;;  %v14720_v44 = vld [vmem:[#allocation477_spill] sm:$0xff]  ;;  %v5525_v48 = vadd.f32 %v11672_v45, %v5397_v10  ;;  %v5651_v6 = vmax.f32 %v5523_v20, 0.0 }
 0x9e1   : > { %5762 = vst [vmem:[#allocation12 + $0xc10] sm:$0xff] %v5634_v13  ;;  %v5400_v42 = vmul.f32 %v11668_v19, %v14720_v44  ;;  %v14721_v13 = vld [vmem:[#allocation481_spill] sm:$0xff]  ;;  %v5526_v52 = vadd.f32 %v11672_v45, %v5398_v53  ;;  %v5652_v21 = vmax.f32 %v5524_v16, 0.0  ;;  %v14735_v16 = vld [vmem:[#allocation38_spill] sm:$0xff] }
 0x9e2   : > { %5763 = vst [vmem:[#allocation12 + $0xc30] sm:$0xff] %v5635_v63  ;;  %v5401_v23 = vmul.f32 %v11668_v19, %v14721_v13  ;;  %v14722_v63 = vld [vmem:[#allocation485_spill] sm:$0xff]  ;;  %v5527_v55 = vadd.f32 %v11672_v45, %v5399_v22  ;;  %v5653_v31 = vmax.f32 %v5525_v48, 0.0 }
 0x9e3   : > { %5764 = vst [vmem:[#allocation12 + $0xc50] sm:$0xff] %v5636_v27  ;;  %v5402_v25 = vmul.f32 %v11668_v19, %v14722_v63  ;;  %v14723_v27 = vld [vmem:[#allocation489_spill] sm:$0xff]  ;;  %v5528_v28 = vadd.f32 %v11672_v45, %v5400_v42  ;;  %v5654_v17 = vmax.f32 %v5526_v52, 0.0  ;;  %v14737_v52 = vld [vmem:[#allocation44_spill] sm:$0xff] }
 0x9e4   : > { %5765 = vst [vmem:[#allocation12 + $0xc70] sm:$0xff] %v5637_v18  ;;  %v5403_v39 = vmul.f32 %v11668_v19, %v14723_v27  ;;  %v14724_v18 = vld [vmem:[#allocation493_spill] sm:$0xff]  ;;  %v5529_v46 = vadd.f32 %v11672_v45, %v5401_v23  ;;  %v5655_v11 = vmax.f32 %v5527_v55, 0.0 }
 0x9e5   : > { %5766 = vst [vmem:[#allocation12 + $0xc90] sm:$0xff] %v5638_v29  ;;  %v5404_v26 = vmul.f32 %v11668_v19, %v14724_v18  ;;  %v14725_v29 = vld [vmem:[#allocation497_spill] sm:$0xff]  ;;  %v5530_v36 = vadd.f32 %v11672_v45, %v5402_v25  ;;  %v5656_v47 = vmax.f32 %v5528_v28, 0.0 }
 0x9e6   : > { %5767 = vst [vmem:[#allocation12 + $0xcb0] sm:$0xff] %v5639_v58  ;;  %v5405_v57 = vmul.f32 %v11668_v19, %v14725_v29  ;;  %v14726_v58 = vld [vmem:[#allocation501_spill] sm:$0xff]  ;;  %v5531_v7 = vadd.f32 %v11672_v45, %v5403_v39  ;;  %v5657_v34 = vmax.f32 %v5529_v46, 0.0 }
 0x9e7   : > { %5768 = vst [vmem:[#allocation12 + $0xcd0] sm:$0xff] %v5640_v30  ;;  %v5406_v3 = vmul.f32 %v11668_v19, %v14726_v58  ;;  %v14727_v30 = vld [vmem:[#allocation505_spill] sm:$0xff]  ;;  %v5532_v4 = vadd.f32 %v11672_v45, %v5404_v26  ;;  %v5658_v59 = vmax.f32 %v5530_v36, 0.0 }
 0x9e8   : > { %5769 = vst [vmem:[#allocation12 + $0xcf0] sm:$0xff] %v5641_v54  ;;  %v5407_v62 = vmul.f32 %v11668_v19, %v14727_v30  ;;  %v14728_v54 = vld [vmem:[#allocation509_spill] sm:$0xff]  ;;  %v5533_v35 = vadd.f32 %v11672_v45, %v5405_v57  ;;  %v5659_v40 = vmax.f32 %v5531_v7, 0.0 }
 0x9e9   : > { %5770 = vst [vmem:[#allocation12 + $0xd10] sm:$0xff] %v5642_v2  ;;  %v5408_v41 = vmul.f32 %v11668_v19, %v14728_v54  ;;  %v14729_v2 = vld [vmem:[#allocation513_spill] sm:$0xff]  ;;  %v5534_v9 = vadd.f32 %v11672_v45, %v5406_v3  ;;  %v5660_v8 = vmax.f32 %v5532_v4, 0.0 }
 0x9ea   : > { %5771 = vst [vmem:[#allocation12 + $0xd30] sm:$0xff] %v5643_v51  ;;  %v5409_v50 = vmul.f32 %v11668_v19, %v14729_v2  ;;  %v14730_v51 = vld [vmem:[#allocation19_spill] sm:$0xff]  ;;  %v5535_v56 = vadd.f32 %v11672_v45, %v5407_v62  ;;  %v5661_v12 = vmax.f32 %v5533_v35, 0.0  ;;  %v14736_v13 = vld [vmem:[#allocation41_spill] sm:$0xff] }
 0x9eb   : > { %5772 = vst [vmem:[#allocation12 + $0xd50] sm:$0xff] %v5644_v32  ;;  %v5794_v61 = vmul.f32 %v11668_v19, %v14730_v51  ;;  %v14731_v32 = vld [vmem:[#allocation23_spill] sm:$0xff]  ;;  %v5536_v0 = vadd.f32 %v11672_v45, %v5408_v41  ;;  %v5662_v15 = vmax.f32 %v5534_v9, 0.0 }
 0x9ec   : > { %5773 = vst [vmem:[#allocation12 + $0xd70] sm:$0xff] %v5645_v60  ;;  %v5795_v24 = vmul.f32 %v11668_v19, %v14731_v32  ;;  %v14732_v60 = vld [vmem:[#allocation27_spill] sm:$0xff]  ;;  %v5537_v10 = vadd.f32 %v11672_v45, %v5409_v50  ;;  %v5663_v33 = vmax.f32 %v5535_v56, 0.0 }
 0x9ed   : > { %5774 = vst [vmem:[#allocation12 + $0xd90] sm:$0xff] %v5646_v38  ;;  %v5796_v5 = vmul.f32 %v11668_v19, %v14732_v60  ;;  %v14733_v38 = vld [vmem:[#allocation31_spill] sm:$0xff]  ;;  %v5922_v53 = vadd.f32 %v11672_v45, %v5794_v61  ;;  %v5664_v42 = vmax.f32 %v5536_v0, 0.0 }
 0x9ee   : > { %5775 = vst [vmem:[#allocation12 + $0xdb0] sm:$0xff] %v5647_v1  ;;  %v5797_v49 = vmul.f32 %v11668_v19, %v14733_v38  ;;  %v14734_v1 = vld [vmem:[#allocation35_spill] sm:$0xff]  ;;  %v5923_v22 = vadd.f32 %v11672_v45, %v5795_v24 }
 0x9ef   : > { %5776 = vst [vmem:[#allocation12 + $0xdd0] sm:$0xff] %v5648_v14  ;;  %v5798_v20 = vmul.f32 %v11668_v19, %v14734_v1  ;;  %v12056_v14 = vld [vmem:[#allocation4] ss:$0 sm:$0xff]  ;;  %v5665_v19 = vmax.f32 %v5537_v10, 0.0  ;;  %v6050_v63 = vmax.f32 %v5922_v53, 0.0 }
 0x9f0   : > { %5777 = vst [vmem:[#allocation12 + $0xdf0] sm:$0xff] %v5649_v37  ;;  %v5799_v44 = vmul.f32 %v12056_v14, %v14735_v16  ;;  %v12060_v37 = vld [vmem:[#allocation5] ss:$0 sm:$0xff]  ;;  %v5800_v23 = vmul.f32 %v12056_v14, %v14736_v13  ;;  %v5801_v45 = vmul.f32 %v12056_v14, %v14737_v52  ;;  %v6051_v27 = vmax.f32 %v5923_v22, 0.0 }
 0x9f1   : > { %5778 = vst [vmem:[#allocation12 + $0xe10] sm:$0xff] %v5650_v43  ;;  %v5924_v48 = vadd.f32 %v12060_v37, %v5796_v5  ;;  %v5925_v43 = vadd.f32 %v12060_v37, %v5797_v49  ;;  %v5926_v25 = vadd.f32 %v12060_v37, %v5798_v20 }
 0x9f2   : > { %5779 = vst [vmem:[#allocation12 + $0xe30] sm:$0xff] %v5651_v6  ;;  %v14738_v6 = vld [vmem:[#allocation47_spill] sm:$0xff]  ;;  %v5927_v39 = vadd.f32 %v12060_v37, %v5799_v44  ;;  %v5928_v26 = vadd.f32 %v12060_v37, %v5800_v23  ;;  %v5929_v57 = vadd.f32 %v12060_v37, %v5801_v45 }
 0x9f3   : > { %5780 = vst [vmem:[#allocation12 + $0xe50] sm:$0xff] %v5652_v21  ;;  %v5802_v55 = vmul.f32 %v12056_v14, %v14738_v6  ;;  %v14739_v21 = vld [vmem:[#allocation50_spill] sm:$0xff]  ;;  %v6052_v18 = vmax.f32 %v5924_v48, 0.0  ;;  %v6053_v29 = vmax.f32 %v5925_v43, 0.0  ;;  %v6054_v58 = vmax.f32 %v5926_v25, 0.0 }
 0x9f4   : > { %5781 = vst [vmem:[#allocation12 + $0xe70] sm:$0xff] %v5653_v31  ;;  %v5803_v28 = vmul.f32 %v12056_v14, %v14739_v21  ;;  %v14740_v31 = vld [vmem:[#allocation53_spill] sm:$0xff]  ;;  %v6055_v30 = vmax.f32 %v5927_v39, 0.0  ;;  %v6056_v54 = vmax.f32 %v5928_v26, 0.0  ;;  %v6057_v2 = vmax.f32 %v5929_v57, 0.0 }
 0x9f5   : > { %5782 = vst [vmem:[#allocation12 + $0xe90] sm:$0xff] %v5654_v17  ;;  %v5804_v46 = vmul.f32 %v12056_v14, %v14740_v31  ;;  %v14741_v17 = vld [vmem:[#allocation56_spill] sm:$0xff]  ;;  %v5930_v3 = vadd.f32 %v12060_v37, %v5802_v55 }
 0x9f6   : > { %5783 = vst [vmem:[#allocation12 + $0xeb0] sm:$0xff] %v5655_v11  ;;  %v5805_v36 = vmul.f32 %v12056_v14, %v14741_v17  ;;  %v14742_v11 = vld [vmem:[#allocation59_spill] sm:$0xff]  ;;  %v5931_v62 = vadd.f32 %v12060_v37, %v5803_v28 }
 0x9f7   : > { %5784 = vst [vmem:[#allocation12 + $0xed0] sm:$0xff] %v5656_v47  ;;  %v5806_v7 = vmul.f32 %v12056_v14, %v14742_v11  ;;  %v14743_v47 = vld [vmem:[#allocation62_spill] sm:$0xff]  ;;  %v5932_v41 = vadd.f32 %v12060_v37, %v5804_v46  ;;  %v6058_v51 = vmax.f32 %v5930_v3, 0.0 }
 0x9f8   : > { %5785 = vst [vmem:[#allocation12 + $0xef0] sm:$0xff] %v5657_v34  ;;  %v5807_v4 = vmul.f32 %v12056_v14, %v14743_v47  ;;  %v14744_v34 = vld [vmem:[#allocation66_spill] sm:$0xff]  ;;  %v5933_v50 = vadd.f32 %v12060_v37, %v5805_v36  ;;  %v6059_v32 = vmax.f32 %v5931_v62, 0.0 }
 0x9f9   : > { %5786 = vst [vmem:[#allocation12 + $0xf10] sm:$0xff] %v5658_v59  ;;  %v5808_v35 = vmul.f32 %v12056_v14, %v14744_v34  ;;  %v14745_v59 = vld [vmem:[#allocation70_spill] sm:$0xff]  ;;  %v5934_v61 = vadd.f32 %v12060_v37, %v5806_v7  ;;  %v6060_v60 = vmax.f32 %v5932_v41, 0.0 }
 0x9fa   : > { %5787 = vst [vmem:[#allocation12 + $0xf30] sm:$0xff] %v5659_v40  ;;  %v5809_v9 = vmul.f32 %v12056_v14, %v14745_v59  ;;  %v14746_v40 = vld [vmem:[#allocation74_spill] sm:$0xff]  ;;  %v5935_v24 = vadd.f32 %v12060_v37, %v5807_v4  ;;  %v6061_v38 = vmax.f32 %v5933_v50, 0.0 }
 0x9fb   : > { %5788 = vst [vmem:[#allocation12 + $0xf50] sm:$0xff] %v5660_v8  ;;  %v5810_v56 = vmul.f32 %v12056_v14, %v14746_v40  ;;  %v14747_v8 = vld [vmem:[#allocation78_spill] sm:$0xff]  ;;  %v5936_v5 = vadd.f32 %v12060_v37, %v5808_v35  ;;  %v6062_v1 = vmax.f32 %v5934_v61, 0.0 }
 0x9fc   : > { %5789 = vst [vmem:[#allocation12 + $0xf70] sm:$0xff] %v5661_v12  ;;  %v5811_v0 = vmul.f32 %v12056_v14, %v14747_v8  ;;  %v14748_v12 = vld [vmem:[#allocation82_spill] sm:$0xff]  ;;  %v5937_v49 = vadd.f32 %v12060_v37, %v5809_v9  ;;  %v6063_v16 = vmax.f32 %v5935_v24, 0.0 }
 0x9fd   : > { %5790 = vst [vmem:[#allocation12 + $0xf90] sm:$0xff] %v5662_v15  ;;  %v5812_v10 = vmul.f32 %v12056_v14, %v14748_v12  ;;  %v14749_v15 = vld [vmem:[#allocation86_spill] sm:$0xff]  ;;  %v5938_v20 = vadd.f32 %v12060_v37, %v5810_v56  ;;  %v6064_v13 = vmax.f32 %v5936_v5, 0.0 }
 0x9fe   : > { %5791 = vst [vmem:[#allocation12 + $0xfb0] sm:$0xff] %v5663_v33  ;;  %v5813_v53 = vmul.f32 %v12056_v14, %v14749_v15  ;;  %v14750_v33 = vld [vmem:[#allocation90_spill] sm:$0xff]  ;;  %v5939_v44 = vadd.f32 %v12060_v37, %v5811_v0  ;;  %v6065_v52 = vmax.f32 %v5937_v49, 0.0 }
 0x9ff   : > { %5792 = vst [vmem:[#allocation12 + $0xfd0] sm:$0xff] %v5664_v42  ;;  %v5814_v22 = vmul.f32 %v12056_v14, %v14750_v33  ;;  %v14751_v42 = vld [vmem:[#allocation94_spill] sm:$0xff]  ;;  %v5940_v23 = vadd.f32 %v12060_v37, %v5812_v10  ;;  %v6066_v6 = vmax.f32 %v5938_v20, 0.0 }
 0xa00   : > { %5793 = vst [vmem:[#allocation12 + $0xff0] sm:$0xff] %v5665_v19  ;;  %v5815_v48 = vmul.f32 %v12056_v14, %v14751_v42  ;;  %v14752_v19 = vld [vmem:[#allocation97_spill] sm:$0xff]  ;;  %v5941_v45 = vadd.f32 %v12060_v37, %v5813_v53  ;;  %v6067_v21 = vmax.f32 %v5939_v44, 0.0 }
 0xa01   : > { %6178 = vst [vmem:[#allocation12 + $0x18] sm:$0xff] %v6050_v63  ;;  %v5816_v43 = vmul.f32 %v12056_v14, %v14752_v19  ;;  %v14753_v63 = vld [vmem:[#allocation100_spill] sm:$0xff]  ;;  %v5942_v55 = vadd.f32 %v12060_v37, %v5814_v22  ;;  %v6068_v31 = vmax.f32 %v5940_v23, 0.0 }
 0xa02   : > { %6179 = vst [vmem:[#allocation12 + $0x38] sm:$0xff] %v6051_v27  ;;  %v5817_v25 = vmul.f32 %v12056_v14, %v14753_v63  ;;  %v14754_v27 = vld [vmem:[#allocation103_spill] sm:$0xff]  ;;  %v5943_v28 = vadd.f32 %v12060_v37, %v5815_v48  ;;  %v6069_v17 = vmax.f32 %v5941_v45, 0.0 }
 0xa03   : > { %6180 = vst [vmem:[#allocation12 + $0x58] sm:$0xff] %v6052_v18  ;;  %v5818_v39 = vmul.f32 %v12056_v14, %v14754_v27  ;;  %v14755_v18 = vld [vmem:[#allocation106_spill] sm:$0xff]  ;;  %v5944_v46 = vadd.f32 %v12060_v37, %v5816_v43  ;;  %v6070_v11 = vmax.f32 %v5942_v55, 0.0 }
 0xa04   : > { %6181 = vst [vmem:[#allocation12 + $0x78] sm:$0xff] %v6053_v29  ;;  %v5819_v26 = vmul.f32 %v12056_v14, %v14755_v18  ;;  %v14756_v29 = vld [vmem:[#allocation110_spill] sm:$0xff]  ;;  %v5945_v36 = vadd.f32 %v12060_v37, %v5817_v25  ;;  %v6071_v47 = vmax.f32 %v5943_v28, 0.0 }
 0xa05   : > { %6182 = vst [vmem:[#allocation12 + $0x98] sm:$0xff] %v6054_v58  ;;  %v5820_v57 = vmul.f32 %v12056_v14, %v14756_v29  ;;  %v14757_v58 = vld [vmem:[#allocation114_spill] sm:$0xff]  ;;  %v5946_v7 = vadd.f32 %v12060_v37, %v5818_v39  ;;  %v6072_v34 = vmax.f32 %v5944_v46, 0.0 }
 0xa06   : > { %6183 = vst [vmem:[#allocation12 + $0xb8] sm:$0xff] %v6055_v30  ;;  %v5821_v3 = vmul.f32 %v12056_v14, %v14757_v58  ;;  %v14758_v30 = vld [vmem:[#allocation118_spill] sm:$0xff]  ;;  %v5947_v4 = vadd.f32 %v12060_v37, %v5819_v26  ;;  %v6073_v59 = vmax.f32 %v5945_v36, 0.0 }
 0xa07   : > { %6184 = vst [vmem:[#allocation12 + $0xd8] sm:$0xff] %v6056_v54  ;;  %v5822_v62 = vmul.f32 %v12056_v14, %v14758_v30  ;;  %v14759_v54 = vld [vmem:[#allocation122_spill] sm:$0xff]  ;;  %v5948_v35 = vadd.f32 %v12060_v37, %v5820_v57  ;;  %v6074_v40 = vmax.f32 %v5946_v7, 0.0 }
 0xa08   : > { %6185 = vst [vmem:[#allocation12 + $0xf8] sm:$0xff] %v6057_v2  ;;  %v5823_v41 = vmul.f32 %v12056_v14, %v14759_v54  ;;  %v14760_v2 = vld [vmem:[#allocation126_spill] sm:$0xff]  ;;  %v5949_v9 = vadd.f32 %v12060_v37, %v5821_v3  ;;  %v6075_v8 = vmax.f32 %v5947_v4, 0.0 }
 0xa09   : > { %6186 = vst [vmem:[#allocation12 + $0x118] sm:$0xff] %v6058_v51  ;;  %v5824_v50 = vmul.f32 %v12056_v14, %v14760_v2  ;;  %v14761_v51 = vld [vmem:[#allocation130_spill] sm:$0xff]  ;;  %v5950_v56 = vadd.f32 %v12060_v37, %v5822_v62  ;;  %v6076_v12 = vmax.f32 %v5948_v35, 0.0 }
 0xa0a   : > { %6187 = vst [vmem:[#allocation12 + $0x138] sm:$0xff] %v6059_v32  ;;  %v5825_v61 = vmul.f32 %v12056_v14, %v14761_v51  ;;  %v14762_v32 = vld [vmem:[#allocation134_spill] sm:$0xff]  ;;  %v5951_v0 = vadd.f32 %v12060_v37, %v5823_v41  ;;  %v6077_v15 = vmax.f32 %v5949_v9, 0.0 }
 0xa0b   : > { %6188 = vst [vmem:[#allocation12 + $0x158] sm:$0xff] %v6060_v60  ;;  %v5826_v24 = vmul.f32 %v12056_v14, %v14762_v32  ;;  %v14763_v60 = vld [vmem:[#allocation138_spill] sm:$0xff]  ;;  %v5952_v10 = vadd.f32 %v12060_v37, %v5824_v50  ;;  %v6078_v33 = vmax.f32 %v5950_v56, 0.0 }
 0xa0c   : > { %6189 = vst [vmem:[#allocation12 + $0x178] sm:$0xff] %v6061_v38  ;;  %v5827_v5 = vmul.f32 %v12056_v14, %v14763_v60  ;;  %v14764_v38 = vld [vmem:[#allocation142_spill] sm:$0xff]  ;;  %v5953_v53 = vadd.f32 %v12060_v37, %v5825_v61  ;;  %v6079_v42 = vmax.f32 %v5951_v0, 0.0 }
 0xa0d   : > { %6190 = vst [vmem:[#allocation12 + $0x198] sm:$0xff] %v6062_v1  ;;  %v5828_v49 = vmul.f32 %v12056_v14, %v14764_v38  ;;  %v14765_v1 = vld [vmem:[#allocation146_spill] sm:$0xff]  ;;  %v5954_v22 = vadd.f32 %v12060_v37, %v5826_v24  ;;  %v6080_v19 = vmax.f32 %v5952_v10, 0.0 }
 0xa0e   : > { %6191 = vst [vmem:[#allocation12 + $0x1b8] sm:$0xff] %v6063_v16  ;;  %v5829_v20 = vmul.f32 %v12056_v14, %v14765_v1  ;;  %v14766_v16 = vld [vmem:[#allocation150_spill] sm:$0xff]  ;;  %v5955_v48 = vadd.f32 %v12060_v37, %v5827_v5  ;;  %v6081_v63 = vmax.f32 %v5953_v53, 0.0 }
 0xa0f   : > { %6192 = vst [vmem:[#allocation12 + $0x1d8] sm:$0xff] %v6064_v13  ;;  %v5830_v44 = vmul.f32 %v12056_v14, %v14766_v16  ;;  %v14767_v13 = vld [vmem:[#allocation154_spill] sm:$0xff]  ;;  %v5956_v43 = vadd.f32 %v12060_v37, %v5828_v49  ;;  %v6082_v27 = vmax.f32 %v5954_v22, 0.0 }
 0xa10   : > { %6193 = vst [vmem:[#allocation12 + $0x1f8] sm:$0xff] %v6065_v52  ;;  %v5831_v23 = vmul.f32 %v12056_v14, %v14767_v13  ;;  %v14768_v52 = vld [vmem:[#allocation158_spill] sm:$0xff]  ;;  %v5957_v25 = vadd.f32 %v12060_v37, %v5829_v20  ;;  %v6083_v18 = vmax.f32 %v5955_v48, 0.0 }
 0xa11   : > { %6194 = vst [vmem:[#allocation12 + $0x218] sm:$0xff] %v6066_v6  ;;  %v5832_v45 = vmul.f32 %v12056_v14, %v14768_v52  ;;  %v14769_v6 = vld [vmem:[#allocation162_spill] sm:$0xff]  ;;  %v5958_v39 = vadd.f32 %v12060_v37, %v5830_v44  ;;  %v6084_v29 = vmax.f32 %v5956_v43, 0.0 }
 0xa12   : > { %6195 = vst [vmem:[#allocation12 + $0x238] sm:$0xff] %v6067_v21  ;;  %v5833_v55 = vmul.f32 %v12056_v14, %v14769_v6  ;;  %v14770_v21 = vld [vmem:[#allocation166_spill] sm:$0xff]  ;;  %v5959_v26 = vadd.f32 %v12060_v37, %v5831_v23  ;;  %v6085_v58 = vmax.f32 %v5957_v25, 0.0 }
 0xa13   : > { %6196 = vst [vmem:[#allocation12 + $0x258] sm:$0xff] %v6068_v31  ;;  %v5834_v28 = vmul.f32 %v12056_v14, %v14770_v21  ;;  %v14771_v31 = vld [vmem:[#allocation170_spill] sm:$0xff]  ;;  %v5960_v57 = vadd.f32 %v12060_v37, %v5832_v45  ;;  %v6086_v30 = vmax.f32 %v5958_v39, 0.0 }
 0xa14   : > { %6197 = vst [vmem:[#allocation12 + $0x278] sm:$0xff] %v6069_v17  ;;  %v5835_v46 = vmul.f32 %v12056_v14, %v14771_v31  ;;  %v14772_v17 = vld [vmem:[#allocation174_spill] sm:$0xff]  ;;  %v5961_v3 = vadd.f32 %v12060_v37, %v5833_v55  ;;  %v6087_v54 = vmax.f32 %v5959_v26, 0.0 }
 0xa15   : > { %6198 = vst [vmem:[#allocation12 + $0x298] sm:$0xff] %v6070_v11  ;;  %v5836_v36 = vmul.f32 %v12056_v14, %v14772_v17  ;;  %v14773_v11 = vld [vmem:[#allocation178_spill] sm:$0xff]  ;;  %v5962_v62 = vadd.f32 %v12060_v37, %v5834_v28  ;;  %v6088_v2 = vmax.f32 %v5960_v57, 0.0 }
 0xa16   : > { %6199 = vst [vmem:[#allocation12 + $0x2b8] sm:$0xff] %v6071_v47  ;;  %v5837_v7 = vmul.f32 %v12056_v14, %v14773_v11  ;;  %v14774_v47 = vld [vmem:[#allocation182_spill] sm:$0xff]  ;;  %v5963_v41 = vadd.f32 %v12060_v37, %v5835_v46  ;;  %v6089_v51 = vmax.f32 %v5961_v3, 0.0 }
 0xa17   : > { %6200 = vst [vmem:[#allocation12 + $0x2d8] sm:$0xff] %v6072_v34  ;;  %v5838_v4 = vmul.f32 %v12056_v14, %v14774_v47  ;;  %v14775_v34 = vld [vmem:[#allocation186_spill] sm:$0xff]  ;;  %v5964_v50 = vadd.f32 %v12060_v37, %v5836_v36  ;;  %v6090_v32 = vmax.f32 %v5962_v62, 0.0 }
 0xa18   : > { %6201 = vst [vmem:[#allocation12 + $0x2f8] sm:$0xff] %v6073_v59  ;;  %v5839_v35 = vmul.f32 %v12056_v14, %v14775_v34  ;;  %v14776_v59 = vld [vmem:[#allocation190_spill] sm:$0xff]  ;;  %v5965_v61 = vadd.f32 %v12060_v37, %v5837_v7  ;;  %v6091_v60 = vmax.f32 %v5963_v41, 0.0 }
 0xa19   : > { %6202 = vst [vmem:[#allocation12 + $0x318] sm:$0xff] %v6074_v40  ;;  %v5840_v9 = vmul.f32 %v12056_v14, %v14776_v59  ;;  %v14777_v40 = vld [vmem:[#allocation194_spill] sm:$0xff]  ;;  %v5966_v24 = vadd.f32 %v12060_v37, %v5838_v4  ;;  %v6092_v38 = vmax.f32 %v5964_v50, 0.0 }
 0xa1a   : > { %6203 = vst [vmem:[#allocation12 + $0x338] sm:$0xff] %v6075_v8  ;;  %v5841_v56 = vmul.f32 %v12056_v14, %v14777_v40  ;;  %v14778_v8 = vld [vmem:[#allocation198_spill] sm:$0xff]  ;;  %v5967_v5 = vadd.f32 %v12060_v37, %v5839_v35  ;;  %v6093_v1 = vmax.f32 %v5965_v61, 0.0 }
 0xa1b   : > { %6204 = vst [vmem:[#allocation12 + $0x358] sm:$0xff] %v6076_v12  ;;  %v5842_v0 = vmul.f32 %v12056_v14, %v14778_v8  ;;  %v14779_v12 = vld [vmem:[#allocation202_spill] sm:$0xff]  ;;  %v5968_v49 = vadd.f32 %v12060_v37, %v5840_v9  ;;  %v6094_v16 = vmax.f32 %v5966_v24, 0.0 }
 0xa1c   : > { %6205 = vst [vmem:[#allocation12 + $0x378] sm:$0xff] %v6077_v15  ;;  %v5843_v10 = vmul.f32 %v12056_v14, %v14779_v12  ;;  %v14780_v15 = vld [vmem:[#allocation206_spill] sm:$0xff]  ;;  %v5969_v20 = vadd.f32 %v12060_v37, %v5841_v56  ;;  %v6095_v13 = vmax.f32 %v5967_v5, 0.0 }
 0xa1d   : > { %6206 = vst [vmem:[#allocation12 + $0x398] sm:$0xff] %v6078_v33  ;;  %v5844_v53 = vmul.f32 %v12056_v14, %v14780_v15  ;;  %v14781_v33 = vld [vmem:[#allocation210_spill] sm:$0xff]  ;;  %v5970_v44 = vadd.f32 %v12060_v37, %v5842_v0  ;;  %v6096_v52 = vmax.f32 %v5968_v49, 0.0 }
 0xa1e   : > { %6207 = vst [vmem:[#allocation12 + $0x3b8] sm:$0xff] %v6079_v42  ;;  %v5845_v22 = vmul.f32 %v12056_v14, %v14781_v33  ;;  %v14782_v42 = vld [vmem:[#allocation214_spill] sm:$0xff]  ;;  %v5971_v23 = vadd.f32 %v12060_v37, %v5843_v10  ;;  %v6097_v6 = vmax.f32 %v5969_v20, 0.0 }
 0xa1f   : > { %6208 = vst [vmem:[#allocation12 + $0x3d8] sm:$0xff] %v6080_v19  ;;  %v5846_v48 = vmul.f32 %v12056_v14, %v14782_v42  ;;  %v14783_v19 = vld [vmem:[#allocation218_spill] sm:$0xff]  ;;  %v5972_v45 = vadd.f32 %v12060_v37, %v5844_v53  ;;  %v6098_v21 = vmax.f32 %v5970_v44, 0.0 }
 0xa20   : > { %6209 = vst [vmem:[#allocation12 + $0x3f8] sm:$0xff] %v6081_v63  ;;  %v5847_v43 = vmul.f32 %v12056_v14, %v14783_v19  ;;  %v14784_v63 = vld [vmem:[#allocation222_spill] sm:$0xff]  ;;  %v5973_v55 = vadd.f32 %v12060_v37, %v5845_v22  ;;  %v6099_v31 = vmax.f32 %v5971_v23, 0.0 }
 0xa21   : > { %6210 = vst [vmem:[#allocation12 + $0x418] sm:$0xff] %v6082_v27  ;;  %v5848_v25 = vmul.f32 %v12056_v14, %v14784_v63  ;;  %v14785_v27 = vld [vmem:[#allocation226_spill] sm:$0xff]  ;;  %v5974_v28 = vadd.f32 %v12060_v37, %v5846_v48  ;;  %v6100_v17 = vmax.f32 %v5972_v45, 0.0 }
 0xa22   : > { %6211 = vst [vmem:[#allocation12 + $0x438] sm:$0xff] %v6083_v18  ;;  %v5849_v39 = vmul.f32 %v12056_v14, %v14785_v27  ;;  %v14786_v18 = vld [vmem:[#allocation230_spill] sm:$0xff]  ;;  %v5975_v46 = vadd.f32 %v12060_v37, %v5847_v43  ;;  %v6101_v11 = vmax.f32 %v5973_v55, 0.0 }
 0xa23   : > { %6212 = vst [vmem:[#allocation12 + $0x458] sm:$0xff] %v6084_v29  ;;  %v5850_v26 = vmul.f32 %v12056_v14, %v14786_v18  ;;  %v14787_v29 = vld [vmem:[#allocation234_spill] sm:$0xff]  ;;  %v5976_v36 = vadd.f32 %v12060_v37, %v5848_v25  ;;  %v6102_v47 = vmax.f32 %v5974_v28, 0.0 }
 0xa24   : > { %6213 = vst [vmem:[#allocation12 + $0x478] sm:$0xff] %v6085_v58  ;;  %v5851_v57 = vmul.f32 %v12056_v14, %v14787_v29  ;;  %v14788_v58 = vld [vmem:[#allocation238_spill] sm:$0xff]  ;;  %v5977_v7 = vadd.f32 %v12060_v37, %v5849_v39  ;;  %v6103_v34 = vmax.f32 %v5975_v46, 0.0 }
 0xa25   : > { %6214 = vst [vmem:[#allocation12 + $0x498] sm:$0xff] %v6086_v30  ;;  %v5852_v3 = vmul.f32 %v12056_v14, %v14788_v58  ;;  %v14789_v30 = vld [vmem:[#allocation242_spill] sm:$0xff]  ;;  %v5978_v4 = vadd.f32 %v12060_v37, %v5850_v26  ;;  %v6104_v59 = vmax.f32 %v5976_v36, 0.0 }
 0xa26   : > { %6215 = vst [vmem:[#allocation12 + $0x4b8] sm:$0xff] %v6087_v54  ;;  %v5853_v62 = vmul.f32 %v12056_v14, %v14789_v30  ;;  %v14790_v54 = vld [vmem:[#allocation246_spill] sm:$0xff]  ;;  %v5979_v35 = vadd.f32 %v12060_v37, %v5851_v57  ;;  %v6105_v40 = vmax.f32 %v5977_v7, 0.0 }
 0xa27   : > { %6216 = vst [vmem:[#allocation12 + $0x4d8] sm:$0xff] %v6088_v2  ;;  %v5854_v41 = vmul.f32 %v12056_v14, %v14790_v54  ;;  %v14791_v2 = vld [vmem:[#allocation250_spill] sm:$0xff]  ;;  %v5980_v9 = vadd.f32 %v12060_v37, %v5852_v3  ;;  %v6106_v8 = vmax.f32 %v5978_v4, 0.0 }
 0xa28   : > { %6217 = vst [vmem:[#allocation12 + $0x4f8] sm:$0xff] %v6089_v51  ;;  %v5855_v50 = vmul.f32 %v12056_v14, %v14791_v2  ;;  %v14792_v51 = vld [vmem:[#allocation254_spill] sm:$0xff]  ;;  %v5981_v56 = vadd.f32 %v12060_v37, %v5853_v62  ;;  %v6107_v12 = vmax.f32 %v5979_v35, 0.0 }
 0xa29   : > { %6218 = vst [vmem:[#allocation12 + $0x518] sm:$0xff] %v6090_v32  ;;  %v5856_v61 = vmul.f32 %v12056_v14, %v14792_v51  ;;  %v14793_v32 = vld [vmem:[#allocation258_spill] sm:$0xff]  ;;  %v5982_v0 = vadd.f32 %v12060_v37, %v5854_v41  ;;  %v6108_v15 = vmax.f32 %v5980_v9, 0.0 }
 0xa2a   : > { %6219 = vst [vmem:[#allocation12 + $0x538] sm:$0xff] %v6091_v60  ;;  %v5857_v24 = vmul.f32 %v12056_v14, %v14793_v32  ;;  %v14794_v60 = vld [vmem:[#allocation262_spill] sm:$0xff]  ;;  %v5983_v10 = vadd.f32 %v12060_v37, %v5855_v50  ;;  %v6109_v33 = vmax.f32 %v5981_v56, 0.0 }
 0xa2b   : > { %6220 = vst [vmem:[#allocation12 + $0x558] sm:$0xff] %v6092_v38  ;;  %v5858_v5 = vmul.f32 %v12056_v14, %v14794_v60  ;;  %v14795_v38 = vld [vmem:[#allocation266_spill] sm:$0xff]  ;;  %v5984_v53 = vadd.f32 %v12060_v37, %v5856_v61  ;;  %v6110_v42 = vmax.f32 %v5982_v0, 0.0 }
 0xa2c   : > { %6221 = vst [vmem:[#allocation12 + $0x578] sm:$0xff] %v6093_v1  ;;  %v5859_v49 = vmul.f32 %v12056_v14, %v14795_v38  ;;  %v14796_v1 = vld [vmem:[#allocation270_spill] sm:$0xff]  ;;  %v5985_v22 = vadd.f32 %v12060_v37, %v5857_v24  ;;  %v6111_v19 = vmax.f32 %v5983_v10, 0.0 }
 0xa2d   : > { %6222 = vst [vmem:[#allocation12 + $0x598] sm:$0xff] %v6094_v16  ;;  %v5860_v20 = vmul.f32 %v12056_v14, %v14796_v1  ;;  %v14797_v16 = vld [vmem:[#allocation274_spill] sm:$0xff]  ;;  %v5986_v48 = vadd.f32 %v12060_v37, %v5858_v5  ;;  %v6112_v63 = vmax.f32 %v5984_v53, 0.0 }
 0xa2e   : > { %6223 = vst [vmem:[#allocation12 + $0x5b8] sm:$0xff] %v6095_v13  ;;  %v5861_v44 = vmul.f32 %v12056_v14, %v14797_v16  ;;  %v14798_v13 = vld [vmem:[#allocation278_spill] sm:$0xff]  ;;  %v5987_v43 = vadd.f32 %v12060_v37, %v5859_v49  ;;  %v6113_v27 = vmax.f32 %v5985_v22, 0.0 }
 0xa2f   : > { %6224 = vst [vmem:[#allocation12 + $0x5d8] sm:$0xff] %v6096_v52  ;;  %v5862_v23 = vmul.f32 %v12056_v14, %v14798_v13  ;;  %v14799_v52 = vld [vmem:[#allocation282_spill] sm:$0xff]  ;;  %v5988_v25 = vadd.f32 %v12060_v37, %v5860_v20  ;;  %v6114_v18 = vmax.f32 %v5986_v48, 0.0 }
 0xa30   : > { %6225 = vst [vmem:[#allocation12 + $0x5f8] sm:$0xff] %v6097_v6  ;;  %v5863_v45 = vmul.f32 %v12056_v14, %v14799_v52  ;;  %v14800_v6 = vld [vmem:[#allocation286_spill] sm:$0xff]  ;;  %v5989_v39 = vadd.f32 %v12060_v37, %v5861_v44  ;;  %v6115_v29 = vmax.f32 %v5987_v43, 0.0 }
 0xa31   : > { %6226 = vst [vmem:[#allocation12 + $0x618] sm:$0xff] %v6098_v21  ;;  %v5864_v55 = vmul.f32 %v12056_v14, %v14800_v6  ;;  %v14801_v21 = vld [vmem:[#allocation290_spill] sm:$0xff]  ;;  %v5990_v26 = vadd.f32 %v12060_v37, %v5862_v23  ;;  %v6116_v58 = vmax.f32 %v5988_v25, 0.0 }
 0xa32   : > { %6227 = vst [vmem:[#allocation12 + $0x638] sm:$0xff] %v6099_v31  ;;  %v5865_v28 = vmul.f32 %v12056_v14, %v14801_v21  ;;  %v14802_v31 = vld [vmem:[#allocation294_spill] sm:$0xff]  ;;  %v5991_v57 = vadd.f32 %v12060_v37, %v5863_v45  ;;  %v6117_v30 = vmax.f32 %v5989_v39, 0.0 }
 0xa33   : > { %6228 = vst [vmem:[#allocation12 + $0x658] sm:$0xff] %v6100_v17  ;;  %v5866_v46 = vmul.f32 %v12056_v14, %v14802_v31  ;;  %v14803_v17 = vld [vmem:[#allocation298_spill] sm:$0xff]  ;;  %v5992_v3 = vadd.f32 %v12060_v37, %v5864_v55  ;;  %v6118_v54 = vmax.f32 %v5990_v26, 0.0 }
 0xa34   : > { %6229 = vst [vmem:[#allocation12 + $0x678] sm:$0xff] %v6101_v11  ;;  %v5867_v36 = vmul.f32 %v12056_v14, %v14803_v17  ;;  %v14804_v11 = vld [vmem:[#allocation302_spill] sm:$0xff]  ;;  %v5993_v62 = vadd.f32 %v12060_v37, %v5865_v28  ;;  %v6119_v2 = vmax.f32 %v5991_v57, 0.0 }
 0xa35   : > { %6230 = vst [vmem:[#allocation12 + $0x698] sm:$0xff] %v6102_v47  ;;  %v5868_v7 = vmul.f32 %v12056_v14, %v14804_v11  ;;  %v14805_v47 = vld [vmem:[#allocation306_spill] sm:$0xff]  ;;  %v5994_v41 = vadd.f32 %v12060_v37, %v5866_v46  ;;  %v6120_v51 = vmax.f32 %v5992_v3, 0.0 }
 0xa36   : > { %6231 = vst [vmem:[#allocation12 + $0x6b8] sm:$0xff] %v6103_v34  ;;  %v5869_v4 = vmul.f32 %v12056_v14, %v14805_v47  ;;  %v14806_v34 = vld [vmem:[#allocation310_spill] sm:$0xff]  ;;  %v5995_v50 = vadd.f32 %v12060_v37, %v5867_v36  ;;  %v6121_v32 = vmax.f32 %v5993_v62, 0.0 }
 0xa37   : > { %6232 = vst [vmem:[#allocation12 + $0x6d8] sm:$0xff] %v6104_v59  ;;  %v5870_v35 = vmul.f32 %v12056_v14, %v14806_v34  ;;  %v14807_v59 = vld [vmem:[#allocation314_spill] sm:$0xff]  ;;  %v5996_v61 = vadd.f32 %v12060_v37, %v5868_v7  ;;  %v6122_v60 = vmax.f32 %v5994_v41, 0.0 }
 0xa38   : > { %6233 = vst [vmem:[#allocation12 + $0x6f8] sm:$0xff] %v6105_v40  ;;  %v5871_v9 = vmul.f32 %v12056_v14, %v14807_v59  ;;  %v14808_v40 = vld [vmem:[#allocation318_spill] sm:$0xff]  ;;  %v5997_v24 = vadd.f32 %v12060_v37, %v5869_v4  ;;  %v6123_v38 = vmax.f32 %v5995_v50, 0.0 }
 0xa39   : > { %6234 = vst [vmem:[#allocation12 + $0x718] sm:$0xff] %v6106_v8  ;;  %v5872_v56 = vmul.f32 %v12056_v14, %v14808_v40  ;;  %v14809_v8 = vld [vmem:[#allocation322_spill] sm:$0xff]  ;;  %v5998_v5 = vadd.f32 %v12060_v37, %v5870_v35  ;;  %v6124_v1 = vmax.f32 %v5996_v61, 0.0 }
 0xa3a   : > { %6235 = vst [vmem:[#allocation12 + $0x738] sm:$0xff] %v6107_v12  ;;  %v5873_v0 = vmul.f32 %v12056_v14, %v14809_v8  ;;  %v14810_v12 = vld [vmem:[#allocation326_spill] sm:$0xff]  ;;  %v5999_v49 = vadd.f32 %v12060_v37, %v5871_v9  ;;  %v6125_v16 = vmax.f32 %v5997_v24, 0.0 }
 0xa3b   : > { %6236 = vst [vmem:[#allocation12 + $0x758] sm:$0xff] %v6108_v15  ;;  %v5874_v10 = vmul.f32 %v12056_v14, %v14810_v12  ;;  %v14811_v15 = vld [vmem:[#allocation330_spill] sm:$0xff]  ;;  %v6000_v20 = vadd.f32 %v12060_v37, %v5872_v56  ;;  %v6126_v13 = vmax.f32 %v5998_v5, 0.0 }
 0xa3c   : > { %6237 = vst [vmem:[#allocation12 + $0x778] sm:$0xff] %v6109_v33  ;;  %v5875_v53 = vmul.f32 %v12056_v14, %v14811_v15  ;;  %v14812_v33 = vld [vmem:[#allocation334_spill] sm:$0xff]  ;;  %v6001_v44 = vadd.f32 %v12060_v37, %v5873_v0  ;;  %v6127_v52 = vmax.f32 %v5999_v49, 0.0 }
 0xa3d   : > { %6238 = vst [vmem:[#allocation12 + $0x798] sm:$0xff] %v6110_v42  ;;  %v5876_v22 = vmul.f32 %v12056_v14, %v14812_v33  ;;  %v14813_v42 = vld [vmem:[#allocation338_spill] sm:$0xff]  ;;  %v6002_v23 = vadd.f32 %v12060_v37, %v5874_v10  ;;  %v6128_v6 = vmax.f32 %v6000_v20, 0.0 }
 0xa3e   : > { %6239 = vst [vmem:[#allocation12 + $0x7b8] sm:$0xff] %v6111_v19  ;;  %v5877_v48 = vmul.f32 %v12056_v14, %v14813_v42  ;;  %v14814_v19 = vld [vmem:[#allocation342_spill] sm:$0xff]  ;;  %v6003_v45 = vadd.f32 %v12060_v37, %v5875_v53  ;;  %v6129_v21 = vmax.f32 %v6001_v44, 0.0 }
 0xa3f   : > { %6240 = vst [vmem:[#allocation12 + $0x7d8] sm:$0xff] %v6112_v63  ;;  %v5878_v43 = vmul.f32 %v12056_v14, %v14814_v19  ;;  %v14815_v63 = vld [vmem:[#allocation346_spill] sm:$0xff]  ;;  %v6004_v55 = vadd.f32 %v12060_v37, %v5876_v22  ;;  %v6130_v31 = vmax.f32 %v6002_v23, 0.0 }
 0xa40   : > { %6241 = vst [vmem:[#allocation12 + $0x7f8] sm:$0xff] %v6113_v27  ;;  %v5879_v25 = vmul.f32 %v12056_v14, %v14815_v63  ;;  %v14816_v27 = vld [vmem:[#allocation350_spill] sm:$0xff]  ;;  %v6005_v28 = vadd.f32 %v12060_v37, %v5877_v48  ;;  %v6131_v17 = vmax.f32 %v6003_v45, 0.0 }
 0xa41   : > { %6242 = vst [vmem:[#allocation12 + $0x818] sm:$0xff] %v6114_v18  ;;  %v5880_v39 = vmul.f32 %v12056_v14, %v14816_v27  ;;  %v14817_v18 = vld [vmem:[#allocation354_spill] sm:$0xff]  ;;  %v6006_v46 = vadd.f32 %v12060_v37, %v5878_v43  ;;  %v6132_v11 = vmax.f32 %v6004_v55, 0.0 }
 0xa42   : > { %6243 = vst [vmem:[#allocation12 + $0x838] sm:$0xff] %v6115_v29  ;;  %v5881_v26 = vmul.f32 %v12056_v14, %v14817_v18  ;;  %v14818_v29 = vld [vmem:[#allocation358_spill] sm:$0xff]  ;;  %v6007_v36 = vadd.f32 %v12060_v37, %v5879_v25  ;;  %v6133_v47 = vmax.f32 %v6005_v28, 0.0 }
 0xa43   : > { %6244 = vst [vmem:[#allocation12 + $0x858] sm:$0xff] %v6116_v58  ;;  %v5882_v57 = vmul.f32 %v12056_v14, %v14818_v29  ;;  %v14819_v58 = vld [vmem:[#allocation362_spill] sm:$0xff]  ;;  %v6008_v7 = vadd.f32 %v12060_v37, %v5880_v39  ;;  %v6134_v34 = vmax.f32 %v6006_v46, 0.0 }
 0xa44   : > { %6245 = vst [vmem:[#allocation12 + $0x878] sm:$0xff] %v6117_v30  ;;  %v5883_v3 = vmul.f32 %v12056_v14, %v14819_v58  ;;  %v14820_v30 = vld [vmem:[#allocation366_spill] sm:$0xff]  ;;  %v6009_v4 = vadd.f32 %v12060_v37, %v5881_v26  ;;  %v6135_v59 = vmax.f32 %v6007_v36, 0.0 }
 0xa45   : > { %6246 = vst [vmem:[#allocation12 + $0x898] sm:$0xff] %v6118_v54  ;;  %v5884_v62 = vmul.f32 %v12056_v14, %v14820_v30  ;;  %v14821_v54 = vld [vmem:[#allocation370_spill] sm:$0xff]  ;;  %v6010_v35 = vadd.f32 %v12060_v37, %v5882_v57  ;;  %v6136_v40 = vmax.f32 %v6008_v7, 0.0 }
 0xa46   : > { %6247 = vst [vmem:[#allocation12 + $0x8b8] sm:$0xff] %v6119_v2  ;;  %v5885_v41 = vmul.f32 %v12056_v14, %v14821_v54  ;;  %v14822_v2 = vld [vmem:[#allocation374_spill] sm:$0xff]  ;;  %v6011_v9 = vadd.f32 %v12060_v37, %v5883_v3  ;;  %v6137_v8 = vmax.f32 %v6009_v4, 0.0 }
 0xa47   : > { %6248 = vst [vmem:[#allocation12 + $0x8d8] sm:$0xff] %v6120_v51  ;;  %v5886_v50 = vmul.f32 %v12056_v14, %v14822_v2  ;;  %v14823_v51 = vld [vmem:[#allocation378_spill] sm:$0xff]  ;;  %v6012_v56 = vadd.f32 %v12060_v37, %v5884_v62  ;;  %v6138_v12 = vmax.f32 %v6010_v35, 0.0 }
 0xa48   : > { %6249 = vst [vmem:[#allocation12 + $0x8f8] sm:$0xff] %v6121_v32  ;;  %v5887_v61 = vmul.f32 %v12056_v14, %v14823_v51  ;;  %v14824_v32 = vld [vmem:[#allocation382_spill] sm:$0xff]  ;;  %v6013_v0 = vadd.f32 %v12060_v37, %v5885_v41  ;;  %v6139_v15 = vmax.f32 %v6011_v9, 0.0 }
 0xa49   : > { %6250 = vst [vmem:[#allocation12 + $0x918] sm:$0xff] %v6122_v60  ;;  %v5888_v24 = vmul.f32 %v12056_v14, %v14824_v32  ;;  %v14825_v60 = vld [vmem:[#allocation386_spill] sm:$0xff]  ;;  %v6014_v10 = vadd.f32 %v12060_v37, %v5886_v50  ;;  %v6140_v33 = vmax.f32 %v6012_v56, 0.0 }
 0xa4a   : > { %6251 = vst [vmem:[#allocation12 + $0x938] sm:$0xff] %v6123_v38  ;;  %v5889_v5 = vmul.f32 %v12056_v14, %v14825_v60  ;;  %v14826_v38 = vld [vmem:[#allocation390_spill] sm:$0xff]  ;;  %v6015_v53 = vadd.f32 %v12060_v37, %v5887_v61  ;;  %v6141_v42 = vmax.f32 %v6013_v0, 0.0 }
 0xa4b   : > { %6252 = vst [vmem:[#allocation12 + $0x958] sm:$0xff] %v6124_v1  ;;  %v5890_v49 = vmul.f32 %v12056_v14, %v14826_v38  ;;  %v14827_v1 = vld [vmem:[#allocation394_spill] sm:$0xff]  ;;  %v6016_v22 = vadd.f32 %v12060_v37, %v5888_v24  ;;  %v6142_v19 = vmax.f32 %v6014_v10, 0.0 }
 0xa4c   : > { %6253 = vst [vmem:[#allocation12 + $0x978] sm:$0xff] %v6125_v16  ;;  %v5891_v20 = vmul.f32 %v12056_v14, %v14827_v1  ;;  %v14828_v16 = vld [vmem:[#allocation398_spill] sm:$0xff]  ;;  %v6017_v48 = vadd.f32 %v12060_v37, %v5889_v5  ;;  %v6143_v63 = vmax.f32 %v6015_v53, 0.0 }
 0xa4d   : > { %6254 = vst [vmem:[#allocation12 + $0x998] sm:$0xff] %v6126_v13  ;;  %v5892_v44 = vmul.f32 %v12056_v14, %v14828_v16  ;;  %v14829_v13 = vld [vmem:[#allocation402_spill] sm:$0xff]  ;;  %v6018_v43 = vadd.f32 %v12060_v37, %v5890_v49  ;;  %v6144_v27 = vmax.f32 %v6016_v22, 0.0 }
 0xa4e   : > { %6255 = vst [vmem:[#allocation12 + $0x9b8] sm:$0xff] %v6127_v52  ;;  %v5893_v23 = vmul.f32 %v12056_v14, %v14829_v13  ;;  %v14830_v52 = vld [vmem:[#allocation406_spill] sm:$0xff]  ;;  %v6019_v25 = vadd.f32 %v12060_v37, %v5891_v20  ;;  %v6145_v18 = vmax.f32 %v6017_v48, 0.0 }
 0xa4f   : > { %6256 = vst [vmem:[#allocation12 + $0x9d8] sm:$0xff] %v6128_v6  ;;  %v5894_v45 = vmul.f32 %v12056_v14, %v14830_v52  ;;  %v14831_v6 = vld [vmem:[#allocation410_spill] sm:$0xff]  ;;  %v6020_v39 = vadd.f32 %v12060_v37, %v5892_v44  ;;  %v6146_v29 = vmax.f32 %v6018_v43, 0.0 }
 0xa50   : > { %6257 = vst [vmem:[#allocation12 + $0x9f8] sm:$0xff] %v6129_v21  ;;  %v5895_v55 = vmul.f32 %v12056_v14, %v14831_v6  ;;  %v14832_v21 = vld [vmem:[#allocation414_spill] sm:$0xff]  ;;  %v6021_v26 = vadd.f32 %v12060_v37, %v5893_v23  ;;  %v6147_v58 = vmax.f32 %v6019_v25, 0.0 }
 0xa51   : > { %6258 = vst [vmem:[#allocation12 + $0xa18] sm:$0xff] %v6130_v31  ;;  %v5896_v28 = vmul.f32 %v12056_v14, %v14832_v21  ;;  %v14833_v31 = vld [vmem:[#allocation418_spill] sm:$0xff]  ;;  %v6022_v57 = vadd.f32 %v12060_v37, %v5894_v45  ;;  %v6148_v30 = vmax.f32 %v6020_v39, 0.0 }
 0xa52   : > { %6259 = vst [vmem:[#allocation12 + $0xa38] sm:$0xff] %v6131_v17  ;;  %v5897_v46 = vmul.f32 %v12056_v14, %v14833_v31  ;;  %v14834_v17 = vld [vmem:[#allocation422_spill] sm:$0xff]  ;;  %v6023_v3 = vadd.f32 %v12060_v37, %v5895_v55  ;;  %v6149_v54 = vmax.f32 %v6021_v26, 0.0 }
 0xa53   : > { %6260 = vst [vmem:[#allocation12 + $0xa58] sm:$0xff] %v6132_v11  ;;  %v5898_v36 = vmul.f32 %v12056_v14, %v14834_v17  ;;  %v14835_v11 = vld [vmem:[#allocation426_spill] sm:$0xff]  ;;  %v6024_v62 = vadd.f32 %v12060_v37, %v5896_v28  ;;  %v6150_v2 = vmax.f32 %v6022_v57, 0.0 }
 0xa54   : > { %6261 = vst [vmem:[#allocation12 + $0xa78] sm:$0xff] %v6133_v47  ;;  %v5899_v7 = vmul.f32 %v12056_v14, %v14835_v11  ;;  %v14836_v47 = vld [vmem:[#allocation430_spill] sm:$0xff]  ;;  %v6025_v41 = vadd.f32 %v12060_v37, %v5897_v46  ;;  %v6151_v51 = vmax.f32 %v6023_v3, 0.0 }
 0xa55   : > { %6262 = vst [vmem:[#allocation12 + $0xa98] sm:$0xff] %v6134_v34  ;;  %v5900_v4 = vmul.f32 %v12056_v14, %v14836_v47  ;;  %v14837_v34 = vld [vmem:[#allocation434_spill] sm:$0xff]  ;;  %v6026_v50 = vadd.f32 %v12060_v37, %v5898_v36  ;;  %v6152_v32 = vmax.f32 %v6024_v62, 0.0 }
 0xa56   : > { %6263 = vst [vmem:[#allocation12 + $0xab8] sm:$0xff] %v6135_v59  ;;  %v5901_v35 = vmul.f32 %v12056_v14, %v14837_v34  ;;  %v14838_v59 = vld [vmem:[#allocation438_spill] sm:$0xff]  ;;  %v6027_v61 = vadd.f32 %v12060_v37, %v5899_v7  ;;  %v6153_v60 = vmax.f32 %v6025_v41, 0.0 }
 0xa57   : > { %6264 = vst [vmem:[#allocation12 + $0xad8] sm:$0xff] %v6136_v40  ;;  %v5902_v9 = vmul.f32 %v12056_v14, %v14838_v59  ;;  %v14839_v40 = vld [vmem:[#allocation442_spill] sm:$0xff]  ;;  %v6028_v24 = vadd.f32 %v12060_v37, %v5900_v4  ;;  %v6154_v38 = vmax.f32 %v6026_v50, 0.0 }
 0xa58   : > { %6265 = vst [vmem:[#allocation12 + $0xaf8] sm:$0xff] %v6137_v8  ;;  %v5903_v56 = vmul.f32 %v12056_v14, %v14839_v40  ;;  %v14840_v8 = vld [vmem:[#allocation446_spill] sm:$0xff]  ;;  %v6029_v5 = vadd.f32 %v12060_v37, %v5901_v35  ;;  %v6155_v1 = vmax.f32 %v6027_v61, 0.0 }
 0xa59   : > { %6266 = vst [vmem:[#allocation12 + $0xb18] sm:$0xff] %v6138_v12  ;;  %v5904_v0 = vmul.f32 %v12056_v14, %v14840_v8  ;;  %v14841_v12 = vld [vmem:[#allocation450_spill] sm:$0xff]  ;;  %v6030_v49 = vadd.f32 %v12060_v37, %v5902_v9  ;;  %v6156_v16 = vmax.f32 %v6028_v24, 0.0 }
 0xa5a   : > { %6267 = vst [vmem:[#allocation12 + $0xb38] sm:$0xff] %v6139_v15  ;;  %v5905_v10 = vmul.f32 %v12056_v14, %v14841_v12  ;;  %v14842_v15 = vld [vmem:[#allocation454_spill] sm:$0xff]  ;;  %v6031_v20 = vadd.f32 %v12060_v37, %v5903_v56  ;;  %v6157_v13 = vmax.f32 %v6029_v5, 0.0 }
 0xa5b   : > { %6268 = vst [vmem:[#allocation12 + $0xb58] sm:$0xff] %v6140_v33  ;;  %v5906_v53 = vmul.f32 %v12056_v14, %v14842_v15  ;;  %v14843_v33 = vld [vmem:[#allocation458_spill] sm:$0xff]  ;;  %v6032_v44 = vadd.f32 %v12060_v37, %v5904_v0  ;;  %v6158_v52 = vmax.f32 %v6030_v49, 0.0 }
 0xa5c   : > { %6269 = vst [vmem:[#allocation12 + $0xb78] sm:$0xff] %v6141_v42  ;;  %v5907_v22 = vmul.f32 %v12056_v14, %v14843_v33  ;;  %v14844_v42 = vld [vmem:[#allocation462_spill] sm:$0xff]  ;;  %v6033_v23 = vadd.f32 %v12060_v37, %v5905_v10  ;;  %v6159_v6 = vmax.f32 %v6031_v20, 0.0 }
 0xa5d   : > { %6270 = vst [vmem:[#allocation12 + $0xb98] sm:$0xff] %v6142_v19  ;;  %v5908_v48 = vmul.f32 %v12056_v14, %v14844_v42  ;;  %v14845_v19 = vld [vmem:[#allocation466_spill] sm:$0xff]  ;;  %v6034_v45 = vadd.f32 %v12060_v37, %v5906_v53  ;;  %v6160_v21 = vmax.f32 %v6032_v44, 0.0 }
 0xa5e   : > { %6271 = vst [vmem:[#allocation12 + $0xbb8] sm:$0xff] %v6143_v63  ;;  %v5909_v43 = vmul.f32 %v12056_v14, %v14845_v19  ;;  %v14846_v63 = vld [vmem:[#allocation470_spill] sm:$0xff]  ;;  %v6035_v55 = vadd.f32 %v12060_v37, %v5907_v22  ;;  %v6161_v31 = vmax.f32 %v6033_v23, 0.0 }
 0xa5f   : > { %6272 = vst [vmem:[#allocation12 + $0xbd8] sm:$0xff] %v6144_v27  ;;  %v5910_v25 = vmul.f32 %v12056_v14, %v14846_v63  ;;  %v14847_v27 = vld [vmem:[#allocation474_spill] sm:$0xff]  ;;  %v6036_v28 = vadd.f32 %v12060_v37, %v5908_v48  ;;  %v6162_v17 = vmax.f32 %v6034_v45, 0.0 }
 0xa60   : > { %6273 = vst [vmem:[#allocation12 + $0xbf8] sm:$0xff] %v6145_v18  ;;  %v5911_v39 = vmul.f32 %v12056_v14, %v14847_v27  ;;  %v14848_v18 = vld [vmem:[#allocation478_spill] sm:$0xff]  ;;  %v6037_v46 = vadd.f32 %v12060_v37, %v5909_v43  ;;  %v6163_v11 = vmax.f32 %v6035_v55, 0.0 }
 0xa61   : > { %6274 = vst [vmem:[#allocation12 + $0xc18] sm:$0xff] %v6146_v29  ;;  %v5912_v26 = vmul.f32 %v12056_v14, %v14848_v18  ;;  %v14849_v29 = vld [vmem:[#allocation482_spill] sm:$0xff]  ;;  %v6038_v36 = vadd.f32 %v12060_v37, %v5910_v25  ;;  %v6164_v47 = vmax.f32 %v6036_v28, 0.0 }
 0xa62   : > { %6275 = vst [vmem:[#allocation12 + $0xc38] sm:$0xff] %v6147_v58  ;;  %v5913_v57 = vmul.f32 %v12056_v14, %v14849_v29  ;;  %v14850_v58 = vld [vmem:[#allocation486_spill] sm:$0xff]  ;;  %v6039_v7 = vadd.f32 %v12060_v37, %v5911_v39  ;;  %v6165_v34 = vmax.f32 %v6037_v46, 0.0 }
 0xa63   : > { %6276 = vst [vmem:[#allocation12 + $0xc58] sm:$0xff] %v6148_v30  ;;  %v5914_v3 = vmul.f32 %v12056_v14, %v14850_v58  ;;  %v14851_v30 = vld [vmem:[#allocation490_spill] sm:$0xff]  ;;  %v6040_v4 = vadd.f32 %v12060_v37, %v5912_v26  ;;  %v6166_v59 = vmax.f32 %v6038_v36, 0.0 }
 0xa64   : > { %6277 = vst [vmem:[#allocation12 + $0xc78] sm:$0xff] %v6149_v54  ;;  %v5915_v62 = vmul.f32 %v12056_v14, %v14851_v30  ;;  %v14852_v54 = vld [vmem:[#allocation494_spill] sm:$0xff]  ;;  %v6041_v35 = vadd.f32 %v12060_v37, %v5913_v57  ;;  %v6167_v40 = vmax.f32 %v6039_v7, 0.0 }
 0xa65   : > { %6278 = vst [vmem:[#allocation12 + $0xc98] sm:$0xff] %v6150_v2  ;;  %v5916_v41 = vmul.f32 %v12056_v14, %v14852_v54  ;;  %v14853_v2 = vld [vmem:[#allocation498_spill] sm:$0xff]  ;;  %v6042_v9 = vadd.f32 %v12060_v37, %v5914_v3  ;;  %v6168_v8 = vmax.f32 %v6040_v4, 0.0 }
 0xa66   : > { %6279 = vst [vmem:[#allocation12 + $0xcb8] sm:$0xff] %v6151_v51  ;;  %v5917_v50 = vmul.f32 %v12056_v14, %v14853_v2  ;;  %v14854_v51 = vld [vmem:[#allocation502_spill] sm:$0xff]  ;;  %v6043_v56 = vadd.f32 %v12060_v37, %v5915_v62  ;;  %v6169_v12 = vmax.f32 %v6041_v35, 0.0 }
 0xa67   : > { %6280 = vst [vmem:[#allocation12 + $0xcd8] sm:$0xff] %v6152_v32  ;;  %v5918_v61 = vmul.f32 %v12056_v14, %v14854_v51  ;;  %v14855_v32 = vld [vmem:[#allocation506_spill] sm:$0xff]  ;;  %v6044_v0 = vadd.f32 %v12060_v37, %v5916_v41  ;;  %v6170_v15 = vmax.f32 %v6042_v9, 0.0 }
 0xa68   : > { %6281 = vst [vmem:[#allocation12 + $0xcf8] sm:$0xff] %v6153_v60  ;;  %v5919_v24 = vmul.f32 %v12056_v14, %v14855_v32  ;;  %v14856_v60 = vld [vmem:[#allocation510_spill] sm:$0xff]  ;;  %v6045_v10 = vadd.f32 %v12060_v37, %v5917_v50 }
 0xa69   : > { %6282 = vst [vmem:[#allocation12 + $0xd18] sm:$0xff] %v6154_v38  ;;  %v5920_v5 = vmul.f32 %v12056_v14, %v14856_v60  ;;  %v14857_v38 = vld [vmem:[#allocation514_spill] sm:$0xff]  ;;  %v6046_v53 = vadd.f32 %v12060_v37, %v5918_v61  ;;  %v6172_v33 = vmax.f32 %v6044_v0, 0.0 }
 0xa6a   : > { %6283 = vst [vmem:[#allocation12 + $0xd38] sm:$0xff] %v6155_v1  ;;  %v5921_v49 = vmul.f32 %v12056_v14, %v14857_v38  ;;  %v6171_v1 = vmax.f32 %v6043_v56, 0.0  ;;  %v6047_v20 = vadd.f32 %v12060_v37, %v5919_v24 }
 0xa6b   : > { %6284 = vst [vmem:[#allocation12 + $0xd58] sm:$0xff] %v6156_v16  ;;  %v6048_v22 = vadd.f32 %v12060_v37, %v5920_v5  ;;  %v6173_v16 = vmax.f32 %v6045_v10, 0.0  ;;  %v6174_v42 = vmax.f32 %v6046_v53, 0.0 }
 0xa6c   : > { %6285 = vst [vmem:[#allocation12 + $0xd78] sm:$0xff] %v6157_v13  ;;  %v6049_v44 = vadd.f32 %v12060_v37, %v5921_v49  ;;  %v6175_v14 = vmax.f32 %v6047_v20, 0.0 }
 0xa6d   : > { %6286 = vst [vmem:[#allocation12 + $0xd98] sm:$0xff] %v6158_v52  ;;  %v6176_v48 = vmax.f32 %v6048_v22, 0.0 }
 0xa6e   : > { %6287 = vst [vmem:[#allocation12 + $0xdb8] sm:$0xff] %v6159_v6  ;;  %v6177_v13 = vmax.f32 %v6049_v44, 0.0 }
 0xa6f   : > { %6288 = vst [vmem:[#allocation12 + $0xdd8] sm:$0xff] %v6160_v21 }
 0xa70   : > { %6289 = vst [vmem:[#allocation12 + $0xdf8] sm:$0xff] %v6161_v31 }
 0xa71   : > { %6290 = vst [vmem:[#allocation12 + $0xe18] sm:$0xff] %v6162_v17 }
 0xa72   : > { %6291 = vst [vmem:[#allocation12 + $0xe38] sm:$0xff] %v6163_v11 }
 0xa73   : > { %6292 = vst [vmem:[#allocation12 + $0xe58] sm:$0xff] %v6164_v47 }
 0xa74   : > { %6293 = vst [vmem:[#allocation12 + $0xe78] sm:$0xff] %v6165_v34 }
 0xa75   : > { %6294 = vst [vmem:[#allocation12 + $0xe98] sm:$0xff] %v6166_v59 }
 0xa76   : > { %6295 = vst [vmem:[#allocation12 + $0xeb8] sm:$0xff] %v6167_v40 }
 0xa77   : > { %6296 = vst [vmem:[#allocation12 + $0xed8] sm:$0xff] %v6168_v8 }
 0xa78   : > { %6297 = vst [vmem:[#allocation12 + $0xef8] sm:$0xff] %v6169_v12 }
 0xa79   : > { %6298 = vst [vmem:[#allocation12 + $0xf18] sm:$0xff] %v6170_v15 }
 0xa7a   : > { %6299 = vst [vmem:[#allocation12 + $0xf38] sm:$0xff] %v6171_v1 }
 0xa7b   : > { %6300 = vst [vmem:[#allocation12 + $0xf58] sm:$0xff] %v6172_v33 }
 0xa7c   : > { %6301 = vst [vmem:[#allocation12 + $0xf78] sm:$0xff] %v6173_v16 }
 0xa7d   : > { %6302 = vst [vmem:[#allocation12 + $0xf98] sm:$0xff] %v6174_v42 }
 0xa7e   : > { %6303 = vst [vmem:[#allocation12 + $0xfb8] sm:$0xff] %v6175_v14 }
 0xa7f   : > { %6304 = vst [vmem:[#allocation12 + $0xfd8] sm:$0xff] %v6176_v48 }
 0xa80   : > { %6305 = vst [vmem:[#allocation12 + $0xff8] sm:$0xff] %v6177_v13 }
 0xa81 PF: > { %p7001_p11 = scmp.eq.s32.totalorder %s6428_s21, 1  ;;  %s6323_s10 = sshll.u32 %s12453_s4, 4  ;;  %s6324_s10 = int_to_ptr.hbm [resolvable:$true] %s6323_s10 }
 0xa82   : > { %s7209_s11 = smov [#allocation12]   ;;  %s7210_s13 = smov 512  }
 0xa83   : > { %s6321_s12 = sshll.u32 %s7209_s11, 4  ;;  %s7211_s14 = smov 32   ;;  %s6322_s12 = int_to_ptr.vmem [resolvable:$true] %s6321_s12 }
 0xa84   : > { %6978 = dma.vmem_to_hbm [thread:$0]  (%p7001_p11), %s6322_s12, 65536, %s6324_s10, [#allocation8], %s7210_s13, %s7210_s13, %s7211_s14  }
 0xa85 PF: > { %p7002_p12 = scmp.ge.s32.totalorder %s7201_s17, 2  ;;  %p7003_p13 = scmp.eq.s32.totalorder %s6429_s22, 1 }
 0xa87   : > { %p6992_p0 = pnand %p7003_p13, %p7002_p12 }
 0xa89   : > { %p6993_p1 = pneg %p6992_p0 }
 0xa8b   : > { %7188 = dma.done.wait (%p6993_p1), [#allocation8], 65536  }
 0xa8c   : > { %7190 = vsyncadd (%p6993_p1), [#allocation8], 4294901760  ;;  %s19_s17 = sadd.s32 1, %s7201_s17   ;;  %s14858_s15 = smov %s7197_s16 }
 0xa8d   : > { %p16_p2 = scmp.ge.s32.totalorder %s19_s17, 4   ;;  %s14859_s16 = smov %s14861_s28 }
 0xa8f   :  { %18 = sbr.rel (!%p16_p2) target bundleno = 5 (0x5), region = 101 }
 0xa94   :  { %6345 = vsyncpa [#allocation7], 1 }
 0xa95   :  { %6347 = vsyncpa [#allocation7 + $0x1], 1 }
 0xa96   :  { %6348 = vsyncpa [#allocation10], 1 }
 0xa97   :  { %6349 = vsyncpa [#allocation8], 1 }
 0xa98   :  { %6351 = vsyncpa [#allocation8 + $0x1], 1 }

</bundles_post_ra>
